<compile_context>
chip_gen: v5e
topology: v5e:2x2
jax: 0.10.0
libtpu: 0.0.40
codegen_flags: <defaults>
</compile_context>

<pallas_src>
import functools

import jax
import jax.numpy as jnp
from jax.experimental import pallas as pl
from jax.experimental.pallas import tpu as pltpu


# Matmul operands are cast to bf16 (f32 accumulation on the MXU).  Halves
# weight/activation DMA traffic into the MXU and roughly doubles matmul
# throughput on v6e/v7x; v5e's MXU also takes bf16.  All VPU/EUP math
# (softmax, masks, norms, bias) stays in f32.
_MXU_DTYPE = jnp.bfloat16

# Row tile for the linear kernels.  At production DFAF scale
# (tm=512, K=2048 f32 in, bf16 [2048, 1536] weight, f32 [512, 1536] out,
# double-buffered) this stays under ~32 MiB -> fits v7x's 64 MiB VMEM with
# headroom and v5e/v6e trivially.
_MAX_TILE_M = 512
_VMEM_LIMIT = 48 * 1024 * 1024


# ----------------------------------------------------------------------------
# Pallas kernels
# ----------------------------------------------------------------------------

def _linear_kernel(x_ref, w_ref, b_ref, *rest, relu_input, l2norm_input,
                   has_mask):
    if has_mask:
        m_ref, o_ref = rest
    else:
        (o_ref,) = rest

    x = x_ref[...]                                     # [tm, K] f32
    if l2norm_input:
        # torch: v / (||v||_2 + 1e-12), per row
        ss = jnp.sum(x * x, axis=-1, keepdims=True)
        x = x * pl.reciprocal(jnp.sqrt(ss) + 1e-12, approx=True)
    if relu_input:
        x = jnp.maximum(x, 0.0)

    acc = jnp.dot(x.astype(_MXU_DTYPE), w_ref[...],
                  preferred_element_type=jnp.float32)  # [tm, N] f32
    acc = acc + b_ref[...]
    if has_mask:
        acc = acc * m_ref[...]                         # [tm, 1] row mask
    o_ref[...] = acc


def linear(x, w, b, *, relu_input=False, l2norm_input=False, out_mask=None):
    """y = (relu?(l2norm?(x))) @ w + b, optionally * row-mask.

    x: [..., K], w: [K, N] (bf16), b: [N] (f32), out_mask: broadcastable [..., L].
    """
    orig_shape = x.shape
    K = orig_shape[-1]
    N = w.shape[1]
    x2 = x.reshape(-1, K)
    M = x2.shape[0]

    # Single full-extent block for small M (always BlockSpec-legal);
    # 512-row tiles (multiple of 8 sublanes) for large M.
    tm = M if M <= _MAX_TILE_M else _MAX_TILE_M
    grid = (pl.cdiv(M, tm),)

    in_specs = [
        pl.BlockSpec((tm, K), lambda i: (i, 0)),
        pl.BlockSpec((K, N), lambda i: (0, 0)),   # weight resident across grid
        pl.BlockSpec((1, N), lambda i: (0, 0)),   # bias resident
    ]
    inputs = [x2, w, b.reshape(1, N)]
    has_mask = out_mask is not None
    if has_mask:
        in_specs.append(pl.BlockSpec((tm, 1), lambda i: (i, 0)))
        inputs.append(out_mask.reshape(-1, 1).astype(jnp.float32))

    out = pl.pallas_call(
        functools.partial(_linear_kernel, relu_input=relu_input,
                          l2norm_input=l2norm_input, has_mask=has_mask),
        out_shape=jax.ShapeDtypeStruct((M, N), jnp.float32),
        grid=grid,
        in_specs=in_specs,
        out_specs=pl.BlockSpec((tm, N), lambda i: (i, 0)),
        compiler_params=pltpu.CompilerParams(
            dimension_semantics=("parallel",),
            vmem_limit_bytes=_VMEM_LIMIT),
    )(*inputs)
    return out.reshape(orig_shape[:-1] + (N,))


def _mha_kernel(*refs, num_head, scale, gated):
    if gated:
        q_ref, k_ref, v_ref, m_ref, g_ref, o_ref = refs
    else:
        q_ref, k_ref, v_ref, m_ref, o_ref = refs
        g_ref = None

    q = q_ref[0]                       # [Lq, H]
    k = k_ref[0]                       # [Lk, H]
    v = v_ref[0]                       # [Lk, H]
    m = m_ref[0]                       # [1, Lk]  float mask, 1 = valid
    g = g_ref[0] if gated else None    # [1, H]   (1 + gate)

    H = q.shape[-1]
    dh = H // num_head
    outs = []
    for h in range(num_head):          # static unrolled head loop
        sl = slice(h * dh, (h + 1) * dh)
        qh = q[:, sl]
        kh = k[:, sl]
        vh = v[:, sl]
        if gated:
            gh = g[:, sl]
            qh = qh * gh
            kh = kh * gh
        # scale folded into q; mask fill value differs from torch only by the
        # 1/sqrt(dh) factor -> identical softmax (exp underflows to 0 either way)
        qh = (qh * scale).astype(_MXU_DTYPE)
        kh = kh.astype(_MXU_DTYPE)
        s = jax.lax.dot_general(qh, kh, (((1,), (1,)), ((), ())),
                                preferred_element_type=jnp.float32)  # [Lq, Lk]
        s = jnp.where(m == 0.0, -1e9, s)
        s = s - jnp.max(s, axis=-1, keepdims=True)
        p = jnp.exp(s)
        p = p * pl.reciprocal(jnp.sum(p, axis=-1, keepdims=True), approx=True)
        outs.append(jnp.dot(p.astype(_MXU_DTYPE), vh.astype(_MXU_DTYPE),
                            preferred_element_type=jnp.float32))
    # lane-dense concatenated-head store: [Lq, H]
    o_ref[0] = jnp.concatenate(outs, axis=-1)


def fused_multihead_attention(query_trans, kv_trans, key_mask, num_head,
                              hidden, gate=None):
    """Masked multi-head attention reading fused [B, L, 3H] projections.

    query_trans: [B, Lq, 3H]  columns ordered (k | q | v) — q slice used
    kv_trans:    [B, Lk, 3H]  columns ordered (k | q | v) — k, v slices used
    key_mask:    [B, Lk]      float, 1 = valid key
    gate:        optional [B, H] = (1 + sigmoid-gate); multiplies q & k slices
    returns:     [B, Lq, H]
    """
    B, Lq, threeH = query_trans.shape
    Lk = kv_trans.shape[1]
    H = hidden
    assert threeH == 3 * H and kv_trans.shape[2] == 3 * H
    assert H % num_head == 0
    assert H % 128 == 0, "hidden must be a multiple of 128 (lane-aligned slices)"
    dh = H // num_head
    scale = 1.0 / (dh ** 0.5)

    in_specs = [
        pl.BlockSpec((1, Lq, H), lambda bi: (bi, 0, 1)),   # q cols [H:2H)
        pl.BlockSpec((1, Lk, H), lambda bi: (bi, 0, 0)),   # k cols [0:H)
        pl.BlockSpec((1, Lk, H), lambda bi: (bi, 0, 2)),   # v cols [2H:3H)
        pl.BlockSpec((1, 1, Lk), lambda bi: (bi, 0, 0)),   # key mask
    ]
    inputs = [query_trans, kv_trans, kv_trans, key_mask.reshape(B, 1, Lk)]
    gated = gate is not None
    if gated:
        in_specs.append(pl.BlockSpec((1, 1, H), lambda bi: (bi, 0, 0)))
        inputs.append(gate.reshape(B, 1, H))

    return pl.pallas_call(
        functools.partial(_mha_kernel, num_head=num_head, scale=scale,
                          gated=gated),
        out_shape=jax.ShapeDtypeStruct((B, Lq, H), jnp.float32),
        grid=(B,),
        in_specs=in_specs,
        out_specs=pl.BlockSpec((1, Lq, H), lambda bi: (bi, 0, 0)),
        compiler_params=pltpu.CompilerParams(
            dimension_semantics=("parallel",),
            vmem_limit_bytes=_VMEM_LIMIT),
    )(*inputs)


# ----------------------------------------------------------------------------
# Small glue ops kept in plain JAX (XLA fuses them; Pallas launch not worth it)
# ----------------------------------------------------------------------------

def masked_mean(x, mask):
    """(x * mask[:,:,None]).sum(1) / mask.sum(1)[:,None] — matches torch
    exactly (no clamp; an all-zero mask row would produce inf/NaN, as in the
    reference)."""
    return (x * mask[:, :, None]).sum(axis=1) / mask.sum(axis=1, keepdims=True)


# ----------------------------------------------------------------------------
# Parameters (deterministic xavier_uniform init, biases zero — like Net.__init__)
# ----------------------------------------------------------------------------

def _xavier_uniform(key, fan_in, fan_out):
    bound = (6.0 / (fan_in + fan_out)) ** 0.5
    return jax.random.uniform(key, (fan_in, fan_out), jnp.float32, -bound, bound)


def init_params(key, cfg):
    keys = iter(jax.random.split(key, 32))

    def lin(din, dout):
        return {"w": _xavier_uniform(next(keys), din, dout).astype(_MXU_DTYPE),
                "b": jnp.zeros((dout,), jnp.float32)}

    H = cfg["hidden"]
    params = {
        # SingleBlock projections
        "sb_v_lin": lin(cfg["vision_features"], H),
        "sb_q_lin": lin(cfg["question_features"], H),
        # InterModalityUpdate
        "inter": {
            "v_lin": lin(H, 3 * H),
            "q_lin": lin(H, 3 * H),
            "v_output": lin(2 * H, H),
            "q_output": lin(2 * H, H),
        },
        # DyIntraModalityUpdate
        "intra": {
            "v4q_gate": lin(H, H),
            "q4v_gate": lin(H, H),
            "v_lin": lin(H, 3 * H),
            "q_lin": lin(H, 3 * H),
            "v_output": lin(H, H),
            "q_output": lin(H, H),
        },
        # Classifier
        "cls": {
            "lin1": lin(H, cfg["mid"]),
            "lin2": lin(cfg["mid"], cfg["answers"]),
        },
    }
    # Fold eval-mode BatchNorm1d (running_mean=0, running_var=1, weight=1,
    # bias=0, eps=1e-5) into lin1:  BN(xW + b) == x(W*s) + (b*s) with
    # s = 1/sqrt(var + eps).
    s = 1.0 / jnp.sqrt(jnp.float32(1.0) + 1e-5)
    lin1 = params["cls"]["lin1"]
    params["cls"]["lin1"] = {
        "w": (lin1["w"].astype(jnp.float32) * s).astype(_MXU_DTYPE),
        "b": lin1["b"] * s,
    }
    return params


# ----------------------------------------------------------------------------
# Module forward passes (dropout = identity, eval mode)
# ----------------------------------------------------------------------------

def inter_modality_update(p, v, q, v_mask, q_mask, num_head, hidden):
    # fused (k|q|v) projections with ReLU-input and row-mask multiply in-kernel
    v_trans = linear(v, p["v_lin"]["w"], p["v_lin"]["b"],
                     relu_input=True, out_mask=v_mask)        # [B, Lv, 3H]
    q_trans = linear(q, p["q_lin"]["w"], p["q_lin"]["b"],
                     relu_input=True, out_mask=q_mask)        # [B, Lq, 3H]
    # q2v: queries from v, keys/values from q (masked by q_mask) and vice versa
    v_update = fused_multihead_attention(v_trans, q_trans, q_mask, num_head, hidden)
    q_update = fused_multihead_attention(q_trans, v_trans, v_mask, num_head, hidden)
    cat_v = jnp.concatenate([v, v_update], axis=2)
    cat_q = jnp.concatenate([q, q_update], axis=2)
    updated_v = linear(cat_v, p["v_output"]["w"], p["v_output"]["b"])
    updated_q = linear(cat_q, p["q_output"]["w"], p["q_output"]["b"])
    return updated_v, updated_q


def intra_modality_update(p, v, q, v_mask, q_mask, num_head, hidden):
    v_mean = masked_mean(v, v_mask)
    q_mean = masked_mean(q, q_mask)
    v4q_gate = jax.nn.sigmoid(
        linear(v_mean, p["v4q_gate"]["w"], p["v4q_gate"]["b"], relu_input=True))
    q4v_gate = jax.nn.sigmoid(
        linear(q_mean, p["q4v_gate"]["w"], p["q4v_gate"]["b"], relu_input=True))
    v_trans = linear(v, p["v_lin"]["w"], p["v_lin"]["b"],
                     relu_input=True, out_mask=v_mask)
    q_trans = linear(q, p["q_lin"]["w"], p["q_lin"]["b"],
                     relu_input=True, out_mask=q_mask)
    # v2v gated by (1 + q4v_gate), q2q gated by (1 + v4q_gate); gate applied
    # to both q and k head slices inside the kernel.
    v_update = fused_multihead_attention(v_trans, v_trans, v_mask, num_head,
                                         hidden, gate=1.0 + q4v_gate)
    q_update = fused_multihead_attention(q_trans, q_trans, q_mask, num_head,
                                         hidden, gate=1.0 + v4q_gate)
    updated_v = linear(v + v_update, p["v_output"]["w"], p["v_output"]["b"])
    updated_q = linear(q + q_update, p["q_output"]["w"], p["q_output"]["b"])
    return updated_v, updated_q


def classifier(p, v, q, v_mask, q_mask):
    v_mean = masked_mean(v, v_mask)
    q_mean = masked_mean(q, q_mask)
    out = linear(v_mean * q_mean, p["lin1"]["w"], p["lin1"]["b"])  # BN folded
    out = linear(out, p["lin2"]["w"], p["lin2"]["b"], relu_input=True)
    return out


def net_forward(params, cfg, v, b, q_feat, v_mask, q_mask):
    """
    v:      [B, vision_features, num_obj]
    b:      [B, 4, num_obj]                 (unused, matches reference)
    q_feat: [B, max_len, question_features] (pre-computed text features)
    v_mask: [B, num_obj]    1 is obj, 0 is none
    q_mask: [B, max_len]    1 is word, 0 is none
    returns logits [B, max_answers]
    """
    del b  # bounding boxes are transposed but never used in the reference forward
    v = jnp.transpose(v, (0, 2, 1))                # [B, num_obj, vision_features]
    q = q_feat
    v_mask = v_mask.astype(jnp.float32)
    q_mask = q_mask.astype(jnp.float32)

    # SingleBlock: visual L2 normalization fused into the first projection.
    v = linear(v, params["sb_v_lin"]["w"], params["sb_v_lin"]["b"],
               l2norm_input=True)
    q = linear(q, params["sb_q_lin"]["w"], params["sb_q_lin"]["b"])
    for _ in range(cfg["num_block"]):
        v, q = inter_modality_update(params["inter"], v, q, v_mask, q_mask,
                                     cfg["num_inter_head"], cfg["hidden"])
        v, q = intra_modality_update(params["intra"], v, q, v_mask, q_mask,
                                     cfg["num_intra_head"], cfg["hidden"])

    return classifier(params["cls"], v, q, v_mask, q_mask)


# ----------------------------------------------------------------------------
# Main
# ----------------------------------------------------------------------------

if __name__ == "__main__":
    cfg = dict(
        vision_features=64,      # scaled-down stand-in for config.output_features (2048)
        question_features=48,    # scaled-down stand-in for 1280 LSTM features
        hidden=128,              # scaled-down stand-in for 512 (multiple of 128 lanes)
        num_inter_head=8,
        num_intra_head=8,
        num_block=2,
        mid=256,                 # scaled-down classifier mid_features (1024)
        answers=16,              # scaled-down config.max_answers
    )
    B, num_obj, max_len = 2, 12, 8

    key = jax.random.PRNGKey(0)
    kp, kv, kb, kq = jax.random.split(key, 4)
    params = init_params(kp, cfg)

    v = jax.random.normal(kv, (B, cfg["vision_features"], num_obj), jnp.float32)
    b = jax.random.normal(kb, (B, 4, num_obj), jnp.float32)
    q_feat = jax.random.normal(kq, (B, max_len, cfg["question_features"]), jnp.float32)
    v_len = jnp.array([num_obj, num_obj - 3])
    q_len = jnp.array([max_len, max_len - 3])
    v_mask = (jnp.arange(num_obj)[None, :] < v_len[:, None]).astype(jnp.float32)
    q_mask = (jnp.arange(max_len)[None, :] < q_len[:, None]).astype(jnp.float32)

    fwd = jax.jit(lambda p, v_, b_, qf, vm, qm: net_forward(p, cfg, v_, b_, qf, vm, qm))
    answer = fwd(params, v, b, q_feat, v_mask, q_mask)
    jax.block_until_ready(answer)

    assert answer.shape == (B, cfg["answers"]), answer.shape
    assert jnp.all(jnp.isfinite(answer))
    print("KERNEL_OK")
</pallas_src>

<mosaic_0001>
module attributes {stable_mosaic.version = 11 : i64} {
  func.func @_linear_kernel(%arg0: i32, %arg1: memref<16x48xf32, #tpu.memory_space<vmem>>, %arg2: memref<48x128xbf16, #tpu.memory_space<vmem>>, %arg3: memref<1x128xf32, #tpu.memory_space<vmem>>, %arg4: memref<16x128xf32, #tpu.memory_space<vmem>>) attributes {dimension_semantics = [#tpu.dimension_semantics<parallel>], iteration_bounds = array<i64: 1>, scalar_prefetch = 0 : i64, scratch_operands = 0 : i64, tpu.core_type = #tpu.core_type<tc>, window_params = [{transform_indices = @transform_0, window_bounds = array<i64: 16, 48>}, {pipeline_mode = #tpu.pipeline_mode<synchronous>, transform_indices = @transform_1, window_bounds = array<i64: 48, 128>}, {pipeline_mode = #tpu.pipeline_mode<synchronous>, transform_indices = @transform_2, window_bounds = array<i64: 1, 128>}, {transform_indices = @transform_3, window_bounds = array<i64: 16, 128>}]} {
    %c0 = arith.constant 0 : index
    %c0_0 = arith.constant 0 : index
    %0 = vector.load %arg1[%c0, %c0_0] : memref<16x48xf32, #tpu.memory_space<vmem>>, vector<16x48xf32>
    %1 = arith.truncf %0 : vector<16x48xf32> to vector<16x48xbf16>
    %c0_1 = arith.constant 0 : index
    %c0_2 = arith.constant 0 : index
    %2 = vector.load %arg2[%c0_1, %c0_2] : memref<48x128xbf16, #tpu.memory_space<vmem>>, vector<48x128xbf16>
    %cst = arith.constant dense<0.000000e+00> : vector<16x128xf32>
    %3 = tpu.matmul %1, %2, %cst {dimension_numbers = #tpu.dot_dimension_numbers<[1], [0], [0], [1], [0, 0, 1, 1], [], []>} : vector<16x48xbf16>, vector<48x128xbf16>, vector<16x128xf32> -> vector<16x128xf32>
    %c0_3 = arith.constant 0 : index
    %c0_4 = arith.constant 0 : index
    %4 = vector.load %arg3[%c0_3, %c0_4] : memref<1x128xf32, #tpu.memory_space<vmem>>, vector<1x128xf32>
    %5 = vector.broadcast %4 : vector<1x128xf32> to vector<16x128xf32>
    %6 = arith.addf %3, %5 : vector<16x128xf32>
    %c0_5 = arith.constant 0 : index
    %c0_6 = arith.constant 0 : index
    %7 = vector.load %arg4[%c0_5, %c0_6] : memref<16x128xf32, #tpu.memory_space<vmem>>, vector<16x128xf32>
    tpu.vector_store %arg4[%c0_5, %c0_6], %6 {strides = array<i32>} : memref<16x128xf32, #tpu.memory_space<vmem>>, vector<16x128xf32>,
    return
  }
  func.func @transform_0(%arg0: i32) -> (i32, i32) {
    %c0_i32 = arith.constant 0 : i32
    %c0_i32_0 = arith.constant 0 : i32
    return %arg0, %c0_i32 : i32, i32
  }
  func.func @transform_1(%arg0: i32) -> (i32, i32) {
    %c0_i32 = arith.constant 0 : i32
    %c0_i32_0 = arith.constant 0 : i32
    %c0_i32_1 = arith.constant 0 : i32
    return %c0_i32, %c0_i32_0 : i32, i32
  }
  func.func @transform_2(%arg0: i32) -> (i32, i32) {
    %c0_i32 = arith.constant 0 : i32
    %c0_i32_0 = arith.constant 0 : i32
    %c0_i32_1 = arith.constant 0 : i32
    return %c0_i32, %c0_i32_0 : i32, i32
  }
  func.func @transform_3(%arg0: i32) -> (i32, i32) {
    %c0_i32 = arith.constant 0 : i32
    %c0_i32_0 = arith.constant 0 : i32
    return %arg0, %c0_i32 : i32, i32
  }
}

module attributes {stable_mosaic.version = 11 : i64} {
  func.func @_linear_kernel(%arg0: i32, %arg1: memref<24x64xf32, #tpu.memory_space<vmem>>, %arg2: memref<64x128xbf16, #tpu.memory_space<vmem>>, %arg3: memref<1x128xf32, #tpu.memory_space<vmem>>, %arg4: memref<24x128xf32, #tpu.memory_space<vmem>>) attributes {dimension_semantics = [#tpu.dimension_semantics<parallel>], iteration_bounds = array<i64: 1>, scalar_prefetch = 0 : i64, scratch_operands = 0 : i64, tpu.core_type = #tpu.core_type<tc>, window_params = [{transform_indices = @transform_0, window_bounds = array<i64: 24, 64>}, {pipeline_mode = #tpu.pipeline_mode<synchronous>, transform_indices = @transform_1, window_bounds = array<i64: 64, 128>}, {pipeline_mode = #tpu.pipeline_mode<synchronous>, transform_indices = @transform_2, window_bounds = array<i64: 1, 128>}, {transform_indices = @transform_3, window_bounds = array<i64: 24, 128>}]} {
    %c0 = arith.constant 0 : index
    %c0_0 = arith.constant 0 : index
    %0 = vector.load %arg1[%c0, %c0_0] : memref<24x64xf32, #tpu.memory_space<vmem>>, vector<24x64xf32>
    %1 = arith.mulf %0, %0 : vector<24x64xf32>
    %cst = arith.constant dense<0.000000e+00> : vector<24xf32>
    %2 = vector.multi_reduction <add>, %1, %cst [1] : vector<24x64xf32> to vector<24xf32>
    %3 = vector.shape_cast %2 : vector<24xf32> to vector<24x1xf32>
    %4 = math.sqrt %3 : vector<24x1xf32>
    %cst_1 = arith.constant 9.99999996E-13 : f32
    %5 = vector.broadcast %cst_1 : f32 to vector<24x1xf32>
    %6 = arith.addf %4, %5 : vector<24x1xf32>
    %7 = tpu.reciprocal %6 {approx = true} : vector<24x1xf32> -> vector<24x1xf32>
    %8 = vector.broadcast %7 : vector<24x1xf32> to vector<24x64xf32>
    %9 = arith.mulf %0, %8 : vector<24x64xf32>
    %10 = arith.truncf %9 : vector<24x64xf32> to vector<24x64xbf16>
    %c0_2 = arith.constant 0 : index
    %c0_3 = arith.constant 0 : index
    %11 = vector.load %arg2[%c0_2, %c0_3] : memref<64x128xbf16, #tpu.memory_space<vmem>>, vector<64x128xbf16>
    %cst_4 = arith.constant dense<0.000000e+00> : vector<24x128xf32>
    %12 = tpu.matmul %10, %11, %cst_4 {dimension_numbers = #tpu.dot_dimension_numbers<[1], [0], [0], [1], [0, 0, 1, 1], [], []>} : vector<24x64xbf16>, vector<64x128xbf16>, vector<24x128xf32> -> vector<24x128xf32>
    %c0_5 = arith.constant 0 : index
    %c0_6 = arith.constant 0 : index
    %13 = vector.load %arg3[%c0_5, %c0_6] : memref<1x128xf32, #tpu.memory_space<vmem>>, vector<1x128xf32>
    %14 = vector.broadcast %13 : vector<1x128xf32> to vector<24x128xf32>
    %15 = arith.addf %12, %14 : vector<24x128xf32>
    %c0_7 = arith.constant 0 : index
    %c0_8 = arith.constant 0 : index
    %16 = vector.load %arg4[%c0_7, %c0_8] : memref<24x128xf32, #tpu.memory_space<vmem>>, vector<24x128xf32>
    tpu.vector_store %arg4[%c0_7, %c0_8], %15 {strides = array<i32>} : memref<24x128xf32, #tpu.memory_space<vmem>>, vector<24x128xf32>,
    return
  }
  func.func @transform_0(%arg0: i32) -> (i32, i32) {
    %c0_i32 = arith.constant 0 : i32
    %c0_i32_0 = arith.constant 0 : i32
    return %arg0, %c0_i32 : i32, i32
  }
  func.func @transform_1(%arg0: i32) -> (i32, i32) {
    %c0_i32 = arith.constant 0 : i32
    %c0_i32_0 = arith.constant 0 : i32
    %c0_i32_1 = arith.constant 0 : i32
    return %c0_i32, %c0_i32_0 : i32, i32
  }
  func.func @transform_2(%arg0: i32) -> (i32, i32) {
    %c0_i32 = arith.constant 0 : i32
    %c0_i32_0 = arith.constant 0 : i32
    %c0_i32_1 = arith.constant 0 : i32
    return %c0_i32, %c0_i32_0 : i32, i32
  }
  func.func @transform_3(%arg0: i32) -> (i32, i32) {
    %c0_i32 = arith.constant 0 : i32
    %c0_i32_0 = arith.constant 0 : i32
    return %arg0, %c0_i32 : i32, i32
  }
}

module attributes {stable_mosaic.version = 11 : i64} {
  func.func @_linear_kernel(%arg0: i32, %arg1: memref<16x128xf32, #tpu.memory_space<vmem>>, %arg2: memref<128x384xbf16, #tpu.memory_space<vmem>>, %arg3: memref<1x384xf32, #tpu.memory_space<vmem>>, %arg4: memref<16x1xf32, #tpu.memory_space<vmem>>, %arg5: memref<16x384xf32, #tpu.memory_space<vmem>>) attributes {dimension_semantics = [#tpu.dimension_semantics<parallel>], iteration_bounds = array<i64: 1>, scalar_prefetch = 0 : i64, scratch_operands = 0 : i64, tpu.core_type = #tpu.core_type<tc>, window_params = [{transform_indices = @transform_0, window_bounds = array<i64: 16, 128>}, {pipeline_mode = #tpu.pipeline_mode<synchronous>, transform_indices = @transform_1, window_bounds = array<i64: 128, 384>}, {pipeline_mode = #tpu.pipeline_mode<synchronous>, transform_indices = @transform_2, window_bounds = array<i64: 1, 384>}, {transform_indices = @transform_3, window_bounds = array<i64: 16, 1>}, {transform_indices = @transform_4, window_bounds = array<i64: 16, 384>}]} {
    %c0 = arith.constant 0 : index
    %c0_0 = arith.constant 0 : index
    %0 = vector.load %arg1[%c0, %c0_0] : memref<16x128xf32, #tpu.memory_space<vmem>>, vector<16x128xf32>
    %cst = arith.constant 0.000000e+00 : f32
    %1 = vector.broadcast %cst : f32 to vector<16x128xf32>
    %2 = arith.maximumf %0, %1 : vector<16x128xf32>
    %3 = arith.truncf %2 : vector<16x128xf32> to vector<16x128xbf16>
    %c0_1 = arith.constant 0 : index
    %c0_2 = arith.constant 0 : index
    %4 = vector.load %arg2[%c0_1, %c0_2] : memref<128x384xbf16, #tpu.memory_space<vmem>>, vector<128x384xbf16>
    %cst_3 = arith.constant dense<0.000000e+00> : vector<16x384xf32>
    %5 = tpu.matmul %3, %4, %cst_3 {dimension_numbers = #tpu.dot_dimension_numbers<[1], [0], [0], [1], [0, 0, 1, 1], [], []>} : vector<16x128xbf16>, vector<128x384xbf16>, vector<16x384xf32> -> vector<16x384xf32>
    %c0_4 = arith.constant 0 : index
    %c0_5 = arith.constant 0 : index
    %6 = vector.load %arg3[%c0_4, %c0_5] : memref<1x384xf32, #tpu.memory_space<vmem>>, vector<1x384xf32>
    %7 = vector.broadcast %6 : vector<1x384xf32> to vector<16x384xf32>
    %8 = arith.addf %5, %7 : vector<16x384xf32>
    %c0_6 = arith.constant 0 : index
    %c0_7 = arith.constant 0 : index
    %9 = vector.load %arg4[%c0_6, %c0_7] : memref<16x1xf32, #tpu.memory_space<vmem>>, vector<16x1xf32>
    %10 = vector.broadcast %9 : vector<16x1xf32> to vector<16x384xf32>
    %11 = arith.mulf %8, %10 : vector<16x384xf32>
    %c0_8 = arith.constant 0 : index
    %c0_9 = arith.constant 0 : index
    %12 = vector.load %arg5[%c0_8, %c0_9] : memref<16x384xf32, #tpu.memory_space<vmem>>, vector<16x384xf32>
    tpu.vector_store %arg5[%c0_8, %c0_9], %11 {strides = array<i32>} : memref<16x384xf32, #tpu.memory_space<vmem>>, vector<16x384xf32>,
    return
  }
  func.func @transform_0(%arg0: i32) -> (i32, i32) {
    %c0_i32 = arith.constant 0 : i32
    %c0_i32_0 = arith.constant 0 : i32
    return %arg0, %c0_i32 : i32, i32
  }
  func.func @transform_1(%arg0: i32) -> (i32, i32) {
    %c0_i32 = arith.constant 0 : i32
    %c0_i32_0 = arith.constant 0 : i32
    %c0_i32_1 = arith.constant 0 : i32
    return %c0_i32, %c0_i32_0 : i32, i32
  }
  func.func @transform_2(%arg0: i32) -> (i32, i32) {
    %c0_i32 = arith.constant 0 : i32
    %c0_i32_0 = arith.constant 0 : i32
    %c0_i32_1 = arith.constant 0 : i32
    return %c0_i32, %c0_i32_0 : i32, i32
  }
  func.func @transform_3(%arg0: i32) -> (i32, i32) {
    %c0_i32 = arith.constant 0 : i32
    %c0_i32_0 = arith.constant 0 : i32
    return %arg0, %c0_i32 : i32, i32
  }
  func.func @transform_4(%arg0: i32) -> (i32, i32) {
    %c0_i32 = arith.constant 0 : i32
    %c0_i32_0 = arith.constant 0 : i32
    return %arg0, %c0_i32 : i32, i32
  }
}

module attributes {stable_mosaic.version = 11 : i64} {
  func.func @_linear_kernel(%arg0: i32, %arg1: memref<24x128xf32, #tpu.memory_space<vmem>>, %arg2: memref<128x384xbf16, #tpu.memory_space<vmem>>, %arg3: memref<1x384xf32, #tpu.memory_space<vmem>>, %arg4: memref<24x1xf32, #tpu.memory_space<vmem>>, %arg5: memref<24x384xf32, #tpu.memory_space<vmem>>) attributes {dimension_semantics = [#tpu.dimension_semantics<parallel>], iteration_bounds = array<i64: 1>, scalar_prefetch = 0 : i64, scratch_operands = 0 : i64, tpu.core_type = #tpu.core_type<tc>, window_params = [{transform_indices = @transform_0, window_bounds = array<i64: 24, 128>}, {pipeline_mode = #tpu.pipeline_mode<synchronous>, transform_indices = @transform_1, window_bounds = array<i64: 128, 384>}, {pipeline_mode = #tpu.pipeline_mode<synchronous>, transform_indices = @transform_2, window_bounds = array<i64: 1, 384>}, {transform_indices = @transform_3, window_bounds = array<i64: 24, 1>}, {transform_indices = @transform_4, window_bounds = array<i64: 24, 384>}]} {
    %c0 = arith.constant 0 : index
    %c0_0 = arith.constant 0 : index
    %0 = vector.load %arg1[%c0, %c0_0] : memref<24x128xf32, #tpu.memory_space<vmem>>, vector<24x128xf32>
    %cst = arith.constant 0.000000e+00 : f32
    %1 = vector.broadcast %cst : f32 to vector<24x128xf32>
    %2 = arith.maximumf %0, %1 : vector<24x128xf32>
    %3 = arith.truncf %2 : vector<24x128xf32> to vector<24x128xbf16>
    %c0_1 = arith.constant 0 : index
    %c0_2 = arith.constant 0 : index
    %4 = vector.load %arg2[%c0_1, %c0_2] : memref<128x384xbf16, #tpu.memory_space<vmem>>, vector<128x384xbf16>
    %cst_3 = arith.constant dense<0.000000e+00> : vector<24x384xf32>
    %5 = tpu.matmul %3, %4, %cst_3 {dimension_numbers = #tpu.dot_dimension_numbers<[1], [0], [0], [1], [0, 0, 1, 1], [], []>} : vector<24x128xbf16>, vector<128x384xbf16>, vector<24x384xf32> -> vector<24x384xf32>
    %c0_4 = arith.constant 0 : index
    %c0_5 = arith.constant 0 : index
    %6 = vector.load %arg3[%c0_4, %c0_5] : memref<1x384xf32, #tpu.memory_space<vmem>>, vector<1x384xf32>
    %7 = vector.broadcast %6 : vector<1x384xf32> to vector<24x384xf32>
    %8 = arith.addf %5, %7 : vector<24x384xf32>
    %c0_6 = arith.constant 0 : index
    %c0_7 = arith.constant 0 : index
    %9 = vector.load %arg4[%c0_6, %c0_7] : memref<24x1xf32, #tpu.memory_space<vmem>>, vector<24x1xf32>
    %10 = vector.broadcast %9 : vector<24x1xf32> to vector<24x384xf32>
    %11 = arith.mulf %8, %10 : vector<24x384xf32>
    %c0_8 = arith.constant 0 : index
    %c0_9 = arith.constant 0 : index
    %12 = vector.load %arg5[%c0_8, %c0_9] : memref<24x384xf32, #tpu.memory_space<vmem>>, vector<24x384xf32>
    tpu.vector_store %arg5[%c0_8, %c0_9], %11 {strides = array<i32>} : memref<24x384xf32, #tpu.memory_space<vmem>>, vector<24x384xf32>,
    return
  }
  func.func @transform_0(%arg0: i32) -> (i32, i32) {
    %c0_i32 = arith.constant 0 : i32
    %c0_i32_0 = arith.constant 0 : i32
    return %arg0, %c0_i32 : i32, i32
  }
  func.func @transform_1(%arg0: i32) -> (i32, i32) {
    %c0_i32 = arith.constant 0 : i32
    %c0_i32_0 = arith.constant 0 : i32
    %c0_i32_1 = arith.constant 0 : i32
    return %c0_i32, %c0_i32_0 : i32, i32
  }
  func.func @transform_2(%arg0: i32) -> (i32, i32) {
    %c0_i32 = arith.constant 0 : i32
    %c0_i32_0 = arith.constant 0 : i32
    %c0_i32_1 = arith.constant 0 : i32
    return %c0_i32, %c0_i32_0 : i32, i32
  }
  func.func @transform_3(%arg0: i32) -> (i32, i32) {
    %c0_i32 = arith.constant 0 : i32
    %c0_i32_0 = arith.constant 0 : i32
    return %arg0, %c0_i32 : i32, i32
  }
  func.func @transform_4(%arg0: i32) -> (i32, i32) {
    %c0_i32 = arith.constant 0 : i32
    %c0_i32_0 = arith.constant 0 : i32
    return %arg0, %c0_i32 : i32, i32
  }
}

module attributes {stable_mosaic.version = 11 : i64} {
  func.func @_mha_kernel(%arg0: i32, %arg1: memref<1x8x128xf32, #tpu.memory_space<vmem>>, %arg2: memref<1x12x128xf32, #tpu.memory_space<vmem>>, %arg3: memref<1x12x128xf32, #tpu.memory_space<vmem>>, %arg4: memref<1x1x12xf32, #tpu.memory_space<vmem>>, %arg5: memref<1x8x128xf32, #tpu.memory_space<vmem>>) attributes {dimension_semantics = [#tpu.dimension_semantics<parallel>], iteration_bounds = array<i64: 2>, scalar_prefetch = 0 : i64, scratch_operands = 0 : i64, tpu.core_type = #tpu.core_type<tc>, window_params = [{transform_indices = @transform_0, window_bounds = array<i64: 1, 8, 128>}, {transform_indices = @transform_1, window_bounds = array<i64: 1, 12, 128>}, {transform_indices = @transform_2, window_bounds = array<i64: 1, 12, 128>}, {transform_indices = @transform_3, window_bounds = array<i64: 1, 1, 12>}, {transform_indices = @transform_4, window_bounds = array<i64: 1, 8, 128>}]} {
    %c0 = arith.constant 0 : index
    %c0_0 = arith.constant 0 : index
    %c0_1 = arith.constant 0 : index
    %0 = vector.load %arg1[%c0, %c0_0, %c0_1] : memref<1x8x128xf32, #tpu.memory_space<vmem>>, vector<1x8x128xf32>
    %1 = vector.shape_cast %0 : vector<1x8x128xf32> to vector<8x128xf32>
    %c0_2 = arith.constant 0 : index
    %c0_3 = arith.constant 0 : index
    %c0_4 = arith.constant 0 : index
    %2 = vector.load %arg2[%c0_2, %c0_3, %c0_4] : memref<1x12x128xf32, #tpu.memory_space<vmem>>, vector<1x12x128xf32>
    %3 = vector.shape_cast %2 : vector<1x12x128xf32> to vector<12x128xf32>
    %c0_5 = arith.constant 0 : index
    %c0_6 = arith.constant 0 : index
    %c0_7 = arith.constant 0 : index
    %4 = vector.load %arg3[%c0_5, %c0_6, %c0_7] : memref<1x12x128xf32, #tpu.memory_space<vmem>>, vector<1x12x128xf32>
    %5 = vector.shape_cast %4 : vector<1x12x128xf32> to vector<12x128xf32>
    %c0_8 = arith.constant 0 : index
    %c0_9 = arith.constant 0 : index
    %c0_10 = arith.constant 0 : index
    %6 = vector.load %arg4[%c0_8, %c0_9, %c0_10] : memref<1x1x12xf32, #tpu.memory_space<vmem>>, vector<1x1x12xf32>
    %7 = vector.shape_cast %6 : vector<1x1x12xf32> to vector<1x12xf32>
    %8 = vector.extract_strided_slice %1 {offsets = [0, 0], sizes = [8, 16], strides = [1, 1]} : vector<8x128xf32> to vector<8x16xf32>
    %9 = vector.extract_strided_slice %3 {offsets = [0, 0], sizes = [12, 16], strides = [1, 1]} : vector<12x128xf32> to vector<12x16xf32>
    %10 = vector.extract_strided_slice %5 {offsets = [0, 0], sizes = [12, 16], strides = [1, 1]} : vector<12x128xf32> to vector<12x16xf32>
    %cst = arith.constant 2.500000e-01 : f32
    %11 = vector.broadcast %cst : f32 to vector<8x16xf32>
    %12 = arith.mulf %8, %11 : vector<8x16xf32>
    %13 = arith.truncf %12 : vector<8x16xf32> to vector<8x16xbf16>
    %14 = arith.truncf %9 : vector<12x16xf32> to vector<12x16xbf16>
    %cst_11 = arith.constant dense<0.000000e+00> : vector<8x12xf32>
    %15 = tpu.matmul %13, %14, %cst_11 {dimension_numbers = #tpu.dot_dimension_numbers<[1], [1], [0], [0], [0, 0, 1, 0], [], []>} : vector<8x16xbf16>, vector<12x16xbf16>, vector<8x12xf32> -> vector<8x12xf32>
    %cst_12 = arith.constant 0.000000e+00 : f32
    %16 = vector.broadcast %cst_12 : f32 to vector<1x12xf32>
    %17 = arith.cmpf oeq, %7, %16 : vector<1x12xf32>
    %cst_13 = arith.constant -1.000000e+09 : f32
    %18 = vector.shape_cast %17 : vector<1x12xi1> to vector<1x12xi1>
    %19 = vector.broadcast %18 : vector<1x12xi1> to vector<8x12xi1>
    %20 = vector.broadcast %cst_13 : f32 to vector<8x12xf32>
    %21 = arith.select %19, %20, %15 : vector<8x12xi1>, vector<8x12xf32>
    %cst_14 = arith.constant dense<0xFF800000> : vector<8xf32>
    %22 = vector.multi_reduction <maximumf>, %21, %cst_14 [1] : vector<8x12xf32> to vector<8xf32>
    %23 = vector.shape_cast %22 : vector<8xf32> to vector<8x1xf32>
    %24 = vector.broadcast %23 : vector<8x1xf32> to vector<8x12xf32>
    %25 = arith.subf %21, %24 : vector<8x12xf32>
    %26 = math.exp %25 : vector<8x12xf32>
    %cst_15 = arith.constant dense<0.000000e+00> : vector<8xf32>
    %27 = vector.multi_reduction <add>, %26, %cst_15 [1] : vector<8x12xf32> to vector<8xf32>
    %28 = vector.shape_cast %27 : vector<8xf32> to vector<8x1xf32>
    %29 = tpu.reciprocal %28 {approx = true} : vector<8x1xf32> -> vector<8x1xf32>
    %30 = vector.broadcast %29 : vector<8x1xf32> to vector<8x12xf32>
    %31 = arith.mulf %26, %30 : vector<8x12xf32>
    %32 = arith.truncf %31 : vector<8x12xf32> to vector<8x12xbf16>
    %33 = arith.truncf %10 : vector<12x16xf32> to vector<12x16xbf16>
    %cst_16 = arith.constant dense<0.000000e+00> : vector<8x16xf32>
    %34 = tpu.matmul %32, %33, %cst_16 {dimension_numbers = #tpu.dot_dimension_numbers<[1], [0], [0], [1], [0, 0, 1, 1], [], []>} : vector<8x12xbf16>, vector<12x16xbf16>, vector<8x16xf32> -> vector<8x16xf32>
    %35 = vector.extract_strided_slice %1 {offsets = [0, 16], sizes = [8, 16], strides = [1, 1]} : vector<8x128xf32> to vector<8x16xf32>
    %36 = vector.extract_strided_slice %3 {offsets = [0, 16], sizes = [12, 16], strides = [1, 1]} : vector<12x128xf32> to vector<12x16xf32>
    %37 = vector.extract_strided_slice %5 {offsets = [0, 16], sizes = [12, 16], strides = [1, 1]} : vector<12x128xf32> to vector<12x16xf32>
    %cst_17 = arith.constant 2.500000e-01 : f32
    %38 = vector.broadcast %cst_17 : f32 to vector<8x16xf32>
    %39 = arith.mulf %35, %38 : vector<8x16xf32>
    %40 = arith.truncf %39 : vector<8x16xf32> to vector<8x16xbf16>
    %41 = arith.truncf %36 : vector<12x16xf32> to vector<12x16xbf16>
    %cst_18 = arith.constant dense<0.000000e+00> : vector<8x12xf32>
    %42 = tpu.matmul %40, %41, %cst_18 {dimension_numbers = #tpu.dot_dimension_numbers<[1], [1], [0], [0], [0, 0, 1, 0], [], []>} : vector<8x16xbf16>, vector<12x16xbf16>, vector<8x12xf32> -> vector<8x12xf32>
    %cst_19 = arith.constant 0.000000e+00 : f32
    %43 = vector.broadcast %cst_19 : f32 to vector<1x12xf32>
    %44 = arith.cmpf oeq, %7, %43 : vector<1x12xf32>
    %cst_20 = arith.constant -1.000000e+09 : f32
    %45 = vector.shape_cast %44 : vector<1x12xi1> to vector<1x12xi1>
    %46 = vector.broadcast %45 : vector<1x12xi1> to vector<8x12xi1>
    %47 = vector.broadcast %cst_20 : f32 to vector<8x12xf32>
    %48 = arith.select %46, %47, %42 : vector<8x12xi1>, vector<8x12xf32>
    %cst_21 = arith.constant dense<0xFF800000> : vector<8xf32>
    %49 = vector.multi_reduction <maximumf>, %48, %cst_21 [1] : vector<8x12xf32> to vector<8xf32>
    %50 = vector.shape_cast %49 : vector<8xf32> to vector<8x1xf32>
    %51 = vector.broadcast %50 : vector<8x1xf32> to vector<8x12xf32>
    %52 = arith.subf %48, %51 : vector<8x12xf32>
    %53 = math.exp %52 : vector<8x12xf32>
    %cst_22 = arith.constant dense<0.000000e+00> : vector<8xf32>
    %54 = vector.multi_reduction <add>, %53, %cst_22 [1] : vector<8x12xf32> to vector<8xf32>
    %55 = vector.shape_cast %54 : vector<8xf32> to vector<8x1xf32>
    %56 = tpu.reciprocal %55 {approx = true} : vector<8x1xf32> -> vector<8x1xf32>
    %57 = vector.broadcast %56 : vector<8x1xf32> to vector<8x12xf32>
    %58 = arith.mulf %53, %57 : vector<8x12xf32>
    %59 = arith.truncf %58 : vector<8x12xf32> to vector<8x12xbf16>
    %60 = arith.truncf %37 : vector<12x16xf32> to vector<12x16xbf16>
    %cst_23 = arith.constant dense<0.000000e+00> : vector<8x16xf32>
    %61 = tpu.matmul %59, %60, %cst_23 {dimension_numbers = #tpu.dot_dimension_numbers<[1], [0], [0], [1], [0, 0, 1, 1], [], []>} : vector<8x12xbf16>, vector<12x16xbf16>, vector<8x16xf32> -> vector<8x16xf32>
    %62 = vector.extract_strided_slice %1 {offsets = [0, 32], sizes = [8, 16], strides = [1, 1]} : vector<8x128xf32> to vector<8x16xf32>
    %63 = vector.extract_strided_slice %3 {offsets = [0, 32], sizes = [12, 16], strides = [1, 1]} : vector<12x128xf32> to vector<12x16xf32>
    %64 = vector.extract_strided_slice %5 {offsets = [0, 32], sizes = [12, 16], strides = [1, 1]} : vector<12x128xf32> to vector<12x16xf32>
    %cst_24 = arith.constant 2.500000e-01 : f32
    %65 = vector.broadcast %cst_24 : f32 to vector<8x16xf32>
    %66 = arith.mulf %62, %65 : vector<8x16xf32>
    %67 = arith.truncf %66 : vector<8x16xf32> to vector<8x16xbf16>
    %68 = arith.truncf %63 : vector<12x16xf32> to vector<12x16xbf16>
    %cst_25 = arith.constant dense<0.000000e+00> : vector<8x12xf32>
    %69 = tpu.matmul %67, %68, %cst_25 {dimension_numbers = #tpu.dot_dimension_numbers<[1], [1], [0], [0], [0, 0, 1, 0], [], []>} : vector<8x16xbf16>, vector<12x16xbf16>, vector<8x12xf32> -> vector<8x12xf32>
    %cst_26 = arith.constant 0.000000e+00 : f32
    %70 = vector.broadcast %cst_26 : f32 to vector<1x12xf32>
    %71 = arith.cmpf oeq, %7, %70 : vector<1x12xf32>
    %cst_27 = arith.constant -1.000000e+09 : f32
    %72 = vector.shape_cast %71 : vector<1x12xi1> to vector<1x12xi1>
    %73 = vector.broadcast %72 : vector<1x12xi1> to vector<8x12xi1>
    %74 = vector.broadcast %cst_27 : f32 to vector<8x12xf32>
    %75 = arith.select %73, %74, %69 : vector<8x12xi1>, vector<8x12xf32>
    %cst_28 = arith.constant dense<0xFF800000> : vector<8xf32>
    %76 = vector.multi_reduction <maximumf>, %75, %cst_28 [1] : vector<8x12xf32> to vector<8xf32>
    %77 = vector.shape_cast %76 : vector<8xf32> to vector<8x1xf32>
    %78 = vector.broadcast %77 : vector<8x1xf32> to vector<8x12xf32>
    %79 = arith.subf %75, %78 : vector<8x12xf32>
    %80 = math.exp %79 : vector<8x12xf32>
    %cst_29 = arith.constant dense<0.000000e+00> : vector<8xf32>
    %81 = vector.multi_reduction <add>, %80, %cst_29 [1] : vector<8x12xf32> to vector<8xf32>
    %82 = vector.shape_cast %81 : vector<8xf32> to vector<8x1xf32>
    %83 = tpu.reciprocal %82 {approx = true} : vector<8x1xf32> -> vector<8x1xf32>
    %84 = vector.broadcast %83 : vector<8x1xf32> to vector<8x12xf32>
    %85 = arith.mulf %80, %84 : vector<8x12xf32>
    %86 = arith.truncf %85 : vector<8x12xf32> to vector<8x12xbf16>
    %87 = arith.truncf %64 : vector<12x16xf32> to vector<12x16xbf16>
    %cst_30 = arith.constant dense<0.000000e+00> : vector<8x16xf32>
    %88 = tpu.matmul %86, %87, %cst_30 {dimension_numbers = #tpu.dot_dimension_numbers<[1], [0], [0], [1], [0, 0, 1, 1], [], []>} : vector<8x12xbf16>, vector<12x16xbf16>, vector<8x16xf32> -> vector<8x16xf32>
    %89 = vector.extract_strided_slice %1 {offsets = [0, 48], sizes = [8, 16], strides = [1, 1]} : vector<8x128xf32> to vector<8x16xf32>
    %90 = vector.extract_strided_slice %3 {offsets = [0, 48], sizes = [12, 16], strides = [1, 1]} : vector<12x128xf32> to vector<12x16xf32>
    %91 = vector.extract_strided_slice %5 {offsets = [0, 48], sizes = [12, 16], strides = [1, 1]} : vector<12x128xf32> to vector<12x16xf32>
    %cst_31 = arith.constant 2.500000e-01 : f32
    %92 = vector.broadcast %cst_31 : f32 to vector<8x16xf32>
    %93 = arith.mulf %89, %92 : vector<8x16xf32>
    %94 = arith.truncf %93 : vector<8x16xf32> to vector<8x16xbf16>
    %95 = arith.truncf %90 : vector<12x16xf32> to vector<12x16xbf16>
    %cst_32 = arith.constant dense<0.000000e+00> : vector<8x12xf32>
    %96 = tpu.matmul %94, %95, %cst_32 {dimension_numbers = #tpu.dot_dimension_numbers<[1], [1], [0], [0], [0, 0, 1, 0], [], []>} : vector<8x16xbf16>, vector<12x16xbf16>, vector<8x12xf32> -> vector<8x12xf32>
    %cst_33 = arith.constant 0.000000e+00 : f32
    %97 = vector.broadcast %cst_33 : f32 to vector<1x12xf32>
    %98 = arith.cmpf oeq, %7, %97 : vector<1x12xf32>
    %cst_34 = arith.constant -1.000000e+09 : f32
    %99 = vector.shape_cast %98 : vector<1x12xi1> to vector<1x12xi1>
    %100 = vector.broadcast %99 : vector<1x12xi1> to vector<8x12xi1>
    %101 = vector.broadcast %cst_34 : f32 to vector<8x12xf32>
    %102 = arith.select %100, %101, %96 : vector<8x12xi1>, vector<8x12xf32>
    %cst_35 = arith.constant dense<0xFF800000> : vector<8xf32>
    %103 = vector.multi_reduction <maximumf>, %102, %cst_35 [1] : vector<8x12xf32> to vector<8xf32>
    %104 = vector.shape_cast %103 : vector<8xf32> to vector<8x1xf32>
    %105 = vector.broadcast %104 : vector<8x1xf32> to vector<8x12xf32>
    %106 = arith.subf %102, %105 : vector<8x12xf32>
    %107 = math.exp %106 : vector<8x12xf32>
    %cst_36 = arith.constant dense<0.000000e+00> : vector<8xf32>
    %108 = vector.multi_reduction <add>, %107, %cst_36 [1] : vector<8x12xf32> to vector<8xf32>
    %109 = vector.shape_cast %108 : vector<8xf32> to vector<8x1xf32>
    %110 = tpu.reciprocal %109 {approx = true} : vector<8x1xf32> -> vector<8x1xf32>
    %111 = vector.broadcast %110 : vector<8x1xf32> to vector<8x12xf32>
    %112 = arith.mulf %107, %111 : vector<8x12xf32>
    %113 = arith.truncf %112 : vector<8x12xf32> to vector<8x12xbf16>
    %114 = arith.truncf %91 : vector<12x16xf32> to vector<12x16xbf16>
    %cst_37 = arith.constant dense<0.000000e+00> : vector<8x16xf32>
    %115 = tpu.matmul %113, %114, %cst_37 {dimension_numbers = #tpu.dot_dimension_numbers<[1], [0], [0], [1], [0, 0, 1, 1], [], []>} : vector<8x12xbf16>, vector<12x16xbf16>, vector<8x16xf32> -> vector<8x16xf32>
    %116 = vector.extract_strided_slice %1 {offsets = [0, 64], sizes = [8, 16], strides = [1, 1]} : vector<8x128xf32> to vector<8x16xf32>
    %117 = vector.extract_strided_slice %3 {offsets = [0, 64], sizes = [12, 16], strides = [1, 1]} : vector<12x128xf32> to vector<12x16xf32>
    %118 = vector.extract_strided_slice %5 {offsets = [0, 64], sizes = [12, 16], strides = [1, 1]} : vector<12x128xf32> to vector<12x16xf32>
    %cst_38 = arith.constant 2.500000e-01 : f32
    %119 = vector.broadcast %cst_38 : f32 to vector<8x16xf32>
    %120 = arith.mulf %116, %119 : vector<8x16xf32>
    %121 = arith.truncf %120 : vector<8x16xf32> to vector<8x16xbf16>
    %122 = arith.truncf %117 : vector<12x16xf32> to vector<12x16xbf16>
    %cst_39 = arith.constant dense<0.000000e+00> : vector<8x12xf32>
    %123 = tpu.matmul %121, %122, %cst_39 {dimension_numbers = #tpu.dot_dimension_numbers<[1], [1], [0], [0], [0, 0, 1, 0], [], []>} : vector<8x16xbf16>, vector<12x16xbf16>, vector<8x12xf32> -> vector<8x12xf32>
    %cst_40 = arith.constant 0.000000e+00 : f32
    %124 = vector.broadcast %cst_40 : f32 to vector<1x12xf32>
    %125 = arith.cmpf oeq, %7, %124 : vector<1x12xf32>
    %cst_41 = arith.constant -1.000000e+09 : f32
    %126 = vector.shape_cast %125 : vector<1x12xi1> to vector<1x12xi1>
    %127 = vector.broadcast %126 : vector<1x12xi1> to vector<8x12xi1>
    %128 = vector.broadcast %cst_41 : f32 to vector<8x12xf32>
    %129 = arith.select %127, %128, %123 : vector<8x12xi1>, vector<8x12xf32>
    %cst_42 = arith.constant dense<0xFF800000> : vector<8xf32>
    %130 = vector.multi_reduction <maximumf>, %129, %cst_42 [1] : vector<8x12xf32> to vector<8xf32>
    %131 = vector.shape_cast %130 : vector<8xf32> to vector<8x1xf32>
    %132 = vector.broadcast %131 : vector<8x1xf32> to vector<8x12xf32>
    %133 = arith.subf %129, %132 : vector<8x12xf32>
    %134 = math.exp %133 : vector<8x12xf32>
    %cst_43 = arith.constant dense<0.000000e+00> : vector<8xf32>
    %135 = vector.multi_reduction <add>, %134, %cst_43 [1] : vector<8x12xf32> to vector<8xf32>
    %136 = vector.shape_cast %135 : vector<8xf32> to vector<8x1xf32>
    %137 = tpu.reciprocal %136 {approx = true} : vector<8x1xf32> -> vector<8x1xf32>
    %138 = vector.broadcast %137 : vector<8x1xf32> to vector<8x12xf32>
    %139 = arith.mulf %134, %138 : vector<8x12xf32>
    %140 = arith.truncf %139 : vector<8x12xf32> to vector<8x12xbf16>
    %141 = arith.truncf %118 : vector<12x16xf32> to vector<12x16xbf16>
    %cst_44 = arith.constant dense<0.000000e+00> : vector<8x16xf32>
    %142 = tpu.matmul %140, %141, %cst_44 {dimension_numbers = #tpu.dot_dimension_numbers<[1], [0], [0], [1], [0, 0, 1, 1], [], []>} : vector<8x12xbf16>, vector<12x16xbf16>, vector<8x16xf32> -> vector<8x16xf32>
    %143 = vector.extract_strided_slice %1 {offsets = [0, 80], sizes = [8, 16], strides = [1, 1]} : vector<8x128xf32> to vector<8x16xf32>
    %144 = vector.extract_strided_slice %3 {offsets = [0, 80], sizes = [12, 16], strides = [1, 1]} : vector<12x128xf32> to vector<12x16xf32>
    %145 = vector.extract_strided_slice %5 {offsets = [0, 80], sizes = [12, 16], strides = [1, 1]} : vector<12x128xf32> to vector<12x16xf32>
    %cst_45 = arith.constant 2.500000e-01 : f32
    %146 = vector.broadcast %cst_45 : f32 to vector<8x16xf32>
    %147 = arith.mulf %143, %146 : vector<8x16xf32>
    %148 = arith.truncf %147 : vector<8x16xf32> to vector<8x16xbf16>
    %149 = arith.truncf %144 : vector<12x16xf32> to vector<12x16xbf16>
    %cst_46 = arith.constant dense<0.000000e+00> : vector<8x12xf32>
    %150 = tpu.matmul %148, %149, %cst_46 {dimension_numbers = #tpu.dot_dimension_numbers<[1], [1], [0], [0], [0, 0, 1, 0], [], []>} : vector<8x16xbf16>, vector<12x16xbf16>, vector<8x12xf32> -> vector<8x12xf32>
    %cst_47 = arith.constant 0.000000e+00 : f32
    %151 = vector.broadcast %cst_47 : f32 to vector<1x12xf32>
    %152 = arith.cmpf oeq, %7, %151 : vector<1x12xf32>
    %cst_48 = arith.constant -1.000000e+09 : f32
    %153 = vector.shape_cast %152 : vector<1x12xi1> to vector<1x12xi1>
    %154 = vector.broadcast %153 : vector<1x12xi1> to vector<8x12xi1>
    %155 = vector.broadcast %cst_48 : f32 to vector<8x12xf32>
    %156 = arith.select %154, %155, %150 : vector<8x12xi1>, vector<8x12xf32>
    %cst_49 = arith.constant dense<0xFF800000> : vector<8xf32>
    %157 = vector.multi_reduction <maximumf>, %156, %cst_49 [1] : vector<8x12xf32> to vector<8xf32>
    %158 = vector.shape_cast %157 : vector<8xf32> to vector<8x1xf32>
    %159 = vector.broadcast %158 : vector<8x1xf32> to vector<8x12xf32>
    %160 = arith.subf %156, %159 : vector<8x12xf32>
    %161 = math.exp %160 : vector<8x12xf32>
    %cst_50 = arith.constant dense<0.000000e+00> : vector<8xf32>
    %162 = vector.multi_reduction <add>, %161, %cst_50 [1] : vector<8x12xf32> to vector<8xf32>
    %163 = vector.shape_cast %162 : vector<8xf32> to vector<8x1xf32>
    %164 = tpu.reciprocal %163 {approx = true} : vector<8x1xf32> -> vector<8x1xf32>
    %165 = vector.broadcast %164 : vector<8x1xf32> to vector<8x12xf32>
    %166 = arith.mulf %161, %165 : vector<8x12xf32>
    %167 = arith.truncf %166 : vector<8x12xf32> to vector<8x12xbf16>
    %168 = arith.truncf %145 : vector<12x16xf32> to vector<12x16xbf16>
    %cst_51 = arith.constant dense<0.000000e+00> : vector<8x16xf32>
    %169 = tpu.matmul %167, %168, %cst_51 {dimension_numbers = #tpu.dot_dimension_numbers<[1], [0], [0], [1], [0, 0, 1, 1], [], []>} : vector<8x12xbf16>, vector<12x16xbf16>, vector<8x16xf32> -> vector<8x16xf32>
    %170 = vector.extract_strided_slice %1 {offsets = [0, 96], sizes = [8, 16], strides = [1, 1]} : vector<8x128xf32> to vector<8x16xf32>
    %171 = vector.extract_strided_slice %3 {offsets = [0, 96], sizes = [12, 16], strides = [1, 1]} : vector<12x128xf32> to vector<12x16xf32>
    %172 = vector.extract_strided_slice %5 {offsets = [0, 96], sizes = [12, 16], strides = [1, 1]} : vector<12x128xf32> to vector<12x16xf32>
    %cst_52 = arith.constant 2.500000e-01 : f32
    %173 = vector.broadcast %cst_52 : f32 to vector<8x16xf32>
    %174 = arith.mulf %170, %173 : vector<8x16xf32>
    %175 = arith.truncf %174 : vector<8x16xf32> to vector<8x16xbf16>
    %176 = arith.truncf %171 : vector<12x16xf32> to vector<12x16xbf16>
    %cst_53 = arith.constant dense<0.000000e+00> : vector<8x12xf32>
    %177 = tpu.matmul %175, %176, %cst_53 {dimension_numbers = #tpu.dot_dimension_numbers<[1], [1], [0], [0], [0, 0, 1, 0], [], []>} : vector<8x16xbf16>, vector<12x16xbf16>, vector<8x12xf32> -> vector<8x12xf32>
    %cst_54 = arith.constant 0.000000e+00 : f32
    %178 = vector.broadcast %cst_54 : f32 to vector<1x12xf32>
    %179 = arith.cmpf oeq, %7, %178 : vector<1x12xf32>
    %cst_55 = arith.constant -1.000000e+09 : f32
    %180 = vector.shape_cast %179 : vector<1x12xi1> to vector<1x12xi1>
    %181 = vector.broadcast %180 : vector<1x12xi1> to vector<8x12xi1>
    %182 = vector.broadcast %cst_55 : f32 to vector<8x12xf32>
    %183 = arith.select %181, %182, %177 : vector<8x12xi1>, vector<8x12xf32>
    %cst_56 = arith.constant dense<0xFF800000> : vector<8xf32>
    %184 = vector.multi_reduction <maximumf>, %183, %cst_56 [1] : vector<8x12xf32> to vector<8xf32>
    %185 = vector.shape_cast %184 : vector<8xf32> to vector<8x1xf32>
    %186 = vector.broadcast %185 : vector<8x1xf32> to vector<8x12xf32>
    %187 = arith.subf %183, %186 : vector<8x12xf32>
    %188 = math.exp %187 : vector<8x12xf32>
    %cst_57 = arith.constant dense<0.000000e+00> : vector<8xf32>
    %189 = vector.multi_reduction <add>, %188, %cst_57 [1] : vector<8x12xf32> to vector<8xf32>
    %190 = vector.shape_cast %189 : vector<8xf32> to vector<8x1xf32>
    %191 = tpu.reciprocal %190 {approx = true} : vector<8x1xf32> -> vector<8x1xf32>
    %192 = vector.broadcast %191 : vector<8x1xf32> to vector<8x12xf32>
    %193 = arith.mulf %188, %192 : vector<8x12xf32>
    %194 = arith.truncf %193 : vector<8x12xf32> to vector<8x12xbf16>
    %195 = arith.truncf %172 : vector<12x16xf32> to vector<12x16xbf16>
    %cst_58 = arith.constant dense<0.000000e+00> : vector<8x16xf32>
    %196 = tpu.matmul %194, %195, %cst_58 {dimension_numbers = #tpu.dot_dimension_numbers<[1], [0], [0], [1], [0, 0, 1, 1], [], []>} : vector<8x12xbf16>, vector<12x16xbf16>, vector<8x16xf32> -> vector<8x16xf32>
    %197 = vector.extract_strided_slice %1 {offsets = [0, 112], sizes = [8, 16], strides = [1, 1]} : vector<8x128xf32> to vector<8x16xf32>
    %198 = vector.extract_strided_slice %3 {offsets = [0, 112], sizes = [12, 16], strides = [1, 1]} : vector<12x128xf32> to vector<12x16xf32>
    %199 = vector.extract_strided_slice %5 {offsets = [0, 112], sizes = [12, 16], strides = [1, 1]} : vector<12x128xf32> to vector<12x16xf32>
    %cst_59 = arith.constant 2.500000e-01 : f32
    %200 = vector.broadcast %cst_59 : f32 to vector<8x16xf32>
    %201 = arith.mulf %197, %200 : vector<8x16xf32>
    %202 = arith.truncf %201 : vector<8x16xf32> to vector<8x16xbf16>
    %203 = arith.truncf %198 : vector<12x16xf32> to vector<12x16xbf16>
    %cst_60 = arith.constant dense<0.000000e+00> : vector<8x12xf32>
    %204 = tpu.matmul %202, %203, %cst_60 {dimension_numbers = #tpu.dot_dimension_numbers<[1], [1], [0], [0], [0, 0, 1, 0], [], []>} : vector<8x16xbf16>, vector<12x16xbf16>, vector<8x12xf32> -> vector<8x12xf32>
    %cst_61 = arith.constant 0.000000e+00 : f32
    %205 = vector.broadcast %cst_61 : f32 to vector<1x12xf32>
    %206 = arith.cmpf oeq, %7, %205 : vector<1x12xf32>
    %cst_62 = arith.constant -1.000000e+09 : f32
    %207 = vector.shape_cast %206 : vector<1x12xi1> to vector<1x12xi1>
    %208 = vector.broadcast %207 : vector<1x12xi1> to vector<8x12xi1>
    %209 = vector.broadcast %cst_62 : f32 to vector<8x12xf32>
    %210 = arith.select %208, %209, %204 : vector<8x12xi1>, vector<8x12xf32>
    %cst_63 = arith.constant dense<0xFF800000> : vector<8xf32>
    %211 = vector.multi_reduction <maximumf>, %210, %cst_63 [1] : vector<8x12xf32> to vector<8xf32>
    %212 = vector.shape_cast %211 : vector<8xf32> to vector<8x1xf32>
    %213 = vector.broadcast %212 : vector<8x1xf32> to vector<8x12xf32>
    %214 = arith.subf %210, %213 : vector<8x12xf32>
    %215 = math.exp %214 : vector<8x12xf32>
    %cst_64 = arith.constant dense<0.000000e+00> : vector<8xf32>
    %216 = vector.multi_reduction <add>, %215, %cst_64 [1] : vector<8x12xf32> to vector<8xf32>
    %217 = vector.shape_cast %216 : vector<8xf32> to vector<8x1xf32>
    %218 = tpu.reciprocal %217 {approx = true} : vector<8x1xf32> -> vector<8x1xf32>
    %219 = vector.broadcast %218 : vector<8x1xf32> to vector<8x12xf32>
    %220 = arith.mulf %215, %219 : vector<8x12xf32>
    %221 = arith.truncf %220 : vector<8x12xf32> to vector<8x12xbf16>
    %222 = arith.truncf %199 : vector<12x16xf32> to vector<12x16xbf16>
    %cst_65 = arith.constant dense<0.000000e+00> : vector<8x16xf32>
    %223 = tpu.matmul %221, %222, %cst_65 {dimension_numbers = #tpu.dot_dimension_numbers<[1], [0], [0], [1], [0, 0, 1, 1], [], []>} : vector<8x12xbf16>, vector<12x16xbf16>, vector<8x16xf32> -> vector<8x16xf32>
    %224 = tpu.concatenate %34, %61, %88, %115, %142, %169, %196, %223 in 1 : vector<8x16xf32>, vector<8x16xf32>, vector<8x16xf32>, vector<8x16xf32>, vector<8x16xf32>, vector<8x16xf32>, vector<8x16xf32>, vector<8x16xf32> -> vector<8x128xf32>
    %c0_66 = arith.constant 0 : index
    %c0_67 = arith.constant 0 : index
    %c0_68 = arith.constant 0 : index
    %225 = vector.load %arg5[%c0_66, %c0_67, %c0_68] : memref<1x8x128xf32, #tpu.memory_space<vmem>>, vector<1x8x128xf32>
    %226 = vector.shape_cast %225 : vector<1x8x128xf32> to vector<8x128xf32>
    %227 = vector.shape_cast %224 : vector<8x128xf32> to vector<1x8x128xf32>
    tpu.vector_store %arg5[%c0_66, %c0_67, %c0_68], %227 {strides = array<i32>} : memref<1x8x128xf32, #tpu.memory_space<vmem>>, vector<1x8x128xf32>,
    return
  }
  func.func @transform_0(%arg0: i32) -> (i32, i32, i32) {
    %c0_i32 = arith.constant 0 : i32
    %c1_i32 = arith.constant 1 : i32
    %c0_i32_0 = arith.constant 0 : i32
    return %arg0, %c0_i32, %c1_i32 : i32, i32, i32
  }
  func.func @transform_1(%arg0: i32) -> (i32, i32, i32) {
    %c0_i32 = arith.constant 0 : i32
    %c0_i32_0 = arith.constant 0 : i32
    %c0_i32_1 = arith.constant 0 : i32
    return %arg0, %c0_i32, %c0_i32_0 : i32, i32, i32
  }
  func.func @transform_2(%arg0: i32) -> (i32, i32, i32) {
    %c0_i32 = arith.constant 0 : i32
    %c2_i32 = arith.constant 2 : i32
    %c0_i32_0 = arith.constant 0 : i32
    return %arg0, %c0_i32, %c2_i32 : i32, i32, i32
  }
  func.func @transform_3(%arg0: i32) -> (i32, i32, i32) {
    %c0_i32 = arith.constant 0 : i32
    %c0_i32_0 = arith.constant 0 : i32
    %c0_i32_1 = arith.constant 0 : i32
    return %arg0, %c0_i32, %c0_i32_0 : i32, i32, i32
  }
  func.func @transform_4(%arg0: i32) -> (i32, i32, i32) {
    %c0_i32 = arith.constant 0 : i32
    %c0_i32_0 = arith.constant 0 : i32
    %c0_i32_1 = arith.constant 0 : i32
    return %arg0, %c0_i32, %c0_i32_0 : i32, i32, i32
  }
}

module attributes {stable_mosaic.version = 11 : i64} {
  func.func @_mha_kernel(%arg0: i32, %arg1: memref<1x12x128xf32, #tpu.memory_space<vmem>>, %arg2: memref<1x8x128xf32, #tpu.memory_space<vmem>>, %arg3: memref<1x8x128xf32, #tpu.memory_space<vmem>>, %arg4: memref<1x1x8xf32, #tpu.memory_space<vmem>>, %arg5: memref<1x12x128xf32, #tpu.memory_space<vmem>>) attributes {dimension_semantics = [#tpu.dimension_semantics<parallel>], iteration_bounds = array<i64: 2>, scalar_prefetch = 0 : i64, scratch_operands = 0 : i64, tpu.core_type = #tpu.core_type<tc>, window_params = [{transform_indices = @transform_0, window_bounds = array<i64: 1, 12, 128>}, {transform_indices = @transform_1, window_bounds = array<i64: 1, 8, 128>}, {transform_indices = @transform_2, window_bounds = array<i64: 1, 8, 128>}, {transform_indices = @transform_3, window_bounds = array<i64: 1, 1, 8>}, {transform_indices = @transform_4, window_bounds = array<i64: 1, 12, 128>}]} {
    %c0 = arith.constant 0 : index
    %c0_0 = arith.constant 0 : index
    %c0_1 = arith.constant 0 : index
    %0 = vector.load %arg1[%c0, %c0_0, %c0_1] : memref<1x12x128xf32, #tpu.memory_space<vmem>>, vector<1x12x128xf32>
    %1 = vector.shape_cast %0 : vector<1x12x128xf32> to vector<12x128xf32>
    %c0_2 = arith.constant 0 : index
    %c0_3 = arith.constant 0 : index
    %c0_4 = arith.constant 0 : index
    %2 = vector.load %arg2[%c0_2, %c0_3, %c0_4] : memref<1x8x128xf32, #tpu.memory_space<vmem>>, vector<1x8x128xf32>
    %3 = vector.shape_cast %2 : vector<1x8x128xf32> to vector<8x128xf32>
    %c0_5 = arith.constant 0 : index
    %c0_6 = arith.constant 0 : index
    %c0_7 = arith.constant 0 : index
    %4 = vector.load %arg3[%c0_5, %c0_6, %c0_7] : memref<1x8x128xf32, #tpu.memory_space<vmem>>, vector<1x8x128xf32>
    %5 = vector.shape_cast %4 : vector<1x8x128xf32> to vector<8x128xf32>
    %c0_8 = arith.constant 0 : index
    %c0_9 = arith.constant 0 : index
    %c0_10 = arith.constant 0 : index
    %6 = vector.load %arg4[%c0_8, %c0_9, %c0_10] : memref<1x1x8xf32, #tpu.memory_space<vmem>>, vector<1x1x8xf32>
    %7 = vector.shape_cast %6 : vector<1x1x8xf32> to vector<1x8xf32>
    %8 = vector.extract_strided_slice %1 {offsets = [0, 0], sizes = [12, 16], strides = [1, 1]} : vector<12x128xf32> to vector<12x16xf32>
    %9 = vector.extract_strided_slice %3 {offsets = [0, 0], sizes = [8, 16], strides = [1, 1]} : vector<8x128xf32> to vector<8x16xf32>
    %10 = vector.extract_strided_slice %5 {offsets = [0, 0], sizes = [8, 16], strides = [1, 1]} : vector<8x128xf32> to vector<8x16xf32>
    %cst = arith.constant 2.500000e-01 : f32
    %11 = vector.broadcast %cst : f32 to vector<12x16xf32>
    %12 = arith.mulf %8, %11 : vector<12x16xf32>
    %13 = arith.truncf %12 : vector<12x16xf32> to vector<12x16xbf16>
    %14 = arith.truncf %9 : vector<8x16xf32> to vector<8x16xbf16>
    %cst_11 = arith.constant dense<0.000000e+00> : vector<12x8xf32>
    %15 = tpu.matmul %13, %14, %cst_11 {dimension_numbers = #tpu.dot_dimension_numbers<[1], [1], [0], [0], [0, 0, 1, 0], [], []>} : vector<12x16xbf16>, vector<8x16xbf16>, vector<12x8xf32> -> vector<12x8xf32>
    %cst_12 = arith.constant 0.000000e+00 : f32
    %16 = vector.broadcast %cst_12 : f32 to vector<1x8xf32>
    %17 = arith.cmpf oeq, %7, %16 : vector<1x8xf32>
    %cst_13 = arith.constant -1.000000e+09 : f32
    %18 = vector.shape_cast %17 : vector<1x8xi1> to vector<1x8xi1>
    %19 = vector.broadcast %18 : vector<1x8xi1> to vector<12x8xi1>
    %20 = vector.broadcast %cst_13 : f32 to vector<12x8xf32>
    %21 = arith.select %19, %20, %15 : vector<12x8xi1>, vector<12x8xf32>
    %cst_14 = arith.constant dense<0xFF800000> : vector<12xf32>
    %22 = vector.multi_reduction <maximumf>, %21, %cst_14 [1] : vector<12x8xf32> to vector<12xf32>
    %23 = vector.shape_cast %22 : vector<12xf32> to vector<12x1xf32>
    %24 = vector.broadcast %23 : vector<12x1xf32> to vector<12x8xf32>
    %25 = arith.subf %21, %24 : vector<12x8xf32>
    %26 = math.exp %25 : vector<12x8xf32>
    %cst_15 = arith.constant dense<0.000000e+00> : vector<12xf32>
    %27 = vector.multi_reduction <add>, %26, %cst_15 [1] : vector<12x8xf32> to vector<12xf32>
    %28 = vector.shape_cast %27 : vector<12xf32> to vector<12x1xf32>
    %29 = tpu.reciprocal %28 {approx = true} : vector<12x1xf32> -> vector<12x1xf32>
    %30 = vector.broadcast %29 : vector<12x1xf32> to vector<12x8xf32>
    %31 = arith.mulf %26, %30 : vector<12x8xf32>
    %32 = arith.truncf %31 : vector<12x8xf32> to vector<12x8xbf16>
    %33 = arith.truncf %10 : vector<8x16xf32> to vector<8x16xbf16>
    %cst_16 = arith.constant dense<0.000000e+00> : vector<12x16xf32>
    %34 = tpu.matmul %32, %33, %cst_16 {dimension_numbers = #tpu.dot_dimension_numbers<[1], [0], [0], [1], [0, 0, 1, 1], [], []>} : vector<12x8xbf16>, vector<8x16xbf16>, vector<12x16xf32> -> vector<12x16xf32>
    %35 = vector.extract_strided_slice %1 {offsets = [0, 16], sizes = [12, 16], strides = [1, 1]} : vector<12x128xf32> to vector<12x16xf32>
    %36 = vector.extract_strided_slice %3 {offsets = [0, 16], sizes = [8, 16], strides = [1, 1]} : vector<8x128xf32> to vector<8x16xf32>
    %37 = vector.extract_strided_slice %5 {offsets = [0, 16], sizes = [8, 16], strides = [1, 1]} : vector<8x128xf32> to vector<8x16xf32>
    %cst_17 = arith.constant 2.500000e-01 : f32
    %38 = vector.broadcast %cst_17 : f32 to vector<12x16xf32>
    %39 = arith.mulf %35, %38 : vector<12x16xf32>
    %40 = arith.truncf %39 : vector<12x16xf32> to vector<12x16xbf16>
    %41 = arith.truncf %36 : vector<8x16xf32> to vector<8x16xbf16>
    %cst_18 = arith.constant dense<0.000000e+00> : vector<12x8xf32>
    %42 = tpu.matmul %40, %41, %cst_18 {dimension_numbers = #tpu.dot_dimension_numbers<[1], [1], [0], [0], [0, 0, 1, 0], [], []>} : vector<12x16xbf16>, vector<8x16xbf16>, vector<12x8xf32> -> vector<12x8xf32>
    %cst_19 = arith.constant 0.000000e+00 : f32
    %43 = vector.broadcast %cst_19 : f32 to vector<1x8xf32>
    %44 = arith.cmpf oeq, %7, %43 : vector<1x8xf32>
    %cst_20 = arith.constant -1.000000e+09 : f32
    %45 = vector.shape_cast %44 : vector<1x8xi1> to vector<1x8xi1>
    %46 = vector.broadcast %45 : vector<1x8xi1> to vector<12x8xi1>
    %47 = vector.broadcast %cst_20 : f32 to vector<12x8xf32>
    %48 = arith.select %46, %47, %42 : vector<12x8xi1>, vector<12x8xf32>
    %cst_21 = arith.constant dense<0xFF800000> : vector<12xf32>
    %49 = vector.multi_reduction <maximumf>, %48, %cst_21 [1] : vector<12x8xf32> to vector<12xf32>
    %50 = vector.shape_cast %49 : vector<12xf32> to vector<12x1xf32>
    %51 = vector.broadcast %50 : vector<12x1xf32> to vector<12x8xf32>
    %52 = arith.subf %48, %51 : vector<12x8xf32>
    %53 = math.exp %52 : vector<12x8xf32>
    %cst_22 = arith.constant dense<0.000000e+00> : vector<12xf32>
    %54 = vector.multi_reduction <add>, %53, %cst_22 [1] : vector<12x8xf32> to vector<12xf32>
    %55 = vector.shape_cast %54 : vector<12xf32> to vector<12x1xf32>
    %56 = tpu.reciprocal %55 {approx = true} : vector<12x1xf32> -> vector<12x1xf32>
    %57 = vector.broadcast %56 : vector<12x1xf32> to vector<12x8xf32>
    %58 = arith.mulf %53, %57 : vector<12x8xf32>
    %59 = arith.truncf %58 : vector<12x8xf32> to vector<12x8xbf16>
    %60 = arith.truncf %37 : vector<8x16xf32> to vector<8x16xbf16>
    %cst_23 = arith.constant dense<0.000000e+00> : vector<12x16xf32>
    %61 = tpu.matmul %59, %60, %cst_23 {dimension_numbers = #tpu.dot_dimension_numbers<[1], [0], [0], [1], [0, 0, 1, 1], [], []>} : vector<12x8xbf16>, vector<8x16xbf16>, vector<12x16xf32> -> vector<12x16xf32>
    %62 = vector.extract_strided_slice %1 {offsets = [0, 32], sizes = [12, 16], strides = [1, 1]} : vector<12x128xf32> to vector<12x16xf32>
    %63 = vector.extract_strided_slice %3 {offsets = [0, 32], sizes = [8, 16], strides = [1, 1]} : vector<8x128xf32> to vector<8x16xf32>
    %64 = vector.extract_strided_slice %5 {offsets = [0, 32], sizes = [8, 16], strides = [1, 1]} : vector<8x128xf32> to vector<8x16xf32>
    %cst_24 = arith.constant 2.500000e-01 : f32
    %65 = vector.broadcast %cst_24 : f32 to vector<12x16xf32>
    %66 = arith.mulf %62, %65 : vector<12x16xf32>
    %67 = arith.truncf %66 : vector<12x16xf32> to vector<12x16xbf16>
    %68 = arith.truncf %63 : vector<8x16xf32> to vector<8x16xbf16>
    %cst_25 = arith.constant dense<0.000000e+00> : vector<12x8xf32>
    %69 = tpu.matmul %67, %68, %cst_25 {dimension_numbers = #tpu.dot_dimension_numbers<[1], [1], [0], [0], [0, 0, 1, 0], [], []>} : vector<12x16xbf16>, vector<8x16xbf16>, vector<12x8xf32> -> vector<12x8xf32>
    %cst_26 = arith.constant 0.000000e+00 : f32
    %70 = vector.broadcast %cst_26 : f32 to vector<1x8xf32>
    %71 = arith.cmpf oeq, %7, %70 : vector<1x8xf32>
    %cst_27 = arith.constant -1.000000e+09 : f32
    %72 = vector.shape_cast %71 : vector<1x8xi1> to vector<1x8xi1>
    %73 = vector.broadcast %72 : vector<1x8xi1> to vector<12x8xi1>
    %74 = vector.broadcast %cst_27 : f32 to vector<12x8xf32>
    %75 = arith.select %73, %74, %69 : vector<12x8xi1>, vector<12x8xf32>
    %cst_28 = arith.constant dense<0xFF800000> : vector<12xf32>
    %76 = vector.multi_reduction <maximumf>, %75, %cst_28 [1] : vector<12x8xf32> to vector<12xf32>
    %77 = vector.shape_cast %76 : vector<12xf32> to vector<12x1xf32>
    %78 = vector.broadcast %77 : vector<12x1xf32> to vector<12x8xf32>
    %79 = arith.subf %75, %78 : vector<12x8xf32>
    %80 = math.exp %79 : vector<12x8xf32>
    %cst_29 = arith.constant dense<0.000000e+00> : vector<12xf32>
    %81 = vector.multi_reduction <add>, %80, %cst_29 [1] : vector<12x8xf32> to vector<12xf32>
    %82 = vector.shape_cast %81 : vector<12xf32> to vector<12x1xf32>
    %83 = tpu.reciprocal %82 {approx = true} : vector<12x1xf32> -> vector<12x1xf32>
    %84 = vector.broadcast %83 : vector<12x1xf32> to vector<12x8xf32>
    %85 = arith.mulf %80, %84 : vector<12x8xf32>
    %86 = arith.truncf %85 : vector<12x8xf32> to vector<12x8xbf16>
    %87 = arith.truncf %64 : vector<8x16xf32> to vector<8x16xbf16>
    %cst_30 = arith.constant dense<0.000000e+00> : vector<12x16xf32>
    %88 = tpu.matmul %86, %87, %cst_30 {dimension_numbers = #tpu.dot_dimension_numbers<[1], [0], [0], [1], [0, 0, 1, 1], [], []>} : vector<12x8xbf16>, vector<8x16xbf16>, vector<12x16xf32> -> vector<12x16xf32>
    %89 = vector.extract_strided_slice %1 {offsets = [0, 48], sizes = [12, 16], strides = [1, 1]} : vector<12x128xf32> to vector<12x16xf32>
    %90 = vector.extract_strided_slice %3 {offsets = [0, 48], sizes = [8, 16], strides = [1, 1]} : vector<8x128xf32> to vector<8x16xf32>
    %91 = vector.extract_strided_slice %5 {offsets = [0, 48], sizes = [8, 16], strides = [1, 1]} : vector<8x128xf32> to vector<8x16xf32>
    %cst_31 = arith.constant 2.500000e-01 : f32
    %92 = vector.broadcast %cst_31 : f32 to vector<12x16xf32>
    %93 = arith.mulf %89, %92 : vector<12x16xf32>
    %94 = arith.truncf %93 : vector<12x16xf32> to vector<12x16xbf16>
    %95 = arith.truncf %90 : vector<8x16xf32> to vector<8x16xbf16>
    %cst_32 = arith.constant dense<0.000000e+00> : vector<12x8xf32>
    %96 = tpu.matmul %94, %95, %cst_32 {dimension_numbers = #tpu.dot_dimension_numbers<[1], [1], [0], [0], [0, 0, 1, 0], [], []>} : vector<12x16xbf16>, vector<8x16xbf16>, vector<12x8xf32> -> vector<12x8xf32>
    %cst_33 = arith.constant 0.000000e+00 : f32
    %97 = vector.broadcast %cst_33 : f32 to vector<1x8xf32>
    %98 = arith.cmpf oeq, %7, %97 : vector<1x8xf32>
    %cst_34 = arith.constant -1.000000e+09 : f32
    %99 = vector.shape_cast %98 : vector<1x8xi1> to vector<1x8xi1>
    %100 = vector.broadcast %99 : vector<1x8xi1> to vector<12x8xi1>
    %101 = vector.broadcast %cst_34 : f32 to vector<12x8xf32>
    %102 = arith.select %100, %101, %96 : vector<12x8xi1>, vector<12x8xf32>
    %cst_35 = arith.constant dense<0xFF800000> : vector<12xf32>
    %103 = vector.multi_reduction <maximumf>, %102, %cst_35 [1] : vector<12x8xf32> to vector<12xf32>
    %104 = vector.shape_cast %103 : vector<12xf32> to vector<12x1xf32>
    %105 = vector.broadcast %104 : vector<12x1xf32> to vector<12x8xf32>
    %106 = arith.subf %102, %105 : vector<12x8xf32>
    %107 = math.exp %106 : vector<12x8xf32>
    %cst_36 = arith.constant dense<0.000000e+00> : vector<12xf32>
    %108 = vector.multi_reduction <add>, %107, %cst_36 [1] : vector<12x8xf32> to vector<12xf32>
    %109 = vector.shape_cast %108 : vector<12xf32> to vector<12x1xf32>
    %110 = tpu.reciprocal %109 {approx = true} : vector<12x1xf32> -> vector<12x1xf32>
    %111 = vector.broadcast %110 : vector<12x1xf32> to vector<12x8xf32>
    %112 = arith.mulf %107, %111 : vector<12x8xf32>
    %113 = arith.truncf %112 : vector<12x8xf32> to vector<12x8xbf16>
    %114 = arith.truncf %91 : vector<8x16xf32> to vector<8x16xbf16>
    %cst_37 = arith.constant dense<0.000000e+00> : vector<12x16xf32>
    %115 = tpu.matmul %113, %114, %cst_37 {dimension_numbers = #tpu.dot_dimension_numbers<[1], [0], [0], [1], [0, 0, 1, 1], [], []>} : vector<12x8xbf16>, vector<8x16xbf16>, vector<12x16xf32> -> vector<12x16xf32>
    %116 = vector.extract_strided_slice %1 {offsets = [0, 64], sizes = [12, 16], strides = [1, 1]} : vector<12x128xf32> to vector<12x16xf32>
    %117 = vector.extract_strided_slice %3 {offsets = [0, 64], sizes = [8, 16], strides = [1, 1]} : vector<8x128xf32> to vector<8x16xf32>
    %118 = vector.extract_strided_slice %5 {offsets = [0, 64], sizes = [8, 16], strides = [1, 1]} : vector<8x128xf32> to vector<8x16xf32>
    %cst_38 = arith.constant 2.500000e-01 : f32
    %119 = vector.broadcast %cst_38 : f32 to vector<12x16xf32>
    %120 = arith.mulf %116, %119 : vector<12x16xf32>
    %121 = arith.truncf %120 : vector<12x16xf32> to vector<12x16xbf16>
    %122 = arith.truncf %117 : vector<8x16xf32> to vector<8x16xbf16>
    %cst_39 = arith.constant dense<0.000000e+00> : vector<12x8xf32>
    %123 = tpu.matmul %121, %122, %cst_39 {dimension_numbers = #tpu.dot_dimension_numbers<[1], [1], [0], [0], [0, 0, 1, 0], [], []>} : vector<12x16xbf16>, vector<8x16xbf16>, vector<12x8xf32> -> vector<12x8xf32>
    %cst_40 = arith.constant 0.000000e+00 : f32
    %124 = vector.broadcast %cst_40 : f32 to vector<1x8xf32>
    %125 = arith.cmpf oeq, %7, %124 : vector<1x8xf32>
    %cst_41 = arith.constant -1.000000e+09 : f32
    %126 = vector.shape_cast %125 : vector<1x8xi1> to vector<1x8xi1>
    %127 = vector.broadcast %126 : vector<1x8xi1> to vector<12x8xi1>
    %128 = vector.broadcast %cst_41 : f32 to vector<12x8xf32>
    %129 = arith.select %127, %128, %123 : vector<12x8xi1>, vector<12x8xf32>
    %cst_42 = arith.constant dense<0xFF800000> : vector<12xf32>
    %130 = vector.multi_reduction <maximumf>, %129, %cst_42 [1] : vector<12x8xf32> to vector<12xf32>
    %131 = vector.shape_cast %130 : vector<12xf32> to vector<12x1xf32>
    %132 = vector.broadcast %131 : vector<12x1xf32> to vector<12x8xf32>
    %133 = arith.subf %129, %132 : vector<12x8xf32>
    %134 = math.exp %133 : vector<12x8xf32>
    %cst_43 = arith.constant dense<0.000000e+00> : vector<12xf32>
    %135 = vector.multi_reduction <add>, %134, %cst_43 [1] : vector<12x8xf32> to vector<12xf32>
    %136 = vector.shape_cast %135 : vector<12xf32> to vector<12x1xf32>
    %137 = tpu.reciprocal %136 {approx = true} : vector<12x1xf32> -> vector<12x1xf32>
    %138 = vector.broadcast %137 : vector<12x1xf32> to vector<12x8xf32>
    %139 = arith.mulf %134, %138 : vector<12x8xf32>
    %140 = arith.truncf %139 : vector<12x8xf32> to vector<12x8xbf16>
    %141 = arith.truncf %118 : vector<8x16xf32> to vector<8x16xbf16>
    %cst_44 = arith.constant dense<0.000000e+00> : vector<12x16xf32>
    %142 = tpu.matmul %140, %141, %cst_44 {dimension_numbers = #tpu.dot_dimension_numbers<[1], [0], [0], [1], [0, 0, 1, 1], [], []>} : vector<12x8xbf16>, vector<8x16xbf16>, vector<12x16xf32> -> vector<12x16xf32>
    %143 = vector.extract_strided_slice %1 {offsets = [0, 80], sizes = [12, 16], strides = [1, 1]} : vector<12x128xf32> to vector<12x16xf32>
    %144 = vector.extract_strided_slice %3 {offsets = [0, 80], sizes = [8, 16], strides = [1, 1]} : vector<8x128xf32> to vector<8x16xf32>
    %145 = vector.extract_strided_slice %5 {offsets = [0, 80], sizes = [8, 16], strides = [1, 1]} : vector<8x128xf32> to vector<8x16xf32>
    %cst_45 = arith.constant 2.500000e-01 : f32
    %146 = vector.broadcast %cst_45 : f32 to vector<12x16xf32>
    %147 = arith.mulf %143, %146 : vector<12x16xf32>
    %148 = arith.truncf %147 : vector<12x16xf32> to vector<12x16xbf16>
    %149 = arith.truncf %144 : vector<8x16xf32> to vector<8x16xbf16>
    %cst_46 = arith.constant dense<0.000000e+00> : vector<12x8xf32>
    %150 = tpu.matmul %148, %149, %cst_46 {dimension_numbers = #tpu.dot_dimension_numbers<[1], [1], [0], [0], [0, 0, 1, 0], [], []>} : vector<12x16xbf16>, vector<8x16xbf16>, vector<12x8xf32> -> vector<12x8xf32>
    %cst_47 = arith.constant 0.000000e+00 : f32
    %151 = vector.broadcast %cst_47 : f32 to vector<1x8xf32>
    %152 = arith.cmpf oeq, %7, %151 : vector<1x8xf32>
    %cst_48 = arith.constant -1.000000e+09 : f32
    %153 = vector.shape_cast %152 : vector<1x8xi1> to vector<1x8xi1>
    %154 = vector.broadcast %153 : vector<1x8xi1> to vector<12x8xi1>
    %155 = vector.broadcast %cst_48 : f32 to vector<12x8xf32>
    %156 = arith.select %154, %155, %150 : vector<12x8xi1>, vector<12x8xf32>
    %cst_49 = arith.constant dense<0xFF800000> : vector<12xf32>
    %157 = vector.multi_reduction <maximumf>, %156, %cst_49 [1] : vector<12x8xf32> to vector<12xf32>
    %158 = vector.shape_cast %157 : vector<12xf32> to vector<12x1xf32>
    %159 = vector.broadcast %158 : vector<12x1xf32> to vector<12x8xf32>
    %160 = arith.subf %156, %159 : vector<12x8xf32>
    %161 = math.exp %160 : vector<12x8xf32>
    %cst_50 = arith.constant dense<0.000000e+00> : vector<12xf32>
    %162 = vector.multi_reduction <add>, %161, %cst_50 [1] : vector<12x8xf32> to vector<12xf32>
    %163 = vector.shape_cast %162 : vector<12xf32> to vector<12x1xf32>
    %164 = tpu.reciprocal %163 {approx = true} : vector<12x1xf32> -> vector<12x1xf32>
    %165 = vector.broadcast %164 : vector<12x1xf32> to vector<12x8xf32>
    %166 = arith.mulf %161, %165 : vector<12x8xf32>
    %167 = arith.truncf %166 : vector<12x8xf32> to vector<12x8xbf16>
    %168 = arith.truncf %145 : vector<8x16xf32> to vector<8x16xbf16>
    %cst_51 = arith.constant dense<0.000000e+00> : vector<12x16xf32>
    %169 = tpu.matmul %167, %168, %cst_51 {dimension_numbers = #tpu.dot_dimension_numbers<[1], [0], [0], [1], [0, 0, 1, 1], [], []>} : vector<12x8xbf16>, vector<8x16xbf16>, vector<12x16xf32> -> vector<12x16xf32>
    %170 = vector.extract_strided_slice %1 {offsets = [0, 96], sizes = [12, 16], strides = [1, 1]} : vector<12x128xf32> to vector<12x16xf32>
    %171 = vector.extract_strided_slice %3 {offsets = [0, 96], sizes = [8, 16], strides = [1, 1]} : vector<8x128xf32> to vector<8x16xf32>
    %172 = vector.extract_strided_slice %5 {offsets = [0, 96], sizes = [8, 16], strides = [1, 1]} : vector<8x128xf32> to vector<8x16xf32>
    %cst_52 = arith.constant 2.500000e-01 : f32
    %173 = vector.broadcast %cst_52 : f32 to vector<12x16xf32>
    %174 = arith.mulf %170, %173 : vector<12x16xf32>
    %175 = arith.truncf %174 : vector<12x16xf32> to vector<12x16xbf16>
    %176 = arith.truncf %171 : vector<8x16xf32> to vector<8x16xbf16>
    %cst_53 = arith.constant dense<0.000000e+00> : vector<12x8xf32>
    %177 = tpu.matmul %175, %176, %cst_53 {dimension_numbers = #tpu.dot_dimension_numbers<[1], [1], [0], [0], [0, 0, 1, 0], [], []>} : vector<12x16xbf16>, vector<8x16xbf16>, vector<12x8xf32> -> vector<12x8xf32>
    %cst_54 = arith.constant 0.000000e+00 : f32
    %178 = vector.broadcast %cst_54 : f32 to vector<1x8xf32>
    %179 = arith.cmpf oeq, %7, %178 : vector<1x8xf32>
    %cst_55 = arith.constant -1.000000e+09 : f32
    %180 = vector.shape_cast %179 : vector<1x8xi1> to vector<1x8xi1>
    %181 = vector.broadcast %180 : vector<1x8xi1> to vector<12x8xi1>
    %182 = vector.broadcast %cst_55 : f32 to vector<12x8xf32>
    %183 = arith.select %181, %182, %177 : vector<12x8xi1>, vector<12x8xf32>
    %cst_56 = arith.constant dense<0xFF800000> : vector<12xf32>
    %184 = vector.multi_reduction <maximumf>, %183, %cst_56 [1] : vector<12x8xf32> to vector<12xf32>
    %185 = vector.shape_cast %184 : vector<12xf32> to vector<12x1xf32>
    %186 = vector.broadcast %185 : vector<12x1xf32> to vector<12x8xf32>
    %187 = arith.subf %183, %186 : vector<12x8xf32>
    %188 = math.exp %187 : vector<12x8xf32>
    %cst_57 = arith.constant dense<0.000000e+00> : vector<12xf32>
    %189 = vector.multi_reduction <add>, %188, %cst_57 [1] : vector<12x8xf32> to vector<12xf32>
    %190 = vector.shape_cast %189 : vector<12xf32> to vector<12x1xf32>
    %191 = tpu.reciprocal %190 {approx = true} : vector<12x1xf32> -> vector<12x1xf32>
    %192 = vector.broadcast %191 : vector<12x1xf32> to vector<12x8xf32>
    %193 = arith.mulf %188, %192 : vector<12x8xf32>
    %194 = arith.truncf %193 : vector<12x8xf32> to vector<12x8xbf16>
    %195 = arith.truncf %172 : vector<8x16xf32> to vector<8x16xbf16>
    %cst_58 = arith.constant dense<0.000000e+00> : vector<12x16xf32>
    %196 = tpu.matmul %194, %195, %cst_58 {dimension_numbers = #tpu.dot_dimension_numbers<[1], [0], [0], [1], [0, 0, 1, 1], [], []>} : vector<12x8xbf16>, vector<8x16xbf16>, vector<12x16xf32> -> vector<12x16xf32>
    %197 = vector.extract_strided_slice %1 {offsets = [0, 112], sizes = [12, 16], strides = [1, 1]} : vector<12x128xf32> to vector<12x16xf32>
    %198 = vector.extract_strided_slice %3 {offsets = [0, 112], sizes = [8, 16], strides = [1, 1]} : vector<8x128xf32> to vector<8x16xf32>
    %199 = vector.extract_strided_slice %5 {offsets = [0, 112], sizes = [8, 16], strides = [1, 1]} : vector<8x128xf32> to vector<8x16xf32>
    %cst_59 = arith.constant 2.500000e-01 : f32
    %200 = vector.broadcast %cst_59 : f32 to vector<12x16xf32>
    %201 = arith.mulf %197, %200 : vector<12x16xf32>
    %202 = arith.truncf %201 : vector<12x16xf32> to vector<12x16xbf16>
    %203 = arith.truncf %198 : vector<8x16xf32> to vector<8x16xbf16>
    %cst_60 = arith.constant dense<0.000000e+00> : vector<12x8xf32>
    %204 = tpu.matmul %202, %203, %cst_60 {dimension_numbers = #tpu.dot_dimension_numbers<[1], [1], [0], [0], [0, 0, 1, 0], [], []>} : vector<12x16xbf16>, vector<8x16xbf16>, vector<12x8xf32> -> vector<12x8xf32>
    %cst_61 = arith.constant 0.000000e+00 : f32
    %205 = vector.broadcast %cst_61 : f32 to vector<1x8xf32>
    %206 = arith.cmpf oeq, %7, %205 : vector<1x8xf32>
    %cst_62 = arith.constant -1.000000e+09 : f32
    %207 = vector.shape_cast %206 : vector<1x8xi1> to vector<1x8xi1>
    %208 = vector.broadcast %207 : vector<1x8xi1> to vector<12x8xi1>
    %209 = vector.broadcast %cst_62 : f32 to vector<12x8xf32>
    %210 = arith.select %208, %209, %204 : vector<12x8xi1>, vector<12x8xf32>
    %cst_63 = arith.constant dense<0xFF800000> : vector<12xf32>
    %211 = vector.multi_reduction <maximumf>, %210, %cst_63 [1] : vector<12x8xf32> to vector<12xf32>
    %212 = vector.shape_cast %211 : vector<12xf32> to vector<12x1xf32>
    %213 = vector.broadcast %212 : vector<12x1xf32> to vector<12x8xf32>
    %214 = arith.subf %210, %213 : vector<12x8xf32>
    %215 = math.exp %214 : vector<12x8xf32>
    %cst_64 = arith.constant dense<0.000000e+00> : vector<12xf32>
    %216 = vector.multi_reduction <add>, %215, %cst_64 [1] : vector<12x8xf32> to vector<12xf32>
    %217 = vector.shape_cast %216 : vector<12xf32> to vector<12x1xf32>
    %218 = tpu.reciprocal %217 {approx = true} : vector<12x1xf32> -> vector<12x1xf32>
    %219 = vector.broadcast %218 : vector<12x1xf32> to vector<12x8xf32>
    %220 = arith.mulf %215, %219 : vector<12x8xf32>
    %221 = arith.truncf %220 : vector<12x8xf32> to vector<12x8xbf16>
    %222 = arith.truncf %199 : vector<8x16xf32> to vector<8x16xbf16>
    %cst_65 = arith.constant dense<0.000000e+00> : vector<12x16xf32>
    %223 = tpu.matmul %221, %222, %cst_65 {dimension_numbers = #tpu.dot_dimension_numbers<[1], [0], [0], [1], [0, 0, 1, 1], [], []>} : vector<12x8xbf16>, vector<8x16xbf16>, vector<12x16xf32> -> vector<12x16xf32>
    %224 = tpu.concatenate %34, %61, %88, %115, %142, %169, %196, %223 in 1 : vector<12x16xf32>, vector<12x16xf32>, vector<12x16xf32>, vector<12x16xf32>, vector<12x16xf32>, vector<12x16xf32>, vector<12x16xf32>, vector<12x16xf32> -> vector<12x128xf32>
    %c0_66 = arith.constant 0 : index
    %c0_67 = arith.constant 0 : index
    %c0_68 = arith.constant 0 : index
    %225 = vector.load %arg5[%c0_66, %c0_67, %c0_68] : memref<1x12x128xf32, #tpu.memory_space<vmem>>, vector<1x12x128xf32>
    %226 = vector.shape_cast %225 : vector<1x12x128xf32> to vector<12x128xf32>
    %227 = vector.shape_cast %224 : vector<12x128xf32> to vector<1x12x128xf32>
    tpu.vector_store %arg5[%c0_66, %c0_67, %c0_68], %227 {strides = array<i32>} : memref<1x12x128xf32, #tpu.memory_space<vmem>>, vector<1x12x128xf32>,
    return
  }
  func.func @transform_0(%arg0: i32) -> (i32, i32, i32) {
    %c0_i32 = arith.constant 0 : i32
    %c1_i32 = arith.constant 1 : i32
    %c0_i32_0 = arith.constant 0 : i32
    return %arg0, %c0_i32, %c1_i32 : i32, i32, i32
  }
  func.func @transform_1(%arg0: i32) -> (i32, i32, i32) {
    %c0_i32 = arith.constant 0 : i32
    %c0_i32_0 = arith.constant 0 : i32
    %c0_i32_1 = arith.constant 0 : i32
    return %arg0, %c0_i32, %c0_i32_0 : i32, i32, i32
  }
  func.func @transform_2(%arg0: i32) -> (i32, i32, i32) {
    %c0_i32 = arith.constant 0 : i32
    %c2_i32 = arith.constant 2 : i32
    %c0_i32_0 = arith.constant 0 : i32
    return %arg0, %c0_i32, %c2_i32 : i32, i32, i32
  }
  func.func @transform_3(%arg0: i32) -> (i32, i32, i32) {
    %c0_i32 = arith.constant 0 : i32
    %c0_i32_0 = arith.constant 0 : i32
    %c0_i32_1 = arith.constant 0 : i32
    return %arg0, %c0_i32, %c0_i32_0 : i32, i32, i32
  }
  func.func @transform_4(%arg0: i32) -> (i32, i32, i32) {
    %c0_i32 = arith.constant 0 : i32
    %c0_i32_0 = arith.constant 0 : i32
    %c0_i32_1 = arith.constant 0 : i32
    return %arg0, %c0_i32, %c0_i32_0 : i32, i32, i32
  }
}

module attributes {stable_mosaic.version = 11 : i64} {
  func.func @_linear_kernel(%arg0: i32, %arg1: memref<24x256xf32, #tpu.memory_space<vmem>>, %arg2: memref<256x128xbf16, #tpu.memory_space<vmem>>, %arg3: memref<1x128xf32, #tpu.memory_space<vmem>>, %arg4: memref<24x128xf32, #tpu.memory_space<vmem>>) attributes {dimension_semantics = [#tpu.dimension_semantics<parallel>], iteration_bounds = array<i64: 1>, scalar_prefetch = 0 : i64, scratch_operands = 0 : i64, tpu.core_type = #tpu.core_type<tc>, window_params = [{transform_indices = @transform_0, window_bounds = array<i64: 24, 256>}, {pipeline_mode = #tpu.pipeline_mode<synchronous>, transform_indices = @transform_1, window_bounds = array<i64: 256, 128>}, {pipeline_mode = #tpu.pipeline_mode<synchronous>, transform_indices = @transform_2, window_bounds = array<i64: 1, 128>}, {transform_indices = @transform_3, window_bounds = array<i64: 24, 128>}]} {
    %c0 = arith.constant 0 : index
    %c0_0 = arith.constant 0 : index
    %0 = vector.load %arg1[%c0, %c0_0] : memref<24x256xf32, #tpu.memory_space<vmem>>, vector<24x256xf32>
    %1 = arith.truncf %0 : vector<24x256xf32> to vector<24x256xbf16>
    %c0_1 = arith.constant 0 : index
    %c0_2 = arith.constant 0 : index
    %2 = vector.load %arg2[%c0_1, %c0_2] : memref<256x128xbf16, #tpu.memory_space<vmem>>, vector<256x128xbf16>
    %cst = arith.constant dense<0.000000e+00> : vector<24x128xf32>
    %3 = tpu.matmul %1, %2, %cst {dimension_numbers = #tpu.dot_dimension_numbers<[1], [0], [0], [1], [0, 0, 1, 1], [], []>} : vector<24x256xbf16>, vector<256x128xbf16>, vector<24x128xf32> -> vector<24x128xf32>
    %c0_3 = arith.constant 0 : index
    %c0_4 = arith.constant 0 : index
    %4 = vector.load %arg3[%c0_3, %c0_4] : memref<1x128xf32, #tpu.memory_space<vmem>>, vector<1x128xf32>
    %5 = vector.broadcast %4 : vector<1x128xf32> to vector<24x128xf32>
    %6 = arith.addf %3, %5 : vector<24x128xf32>
    %c0_5 = arith.constant 0 : index
    %c0_6 = arith.constant 0 : index
    %7 = vector.load %arg4[%c0_5, %c0_6] : memref<24x128xf32, #tpu.memory_space<vmem>>, vector<24x128xf32>
    tpu.vector_store %arg4[%c0_5, %c0_6], %6 {strides = array<i32>} : memref<24x128xf32, #tpu.memory_space<vmem>>, vector<24x128xf32>,
    return
  }
  func.func @transform_0(%arg0: i32) -> (i32, i32) {
    %c0_i32 = arith.constant 0 : i32
    %c0_i32_0 = arith.constant 0 : i32
    return %arg0, %c0_i32 : i32, i32
  }
  func.func @transform_1(%arg0: i32) -> (i32, i32) {
    %c0_i32 = arith.constant 0 : i32
    %c0_i32_0 = arith.constant 0 : i32
    %c0_i32_1 = arith.constant 0 : i32
    return %c0_i32, %c0_i32_0 : i32, i32
  }
  func.func @transform_2(%arg0: i32) -> (i32, i32) {
    %c0_i32 = arith.constant 0 : i32
    %c0_i32_0 = arith.constant 0 : i32
    %c0_i32_1 = arith.constant 0 : i32
    return %c0_i32, %c0_i32_0 : i32, i32
  }
  func.func @transform_3(%arg0: i32) -> (i32, i32) {
    %c0_i32 = arith.constant 0 : i32
    %c0_i32_0 = arith.constant 0 : i32
    return %arg0, %c0_i32 : i32, i32
  }
}

module attributes {stable_mosaic.version = 11 : i64} {
  func.func @_linear_kernel(%arg0: i32, %arg1: memref<16x256xf32, #tpu.memory_space<vmem>>, %arg2: memref<256x128xbf16, #tpu.memory_space<vmem>>, %arg3: memref<1x128xf32, #tpu.memory_space<vmem>>, %arg4: memref<16x128xf32, #tpu.memory_space<vmem>>) attributes {dimension_semantics = [#tpu.dimension_semantics<parallel>], iteration_bounds = array<i64: 1>, scalar_prefetch = 0 : i64, scratch_operands = 0 : i64, tpu.core_type = #tpu.core_type<tc>, window_params = [{transform_indices = @transform_0, window_bounds = array<i64: 16, 256>}, {pipeline_mode = #tpu.pipeline_mode<synchronous>, transform_indices = @transform_1, window_bounds = array<i64: 256, 128>}, {pipeline_mode = #tpu.pipeline_mode<synchronous>, transform_indices = @transform_2, window_bounds = array<i64: 1, 128>}, {transform_indices = @transform_3, window_bounds = array<i64: 16, 128>}]} {
    %c0 = arith.constant 0 : index
    %c0_0 = arith.constant 0 : index
    %0 = vector.load %arg1[%c0, %c0_0] : memref<16x256xf32, #tpu.memory_space<vmem>>, vector<16x256xf32>
    %1 = arith.truncf %0 : vector<16x256xf32> to vector<16x256xbf16>
    %c0_1 = arith.constant 0 : index
    %c0_2 = arith.constant 0 : index
    %2 = vector.load %arg2[%c0_1, %c0_2] : memref<256x128xbf16, #tpu.memory_space<vmem>>, vector<256x128xbf16>
    %cst = arith.constant dense<0.000000e+00> : vector<16x128xf32>
    %3 = tpu.matmul %1, %2, %cst {dimension_numbers = #tpu.dot_dimension_numbers<[1], [0], [0], [1], [0, 0, 1, 1], [], []>} : vector<16x256xbf16>, vector<256x128xbf16>, vector<16x128xf32> -> vector<16x128xf32>
    %c0_3 = arith.constant 0 : index
    %c0_4 = arith.constant 0 : index
    %4 = vector.load %arg3[%c0_3, %c0_4] : memref<1x128xf32, #tpu.memory_space<vmem>>, vector<1x128xf32>
    %5 = vector.broadcast %4 : vector<1x128xf32> to vector<16x128xf32>
    %6 = arith.addf %3, %5 : vector<16x128xf32>
    %c0_5 = arith.constant 0 : index
    %c0_6 = arith.constant 0 : index
    %7 = vector.load %arg4[%c0_5, %c0_6] : memref<16x128xf32, #tpu.memory_space<vmem>>, vector<16x128xf32>
    tpu.vector_store %arg4[%c0_5, %c0_6], %6 {strides = array<i32>} : memref<16x128xf32, #tpu.memory_space<vmem>>, vector<16x128xf32>,
    return
  }
  func.func @transform_0(%arg0: i32) -> (i32, i32) {
    %c0_i32 = arith.constant 0 : i32
    %c0_i32_0 = arith.constant 0 : i32
    return %arg0, %c0_i32 : i32, i32
  }
  func.func @transform_1(%arg0: i32) -> (i32, i32) {
    %c0_i32 = arith.constant 0 : i32
    %c0_i32_0 = arith.constant 0 : i32
    %c0_i32_1 = arith.constant 0 : i32
    return %c0_i32, %c0_i32_0 : i32, i32
  }
  func.func @transform_2(%arg0: i32) -> (i32, i32) {
    %c0_i32 = arith.constant 0 : i32
    %c0_i32_0 = arith.constant 0 : i32
    %c0_i32_1 = arith.constant 0 : i32
    return %c0_i32, %c0_i32_0 : i32, i32
  }
  func.func @transform_3(%arg0: i32) -> (i32, i32) {
    %c0_i32 = arith.constant 0 : i32
    %c0_i32_0 = arith.constant 0 : i32
    return %arg0, %c0_i32 : i32, i32
  }
}

module attributes {stable_mosaic.version = 11 : i64} {
  func.func @_linear_kernel(%arg0: i32, %arg1: memref<2x128xf32, #tpu.memory_space<vmem>>, %arg2: memref<128x128xbf16, #tpu.memory_space<vmem>>, %arg3: memref<1x128xf32, #tpu.memory_space<vmem>>, %arg4: memref<2x128xf32, #tpu.memory_space<vmem>>) attributes {dimension_semantics = [#tpu.dimension_semantics<parallel>], iteration_bounds = array<i64: 1>, scalar_prefetch = 0 : i64, scratch_operands = 0 : i64, tpu.core_type = #tpu.core_type<tc>, window_params = [{transform_indices = @transform_0, window_bounds = array<i64: 2, 128>}, {pipeline_mode = #tpu.pipeline_mode<synchronous>, transform_indices = @transform_1, window_bounds = array<i64: 128, 128>}, {pipeline_mode = #tpu.pipeline_mode<synchronous>, transform_indices = @transform_2, window_bounds = array<i64: 1, 128>}, {transform_indices = @transform_3, window_bounds = array<i64: 2, 128>}]} {
    %c0 = arith.constant 0 : index
    %c0_0 = arith.constant 0 : index
    %0 = vector.load %arg1[%c0, %c0_0] : memref<2x128xf32, #tpu.memory_space<vmem>>, vector<2x128xf32>
    %cst = arith.constant 0.000000e+00 : f32
    %1 = vector.broadcast %cst : f32 to vector<2x128xf32>
    %2 = arith.maximumf %0, %1 : vector<2x128xf32>
    %3 = arith.truncf %2 : vector<2x128xf32> to vector<2x128xbf16>
    %c0_1 = arith.constant 0 : index
    %c0_2 = arith.constant 0 : index
    %4 = vector.load %arg2[%c0_1, %c0_2] : memref<128x128xbf16, #tpu.memory_space<vmem>>, vector<128x128xbf16>
    %cst_3 = arith.constant dense<0.000000e+00> : vector<2x128xf32>
    %5 = tpu.matmul %3, %4, %cst_3 {dimension_numbers = #tpu.dot_dimension_numbers<[1], [0], [0], [1], [0, 0, 1, 1], [], []>} : vector<2x128xbf16>, vector<128x128xbf16>, vector<2x128xf32> -> vector<2x128xf32>
    %c0_4 = arith.constant 0 : index
    %c0_5 = arith.constant 0 : index
    %6 = vector.load %arg3[%c0_4, %c0_5] : memref<1x128xf32, #tpu.memory_space<vmem>>, vector<1x128xf32>
    %7 = vector.broadcast %6 : vector<1x128xf32> to vector<2x128xf32>
    %8 = arith.addf %5, %7 : vector<2x128xf32>
    %c0_6 = arith.constant 0 : index
    %c0_7 = arith.constant 0 : index
    %9 = vector.load %arg4[%c0_6, %c0_7] : memref<2x128xf32, #tpu.memory_space<vmem>>, vector<2x128xf32>
    tpu.vector_store %arg4[%c0_6, %c0_7], %8 {strides = array<i32>} : memref<2x128xf32, #tpu.memory_space<vmem>>, vector<2x128xf32>,
    return
  }
  func.func @transform_0(%arg0: i32) -> (i32, i32) {
    %c0_i32 = arith.constant 0 : i32
    %c0_i32_0 = arith.constant 0 : i32
    return %arg0, %c0_i32 : i32, i32
  }
  func.func @transform_1(%arg0: i32) -> (i32, i32) {
    %c0_i32 = arith.constant 0 : i32
    %c0_i32_0 = arith.constant 0 : i32
    %c0_i32_1 = arith.constant 0 : i32
    return %c0_i32, %c0_i32_0 : i32, i32
  }
  func.func @transform_2(%arg0: i32) -> (i32, i32) {
    %c0_i32 = arith.constant 0 : i32
    %c0_i32_0 = arith.constant 0 : i32
    %c0_i32_1 = arith.constant 0 : i32
    return %c0_i32, %c0_i32_0 : i32, i32
  }
  func.func @transform_3(%arg0: i32) -> (i32, i32) {
    %c0_i32 = arith.constant 0 : i32
    %c0_i32_0 = arith.constant 0 : i32
    return %arg0, %c0_i32 : i32, i32
  }
}

module attributes {stable_mosaic.version = 11 : i64} {
  func.func @_linear_kernel(%arg0: i32, %arg1: memref<24x128xf32, #tpu.memory_space<vmem>>, %arg2: memref<128x384xbf16, #tpu.memory_space<vmem>>, %arg3: memref<1x384xf32, #tpu.memory_space<vmem>>, %arg4: memref<24x1xf32, #tpu.memory_space<vmem>>, %arg5: memref<24x384xf32, #tpu.memory_space<vmem>>) attributes {dimension_semantics = [#tpu.dimension_semantics<parallel>], iteration_bounds = array<i64: 1>, scalar_prefetch = 0 : i64, scratch_operands = 0 : i64, tpu.core_type = #tpu.core_type<tc>, window_params = [{transform_indices = @transform_0, window_bounds = array<i64: 24, 128>}, {pipeline_mode = #tpu.pipeline_mode<synchronous>, transform_indices = @transform_1, window_bounds = array<i64: 128, 384>}, {pipeline_mode = #tpu.pipeline_mode<synchronous>, transform_indices = @transform_2, window_bounds = array<i64: 1, 384>}, {transform_indices = @transform_3, window_bounds = array<i64: 24, 1>}, {transform_indices = @transform_4, window_bounds = array<i64: 24, 384>}]} {
    %c0 = arith.constant 0 : index
    %c0_0 = arith.constant 0 : index
    %0 = vector.load %arg1[%c0, %c0_0] : memref<24x128xf32, #tpu.memory_space<vmem>>, vector<24x128xf32>
    %cst = arith.constant 0.000000e+00 : f32
    %1 = vector.broadcast %cst : f32 to vector<24x128xf32>
    %2 = arith.maximumf %0, %1 : vector<24x128xf32>
    %3 = arith.truncf %2 : vector<24x128xf32> to vector<24x128xbf16>
    %c0_1 = arith.constant 0 : index
    %c0_2 = arith.constant 0 : index
    %4 = vector.load %arg2[%c0_1, %c0_2] : memref<128x384xbf16, #tpu.memory_space<vmem>>, vector<128x384xbf16>
    %cst_3 = arith.constant dense<0.000000e+00> : vector<24x384xf32>
    %5 = tpu.matmul %3, %4, %cst_3 {dimension_numbers = #tpu.dot_dimension_numbers<[1], [0], [0], [1], [0, 0, 1, 1], [], []>} : vector<24x128xbf16>, vector<128x384xbf16>, vector<24x384xf32> -> vector<24x384xf32>
    %c0_4 = arith.constant 0 : index
    %c0_5 = arith.constant 0 : index
    %6 = vector.load %arg3[%c0_4, %c0_5] : memref<1x384xf32, #tpu.memory_space<vmem>>, vector<1x384xf32>
    %7 = vector.broadcast %6 : vector<1x384xf32> to vector<24x384xf32>
    %8 = arith.addf %5, %7 : vector<24x384xf32>
    %c0_6 = arith.constant 0 : index
    %c0_7 = arith.constant 0 : index
    %9 = vector.load %arg4[%c0_6, %c0_7] : memref<24x1xf32, #tpu.memory_space<vmem>>, vector<24x1xf32>
    %10 = vector.broadcast %9 : vector<24x1xf32> to vector<24x384xf32>
    %11 = arith.mulf %8, %10 : vector<24x384xf32>
    %c0_8 = arith.constant 0 : index
    %c0_9 = arith.constant 0 : index
    %12 = vector.load %arg5[%c0_8, %c0_9] : memref<24x384xf32, #tpu.memory_space<vmem>>, vector<24x384xf32>
    tpu.vector_store %arg5[%c0_8, %c0_9], %11 {strides = array<i32>} : memref<24x384xf32, #tpu.memory_space<vmem>>, vector<24x384xf32>,
    return
  }
  func.func @transform_0(%arg0: i32) -> (i32, i32) {
    %c0_i32 = arith.constant 0 : i32
    %c0_i32_0 = arith.constant 0 : i32
    return %arg0, %c0_i32 : i32, i32
  }
  func.func @transform_1(%arg0: i32) -> (i32, i32) {
    %c0_i32 = arith.constant 0 : i32
    %c0_i32_0 = arith.constant 0 : i32
    %c0_i32_1 = arith.constant 0 : i32
    return %c0_i32, %c0_i32_0 : i32, i32
  }
  func.func @transform_2(%arg0: i32) -> (i32, i32) {
    %c0_i32 = arith.constant 0 : i32
    %c0_i32_0 = arith.constant 0 : i32
    %c0_i32_1 = arith.constant 0 : i32
    return %c0_i32, %c0_i32_0 : i32, i32
  }
  func.func @transform_3(%arg0: i32) -> (i32, i32) {
    %c0_i32 = arith.constant 0 : i32
    %c0_i32_0 = arith.constant 0 : i32
    return %arg0, %c0_i32 : i32, i32
  }
  func.func @transform_4(%arg0: i32) -> (i32, i32) {
    %c0_i32 = arith.constant 0 : i32
    %c0_i32_0 = arith.constant 0 : i32
    return %arg0, %c0_i32 : i32, i32
  }
}

module attributes {stable_mosaic.version = 11 : i64} {
  func.func @_linear_kernel(%arg0: i32, %arg1: memref<24x128xf32, #tpu.memory_space<vmem>>, %arg2: memref<128x128xbf16, #tpu.memory_space<vmem>>, %arg3: memref<1x128xf32, #tpu.memory_space<vmem>>, %arg4: memref<24x128xf32, #tpu.memory_space<vmem>>) attributes {dimension_semantics = [#tpu.dimension_semantics<parallel>], iteration_bounds = array<i64: 1>, scalar_prefetch = 0 : i64, scratch_operands = 0 : i64, tpu.core_type = #tpu.core_type<tc>, window_params = [{transform_indices = @transform_0, window_bounds = array<i64: 24, 128>}, {pipeline_mode = #tpu.pipeline_mode<synchronous>, transform_indices = @transform_1, window_bounds = array<i64: 128, 128>}, {pipeline_mode = #tpu.pipeline_mode<synchronous>, transform_indices = @transform_2, window_bounds = array<i64: 1, 128>}, {transform_indices = @transform_3, window_bounds = array<i64: 24, 128>}]} {
    %c0 = arith.constant 0 : index
    %c0_0 = arith.constant 0 : index
    %0 = vector.load %arg1[%c0, %c0_0] : memref<24x128xf32, #tpu.memory_space<vmem>>, vector<24x128xf32>
    %1 = arith.truncf %0 : vector<24x128xf32> to vector<24x128xbf16>
    %c0_1 = arith.constant 0 : index
    %c0_2 = arith.constant 0 : index
    %2 = vector.load %arg2[%c0_1, %c0_2] : memref<128x128xbf16, #tpu.memory_space<vmem>>, vector<128x128xbf16>
    %cst = arith.constant dense<0.000000e+00> : vector<24x128xf32>
    %3 = tpu.matmul %1, %2, %cst {dimension_numbers = #tpu.dot_dimension_numbers<[1], [0], [0], [1], [0, 0, 1, 1], [], []>} : vector<24x128xbf16>, vector<128x128xbf16>, vector<24x128xf32> -> vector<24x128xf32>
    %c0_3 = arith.constant 0 : index
    %c0_4 = arith.constant 0 : index
    %4 = vector.load %arg3[%c0_3, %c0_4] : memref<1x128xf32, #tpu.memory_space<vmem>>, vector<1x128xf32>
    %5 = vector.broadcast %4 : vector<1x128xf32> to vector<24x128xf32>
    %6 = arith.addf %3, %5 : vector<24x128xf32>
    %c0_5 = arith.constant 0 : index
    %c0_6 = arith.constant 0 : index
    %7 = vector.load %arg4[%c0_5, %c0_6] : memref<24x128xf32, #tpu.memory_space<vmem>>, vector<24x128xf32>
    tpu.vector_store %arg4[%c0_5, %c0_6], %6 {strides = array<i32>} : memref<24x128xf32, #tpu.memory_space<vmem>>, vector<24x128xf32>,
    return
  }
  func.func @transform_0(%arg0: i32) -> (i32, i32) {
    %c0_i32 = arith.constant 0 : i32
    %c0_i32_0 = arith.constant 0 : i32
    return %arg0, %c0_i32 : i32, i32
  }
  func.func @transform_1(%arg0: i32) -> (i32, i32) {
    %c0_i32 = arith.constant 0 : i32
    %c0_i32_0 = arith.constant 0 : i32
    %c0_i32_1 = arith.constant 0 : i32
    return %c0_i32, %c0_i32_0 : i32, i32
  }
  func.func @transform_2(%arg0: i32) -> (i32, i32) {
    %c0_i32 = arith.constant 0 : i32
    %c0_i32_0 = arith.constant 0 : i32
    %c0_i32_1 = arith.constant 0 : i32
    return %c0_i32, %c0_i32_0 : i32, i32
  }
  func.func @transform_3(%arg0: i32) -> (i32, i32) {
    %c0_i32 = arith.constant 0 : i32
    %c0_i32_0 = arith.constant 0 : i32
    return %arg0, %c0_i32 : i32, i32
  }
}

module attributes {stable_mosaic.version = 11 : i64} {
  func.func @_mha_kernel(%arg0: i32, %arg1: memref<1x12x128xf32, #tpu.memory_space<vmem>>, %arg2: memref<1x12x128xf32, #tpu.memory_space<vmem>>, %arg3: memref<1x12x128xf32, #tpu.memory_space<vmem>>, %arg4: memref<1x1x12xf32, #tpu.memory_space<vmem>>, %arg5: memref<1x1x128xf32, #tpu.memory_space<vmem>>, %arg6: memref<1x12x128xf32, #tpu.memory_space<vmem>>) attributes {dimension_semantics = [#tpu.dimension_semantics<parallel>], iteration_bounds = array<i64: 2>, scalar_prefetch = 0 : i64, scratch_operands = 0 : i64, tpu.core_type = #tpu.core_type<tc>, window_params = [{transform_indices = @transform_0, window_bounds = array<i64: 1, 12, 128>}, {transform_indices = @transform_1, window_bounds = array<i64: 1, 12, 128>}, {transform_indices = @transform_2, window_bounds = array<i64: 1, 12, 128>}, {transform_indices = @transform_3, window_bounds = array<i64: 1, 1, 12>}, {transform_indices = @transform_4, window_bounds = array<i64: 1, 1, 128>}, {transform_indices = @transform_5, window_bounds = array<i64: 1, 12, 128>}]} {
    %c0 = arith.constant 0 : index
    %c0_0 = arith.constant 0 : index
    %c0_1 = arith.constant 0 : index
    %0 = vector.load %arg1[%c0, %c0_0, %c0_1] : memref<1x12x128xf32, #tpu.memory_space<vmem>>, vector<1x12x128xf32>
    %1 = vector.shape_cast %0 : vector<1x12x128xf32> to vector<12x128xf32>
    %c0_2 = arith.constant 0 : index
    %c0_3 = arith.constant 0 : index
    %c0_4 = arith.constant 0 : index
    %2 = vector.load %arg2[%c0_2, %c0_3, %c0_4] : memref<1x12x128xf32, #tpu.memory_space<vmem>>, vector<1x12x128xf32>
    %3 = vector.shape_cast %2 : vector<1x12x128xf32> to vector<12x128xf32>
    %c0_5 = arith.constant 0 : index
    %c0_6 = arith.constant 0 : index
    %c0_7 = arith.constant 0 : index
    %4 = vector.load %arg3[%c0_5, %c0_6, %c0_7] : memref<1x12x128xf32, #tpu.memory_space<vmem>>, vector<1x12x128xf32>
    %5 = vector.shape_cast %4 : vector<1x12x128xf32> to vector<12x128xf32>
    %c0_8 = arith.constant 0 : index
    %c0_9 = arith.constant 0 : index
    %c0_10 = arith.constant 0 : index
    %6 = vector.load %arg4[%c0_8, %c0_9, %c0_10] : memref<1x1x12xf32, #tpu.memory_space<vmem>>, vector<1x1x12xf32>
    %7 = vector.shape_cast %6 : vector<1x1x12xf32> to vector<1x12xf32>
    %c0_11 = arith.constant 0 : index
    %c0_12 = arith.constant 0 : index
    %c0_13 = arith.constant 0 : index
    %8 = vector.load %arg5[%c0_11, %c0_12, %c0_13] : memref<1x1x128xf32, #tpu.memory_space<vmem>>, vector<1x1x128xf32>
    %9 = vector.shape_cast %8 : vector<1x1x128xf32> to vector<1x128xf32>
    %10 = vector.extract_strided_slice %1 {offsets = [0, 0], sizes = [12, 16], strides = [1, 1]} : vector<12x128xf32> to vector<12x16xf32>
    %11 = vector.extract_strided_slice %3 {offsets = [0, 0], sizes = [12, 16], strides = [1, 1]} : vector<12x128xf32> to vector<12x16xf32>
    %12 = vector.extract_strided_slice %5 {offsets = [0, 0], sizes = [12, 16], strides = [1, 1]} : vector<12x128xf32> to vector<12x16xf32>
    %13 = vector.extract_strided_slice %9 {offsets = [0, 0], sizes = [1, 16], strides = [1, 1]} : vector<1x128xf32> to vector<1x16xf32>
    %14 = vector.broadcast %13 : vector<1x16xf32> to vector<12x16xf32>
    %15 = arith.mulf %10, %14 : vector<12x16xf32>
    %16 = vector.broadcast %13 : vector<1x16xf32> to vector<12x16xf32>
    %17 = arith.mulf %11, %16 : vector<12x16xf32>
    %cst = arith.constant 2.500000e-01 : f32
    %18 = vector.broadcast %cst : f32 to vector<12x16xf32>
    %19 = arith.mulf %15, %18 : vector<12x16xf32>
    %20 = arith.truncf %19 : vector<12x16xf32> to vector<12x16xbf16>
    %21 = arith.truncf %17 : vector<12x16xf32> to vector<12x16xbf16>
    %cst_14 = arith.constant dense<0.000000e+00> : vector<12x12xf32>
    %22 = tpu.matmul %20, %21, %cst_14 {dimension_numbers = #tpu.dot_dimension_numbers<[1], [1], [0], [0], [0, 0, 1, 0], [], []>} : vector<12x16xbf16>, vector<12x16xbf16>, vector<12x12xf32> -> vector<12x12xf32>
    %cst_15 = arith.constant 0.000000e+00 : f32
    %23 = vector.broadcast %cst_15 : f32 to vector<1x12xf32>
    %24 = arith.cmpf oeq, %7, %23 : vector<1x12xf32>
    %cst_16 = arith.constant -1.000000e+09 : f32
    %25 = vector.shape_cast %24 : vector<1x12xi1> to vector<1x12xi1>
    %26 = vector.broadcast %25 : vector<1x12xi1> to vector<12x12xi1>
    %27 = vector.broadcast %cst_16 : f32 to vector<12x12xf32>
    %28 = arith.select %26, %27, %22 : vector<12x12xi1>, vector<12x12xf32>
    %cst_17 = arith.constant dense<0xFF800000> : vector<12xf32>
    %29 = vector.multi_reduction <maximumf>, %28, %cst_17 [1] : vector<12x12xf32> to vector<12xf32>
    %30 = vector.shape_cast %29 : vector<12xf32> to vector<12x1xf32>
    %31 = vector.broadcast %30 : vector<12x1xf32> to vector<12x12xf32>
    %32 = arith.subf %28, %31 : vector<12x12xf32>
    %33 = math.exp %32 : vector<12x12xf32>
    %cst_18 = arith.constant dense<0.000000e+00> : vector<12xf32>
    %34 = vector.multi_reduction <add>, %33, %cst_18 [1] : vector<12x12xf32> to vector<12xf32>
    %35 = vector.shape_cast %34 : vector<12xf32> to vector<12x1xf32>
    %36 = tpu.reciprocal %35 {approx = true} : vector<12x1xf32> -> vector<12x1xf32>
    %37 = vector.broadcast %36 : vector<12x1xf32> to vector<12x12xf32>
    %38 = arith.mulf %33, %37 : vector<12x12xf32>
    %39 = arith.truncf %38 : vector<12x12xf32> to vector<12x12xbf16>
    %40 = arith.truncf %12 : vector<12x16xf32> to vector<12x16xbf16>
    %cst_19 = arith.constant dense<0.000000e+00> : vector<12x16xf32>
    %41 = tpu.matmul %39, %40, %cst_19 {dimension_numbers = #tpu.dot_dimension_numbers<[1], [0], [0], [1], [0, 0, 1, 1], [], []>} : vector<12x12xbf16>, vector<12x16xbf16>, vector<12x16xf32> -> vector<12x16xf32>
    %42 = vector.extract_strided_slice %1 {offsets = [0, 16], sizes = [12, 16], strides = [1, 1]} : vector<12x128xf32> to vector<12x16xf32>
    %43 = vector.extract_strided_slice %3 {offsets = [0, 16], sizes = [12, 16], strides = [1, 1]} : vector<12x128xf32> to vector<12x16xf32>
    %44 = vector.extract_strided_slice %5 {offsets = [0, 16], sizes = [12, 16], strides = [1, 1]} : vector<12x128xf32> to vector<12x16xf32>
    %45 = vector.extract_strided_slice %9 {offsets = [0, 16], sizes = [1, 16], strides = [1, 1]} : vector<1x128xf32> to vector<1x16xf32>
    %46 = vector.broadcast %45 : vector<1x16xf32> to vector<12x16xf32>
    %47 = arith.mulf %42, %46 : vector<12x16xf32>
    %48 = vector.broadcast %45 : vector<1x16xf32> to vector<12x16xf32>
    %49 = arith.mulf %43, %48 : vector<12x16xf32>
    %cst_20 = arith.constant 2.500000e-01 : f32
    %50 = vector.broadcast %cst_20 : f32 to vector<12x16xf32>
    %51 = arith.mulf %47, %50 : vector<12x16xf32>
    %52 = arith.truncf %51 : vector<12x16xf32> to vector<12x16xbf16>
    %53 = arith.truncf %49 : vector<12x16xf32> to vector<12x16xbf16>
    %cst_21 = arith.constant dense<0.000000e+00> : vector<12x12xf32>
    %54 = tpu.matmul %52, %53, %cst_21 {dimension_numbers = #tpu.dot_dimension_numbers<[1], [1], [0], [0], [0, 0, 1, 0], [], []>} : vector<12x16xbf16>, vector<12x16xbf16>, vector<12x12xf32> -> vector<12x12xf32>
    %cst_22 = arith.constant 0.000000e+00 : f32
    %55 = vector.broadcast %cst_22 : f32 to vector<1x12xf32>
    %56 = arith.cmpf oeq, %7, %55 : vector<1x12xf32>
    %cst_23 = arith.constant -1.000000e+09 : f32
    %57 = vector.shape_cast %56 : vector<1x12xi1> to vector<1x12xi1>
    %58 = vector.broadcast %57 : vector<1x12xi1> to vector<12x12xi1>
    %59 = vector.broadcast %cst_23 : f32 to vector<12x12xf32>
    %60 = arith.select %58, %59, %54 : vector<12x12xi1>, vector<12x12xf32>
    %cst_24 = arith.constant dense<0xFF800000> : vector<12xf32>
    %61 = vector.multi_reduction <maximumf>, %60, %cst_24 [1] : vector<12x12xf32> to vector<12xf32>
    %62 = vector.shape_cast %61 : vector<12xf32> to vector<12x1xf32>
    %63 = vector.broadcast %62 : vector<12x1xf32> to vector<12x12xf32>
    %64 = arith.subf %60, %63 : vector<12x12xf32>
    %65 = math.exp %64 : vector<12x12xf32>
    %cst_25 = arith.constant dense<0.000000e+00> : vector<12xf32>
    %66 = vector.multi_reduction <add>, %65, %cst_25 [1] : vector<12x12xf32> to vector<12xf32>
    %67 = vector.shape_cast %66 : vector<12xf32> to vector<12x1xf32>
    %68 = tpu.reciprocal %67 {approx = true} : vector<12x1xf32> -> vector<12x1xf32>
    %69 = vector.broadcast %68 : vector<12x1xf32> to vector<12x12xf32>
    %70 = arith.mulf %65, %69 : vector<12x12xf32>
    %71 = arith.truncf %70 : vector<12x12xf32> to vector<12x12xbf16>
    %72 = arith.truncf %44 : vector<12x16xf32> to vector<12x16xbf16>
    %cst_26 = arith.constant dense<0.000000e+00> : vector<12x16xf32>
    %73 = tpu.matmul %71, %72, %cst_26 {dimension_numbers = #tpu.dot_dimension_numbers<[1], [0], [0], [1], [0, 0, 1, 1], [], []>} : vector<12x12xbf16>, vector<12x16xbf16>, vector<12x16xf32> -> vector<12x16xf32>
    %74 = vector.extract_strided_slice %1 {offsets = [0, 32], sizes = [12, 16], strides = [1, 1]} : vector<12x128xf32> to vector<12x16xf32>
    %75 = vector.extract_strided_slice %3 {offsets = [0, 32], sizes = [12, 16], strides = [1, 1]} : vector<12x128xf32> to vector<12x16xf32>
    %76 = vector.extract_strided_slice %5 {offsets = [0, 32], sizes = [12, 16], strides = [1, 1]} : vector<12x128xf32> to vector<12x16xf32>
    %77 = vector.extract_strided_slice %9 {offsets = [0, 32], sizes = [1, 16], strides = [1, 1]} : vector<1x128xf32> to vector<1x16xf32>
    %78 = vector.broadcast %77 : vector<1x16xf32> to vector<12x16xf32>
    %79 = arith.mulf %74, %78 : vector<12x16xf32>
    %80 = vector.broadcast %77 : vector<1x16xf32> to vector<12x16xf32>
    %81 = arith.mulf %75, %80 : vector<12x16xf32>
    %cst_27 = arith.constant 2.500000e-01 : f32
    %82 = vector.broadcast %cst_27 : f32 to vector<12x16xf32>
    %83 = arith.mulf %79, %82 : vector<12x16xf32>
    %84 = arith.truncf %83 : vector<12x16xf32> to vector<12x16xbf16>
    %85 = arith.truncf %81 : vector<12x16xf32> to vector<12x16xbf16>
    %cst_28 = arith.constant dense<0.000000e+00> : vector<12x12xf32>
    %86 = tpu.matmul %84, %85, %cst_28 {dimension_numbers = #tpu.dot_dimension_numbers<[1], [1], [0], [0], [0, 0, 1, 0], [], []>} : vector<12x16xbf16>, vector<12x16xbf16>, vector<12x12xf32> -> vector<12x12xf32>
    %cst_29 = arith.constant 0.000000e+00 : f32
    %87 = vector.broadcast %cst_29 : f32 to vector<1x12xf32>
    %88 = arith.cmpf oeq, %7, %87 : vector<1x12xf32>
    %cst_30 = arith.constant -1.000000e+09 : f32
    %89 = vector.shape_cast %88 : vector<1x12xi1> to vector<1x12xi1>
    %90 = vector.broadcast %89 : vector<1x12xi1> to vector<12x12xi1>
    %91 = vector.broadcast %cst_30 : f32 to vector<12x12xf32>
    %92 = arith.select %90, %91, %86 : vector<12x12xi1>, vector<12x12xf32>
    %cst_31 = arith.constant dense<0xFF800000> : vector<12xf32>
    %93 = vector.multi_reduction <maximumf>, %92, %cst_31 [1] : vector<12x12xf32> to vector<12xf32>
    %94 = vector.shape_cast %93 : vector<12xf32> to vector<12x1xf32>
    %95 = vector.broadcast %94 : vector<12x1xf32> to vector<12x12xf32>
    %96 = arith.subf %92, %95 : vector<12x12xf32>
    %97 = math.exp %96 : vector<12x12xf32>
    %cst_32 = arith.constant dense<0.000000e+00> : vector<12xf32>
    %98 = vector.multi_reduction <add>, %97, %cst_32 [1] : vector<12x12xf32> to vector<12xf32>
    %99 = vector.shape_cast %98 : vector<12xf32> to vector<12x1xf32>
    %100 = tpu.reciprocal %99 {approx = true} : vector<12x1xf32> -> vector<12x1xf32>
    %101 = vector.broadcast %100 : vector<12x1xf32> to vector<12x12xf32>
    %102 = arith.mulf %97, %101 : vector<12x12xf32>
    %103 = arith.truncf %102 : vector<12x12xf32> to vector<12x12xbf16>
    %104 = arith.truncf %76 : vector<12x16xf32> to vector<12x16xbf16>
    %cst_33 = arith.constant dense<0.000000e+00> : vector<12x16xf32>
    %105 = tpu.matmul %103, %104, %cst_33 {dimension_numbers = #tpu.dot_dimension_numbers<[1], [0], [0], [1], [0, 0, 1, 1], [], []>} : vector<12x12xbf16>, vector<12x16xbf16>, vector<12x16xf32> -> vector<12x16xf32>
    %106 = vector.extract_strided_slice %1 {offsets = [0, 48], sizes = [12, 16], strides = [1, 1]} : vector<12x128xf32> to vector<12x16xf32>
    %107 = vector.extract_strided_slice %3 {offsets = [0, 48], sizes = [12, 16], strides = [1, 1]} : vector<12x128xf32> to vector<12x16xf32>
    %108 = vector.extract_strided_slice %5 {offsets = [0, 48], sizes = [12, 16], strides = [1, 1]} : vector<12x128xf32> to vector<12x16xf32>
    %109 = vector.extract_strided_slice %9 {offsets = [0, 48], sizes = [1, 16], strides = [1, 1]} : vector<1x128xf32> to vector<1x16xf32>
    %110 = vector.broadcast %109 : vector<1x16xf32> to vector<12x16xf32>
    %111 = arith.mulf %106, %110 : vector<12x16xf32>
    %112 = vector.broadcast %109 : vector<1x16xf32> to vector<12x16xf32>
    %113 = arith.mulf %107, %112 : vector<12x16xf32>
    %cst_34 = arith.constant 2.500000e-01 : f32
    %114 = vector.broadcast %cst_34 : f32 to vector<12x16xf32>
    %115 = arith.mulf %111, %114 : vector<12x16xf32>
    %116 = arith.truncf %115 : vector<12x16xf32> to vector<12x16xbf16>
    %117 = arith.truncf %113 : vector<12x16xf32> to vector<12x16xbf16>
    %cst_35 = arith.constant dense<0.000000e+00> : vector<12x12xf32>
    %118 = tpu.matmul %116, %117, %cst_35 {dimension_numbers = #tpu.dot_dimension_numbers<[1], [1], [0], [0], [0, 0, 1, 0], [], []>} : vector<12x16xbf16>, vector<12x16xbf16>, vector<12x12xf32> -> vector<12x12xf32>
    %cst_36 = arith.constant 0.000000e+00 : f32
    %119 = vector.broadcast %cst_36 : f32 to vector<1x12xf32>
    %120 = arith.cmpf oeq, %7, %119 : vector<1x12xf32>
    %cst_37 = arith.constant -1.000000e+09 : f32
    %121 = vector.shape_cast %120 : vector<1x12xi1> to vector<1x12xi1>
    %122 = vector.broadcast %121 : vector<1x12xi1> to vector<12x12xi1>
    %123 = vector.broadcast %cst_37 : f32 to vector<12x12xf32>
    %124 = arith.select %122, %123, %118 : vector<12x12xi1>, vector<12x12xf32>
    %cst_38 = arith.constant dense<0xFF800000> : vector<12xf32>
    %125 = vector.multi_reduction <maximumf>, %124, %cst_38 [1] : vector<12x12xf32> to vector<12xf32>
    %126 = vector.shape_cast %125 : vector<12xf32> to vector<12x1xf32>
    %127 = vector.broadcast %126 : vector<12x1xf32> to vector<12x12xf32>
    %128 = arith.subf %124, %127 : vector<12x12xf32>
    %129 = math.exp %128 : vector<12x12xf32>
    %cst_39 = arith.constant dense<0.000000e+00> : vector<12xf32>
    %130 = vector.multi_reduction <add>, %129, %cst_39 [1] : vector<12x12xf32> to vector<12xf32>
    %131 = vector.shape_cast %130 : vector<12xf32> to vector<12x1xf32>
    %132 = tpu.reciprocal %131 {approx = true} : vector<12x1xf32> -> vector<12x1xf32>
    %133 = vector.broadcast %132 : vector<12x1xf32> to vector<12x12xf32>
    %134 = arith.mulf %129, %133 : vector<12x12xf32>
    %135 = arith.truncf %134 : vector<12x12xf32> to vector<12x12xbf16>
    %136 = arith.truncf %108 : vector<12x16xf32> to vector<12x16xbf16>
    %cst_40 = arith.constant dense<0.000000e+00> : vector<12x16xf32>
    %137 = tpu.matmul %135, %136, %cst_40 {dimension_numbers = #tpu.dot_dimension_numbers<[1], [0], [0], [1], [0, 0, 1, 1], [], []>} : vector<12x12xbf16>, vector<12x16xbf16>, vector<12x16xf32> -> vector<12x16xf32>
    %138 = vector.extract_strided_slice %1 {offsets = [0, 64], sizes = [12, 16], strides = [1, 1]} : vector<12x128xf32> to vector<12x16xf32>
    %139 = vector.extract_strided_slice %3 {offsets = [0, 64], sizes = [12, 16], strides = [1, 1]} : vector<12x128xf32> to vector<12x16xf32>
    %140 = vector.extract_strided_slice %5 {offsets = [0, 64], sizes = [12, 16], strides = [1, 1]} : vector<12x128xf32> to vector<12x16xf32>
    %141 = vector.extract_strided_slice %9 {offsets = [0, 64], sizes = [1, 16], strides = [1, 1]} : vector<1x128xf32> to vector<1x16xf32>
    %142 = vector.broadcast %141 : vector<1x16xf32> to vector<12x16xf32>
    %143 = arith.mulf %138, %142 : vector<12x16xf32>
    %144 = vector.broadcast %141 : vector<1x16xf32> to vector<12x16xf32>
    %145 = arith.mulf %139, %144 : vector<12x16xf32>
    %cst_41 = arith.constant 2.500000e-01 : f32
    %146 = vector.broadcast %cst_41 : f32 to vector<12x16xf32>
    %147 = arith.mulf %143, %146 : vector<12x16xf32>
    %148 = arith.truncf %147 : vector<12x16xf32> to vector<12x16xbf16>
    %149 = arith.truncf %145 : vector<12x16xf32> to vector<12x16xbf16>
    %cst_42 = arith.constant dense<0.000000e+00> : vector<12x12xf32>
    %150 = tpu.matmul %148, %149, %cst_42 {dimension_numbers = #tpu.dot_dimension_numbers<[1], [1], [0], [0], [0, 0, 1, 0], [], []>} : vector<12x16xbf16>, vector<12x16xbf16>, vector<12x12xf32> -> vector<12x12xf32>
    %cst_43 = arith.constant 0.000000e+00 : f32
    %151 = vector.broadcast %cst_43 : f32 to vector<1x12xf32>
    %152 = arith.cmpf oeq, %7, %151 : vector<1x12xf32>
    %cst_44 = arith.constant -1.000000e+09 : f32
    %153 = vector.shape_cast %152 : vector<1x12xi1> to vector<1x12xi1>
    %154 = vector.broadcast %153 : vector<1x12xi1> to vector<12x12xi1>
    %155 = vector.broadcast %cst_44 : f32 to vector<12x12xf32>
    %156 = arith.select %154, %155, %150 : vector<12x12xi1>, vector<12x12xf32>
    %cst_45 = arith.constant dense<0xFF800000> : vector<12xf32>
    %157 = vector.multi_reduction <maximumf>, %156, %cst_45 [1] : vector<12x12xf32> to vector<12xf32>
    %158 = vector.shape_cast %157 : vector<12xf32> to vector<12x1xf32>
    %159 = vector.broadcast %158 : vector<12x1xf32> to vector<12x12xf32>
    %160 = arith.subf %156, %159 : vector<12x12xf32>
    %161 = math.exp %160 : vector<12x12xf32>
    %cst_46 = arith.constant dense<0.000000e+00> : vector<12xf32>
    %162 = vector.multi_reduction <add>, %161, %cst_46 [1] : vector<12x12xf32> to vector<12xf32>
    %163 = vector.shape_cast %162 : vector<12xf32> to vector<12x1xf32>
    %164 = tpu.reciprocal %163 {approx = true} : vector<12x1xf32> -> vector<12x1xf32>
    %165 = vector.broadcast %164 : vector<12x1xf32> to vector<12x12xf32>
    %166 = arith.mulf %161, %165 : vector<12x12xf32>
    %167 = arith.truncf %166 : vector<12x12xf32> to vector<12x12xbf16>
    %168 = arith.truncf %140 : vector<12x16xf32> to vector<12x16xbf16>
    %cst_47 = arith.constant dense<0.000000e+00> : vector<12x16xf32>
    %169 = tpu.matmul %167, %168, %cst_47 {dimension_numbers = #tpu.dot_dimension_numbers<[1], [0], [0], [1], [0, 0, 1, 1], [], []>} : vector<12x12xbf16>, vector<12x16xbf16>, vector<12x16xf32> -> vector<12x16xf32>
    %170 = vector.extract_strided_slice %1 {offsets = [0, 80], sizes = [12, 16], strides = [1, 1]} : vector<12x128xf32> to vector<12x16xf32>
    %171 = vector.extract_strided_slice %3 {offsets = [0, 80], sizes = [12, 16], strides = [1, 1]} : vector<12x128xf32> to vector<12x16xf32>
    %172 = vector.extract_strided_slice %5 {offsets = [0, 80], sizes = [12, 16], strides = [1, 1]} : vector<12x128xf32> to vector<12x16xf32>
    %173 = vector.extract_strided_slice %9 {offsets = [0, 80], sizes = [1, 16], strides = [1, 1]} : vector<1x128xf32> to vector<1x16xf32>
    %174 = vector.broadcast %173 : vector<1x16xf32> to vector<12x16xf32>
    %175 = arith.mulf %170, %174 : vector<12x16xf32>
    %176 = vector.broadcast %173 : vector<1x16xf32> to vector<12x16xf32>
    %177 = arith.mulf %171, %176 : vector<12x16xf32>
    %cst_48 = arith.constant 2.500000e-01 : f32
    %178 = vector.broadcast %cst_48 : f32 to vector<12x16xf32>
    %179 = arith.mulf %175, %178 : vector<12x16xf32>
    %180 = arith.truncf %179 : vector<12x16xf32> to vector<12x16xbf16>
    %181 = arith.truncf %177 : vector<12x16xf32> to vector<12x16xbf16>
    %cst_49 = arith.constant dense<0.000000e+00> : vector<12x12xf32>
    %182 = tpu.matmul %180, %181, %cst_49 {dimension_numbers = #tpu.dot_dimension_numbers<[1], [1], [0], [0], [0, 0, 1, 0], [], []>} : vector<12x16xbf16>, vector<12x16xbf16>, vector<12x12xf32> -> vector<12x12xf32>
    %cst_50 = arith.constant 0.000000e+00 : f32
    %183 = vector.broadcast %cst_50 : f32 to vector<1x12xf32>
    %184 = arith.cmpf oeq, %7, %183 : vector<1x12xf32>
    %cst_51 = arith.constant -1.000000e+09 : f32
    %185 = vector.shape_cast %184 : vector<1x12xi1> to vector<1x12xi1>
    %186 = vector.broadcast %185 : vector<1x12xi1> to vector<12x12xi1>
    %187 = vector.broadcast %cst_51 : f32 to vector<12x12xf32>
    %188 = arith.select %186, %187, %182 : vector<12x12xi1>, vector<12x12xf32>
    %cst_52 = arith.constant dense<0xFF800000> : vector<12xf32>
    %189 = vector.multi_reduction <maximumf>, %188, %cst_52 [1] : vector<12x12xf32> to vector<12xf32>
    %190 = vector.shape_cast %189 : vector<12xf32> to vector<12x1xf32>
    %191 = vector.broadcast %190 : vector<12x1xf32> to vector<12x12xf32>
    %192 = arith.subf %188, %191 : vector<12x12xf32>
    %193 = math.exp %192 : vector<12x12xf32>
    %cst_53 = arith.constant dense<0.000000e+00> : vector<12xf32>
    %194 = vector.multi_reduction <add>, %193, %cst_53 [1] : vector<12x12xf32> to vector<12xf32>
    %195 = vector.shape_cast %194 : vector<12xf32> to vector<12x1xf32>
    %196 = tpu.reciprocal %195 {approx = true} : vector<12x1xf32> -> vector<12x1xf32>
    %197 = vector.broadcast %196 : vector<12x1xf32> to vector<12x12xf32>
    %198 = arith.mulf %193, %197 : vector<12x12xf32>
    %199 = arith.truncf %198 : vector<12x12xf32> to vector<12x12xbf16>
    %200 = arith.truncf %172 : vector<12x16xf32> to vector<12x16xbf16>
    %cst_54 = arith.constant dense<0.000000e+00> : vector<12x16xf32>
    %201 = tpu.matmul %199, %200, %cst_54 {dimension_numbers = #tpu.dot_dimension_numbers<[1], [0], [0], [1], [0, 0, 1, 1], [], []>} : vector<12x12xbf16>, vector<12x16xbf16>, vector<12x16xf32> -> vector<12x16xf32>
    %202 = vector.extract_strided_slice %1 {offsets = [0, 96], sizes = [12, 16], strides = [1, 1]} : vector<12x128xf32> to vector<12x16xf32>
    %203 = vector.extract_strided_slice %3 {offsets = [0, 96], sizes = [12, 16], strides = [1, 1]} : vector<12x128xf32> to vector<12x16xf32>
    %204 = vector.extract_strided_slice %5 {offsets = [0, 96], sizes = [12, 16], strides = [1, 1]} : vector<12x128xf32> to vector<12x16xf32>
    %205 = vector.extract_strided_slice %9 {offsets = [0, 96], sizes = [1, 16], strides = [1, 1]} : vector<1x128xf32> to vector<1x16xf32>
    %206 = vector.broadcast %205 : vector<1x16xf32> to vector<12x16xf32>
    %207 = arith.mulf %202, %206 : vector<12x16xf32>
    %208 = vector.broadcast %205 : vector<1x16xf32> to vector<12x16xf32>
    %209 = arith.mulf %203, %208 : vector<12x16xf32>
    %cst_55 = arith.constant 2.500000e-01 : f32
    %210 = vector.broadcast %cst_55 : f32 to vector<12x16xf32>
    %211 = arith.mulf %207, %210 : vector<12x16xf32>
    %212 = arith.truncf %211 : vector<12x16xf32> to vector<12x16xbf16>
    %213 = arith.truncf %209 : vector<12x16xf32> to vector<12x16xbf16>
    %cst_56 = arith.constant dense<0.000000e+00> : vector<12x12xf32>
    %214 = tpu.matmul %212, %213, %cst_56 {dimension_numbers = #tpu.dot_dimension_numbers<[1], [1], [0], [0], [0, 0, 1, 0], [], []>} : vector<12x16xbf16>, vector<12x16xbf16>, vector<12x12xf32> -> vector<12x12xf32>
    %cst_57 = arith.constant 0.000000e+00 : f32
    %215 = vector.broadcast %cst_57 : f32 to vector<1x12xf32>
    %216 = arith.cmpf oeq, %7, %215 : vector<1x12xf32>
    %cst_58 = arith.constant -1.000000e+09 : f32
    %217 = vector.shape_cast %216 : vector<1x12xi1> to vector<1x12xi1>
    %218 = vector.broadcast %217 : vector<1x12xi1> to vector<12x12xi1>
    %219 = vector.broadcast %cst_58 : f32 to vector<12x12xf32>
    %220 = arith.select %218, %219, %214 : vector<12x12xi1>, vector<12x12xf32>
    %cst_59 = arith.constant dense<0xFF800000> : vector<12xf32>
    %221 = vector.multi_reduction <maximumf>, %220, %cst_59 [1] : vector<12x12xf32> to vector<12xf32>
    %222 = vector.shape_cast %221 : vector<12xf32> to vector<12x1xf32>
    %223 = vector.broadcast %222 : vector<12x1xf32> to vector<12x12xf32>
    %224 = arith.subf %220, %223 : vector<12x12xf32>
    %225 = math.exp %224 : vector<12x12xf32>
    %cst_60 = arith.constant dense<0.000000e+00> : vector<12xf32>
    %226 = vector.multi_reduction <add>, %225, %cst_60 [1] : vector<12x12xf32> to vector<12xf32>
    %227 = vector.shape_cast %226 : vector<12xf32> to vector<12x1xf32>
    %228 = tpu.reciprocal %227 {approx = true} : vector<12x1xf32> -> vector<12x1xf32>
    %229 = vector.broadcast %228 : vector<12x1xf32> to vector<12x12xf32>
    %230 = arith.mulf %225, %229 : vector<12x12xf32>
    %231 = arith.truncf %230 : vector<12x12xf32> to vector<12x12xbf16>
    %232 = arith.truncf %204 : vector<12x16xf32> to vector<12x16xbf16>
    %cst_61 = arith.constant dense<0.000000e+00> : vector<12x16xf32>
    %233 = tpu.matmul %231, %232, %cst_61 {dimension_numbers = #tpu.dot_dimension_numbers<[1], [0], [0], [1], [0, 0, 1, 1], [], []>} : vector<12x12xbf16>, vector<12x16xbf16>, vector<12x16xf32> -> vector<12x16xf32>
    %234 = vector.extract_strided_slice %1 {offsets = [0, 112], sizes = [12, 16], strides = [1, 1]} : vector<12x128xf32> to vector<12x16xf32>
    %235 = vector.extract_strided_slice %3 {offsets = [0, 112], sizes = [12, 16], strides = [1, 1]} : vector<12x128xf32> to vector<12x16xf32>
    %236 = vector.extract_strided_slice %5 {offsets = [0, 112], sizes = [12, 16], strides = [1, 1]} : vector<12x128xf32> to vector<12x16xf32>
    %237 = vector.extract_strided_slice %9 {offsets = [0, 112], sizes = [1, 16], strides = [1, 1]} : vector<1x128xf32> to vector<1x16xf32>
    %238 = vector.broadcast %237 : vector<1x16xf32> to vector<12x16xf32>
    %239 = arith.mulf %234, %238 : vector<12x16xf32>
    %240 = vector.broadcast %237 : vector<1x16xf32> to vector<12x16xf32>
    %241 = arith.mulf %235, %240 : vector<12x16xf32>
    %cst_62 = arith.constant 2.500000e-01 : f32
    %242 = vector.broadcast %cst_62 : f32 to vector<12x16xf32>
    %243 = arith.mulf %239, %242 : vector<12x16xf32>
    %244 = arith.truncf %243 : vector<12x16xf32> to vector<12x16xbf16>
    %245 = arith.truncf %241 : vector<12x16xf32> to vector<12x16xbf16>
    %cst_63 = arith.constant dense<0.000000e+00> : vector<12x12xf32>
    %246 = tpu.matmul %244, %245, %cst_63 {dimension_numbers = #tpu.dot_dimension_numbers<[1], [1], [0], [0], [0, 0, 1, 0], [], []>} : vector<12x16xbf16>, vector<12x16xbf16>, vector<12x12xf32> -> vector<12x12xf32>
    %cst_64 = arith.constant 0.000000e+00 : f32
    %247 = vector.broadcast %cst_64 : f32 to vector<1x12xf32>
    %248 = arith.cmpf oeq, %7, %247 : vector<1x12xf32>
    %cst_65 = arith.constant -1.000000e+09 : f32
    %249 = vector.shape_cast %248 : vector<1x12xi1> to vector<1x12xi1>
    %250 = vector.broadcast %249 : vector<1x12xi1> to vector<12x12xi1>
    %251 = vector.broadcast %cst_65 : f32 to vector<12x12xf32>
    %252 = arith.select %250, %251, %246 : vector<12x12xi1>, vector<12x12xf32>
    %cst_66 = arith.constant dense<0xFF800000> : vector<12xf32>
    %253 = vector.multi_reduction <maximumf>, %252, %cst_66 [1] : vector<12x12xf32> to vector<12xf32>
    %254 = vector.shape_cast %253 : vector<12xf32> to vector<12x1xf32>
    %255 = vector.broadcast %254 : vector<12x1xf32> to vector<12x12xf32>
    %256 = arith.subf %252, %255 : vector<12x12xf32>
    %257 = math.exp %256 : vector<12x12xf32>
    %cst_67 = arith.constant dense<0.000000e+00> : vector<12xf32>
    %258 = vector.multi_reduction <add>, %257, %cst_67 [1] : vector<12x12xf32> to vector<12xf32>
    %259 = vector.shape_cast %258 : vector<12xf32> to vector<12x1xf32>
    %260 = tpu.reciprocal %259 {approx = true} : vector<12x1xf32> -> vector<12x1xf32>
    %261 = vector.broadcast %260 : vector<12x1xf32> to vector<12x12xf32>
    %262 = arith.mulf %257, %261 : vector<12x12xf32>
    %263 = arith.truncf %262 : vector<12x12xf32> to vector<12x12xbf16>
    %264 = arith.truncf %236 : vector<12x16xf32> to vector<12x16xbf16>
    %cst_68 = arith.constant dense<0.000000e+00> : vector<12x16xf32>
    %265 = tpu.matmul %263, %264, %cst_68 {dimension_numbers = #tpu.dot_dimension_numbers<[1], [0], [0], [1], [0, 0, 1, 1], [], []>} : vector<12x12xbf16>, vector<12x16xbf16>, vector<12x16xf32> -> vector<12x16xf32>
    %266 = tpu.concatenate %41, %73, %105, %137, %169, %201, %233, %265 in 1 : vector<12x16xf32>, vector<12x16xf32>, vector<12x16xf32>, vector<12x16xf32>, vector<12x16xf32>, vector<12x16xf32>, vector<12x16xf32>, vector<12x16xf32> -> vector<12x128xf32>
    %c0_69 = arith.constant 0 : index
    %c0_70 = arith.constant 0 : index
    %c0_71 = arith.constant 0 : index
    %267 = vector.load %arg6[%c0_69, %c0_70, %c0_71] : memref<1x12x128xf32, #tpu.memory_space<vmem>>, vector<1x12x128xf32>
    %268 = vector.shape_cast %267 : vector<1x12x128xf32> to vector<12x128xf32>
    %269 = vector.shape_cast %266 : vector<12x128xf32> to vector<1x12x128xf32>
    tpu.vector_store %arg6[%c0_69, %c0_70, %c0_71], %269 {strides = array<i32>} : memref<1x12x128xf32, #tpu.memory_space<vmem>>, vector<1x12x128xf32>,
    return
  }
  func.func @transform_0(%arg0: i32) -> (i32, i32, i32) {
    %c0_i32 = arith.constant 0 : i32
    %c1_i32 = arith.constant 1 : i32
    %c0_i32_0 = arith.constant 0 : i32
    return %arg0, %c0_i32, %c1_i32 : i32, i32, i32
  }
  func.func @transform_1(%arg0: i32) -> (i32, i32, i32) {
    %c0_i32 = arith.constant 0 : i32
    %c0_i32_0 = arith.constant 0 : i32
    %c0_i32_1 = arith.constant 0 : i32
    return %arg0, %c0_i32, %c0_i32_0 : i32, i32, i32
  }
  func.func @transform_2(%arg0: i32) -> (i32, i32, i32) {
    %c0_i32 = arith.constant 0 : i32
    %c2_i32 = arith.constant 2 : i32
    %c0_i32_0 = arith.constant 0 : i32
    return %arg0, %c0_i32, %c2_i32 : i32, i32, i32
  }
  func.func @transform_3(%arg0: i32) -> (i32, i32, i32) {
    %c0_i32 = arith.constant 0 : i32
    %c0_i32_0 = arith.constant 0 : i32
    %c0_i32_1 = arith.constant 0 : i32
    return %arg0, %c0_i32, %c0_i32_0 : i32, i32, i32
  }
  func.func @transform_4(%arg0: i32) -> (i32, i32, i32) {
    %c0_i32 = arith.constant 0 : i32
    %c0_i32_0 = arith.constant 0 : i32
    %c0_i32_1 = arith.constant 0 : i32
    return %arg0, %c0_i32, %c0_i32_0 : i32, i32, i32
  }
  func.func @transform_5(%arg0: i32) -> (i32, i32, i32) {
    %c0_i32 = arith.constant 0 : i32
    %c0_i32_0 = arith.constant 0 : i32
    %c0_i32_1 = arith.constant 0 : i32
    return %arg0, %c0_i32, %c0_i32_0 : i32, i32, i32
  }
}

module attributes {stable_mosaic.version = 11 : i64} {
  func.func @_linear_kernel(%arg0: i32, %arg1: memref<2x128xf32, #tpu.memory_space<vmem>>, %arg2: memref<128x128xbf16, #tpu.memory_space<vmem>>, %arg3: memref<1x128xf32, #tpu.memory_space<vmem>>, %arg4: memref<2x128xf32, #tpu.memory_space<vmem>>) attributes {dimension_semantics = [#tpu.dimension_semantics<parallel>], iteration_bounds = array<i64: 1>, scalar_prefetch = 0 : i64, scratch_operands = 0 : i64, tpu.core_type = #tpu.core_type<tc>, window_params = [{transform_indices = @transform_0, window_bounds = array<i64: 2, 128>}, {pipeline_mode = #tpu.pipeline_mode<synchronous>, transform_indices = @transform_1, window_bounds = array<i64: 128, 128>}, {pipeline_mode = #tpu.pipeline_mode<synchronous>, transform_indices = @transform_2, window_bounds = array<i64: 1, 128>}, {transform_indices = @transform_3, window_bounds = array<i64: 2, 128>}]} {
    %c0 = arith.constant 0 : index
    %c0_0 = arith.constant 0 : index
    %0 = vector.load %arg1[%c0, %c0_0] : memref<2x128xf32, #tpu.memory_space<vmem>>, vector<2x128xf32>
    %cst = arith.constant 0.000000e+00 : f32
    %1 = vector.broadcast %cst : f32 to vector<2x128xf32>
    %2 = arith.maximumf %0, %1 : vector<2x128xf32>
    %3 = arith.truncf %2 : vector<2x128xf32> to vector<2x128xbf16>
    %c0_1 = arith.constant 0 : index
    %c0_2 = arith.constant 0 : index
    %4 = vector.load %arg2[%c0_1, %c0_2] : memref<128x128xbf16, #tpu.memory_space<vmem>>, vector<128x128xbf16>
    %cst_3 = arith.constant dense<0.000000e+00> : vector<2x128xf32>
    %5 = tpu.matmul %3, %4, %cst_3 {dimension_numbers = #tpu.dot_dimension_numbers<[1], [0], [0], [1], [0, 0, 1, 1], [], []>} : vector<2x128xbf16>, vector<128x128xbf16>, vector<2x128xf32> -> vector<2x128xf32>
    %c0_4 = arith.constant 0 : index
    %c0_5 = arith.constant 0 : index
    %6 = vector.load %arg3[%c0_4, %c0_5] : memref<1x128xf32, #tpu.memory_space<vmem>>, vector<1x128xf32>
    %7 = vector.broadcast %6 : vector<1x128xf32> to vector<2x128xf32>
    %8 = arith.addf %5, %7 : vector<2x128xf32>
    %c0_6 = arith.constant 0 : index
    %c0_7 = arith.constant 0 : index
    %9 = vector.load %arg4[%c0_6, %c0_7] : memref<2x128xf32, #tpu.memory_space<vmem>>, vector<2x128xf32>
    tpu.vector_store %arg4[%c0_6, %c0_7], %8 {strides = array<i32>} : memref<2x128xf32, #tpu.memory_space<vmem>>, vector<2x128xf32>,
    return
  }
  func.func @transform_0(%arg0: i32) -> (i32, i32) {
    %c0_i32 = arith.constant 0 : i32
    %c0_i32_0 = arith.constant 0 : i32
    return %arg0, %c0_i32 : i32, i32
  }
  func.func @transform_1(%arg0: i32) -> (i32, i32) {
    %c0_i32 = arith.constant 0 : i32
    %c0_i32_0 = arith.constant 0 : i32
    %c0_i32_1 = arith.constant 0 : i32
    return %c0_i32, %c0_i32_0 : i32, i32
  }
  func.func @transform_2(%arg0: i32) -> (i32, i32) {
    %c0_i32 = arith.constant 0 : i32
    %c0_i32_0 = arith.constant 0 : i32
    %c0_i32_1 = arith.constant 0 : i32
    return %c0_i32, %c0_i32_0 : i32, i32
  }
  func.func @transform_3(%arg0: i32) -> (i32, i32) {
    %c0_i32 = arith.constant 0 : i32
    %c0_i32_0 = arith.constant 0 : i32
    return %arg0, %c0_i32 : i32, i32
  }
}

module attributes {stable_mosaic.version = 11 : i64} {
  func.func @_linear_kernel(%arg0: i32, %arg1: memref<16x128xf32, #tpu.memory_space<vmem>>, %arg2: memref<128x384xbf16, #tpu.memory_space<vmem>>, %arg3: memref<1x384xf32, #tpu.memory_space<vmem>>, %arg4: memref<16x1xf32, #tpu.memory_space<vmem>>, %arg5: memref<16x384xf32, #tpu.memory_space<vmem>>) attributes {dimension_semantics = [#tpu.dimension_semantics<parallel>], iteration_bounds = array<i64: 1>, scalar_prefetch = 0 : i64, scratch_operands = 0 : i64, tpu.core_type = #tpu.core_type<tc>, window_params = [{transform_indices = @transform_0, window_bounds = array<i64: 16, 128>}, {pipeline_mode = #tpu.pipeline_mode<synchronous>, transform_indices = @transform_1, window_bounds = array<i64: 128, 384>}, {pipeline_mode = #tpu.pipeline_mode<synchronous>, transform_indices = @transform_2, window_bounds = array<i64: 1, 384>}, {transform_indices = @transform_3, window_bounds = array<i64: 16, 1>}, {transform_indices = @transform_4, window_bounds = array<i64: 16, 384>}]} {
    %c0 = arith.constant 0 : index
    %c0_0 = arith.constant 0 : index
    %0 = vector.load %arg1[%c0, %c0_0] : memref<16x128xf32, #tpu.memory_space<vmem>>, vector<16x128xf32>
    %cst = arith.constant 0.000000e+00 : f32
    %1 = vector.broadcast %cst : f32 to vector<16x128xf32>
    %2 = arith.maximumf %0, %1 : vector<16x128xf32>
    %3 = arith.truncf %2 : vector<16x128xf32> to vector<16x128xbf16>
    %c0_1 = arith.constant 0 : index
    %c0_2 = arith.constant 0 : index
    %4 = vector.load %arg2[%c0_1, %c0_2] : memref<128x384xbf16, #tpu.memory_space<vmem>>, vector<128x384xbf16>
    %cst_3 = arith.constant dense<0.000000e+00> : vector<16x384xf32>
    %5 = tpu.matmul %3, %4, %cst_3 {dimension_numbers = #tpu.dot_dimension_numbers<[1], [0], [0], [1], [0, 0, 1, 1], [], []>} : vector<16x128xbf16>, vector<128x384xbf16>, vector<16x384xf32> -> vector<16x384xf32>
    %c0_4 = arith.constant 0 : index
    %c0_5 = arith.constant 0 : index
    %6 = vector.load %arg3[%c0_4, %c0_5] : memref<1x384xf32, #tpu.memory_space<vmem>>, vector<1x384xf32>
    %7 = vector.broadcast %6 : vector<1x384xf32> to vector<16x384xf32>
    %8 = arith.addf %5, %7 : vector<16x384xf32>
    %c0_6 = arith.constant 0 : index
    %c0_7 = arith.constant 0 : index
    %9 = vector.load %arg4[%c0_6, %c0_7] : memref<16x1xf32, #tpu.memory_space<vmem>>, vector<16x1xf32>
    %10 = vector.broadcast %9 : vector<16x1xf32> to vector<16x384xf32>
    %11 = arith.mulf %8, %10 : vector<16x384xf32>
    %c0_8 = arith.constant 0 : index
    %c0_9 = arith.constant 0 : index
    %12 = vector.load %arg5[%c0_8, %c0_9] : memref<16x384xf32, #tpu.memory_space<vmem>>, vector<16x384xf32>
    tpu.vector_store %arg5[%c0_8, %c0_9], %11 {strides = array<i32>} : memref<16x384xf32, #tpu.memory_space<vmem>>, vector<16x384xf32>,
    return
  }
  func.func @transform_0(%arg0: i32) -> (i32, i32) {
    %c0_i32 = arith.constant 0 : i32
    %c0_i32_0 = arith.constant 0 : i32
    return %arg0, %c0_i32 : i32, i32
  }
  func.func @transform_1(%arg0: i32) -> (i32, i32) {
    %c0_i32 = arith.constant 0 : i32
    %c0_i32_0 = arith.constant 0 : i32
    %c0_i32_1 = arith.constant 0 : i32
    return %c0_i32, %c0_i32_0 : i32, i32
  }
  func.func @transform_2(%arg0: i32) -> (i32, i32) {
    %c0_i32 = arith.constant 0 : i32
    %c0_i32_0 = arith.constant 0 : i32
    %c0_i32_1 = arith.constant 0 : i32
    return %c0_i32, %c0_i32_0 : i32, i32
  }
  func.func @transform_3(%arg0: i32) -> (i32, i32) {
    %c0_i32 = arith.constant 0 : i32
    %c0_i32_0 = arith.constant 0 : i32
    return %arg0, %c0_i32 : i32, i32
  }
  func.func @transform_4(%arg0: i32) -> (i32, i32) {
    %c0_i32 = arith.constant 0 : i32
    %c0_i32_0 = arith.constant 0 : i32
    return %arg0, %c0_i32 : i32, i32
  }
}

module attributes {stable_mosaic.version = 11 : i64} {
  func.func @_mha_kernel(%arg0: i32, %arg1: memref<1x8x128xf32, #tpu.memory_space<vmem>>, %arg2: memref<1x8x128xf32, #tpu.memory_space<vmem>>, %arg3: memref<1x8x128xf32, #tpu.memory_space<vmem>>, %arg4: memref<1x1x8xf32, #tpu.memory_space<vmem>>, %arg5: memref<1x1x128xf32, #tpu.memory_space<vmem>>, %arg6: memref<1x8x128xf32, #tpu.memory_space<vmem>>) attributes {dimension_semantics = [#tpu.dimension_semantics<parallel>], iteration_bounds = array<i64: 2>, scalar_prefetch = 0 : i64, scratch_operands = 0 : i64, tpu.core_type = #tpu.core_type<tc>, window_params = [{transform_indices = @transform_0, window_bounds = array<i64: 1, 8, 128>}, {transform_indices = @transform_1, window_bounds = array<i64: 1, 8, 128>}, {transform_indices = @transform_2, window_bounds = array<i64: 1, 8, 128>}, {transform_indices = @transform_3, window_bounds = array<i64: 1, 1, 8>}, {transform_indices = @transform_4, window_bounds = array<i64: 1, 1, 128>}, {transform_indices = @transform_5, window_bounds = array<i64: 1, 8, 128>}]} {
    %c0 = arith.constant 0 : index
    %c0_0 = arith.constant 0 : index
    %c0_1 = arith.constant 0 : index
    %0 = vector.load %arg1[%c0, %c0_0, %c0_1] : memref<1x8x128xf32, #tpu.memory_space<vmem>>, vector<1x8x128xf32>
    %1 = vector.shape_cast %0 : vector<1x8x128xf32> to vector<8x128xf32>
    %c0_2 = arith.constant 0 : index
    %c0_3 = arith.constant 0 : index
    %c0_4 = arith.constant 0 : index
    %2 = vector.load %arg2[%c0_2, %c0_3, %c0_4] : memref<1x8x128xf32, #tpu.memory_space<vmem>>, vector<1x8x128xf32>
    %3 = vector.shape_cast %2 : vector<1x8x128xf32> to vector<8x128xf32>
    %c0_5 = arith.constant 0 : index
    %c0_6 = arith.constant 0 : index
    %c0_7 = arith.constant 0 : index
    %4 = vector.load %arg3[%c0_5, %c0_6, %c0_7] : memref<1x8x128xf32, #tpu.memory_space<vmem>>, vector<1x8x128xf32>
    %5 = vector.shape_cast %4 : vector<1x8x128xf32> to vector<8x128xf32>
    %c0_8 = arith.constant 0 : index
    %c0_9 = arith.constant 0 : index
    %c0_10 = arith.constant 0 : index
    %6 = vector.load %arg4[%c0_8, %c0_9, %c0_10] : memref<1x1x8xf32, #tpu.memory_space<vmem>>, vector<1x1x8xf32>
    %7 = vector.shape_cast %6 : vector<1x1x8xf32> to vector<1x8xf32>
    %c0_11 = arith.constant 0 : index
    %c0_12 = arith.constant 0 : index
    %c0_13 = arith.constant 0 : index
    %8 = vector.load %arg5[%c0_11, %c0_12, %c0_13] : memref<1x1x128xf32, #tpu.memory_space<vmem>>, vector<1x1x128xf32>
    %9 = vector.shape_cast %8 : vector<1x1x128xf32> to vector<1x128xf32>
    %10 = vector.extract_strided_slice %1 {offsets = [0, 0], sizes = [8, 16], strides = [1, 1]} : vector<8x128xf32> to vector<8x16xf32>
    %11 = vector.extract_strided_slice %3 {offsets = [0, 0], sizes = [8, 16], strides = [1, 1]} : vector<8x128xf32> to vector<8x16xf32>
    %12 = vector.extract_strided_slice %5 {offsets = [0, 0], sizes = [8, 16], strides = [1, 1]} : vector<8x128xf32> to vector<8x16xf32>
    %13 = vector.extract_strided_slice %9 {offsets = [0, 0], sizes = [1, 16], strides = [1, 1]} : vector<1x128xf32> to vector<1x16xf32>
    %14 = vector.broadcast %13 : vector<1x16xf32> to vector<8x16xf32>
    %15 = arith.mulf %10, %14 : vector<8x16xf32>
    %16 = vector.broadcast %13 : vector<1x16xf32> to vector<8x16xf32>
    %17 = arith.mulf %11, %16 : vector<8x16xf32>
    %cst = arith.constant 2.500000e-01 : f32
    %18 = vector.broadcast %cst : f32 to vector<8x16xf32>
    %19 = arith.mulf %15, %18 : vector<8x16xf32>
    %20 = arith.truncf %19 : vector<8x16xf32> to vector<8x16xbf16>
    %21 = arith.truncf %17 : vector<8x16xf32> to vector<8x16xbf16>
    %cst_14 = arith.constant dense<0.000000e+00> : vector<8x8xf32>
    %22 = tpu.matmul %20, %21, %cst_14 {dimension_numbers = #tpu.dot_dimension_numbers<[1], [1], [0], [0], [0, 0, 1, 0], [], []>} : vector<8x16xbf16>, vector<8x16xbf16>, vector<8x8xf32> -> vector<8x8xf32>
    %cst_15 = arith.constant 0.000000e+00 : f32
    %23 = vector.broadcast %cst_15 : f32 to vector<1x8xf32>
    %24 = arith.cmpf oeq, %7, %23 : vector<1x8xf32>
    %cst_16 = arith.constant -1.000000e+09 : f32
    %25 = vector.shape_cast %24 : vector<1x8xi1> to vector<1x8xi1>
    %26 = vector.broadcast %25 : vector<1x8xi1> to vector<8x8xi1>
    %27 = vector.broadcast %cst_16 : f32 to vector<8x8xf32>
    %28 = arith.select %26, %27, %22 : vector<8x8xi1>, vector<8x8xf32>
    %cst_17 = arith.constant dense<0xFF800000> : vector<8xf32>
    %29 = vector.multi_reduction <maximumf>, %28, %cst_17 [1] : vector<8x8xf32> to vector<8xf32>
    %30 = vector.shape_cast %29 : vector<8xf32> to vector<8x1xf32>
    %31 = vector.broadcast %30 : vector<8x1xf32> to vector<8x8xf32>
    %32 = arith.subf %28, %31 : vector<8x8xf32>
    %33 = math.exp %32 : vector<8x8xf32>
    %cst_18 = arith.constant dense<0.000000e+00> : vector<8xf32>
    %34 = vector.multi_reduction <add>, %33, %cst_18 [1] : vector<8x8xf32> to vector<8xf32>
    %35 = vector.shape_cast %34 : vector<8xf32> to vector<8x1xf32>
    %36 = tpu.reciprocal %35 {approx = true} : vector<8x1xf32> -> vector<8x1xf32>
    %37 = vector.broadcast %36 : vector<8x1xf32> to vector<8x8xf32>
    %38 = arith.mulf %33, %37 : vector<8x8xf32>
    %39 = arith.truncf %38 : vector<8x8xf32> to vector<8x8xbf16>
    %40 = arith.truncf %12 : vector<8x16xf32> to vector<8x16xbf16>
    %cst_19 = arith.constant dense<0.000000e+00> : vector<8x16xf32>
    %41 = tpu.matmul %39, %40, %cst_19 {dimension_numbers = #tpu.dot_dimension_numbers<[1], [0], [0], [1], [0, 0, 1, 1], [], []>} : vector<8x8xbf16>, vector<8x16xbf16>, vector<8x16xf32> -> vector<8x16xf32>
    %42 = vector.extract_strided_slice %1 {offsets = [0, 16], sizes = [8, 16], strides = [1, 1]} : vector<8x128xf32> to vector<8x16xf32>
    %43 = vector.extract_strided_slice %3 {offsets = [0, 16], sizes = [8, 16], strides = [1, 1]} : vector<8x128xf32> to vector<8x16xf32>
    %44 = vector.extract_strided_slice %5 {offsets = [0, 16], sizes = [8, 16], strides = [1, 1]} : vector<8x128xf32> to vector<8x16xf32>
    %45 = vector.extract_strided_slice %9 {offsets = [0, 16], sizes = [1, 16], strides = [1, 1]} : vector<1x128xf32> to vector<1x16xf32>
    %46 = vector.broadcast %45 : vector<1x16xf32> to vector<8x16xf32>
    %47 = arith.mulf %42, %46 : vector<8x16xf32>
    %48 = vector.broadcast %45 : vector<1x16xf32> to vector<8x16xf32>
    %49 = arith.mulf %43, %48 : vector<8x16xf32>
    %cst_20 = arith.constant 2.500000e-01 : f32
    %50 = vector.broadcast %cst_20 : f32 to vector<8x16xf32>
    %51 = arith.mulf %47, %50 : vector<8x16xf32>
    %52 = arith.truncf %51 : vector<8x16xf32> to vector<8x16xbf16>
    %53 = arith.truncf %49 : vector<8x16xf32> to vector<8x16xbf16>
    %cst_21 = arith.constant dense<0.000000e+00> : vector<8x8xf32>
    %54 = tpu.matmul %52, %53, %cst_21 {dimension_numbers = #tpu.dot_dimension_numbers<[1], [1], [0], [0], [0, 0, 1, 0], [], []>} : vector<8x16xbf16>, vector<8x16xbf16>, vector<8x8xf32> -> vector<8x8xf32>
    %cst_22 = arith.constant 0.000000e+00 : f32
    %55 = vector.broadcast %cst_22 : f32 to vector<1x8xf32>
    %56 = arith.cmpf oeq, %7, %55 : vector<1x8xf32>
    %cst_23 = arith.constant -1.000000e+09 : f32
    %57 = vector.shape_cast %56 : vector<1x8xi1> to vector<1x8xi1>
    %58 = vector.broadcast %57 : vector<1x8xi1> to vector<8x8xi1>
    %59 = vector.broadcast %cst_23 : f32 to vector<8x8xf32>
    %60 = arith.select %58, %59, %54 : vector<8x8xi1>, vector<8x8xf32>
    %cst_24 = arith.constant dense<0xFF800000> : vector<8xf32>
    %61 = vector.multi_reduction <maximumf>, %60, %cst_24 [1] : vector<8x8xf32> to vector<8xf32>
    %62 = vector.shape_cast %61 : vector<8xf32> to vector<8x1xf32>
    %63 = vector.broadcast %62 : vector<8x1xf32> to vector<8x8xf32>
    %64 = arith.subf %60, %63 : vector<8x8xf32>
    %65 = math.exp %64 : vector<8x8xf32>
    %cst_25 = arith.constant dense<0.000000e+00> : vector<8xf32>
    %66 = vector.multi_reduction <add>, %65, %cst_25 [1] : vector<8x8xf32> to vector<8xf32>
    %67 = vector.shape_cast %66 : vector<8xf32> to vector<8x1xf32>
    %68 = tpu.reciprocal %67 {approx = true} : vector<8x1xf32> -> vector<8x1xf32>
    %69 = vector.broadcast %68 : vector<8x1xf32> to vector<8x8xf32>
    %70 = arith.mulf %65, %69 : vector<8x8xf32>
    %71 = arith.truncf %70 : vector<8x8xf32> to vector<8x8xbf16>
    %72 = arith.truncf %44 : vector<8x16xf32> to vector<8x16xbf16>
    %cst_26 = arith.constant dense<0.000000e+00> : vector<8x16xf32>
    %73 = tpu.matmul %71, %72, %cst_26 {dimension_numbers = #tpu.dot_dimension_numbers<[1], [0], [0], [1], [0, 0, 1, 1], [], []>} : vector<8x8xbf16>, vector<8x16xbf16>, vector<8x16xf32> -> vector<8x16xf32>
    %74 = vector.extract_strided_slice %1 {offsets = [0, 32], sizes = [8, 16], strides = [1, 1]} : vector<8x128xf32> to vector<8x16xf32>
    %75 = vector.extract_strided_slice %3 {offsets = [0, 32], sizes = [8, 16], strides = [1, 1]} : vector<8x128xf32> to vector<8x16xf32>
    %76 = vector.extract_strided_slice %5 {offsets = [0, 32], sizes = [8, 16], strides = [1, 1]} : vector<8x128xf32> to vector<8x16xf32>
    %77 = vector.extract_strided_slice %9 {offsets = [0, 32], sizes = [1, 16], strides = [1, 1]} : vector<1x128xf32> to vector<1x16xf32>
    %78 = vector.broadcast %77 : vector<1x16xf32> to vector<8x16xf32>
    %79 = arith.mulf %74, %78 : vector<8x16xf32>
    %80 = vector.broadcast %77 : vector<1x16xf32> to vector<8x16xf32>
    %81 = arith.mulf %75, %80 : vector<8x16xf32>
    %cst_27 = arith.constant 2.500000e-01 : f32
    %82 = vector.broadcast %cst_27 : f32 to vector<8x16xf32>
    %83 = arith.mulf %79, %82 : vector<8x16xf32>
    %84 = arith.truncf %83 : vector<8x16xf32> to vector<8x16xbf16>
    %85 = arith.truncf %81 : vector<8x16xf32> to vector<8x16xbf16>
    %cst_28 = arith.constant dense<0.000000e+00> : vector<8x8xf32>
    %86 = tpu.matmul %84, %85, %cst_28 {dimension_numbers = #tpu.dot_dimension_numbers<[1], [1], [0], [0], [0, 0, 1, 0], [], []>} : vector<8x16xbf16>, vector<8x16xbf16>, vector<8x8xf32> -> vector<8x8xf32>
    %cst_29 = arith.constant 0.000000e+00 : f32
    %87 = vector.broadcast %cst_29 : f32 to vector<1x8xf32>
    %88 = arith.cmpf oeq, %7, %87 : vector<1x8xf32>
    %cst_30 = arith.constant -1.000000e+09 : f32
    %89 = vector.shape_cast %88 : vector<1x8xi1> to vector<1x8xi1>
    %90 = vector.broadcast %89 : vector<1x8xi1> to vector<8x8xi1>
    %91 = vector.broadcast %cst_30 : f32 to vector<8x8xf32>
    %92 = arith.select %90, %91, %86 : vector<8x8xi1>, vector<8x8xf32>
    %cst_31 = arith.constant dense<0xFF800000> : vector<8xf32>
    %93 = vector.multi_reduction <maximumf>, %92, %cst_31 [1] : vector<8x8xf32> to vector<8xf32>
    %94 = vector.shape_cast %93 : vector<8xf32> to vector<8x1xf32>
    %95 = vector.broadcast %94 : vector<8x1xf32> to vector<8x8xf32>
    %96 = arith.subf %92, %95 : vector<8x8xf32>
    %97 = math.exp %96 : vector<8x8xf32>
    %cst_32 = arith.constant dense<0.000000e+00> : vector<8xf32>
    %98 = vector.multi_reduction <add>, %97, %cst_32 [1] : vector<8x8xf32> to vector<8xf32>
    %99 = vector.shape_cast %98 : vector<8xf32> to vector<8x1xf32>
    %100 = tpu.reciprocal %99 {approx = true} : vector<8x1xf32> -> vector<8x1xf32>
    %101 = vector.broadcast %100 : vector<8x1xf32> to vector<8x8xf32>
    %102 = arith.mulf %97, %101 : vector<8x8xf32>
    %103 = arith.truncf %102 : vector<8x8xf32> to vector<8x8xbf16>
    %104 = arith.truncf %76 : vector<8x16xf32> to vector<8x16xbf16>
    %cst_33 = arith.constant dense<0.000000e+00> : vector<8x16xf32>
    %105 = tpu.matmul %103, %104, %cst_33 {dimension_numbers = #tpu.dot_dimension_numbers<[1], [0], [0], [1], [0, 0, 1, 1], [], []>} : vector<8x8xbf16>, vector<8x16xbf16>, vector<8x16xf32> -> vector<8x16xf32>
    %106 = vector.extract_strided_slice %1 {offsets = [0, 48], sizes = [8, 16], strides = [1, 1]} : vector<8x128xf32> to vector<8x16xf32>
    %107 = vector.extract_strided_slice %3 {offsets = [0, 48], sizes = [8, 16], strides = [1, 1]} : vector<8x128xf32> to vector<8x16xf32>
    %108 = vector.extract_strided_slice %5 {offsets = [0, 48], sizes = [8, 16], strides = [1, 1]} : vector<8x128xf32> to vector<8x16xf32>
    %109 = vector.extract_strided_slice %9 {offsets = [0, 48], sizes = [1, 16], strides = [1, 1]} : vector<1x128xf32> to vector<1x16xf32>
    %110 = vector.broadcast %109 : vector<1x16xf32> to vector<8x16xf32>
    %111 = arith.mulf %106, %110 : vector<8x16xf32>
    %112 = vector.broadcast %109 : vector<1x16xf32> to vector<8x16xf32>
    %113 = arith.mulf %107, %112 : vector<8x16xf32>
    %cst_34 = arith.constant 2.500000e-01 : f32
    %114 = vector.broadcast %cst_34 : f32 to vector<8x16xf32>
    %115 = arith.mulf %111, %114 : vector<8x16xf32>
    %116 = arith.truncf %115 : vector<8x16xf32> to vector<8x16xbf16>
    %117 = arith.truncf %113 : vector<8x16xf32> to vector<8x16xbf16>
    %cst_35 = arith.constant dense<0.000000e+00> : vector<8x8xf32>
    %118 = tpu.matmul %116, %117, %cst_35 {dimension_numbers = #tpu.dot_dimension_numbers<[1], [1], [0], [0], [0, 0, 1, 0], [], []>} : vector<8x16xbf16>, vector<8x16xbf16>, vector<8x8xf32> -> vector<8x8xf32>
    %cst_36 = arith.constant 0.000000e+00 : f32
    %119 = vector.broadcast %cst_36 : f32 to vector<1x8xf32>
    %120 = arith.cmpf oeq, %7, %119 : vector<1x8xf32>
    %cst_37 = arith.constant -1.000000e+09 : f32
    %121 = vector.shape_cast %120 : vector<1x8xi1> to vector<1x8xi1>
    %122 = vector.broadcast %121 : vector<1x8xi1> to vector<8x8xi1>
    %123 = vector.broadcast %cst_37 : f32 to vector<8x8xf32>
    %124 = arith.select %122, %123, %118 : vector<8x8xi1>, vector<8x8xf32>
    %cst_38 = arith.constant dense<0xFF800000> : vector<8xf32>
    %125 = vector.multi_reduction <maximumf>, %124, %cst_38 [1] : vector<8x8xf32> to vector<8xf32>
    %126 = vector.shape_cast %125 : vector<8xf32> to vector<8x1xf32>
    %127 = vector.broadcast %126 : vector<8x1xf32> to vector<8x8xf32>
    %128 = arith.subf %124, %127 : vector<8x8xf32>
    %129 = math.exp %128 : vector<8x8xf32>
    %cst_39 = arith.constant dense<0.000000e+00> : vector<8xf32>
    %130 = vector.multi_reduction <add>, %129, %cst_39 [1] : vector<8x8xf32> to vector<8xf32>
    %131 = vector.shape_cast %130 : vector<8xf32> to vector<8x1xf32>
    %132 = tpu.reciprocal %131 {approx = true} : vector<8x1xf32> -> vector<8x1xf32>
    %133 = vector.broadcast %132 : vector<8x1xf32> to vector<8x8xf32>
    %134 = arith.mulf %129, %133 : vector<8x8xf32>
    %135 = arith.truncf %134 : vector<8x8xf32> to vector<8x8xbf16>
    %136 = arith.truncf %108 : vector<8x16xf32> to vector<8x16xbf16>
    %cst_40 = arith.constant dense<0.000000e+00> : vector<8x16xf32>
    %137 = tpu.matmul %135, %136, %cst_40 {dimension_numbers = #tpu.dot_dimension_numbers<[1], [0], [0], [1], [0, 0, 1, 1], [], []>} : vector<8x8xbf16>, vector<8x16xbf16>, vector<8x16xf32> -> vector<8x16xf32>
    %138 = vector.extract_strided_slice %1 {offsets = [0, 64], sizes = [8, 16], strides = [1, 1]} : vector<8x128xf32> to vector<8x16xf32>
    %139 = vector.extract_strided_slice %3 {offsets = [0, 64], sizes = [8, 16], strides = [1, 1]} : vector<8x128xf32> to vector<8x16xf32>
    %140 = vector.extract_strided_slice %5 {offsets = [0, 64], sizes = [8, 16], strides = [1, 1]} : vector<8x128xf32> to vector<8x16xf32>
    %141 = vector.extract_strided_slice %9 {offsets = [0, 64], sizes = [1, 16], strides = [1, 1]} : vector<1x128xf32> to vector<1x16xf32>
    %142 = vector.broadcast %141 : vector<1x16xf32> to vector<8x16xf32>
    %143 = arith.mulf %138, %142 : vector<8x16xf32>
    %144 = vector.broadcast %141 : vector<1x16xf32> to vector<8x16xf32>
    %145 = arith.mulf %139, %144 : vector<8x16xf32>
    %cst_41 = arith.constant 2.500000e-01 : f32
    %146 = vector.broadcast %cst_41 : f32 to vector<8x16xf32>
    %147 = arith.mulf %143, %146 : vector<8x16xf32>
    %148 = arith.truncf %147 : vector<8x16xf32> to vector<8x16xbf16>
    %149 = arith.truncf %145 : vector<8x16xf32> to vector<8x16xbf16>
    %cst_42 = arith.constant dense<0.000000e+00> : vector<8x8xf32>
    %150 = tpu.matmul %148, %149, %cst_42 {dimension_numbers = #tpu.dot_dimension_numbers<[1], [1], [0], [0], [0, 0, 1, 0], [], []>} : vector<8x16xbf16>, vector<8x16xbf16>, vector<8x8xf32> -> vector<8x8xf32>
    %cst_43 = arith.constant 0.000000e+00 : f32
    %151 = vector.broadcast %cst_43 : f32 to vector<1x8xf32>
    %152 = arith.cmpf oeq, %7, %151 : vector<1x8xf32>
    %cst_44 = arith.constant -1.000000e+09 : f32
    %153 = vector.shape_cast %152 : vector<1x8xi1> to vector<1x8xi1>
    %154 = vector.broadcast %153 : vector<1x8xi1> to vector<8x8xi1>
    %155 = vector.broadcast %cst_44 : f32 to vector<8x8xf32>
    %156 = arith.select %154, %155, %150 : vector<8x8xi1>, vector<8x8xf32>
    %cst_45 = arith.constant dense<0xFF800000> : vector<8xf32>
    %157 = vector.multi_reduction <maximumf>, %156, %cst_45 [1] : vector<8x8xf32> to vector<8xf32>
    %158 = vector.shape_cast %157 : vector<8xf32> to vector<8x1xf32>
    %159 = vector.broadcast %158 : vector<8x1xf32> to vector<8x8xf32>
    %160 = arith.subf %156, %159 : vector<8x8xf32>
    %161 = math.exp %160 : vector<8x8xf32>
    %cst_46 = arith.constant dense<0.000000e+00> : vector<8xf32>
    %162 = vector.multi_reduction <add>, %161, %cst_46 [1] : vector<8x8xf32> to vector<8xf32>
    %163 = vector.shape_cast %162 : vector<8xf32> to vector<8x1xf32>
    %164 = tpu.reciprocal %163 {approx = true} : vector<8x1xf32> -> vector<8x1xf32>
    %165 = vector.broadcast %164 : vector<8x1xf32> to vector<8x8xf32>
    %166 = arith.mulf %161, %165 : vector<8x8xf32>
    %167 = arith.truncf %166 : vector<8x8xf32> to vector<8x8xbf16>
    %168 = arith.truncf %140 : vector<8x16xf32> to vector<8x16xbf16>
    %cst_47 = arith.constant dense<0.000000e+00> : vector<8x16xf32>
    %169 = tpu.matmul %167, %168, %cst_47 {dimension_numbers = #tpu.dot_dimension_numbers<[1], [0], [0], [1], [0, 0, 1, 1], [], []>} : vector<8x8xbf16>, vector<8x16xbf16>, vector<8x16xf32> -> vector<8x16xf32>
    %170 = vector.extract_strided_slice %1 {offsets = [0, 80], sizes = [8, 16], strides = [1, 1]} : vector<8x128xf32> to vector<8x16xf32>
    %171 = vector.extract_strided_slice %3 {offsets = [0, 80], sizes = [8, 16], strides = [1, 1]} : vector<8x128xf32> to vector<8x16xf32>
    %172 = vector.extract_strided_slice %5 {offsets = [0, 80], sizes = [8, 16], strides = [1, 1]} : vector<8x128xf32> to vector<8x16xf32>
    %173 = vector.extract_strided_slice %9 {offsets = [0, 80], sizes = [1, 16], strides = [1, 1]} : vector<1x128xf32> to vector<1x16xf32>
    %174 = vector.broadcast %173 : vector<1x16xf32> to vector<8x16xf32>
    %175 = arith.mulf %170, %174 : vector<8x16xf32>
    %176 = vector.broadcast %173 : vector<1x16xf32> to vector<8x16xf32>
    %177 = arith.mulf %171, %176 : vector<8x16xf32>
    %cst_48 = arith.constant 2.500000e-01 : f32
    %178 = vector.broadcast %cst_48 : f32 to vector<8x16xf32>
    %179 = arith.mulf %175, %178 : vector<8x16xf32>
    %180 = arith.truncf %179 : vector<8x16xf32> to vector<8x16xbf16>
    %181 = arith.truncf %177 : vector<8x16xf32> to vector<8x16xbf16>
    %cst_49 = arith.constant dense<0.000000e+00> : vector<8x8xf32>
    %182 = tpu.matmul %180, %181, %cst_49 {dimension_numbers = #tpu.dot_dimension_numbers<[1], [1], [0], [0], [0, 0, 1, 0], [], []>} : vector<8x16xbf16>, vector<8x16xbf16>, vector<8x8xf32> -> vector<8x8xf32>
    %cst_50 = arith.constant 0.000000e+00 : f32
    %183 = vector.broadcast %cst_50 : f32 to vector<1x8xf32>
    %184 = arith.cmpf oeq, %7, %183 : vector<1x8xf32>
    %cst_51 = arith.constant -1.000000e+09 : f32
    %185 = vector.shape_cast %184 : vector<1x8xi1> to vector<1x8xi1>
    %186 = vector.broadcast %185 : vector<1x8xi1> to vector<8x8xi1>
    %187 = vector.broadcast %cst_51 : f32 to vector<8x8xf32>
    %188 = arith.select %186, %187, %182 : vector<8x8xi1>, vector<8x8xf32>
    %cst_52 = arith.constant dense<0xFF800000> : vector<8xf32>
    %189 = vector.multi_reduction <maximumf>, %188, %cst_52 [1] : vector<8x8xf32> to vector<8xf32>
    %190 = vector.shape_cast %189 : vector<8xf32> to vector<8x1xf32>
    %191 = vector.broadcast %190 : vector<8x1xf32> to vector<8x8xf32>
    %192 = arith.subf %188, %191 : vector<8x8xf32>
    %193 = math.exp %192 : vector<8x8xf32>
    %cst_53 = arith.constant dense<0.000000e+00> : vector<8xf32>
    %194 = vector.multi_reduction <add>, %193, %cst_53 [1] : vector<8x8xf32> to vector<8xf32>
    %195 = vector.shape_cast %194 : vector<8xf32> to vector<8x1xf32>
    %196 = tpu.reciprocal %195 {approx = true} : vector<8x1xf32> -> vector<8x1xf32>
    %197 = vector.broadcast %196 : vector<8x1xf32> to vector<8x8xf32>
    %198 = arith.mulf %193, %197 : vector<8x8xf32>
    %199 = arith.truncf %198 : vector<8x8xf32> to vector<8x8xbf16>
    %200 = arith.truncf %172 : vector<8x16xf32> to vector<8x16xbf16>
    %cst_54 = arith.constant dense<0.000000e+00> : vector<8x16xf32>
    %201 = tpu.matmul %199, %200, %cst_54 {dimension_numbers = #tpu.dot_dimension_numbers<[1], [0], [0], [1], [0, 0, 1, 1], [], []>} : vector<8x8xbf16>, vector<8x16xbf16>, vector<8x16xf32> -> vector<8x16xf32>
    %202 = vector.extract_strided_slice %1 {offsets = [0, 96], sizes = [8, 16], strides = [1, 1]} : vector<8x128xf32> to vector<8x16xf32>
    %203 = vector.extract_strided_slice %3 {offsets = [0, 96], sizes = [8, 16], strides = [1, 1]} : vector<8x128xf32> to vector<8x16xf32>
    %204 = vector.extract_strided_slice %5 {offsets = [0, 96], sizes = [8, 16], strides = [1, 1]} : vector<8x128xf32> to vector<8x16xf32>
    %205 = vector.extract_strided_slice %9 {offsets = [0, 96], sizes = [1, 16], strides = [1, 1]} : vector<1x128xf32> to vector<1x16xf32>
    %206 = vector.broadcast %205 : vector<1x16xf32> to vector<8x16xf32>
    %207 = arith.mulf %202, %206 : vector<8x16xf32>
    %208 = vector.broadcast %205 : vector<1x16xf32> to vector<8x16xf32>
    %209 = arith.mulf %203, %208 : vector<8x16xf32>
    %cst_55 = arith.constant 2.500000e-01 : f32
    %210 = vector.broadcast %cst_55 : f32 to vector<8x16xf32>
    %211 = arith.mulf %207, %210 : vector<8x16xf32>
    %212 = arith.truncf %211 : vector<8x16xf32> to vector<8x16xbf16>
    %213 = arith.truncf %209 : vector<8x16xf32> to vector<8x16xbf16>
    %cst_56 = arith.constant dense<0.000000e+00> : vector<8x8xf32>
    %214 = tpu.matmul %212, %213, %cst_56 {dimension_numbers = #tpu.dot_dimension_numbers<[1], [1], [0], [0], [0, 0, 1, 0], [], []>} : vector<8x16xbf16>, vector<8x16xbf16>, vector<8x8xf32> -> vector<8x8xf32>
    %cst_57 = arith.constant 0.000000e+00 : f32
    %215 = vector.broadcast %cst_57 : f32 to vector<1x8xf32>
    %216 = arith.cmpf oeq, %7, %215 : vector<1x8xf32>
    %cst_58 = arith.constant -1.000000e+09 : f32
    %217 = vector.shape_cast %216 : vector<1x8xi1> to vector<1x8xi1>
    %218 = vector.broadcast %217 : vector<1x8xi1> to vector<8x8xi1>
    %219 = vector.broadcast %cst_58 : f32 to vector<8x8xf32>
    %220 = arith.select %218, %219, %214 : vector<8x8xi1>, vector<8x8xf32>
    %cst_59 = arith.constant dense<0xFF800000> : vector<8xf32>
    %221 = vector.multi_reduction <maximumf>, %220, %cst_59 [1] : vector<8x8xf32> to vector<8xf32>
    %222 = vector.shape_cast %221 : vector<8xf32> to vector<8x1xf32>
    %223 = vector.broadcast %222 : vector<8x1xf32> to vector<8x8xf32>
    %224 = arith.subf %220, %223 : vector<8x8xf32>
    %225 = math.exp %224 : vector<8x8xf32>
    %cst_60 = arith.constant dense<0.000000e+00> : vector<8xf32>
    %226 = vector.multi_reduction <add>, %225, %cst_60 [1] : vector<8x8xf32> to vector<8xf32>
    %227 = vector.shape_cast %226 : vector<8xf32> to vector<8x1xf32>
    %228 = tpu.reciprocal %227 {approx = true} : vector<8x1xf32> -> vector<8x1xf32>
    %229 = vector.broadcast %228 : vector<8x1xf32> to vector<8x8xf32>
    %230 = arith.mulf %225, %229 : vector<8x8xf32>
    %231 = arith.truncf %230 : vector<8x8xf32> to vector<8x8xbf16>
    %232 = arith.truncf %204 : vector<8x16xf32> to vector<8x16xbf16>
    %cst_61 = arith.constant dense<0.000000e+00> : vector<8x16xf32>
    %233 = tpu.matmul %231, %232, %cst_61 {dimension_numbers = #tpu.dot_dimension_numbers<[1], [0], [0], [1], [0, 0, 1, 1], [], []>} : vector<8x8xbf16>, vector<8x16xbf16>, vector<8x16xf32> -> vector<8x16xf32>
    %234 = vector.extract_strided_slice %1 {offsets = [0, 112], sizes = [8, 16], strides = [1, 1]} : vector<8x128xf32> to vector<8x16xf32>
    %235 = vector.extract_strided_slice %3 {offsets = [0, 112], sizes = [8, 16], strides = [1, 1]} : vector<8x128xf32> to vector<8x16xf32>
    %236 = vector.extract_strided_slice %5 {offsets = [0, 112], sizes = [8, 16], strides = [1, 1]} : vector<8x128xf32> to vector<8x16xf32>
    %237 = vector.extract_strided_slice %9 {offsets = [0, 112], sizes = [1, 16], strides = [1, 1]} : vector<1x128xf32> to vector<1x16xf32>
    %238 = vector.broadcast %237 : vector<1x16xf32> to vector<8x16xf32>
    %239 = arith.mulf %234, %238 : vector<8x16xf32>
    %240 = vector.broadcast %237 : vector<1x16xf32> to vector<8x16xf32>
    %241 = arith.mulf %235, %240 : vector<8x16xf32>
    %cst_62 = arith.constant 2.500000e-01 : f32
    %242 = vector.broadcast %cst_62 : f32 to vector<8x16xf32>
    %243 = arith.mulf %239, %242 : vector<8x16xf32>
    %244 = arith.truncf %243 : vector<8x16xf32> to vector<8x16xbf16>
    %245 = arith.truncf %241 : vector<8x16xf32> to vector<8x16xbf16>
    %cst_63 = arith.constant dense<0.000000e+00> : vector<8x8xf32>
    %246 = tpu.matmul %244, %245, %cst_63 {dimension_numbers = #tpu.dot_dimension_numbers<[1], [1], [0], [0], [0, 0, 1, 0], [], []>} : vector<8x16xbf16>, vector<8x16xbf16>, vector<8x8xf32> -> vector<8x8xf32>
    %cst_64 = arith.constant 0.000000e+00 : f32
    %247 = vector.broadcast %cst_64 : f32 to vector<1x8xf32>
    %248 = arith.cmpf oeq, %7, %247 : vector<1x8xf32>
    %cst_65 = arith.constant -1.000000e+09 : f32
    %249 = vector.shape_cast %248 : vector<1x8xi1> to vector<1x8xi1>
    %250 = vector.broadcast %249 : vector<1x8xi1> to vector<8x8xi1>
    %251 = vector.broadcast %cst_65 : f32 to vector<8x8xf32>
    %252 = arith.select %250, %251, %246 : vector<8x8xi1>, vector<8x8xf32>
    %cst_66 = arith.constant dense<0xFF800000> : vector<8xf32>
    %253 = vector.multi_reduction <maximumf>, %252, %cst_66 [1] : vector<8x8xf32> to vector<8xf32>
    %254 = vector.shape_cast %253 : vector<8xf32> to vector<8x1xf32>
    %255 = vector.broadcast %254 : vector<8x1xf32> to vector<8x8xf32>
    %256 = arith.subf %252, %255 : vector<8x8xf32>
    %257 = math.exp %256 : vector<8x8xf32>
    %cst_67 = arith.constant dense<0.000000e+00> : vector<8xf32>
    %258 = vector.multi_reduction <add>, %257, %cst_67 [1] : vector<8x8xf32> to vector<8xf32>
    %259 = vector.shape_cast %258 : vector<8xf32> to vector<8x1xf32>
    %260 = tpu.reciprocal %259 {approx = true} : vector<8x1xf32> -> vector<8x1xf32>
    %261 = vector.broadcast %260 : vector<8x1xf32> to vector<8x8xf32>
    %262 = arith.mulf %257, %261 : vector<8x8xf32>
    %263 = arith.truncf %262 : vector<8x8xf32> to vector<8x8xbf16>
    %264 = arith.truncf %236 : vector<8x16xf32> to vector<8x16xbf16>
    %cst_68 = arith.constant dense<0.000000e+00> : vector<8x16xf32>
    %265 = tpu.matmul %263, %264, %cst_68 {dimension_numbers = #tpu.dot_dimension_numbers<[1], [0], [0], [1], [0, 0, 1, 1], [], []>} : vector<8x8xbf16>, vector<8x16xbf16>, vector<8x16xf32> -> vector<8x16xf32>
    %266 = tpu.concatenate %41, %73, %105, %137, %169, %201, %233, %265 in 1 : vector<8x16xf32>, vector<8x16xf32>, vector<8x16xf32>, vector<8x16xf32>, vector<8x16xf32>, vector<8x16xf32>, vector<8x16xf32>, vector<8x16xf32> -> vector<8x128xf32>
    %c0_69 = arith.constant 0 : index
    %c0_70 = arith.constant 0 : index
    %c0_71 = arith.constant 0 : index
    %267 = vector.load %arg6[%c0_69, %c0_70, %c0_71] : memref<1x8x128xf32, #tpu.memory_space<vmem>>, vector<1x8x128xf32>
    %268 = vector.shape_cast %267 : vector<1x8x128xf32> to vector<8x128xf32>
    %269 = vector.shape_cast %266 : vector<8x128xf32> to vector<1x8x128xf32>
    tpu.vector_store %arg6[%c0_69, %c0_70, %c0_71], %269 {strides = array<i32>} : memref<1x8x128xf32, #tpu.memory_space<vmem>>, vector<1x8x128xf32>,
    return
  }
  func.func @transform_0(%arg0: i32) -> (i32, i32, i32) {
    %c0_i32 = arith.constant 0 : i32
    %c1_i32 = arith.constant 1 : i32
    %c0_i32_0 = arith.constant 0 : i32
    return %arg0, %c0_i32, %c1_i32 : i32, i32, i32
  }
  func.func @transform_1(%arg0: i32) -> (i32, i32, i32) {
    %c0_i32 = arith.constant 0 : i32
    %c0_i32_0 = arith.constant 0 : i32
    %c0_i32_1 = arith.constant 0 : i32
    return %arg0, %c0_i32, %c0_i32_0 : i32, i32, i32
  }
  func.func @transform_2(%arg0: i32) -> (i32, i32, i32) {
    %c0_i32 = arith.constant 0 : i32
    %c2_i32 = arith.constant 2 : i32
    %c0_i32_0 = arith.constant 0 : i32
    return %arg0, %c0_i32, %c2_i32 : i32, i32, i32
  }
  func.func @transform_3(%arg0: i32) -> (i32, i32, i32) {
    %c0_i32 = arith.constant 0 : i32
    %c0_i32_0 = arith.constant 0 : i32
    %c0_i32_1 = arith.constant 0 : i32
    return %arg0, %c0_i32, %c0_i32_0 : i32, i32, i32
  }
  func.func @transform_4(%arg0: i32) -> (i32, i32, i32) {
    %c0_i32 = arith.constant 0 : i32
    %c0_i32_0 = arith.constant 0 : i32
    %c0_i32_1 = arith.constant 0 : i32
    return %arg0, %c0_i32, %c0_i32_0 : i32, i32, i32
  }
  func.func @transform_5(%arg0: i32) -> (i32, i32, i32) {
    %c0_i32 = arith.constant 0 : i32
    %c0_i32_0 = arith.constant 0 : i32
    %c0_i32_1 = arith.constant 0 : i32
    return %arg0, %c0_i32, %c0_i32_0 : i32, i32, i32
  }
}

module attributes {stable_mosaic.version = 11 : i64} {
  func.func @_linear_kernel(%arg0: i32, %arg1: memref<16x128xf32, #tpu.memory_space<vmem>>, %arg2: memref<128x128xbf16, #tpu.memory_space<vmem>>, %arg3: memref<1x128xf32, #tpu.memory_space<vmem>>, %arg4: memref<16x128xf32, #tpu.memory_space<vmem>>) attributes {dimension_semantics = [#tpu.dimension_semantics<parallel>], iteration_bounds = array<i64: 1>, scalar_prefetch = 0 : i64, scratch_operands = 0 : i64, tpu.core_type = #tpu.core_type<tc>, window_params = [{transform_indices = @transform_0, window_bounds = array<i64: 16, 128>}, {pipeline_mode = #tpu.pipeline_mode<synchronous>, transform_indices = @transform_1, window_bounds = array<i64: 128, 128>}, {pipeline_mode = #tpu.pipeline_mode<synchronous>, transform_indices = @transform_2, window_bounds = array<i64: 1, 128>}, {transform_indices = @transform_3, window_bounds = array<i64: 16, 128>}]} {
    %c0 = arith.constant 0 : index
    %c0_0 = arith.constant 0 : index
    %0 = vector.load %arg1[%c0, %c0_0] : memref<16x128xf32, #tpu.memory_space<vmem>>, vector<16x128xf32>
    %1 = arith.truncf %0 : vector<16x128xf32> to vector<16x128xbf16>
    %c0_1 = arith.constant 0 : index
    %c0_2 = arith.constant 0 : index
    %2 = vector.load %arg2[%c0_1, %c0_2] : memref<128x128xbf16, #tpu.memory_space<vmem>>, vector<128x128xbf16>
    %cst = arith.constant dense<0.000000e+00> : vector<16x128xf32>
    %3 = tpu.matmul %1, %2, %cst {dimension_numbers = #tpu.dot_dimension_numbers<[1], [0], [0], [1], [0, 0, 1, 1], [], []>} : vector<16x128xbf16>, vector<128x128xbf16>, vector<16x128xf32> -> vector<16x128xf32>
    %c0_3 = arith.constant 0 : index
    %c0_4 = arith.constant 0 : index
    %4 = vector.load %arg3[%c0_3, %c0_4] : memref<1x128xf32, #tpu.memory_space<vmem>>, vector<1x128xf32>
    %5 = vector.broadcast %4 : vector<1x128xf32> to vector<16x128xf32>
    %6 = arith.addf %3, %5 : vector<16x128xf32>
    %c0_5 = arith.constant 0 : index
    %c0_6 = arith.constant 0 : index
    %7 = vector.load %arg4[%c0_5, %c0_6] : memref<16x128xf32, #tpu.memory_space<vmem>>, vector<16x128xf32>
    tpu.vector_store %arg4[%c0_5, %c0_6], %6 {strides = array<i32>} : memref<16x128xf32, #tpu.memory_space<vmem>>, vector<16x128xf32>,
    return
  }
  func.func @transform_0(%arg0: i32) -> (i32, i32) {
    %c0_i32 = arith.constant 0 : i32
    %c0_i32_0 = arith.constant 0 : i32
    return %arg0, %c0_i32 : i32, i32
  }
  func.func @transform_1(%arg0: i32) -> (i32, i32) {
    %c0_i32 = arith.constant 0 : i32
    %c0_i32_0 = arith.constant 0 : i32
    %c0_i32_1 = arith.constant 0 : i32
    return %c0_i32, %c0_i32_0 : i32, i32
  }
  func.func @transform_2(%arg0: i32) -> (i32, i32) {
    %c0_i32 = arith.constant 0 : i32
    %c0_i32_0 = arith.constant 0 : i32
    %c0_i32_1 = arith.constant 0 : i32
    return %c0_i32, %c0_i32_0 : i32, i32
  }
  func.func @transform_3(%arg0: i32) -> (i32, i32) {
    %c0_i32 = arith.constant 0 : i32
    %c0_i32_0 = arith.constant 0 : i32
    return %arg0, %c0_i32 : i32, i32
  }
}

module attributes {stable_mosaic.version = 11 : i64} {
  func.func @_linear_kernel(%arg0: i32, %arg1: memref<16x256xf32, #tpu.memory_space<vmem>>, %arg2: memref<256x128xbf16, #tpu.memory_space<vmem>>, %arg3: memref<1x128xf32, #tpu.memory_space<vmem>>, %arg4: memref<16x128xf32, #tpu.memory_space<vmem>>) attributes {dimension_semantics = [#tpu.dimension_semantics<parallel>], iteration_bounds = array<i64: 1>, scalar_prefetch = 0 : i64, scratch_operands = 0 : i64, tpu.core_type = #tpu.core_type<tc>, window_params = [{transform_indices = @transform_0, window_bounds = array<i64: 16, 256>}, {pipeline_mode = #tpu.pipeline_mode<synchronous>, transform_indices = @transform_1, window_bounds = array<i64: 256, 128>}, {pipeline_mode = #tpu.pipeline_mode<synchronous>, transform_indices = @transform_2, window_bounds = array<i64: 1, 128>}, {transform_indices = @transform_3, window_bounds = array<i64: 16, 128>}]} {
    %c0 = arith.constant 0 : index
    %c0_0 = arith.constant 0 : index
    %0 = vector.load %arg1[%c0, %c0_0] : memref<16x256xf32, #tpu.memory_space<vmem>>, vector<16x256xf32>
    %1 = arith.truncf %0 : vector<16x256xf32> to vector<16x256xbf16>
    %c0_1 = arith.constant 0 : index
    %c0_2 = arith.constant 0 : index
    %2 = vector.load %arg2[%c0_1, %c0_2] : memref<256x128xbf16, #tpu.memory_space<vmem>>, vector<256x128xbf16>
    %cst = arith.constant dense<0.000000e+00> : vector<16x128xf32>
    %3 = tpu.matmul %1, %2, %cst {dimension_numbers = #tpu.dot_dimension_numbers<[1], [0], [0], [1], [0, 0, 1, 1], [], []>} : vector<16x256xbf16>, vector<256x128xbf16>, vector<16x128xf32> -> vector<16x128xf32>
    %c0_3 = arith.constant 0 : index
    %c0_4 = arith.constant 0 : index
    %4 = vector.load %arg3[%c0_3, %c0_4] : memref<1x128xf32, #tpu.memory_space<vmem>>, vector<1x128xf32>
    %5 = vector.broadcast %4 : vector<1x128xf32> to vector<16x128xf32>
    %6 = arith.addf %3, %5 : vector<16x128xf32>
    %c0_5 = arith.constant 0 : index
    %c0_6 = arith.constant 0 : index
    %7 = vector.load %arg4[%c0_5, %c0_6] : memref<16x128xf32, #tpu.memory_space<vmem>>, vector<16x128xf32>
    tpu.vector_store %arg4[%c0_5, %c0_6], %6 {strides = array<i32>} : memref<16x128xf32, #tpu.memory_space<vmem>>, vector<16x128xf32>,
    return
  }
  func.func @transform_0(%arg0: i32) -> (i32, i32) {
    %c0_i32 = arith.constant 0 : i32
    %c0_i32_0 = arith.constant 0 : i32
    return %arg0, %c0_i32 : i32, i32
  }
  func.func @transform_1(%arg0: i32) -> (i32, i32) {
    %c0_i32 = arith.constant 0 : i32
    %c0_i32_0 = arith.constant 0 : i32
    %c0_i32_1 = arith.constant 0 : i32
    return %c0_i32, %c0_i32_0 : i32, i32
  }
  func.func @transform_2(%arg0: i32) -> (i32, i32) {
    %c0_i32 = arith.constant 0 : i32
    %c0_i32_0 = arith.constant 0 : i32
    %c0_i32_1 = arith.constant 0 : i32
    return %c0_i32, %c0_i32_0 : i32, i32
  }
  func.func @transform_3(%arg0: i32) -> (i32, i32) {
    %c0_i32 = arith.constant 0 : i32
    %c0_i32_0 = arith.constant 0 : i32
    return %arg0, %c0_i32 : i32, i32
  }
}

module attributes {stable_mosaic.version = 11 : i64} {
  func.func @_linear_kernel(%arg0: i32, %arg1: memref<24x128xf32, #tpu.memory_space<vmem>>, %arg2: memref<128x128xbf16, #tpu.memory_space<vmem>>, %arg3: memref<1x128xf32, #tpu.memory_space<vmem>>, %arg4: memref<24x128xf32, #tpu.memory_space<vmem>>) attributes {dimension_semantics = [#tpu.dimension_semantics<parallel>], iteration_bounds = array<i64: 1>, scalar_prefetch = 0 : i64, scratch_operands = 0 : i64, tpu.core_type = #tpu.core_type<tc>, window_params = [{transform_indices = @transform_0, window_bounds = array<i64: 24, 128>}, {pipeline_mode = #tpu.pipeline_mode<synchronous>, transform_indices = @transform_1, window_bounds = array<i64: 128, 128>}, {pipeline_mode = #tpu.pipeline_mode<synchronous>, transform_indices = @transform_2, window_bounds = array<i64: 1, 128>}, {transform_indices = @transform_3, window_bounds = array<i64: 24, 128>}]} {
    %c0 = arith.constant 0 : index
    %c0_0 = arith.constant 0 : index
    %0 = vector.load %arg1[%c0, %c0_0] : memref<24x128xf32, #tpu.memory_space<vmem>>, vector<24x128xf32>
    %1 = arith.truncf %0 : vector<24x128xf32> to vector<24x128xbf16>
    %c0_1 = arith.constant 0 : index
    %c0_2 = arith.constant 0 : index
    %2 = vector.load %arg2[%c0_1, %c0_2] : memref<128x128xbf16, #tpu.memory_space<vmem>>, vector<128x128xbf16>
    %cst = arith.constant dense<0.000000e+00> : vector<24x128xf32>
    %3 = tpu.matmul %1, %2, %cst {dimension_numbers = #tpu.dot_dimension_numbers<[1], [0], [0], [1], [0, 0, 1, 1], [], []>} : vector<24x128xbf16>, vector<128x128xbf16>, vector<24x128xf32> -> vector<24x128xf32>
    %c0_3 = arith.constant 0 : index
    %c0_4 = arith.constant 0 : index
    %4 = vector.load %arg3[%c0_3, %c0_4] : memref<1x128xf32, #tpu.memory_space<vmem>>, vector<1x128xf32>
    %5 = vector.broadcast %4 : vector<1x128xf32> to vector<24x128xf32>
    %6 = arith.addf %3, %5 : vector<24x128xf32>
    %c0_5 = arith.constant 0 : index
    %c0_6 = arith.constant 0 : index
    %7 = vector.load %arg4[%c0_5, %c0_6] : memref<24x128xf32, #tpu.memory_space<vmem>>, vector<24x128xf32>
    tpu.vector_store %arg4[%c0_5, %c0_6], %6 {strides = array<i32>} : memref<24x128xf32, #tpu.memory_space<vmem>>, vector<24x128xf32>,
    return
  }
  func.func @transform_0(%arg0: i32) -> (i32, i32) {
    %c0_i32 = arith.constant 0 : i32
    %c0_i32_0 = arith.constant 0 : i32
    return %arg0, %c0_i32 : i32, i32
  }
  func.func @transform_1(%arg0: i32) -> (i32, i32) {
    %c0_i32 = arith.constant 0 : i32
    %c0_i32_0 = arith.constant 0 : i32
    %c0_i32_1 = arith.constant 0 : i32
    return %c0_i32, %c0_i32_0 : i32, i32
  }
  func.func @transform_2(%arg0: i32) -> (i32, i32) {
    %c0_i32 = arith.constant 0 : i32
    %c0_i32_0 = arith.constant 0 : i32
    %c0_i32_1 = arith.constant 0 : i32
    return %c0_i32, %c0_i32_0 : i32, i32
  }
  func.func @transform_3(%arg0: i32) -> (i32, i32) {
    %c0_i32 = arith.constant 0 : i32
    %c0_i32_0 = arith.constant 0 : i32
    return %arg0, %c0_i32 : i32, i32
  }
}

module attributes {stable_mosaic.version = 11 : i64} {
  func.func @_linear_kernel(%arg0: i32, %arg1: memref<16x128xf32, #tpu.memory_space<vmem>>, %arg2: memref<128x128xbf16, #tpu.memory_space<vmem>>, %arg3: memref<1x128xf32, #tpu.memory_space<vmem>>, %arg4: memref<16x128xf32, #tpu.memory_space<vmem>>) attributes {dimension_semantics = [#tpu.dimension_semantics<parallel>], iteration_bounds = array<i64: 1>, scalar_prefetch = 0 : i64, scratch_operands = 0 : i64, tpu.core_type = #tpu.core_type<tc>, window_params = [{transform_indices = @transform_0, window_bounds = array<i64: 16, 128>}, {pipeline_mode = #tpu.pipeline_mode<synchronous>, transform_indices = @transform_1, window_bounds = array<i64: 128, 128>}, {pipeline_mode = #tpu.pipeline_mode<synchronous>, transform_indices = @transform_2, window_bounds = array<i64: 1, 128>}, {transform_indices = @transform_3, window_bounds = array<i64: 16, 128>}]} {
    %c0 = arith.constant 0 : index
    %c0_0 = arith.constant 0 : index
    %0 = vector.load %arg1[%c0, %c0_0] : memref<16x128xf32, #tpu.memory_space<vmem>>, vector<16x128xf32>
    %1 = arith.truncf %0 : vector<16x128xf32> to vector<16x128xbf16>
    %c0_1 = arith.constant 0 : index
    %c0_2 = arith.constant 0 : index
    %2 = vector.load %arg2[%c0_1, %c0_2] : memref<128x128xbf16, #tpu.memory_space<vmem>>, vector<128x128xbf16>
    %cst = arith.constant dense<0.000000e+00> : vector<16x128xf32>
    %3 = tpu.matmul %1, %2, %cst {dimension_numbers = #tpu.dot_dimension_numbers<[1], [0], [0], [1], [0, 0, 1, 1], [], []>} : vector<16x128xbf16>, vector<128x128xbf16>, vector<16x128xf32> -> vector<16x128xf32>
    %c0_3 = arith.constant 0 : index
    %c0_4 = arith.constant 0 : index
    %4 = vector.load %arg3[%c0_3, %c0_4] : memref<1x128xf32, #tpu.memory_space<vmem>>, vector<1x128xf32>
    %5 = vector.broadcast %4 : vector<1x128xf32> to vector<16x128xf32>
    %6 = arith.addf %3, %5 : vector<16x128xf32>
    %c0_5 = arith.constant 0 : index
    %c0_6 = arith.constant 0 : index
    %7 = vector.load %arg4[%c0_5, %c0_6] : memref<16x128xf32, #tpu.memory_space<vmem>>, vector<16x128xf32>
    tpu.vector_store %arg4[%c0_5, %c0_6], %6 {strides = array<i32>} : memref<16x128xf32, #tpu.memory_space<vmem>>, vector<16x128xf32>,
    return
  }
  func.func @transform_0(%arg0: i32) -> (i32, i32) {
    %c0_i32 = arith.constant 0 : i32
    %c0_i32_0 = arith.constant 0 : i32
    return %arg0, %c0_i32 : i32, i32
  }
  func.func @transform_1(%arg0: i32) -> (i32, i32) {
    %c0_i32 = arith.constant 0 : i32
    %c0_i32_0 = arith.constant 0 : i32
    %c0_i32_1 = arith.constant 0 : i32
    return %c0_i32, %c0_i32_0 : i32, i32
  }
  func.func @transform_2(%arg0: i32) -> (i32, i32) {
    %c0_i32 = arith.constant 0 : i32
    %c0_i32_0 = arith.constant 0 : i32
    %c0_i32_1 = arith.constant 0 : i32
    return %c0_i32, %c0_i32_0 : i32, i32
  }
  func.func @transform_3(%arg0: i32) -> (i32, i32) {
    %c0_i32 = arith.constant 0 : i32
    %c0_i32_0 = arith.constant 0 : i32
    return %arg0, %c0_i32 : i32, i32
  }
}

module attributes {stable_mosaic.version = 11 : i64} {
  func.func @_linear_kernel(%arg0: i32, %arg1: memref<2x128xf32, #tpu.memory_space<vmem>>, %arg2: memref<128x256xbf16, #tpu.memory_space<vmem>>, %arg3: memref<1x256xf32, #tpu.memory_space<vmem>>, %arg4: memref<2x256xf32, #tpu.memory_space<vmem>>) attributes {dimension_semantics = [#tpu.dimension_semantics<parallel>], iteration_bounds = array<i64: 1>, scalar_prefetch = 0 : i64, scratch_operands = 0 : i64, tpu.core_type = #tpu.core_type<tc>, window_params = [{transform_indices = @transform_0, window_bounds = array<i64: 2, 128>}, {pipeline_mode = #tpu.pipeline_mode<synchronous>, transform_indices = @transform_1, window_bounds = array<i64: 128, 256>}, {pipeline_mode = #tpu.pipeline_mode<synchronous>, transform_indices = @transform_2, window_bounds = array<i64: 1, 256>}, {transform_indices = @transform_3, window_bounds = array<i64: 2, 256>}]} {
    %c0 = arith.constant 0 : index
    %c0_0 = arith.constant 0 : index
    %0 = vector.load %arg1[%c0, %c0_0] : memref<2x128xf32, #tpu.memory_space<vmem>>, vector<2x128xf32>
    %1 = arith.truncf %0 : vector<2x128xf32> to vector<2x128xbf16>
    %c0_1 = arith.constant 0 : index
    %c0_2 = arith.constant 0 : index
    %2 = vector.load %arg2[%c0_1, %c0_2] : memref<128x256xbf16, #tpu.memory_space<vmem>>, vector<128x256xbf16>
    %cst = arith.constant dense<0.000000e+00> : vector<2x256xf32>
    %3 = tpu.matmul %1, %2, %cst {dimension_numbers = #tpu.dot_dimension_numbers<[1], [0], [0], [1], [0, 0, 1, 1], [], []>} : vector<2x128xbf16>, vector<128x256xbf16>, vector<2x256xf32> -> vector<2x256xf32>
    %c0_3 = arith.constant 0 : index
    %c0_4 = arith.constant 0 : index
    %4 = vector.load %arg3[%c0_3, %c0_4] : memref<1x256xf32, #tpu.memory_space<vmem>>, vector<1x256xf32>
    %5 = vector.broadcast %4 : vector<1x256xf32> to vector<2x256xf32>
    %6 = arith.addf %3, %5 : vector<2x256xf32>
    %c0_5 = arith.constant 0 : index
    %c0_6 = arith.constant 0 : index
    %7 = vector.load %arg4[%c0_5, %c0_6] : memref<2x256xf32, #tpu.memory_space<vmem>>, vector<2x256xf32>
    tpu.vector_store %arg4[%c0_5, %c0_6], %6 {strides = array<i32>} : memref<2x256xf32, #tpu.memory_space<vmem>>, vector<2x256xf32>,
    return
  }
  func.func @transform_0(%arg0: i32) -> (i32, i32) {
    %c0_i32 = arith.constant 0 : i32
    %c0_i32_0 = arith.constant 0 : i32
    return %arg0, %c0_i32 : i32, i32
  }
  func.func @transform_1(%arg0: i32) -> (i32, i32) {
    %c0_i32 = arith.constant 0 : i32
    %c0_i32_0 = arith.constant 0 : i32
    %c0_i32_1 = arith.constant 0 : i32
    return %c0_i32, %c0_i32_0 : i32, i32
  }
  func.func @transform_2(%arg0: i32) -> (i32, i32) {
    %c0_i32 = arith.constant 0 : i32
    %c0_i32_0 = arith.constant 0 : i32
    %c0_i32_1 = arith.constant 0 : i32
    return %c0_i32, %c0_i32_0 : i32, i32
  }
  func.func @transform_3(%arg0: i32) -> (i32, i32) {
    %c0_i32 = arith.constant 0 : i32
    %c0_i32_0 = arith.constant 0 : i32
    return %arg0, %c0_i32 : i32, i32
  }
}

module attributes {stable_mosaic.version = 11 : i64} {
  func.func @_linear_kernel(%arg0: i32, %arg1: memref<2x256xf32, #tpu.memory_space<vmem>>, %arg2: memref<256x16xbf16, #tpu.memory_space<vmem>>, %arg3: memref<1x16xf32, #tpu.memory_space<vmem>>, %arg4: memref<2x16xf32, #tpu.memory_space<vmem>>) attributes {dimension_semantics = [#tpu.dimension_semantics<parallel>], iteration_bounds = array<i64: 1>, scalar_prefetch = 0 : i64, scratch_operands = 0 : i64, tpu.core_type = #tpu.core_type<tc>, window_params = [{transform_indices = @transform_0, window_bounds = array<i64: 2, 256>}, {pipeline_mode = #tpu.pipeline_mode<synchronous>, transform_indices = @transform_1, window_bounds = array<i64: 256, 16>}, {pipeline_mode = #tpu.pipeline_mode<synchronous>, transform_indices = @transform_2, window_bounds = array<i64: 1, 16>}, {transform_indices = @transform_3, window_bounds = array<i64: 2, 16>}]} {
    %c0 = arith.constant 0 : index
    %c0_0 = arith.constant 0 : index
    %0 = vector.load %arg1[%c0, %c0_0] : memref<2x256xf32, #tpu.memory_space<vmem>>, vector<2x256xf32>
    %cst = arith.constant 0.000000e+00 : f32
    %1 = vector.broadcast %cst : f32 to vector<2x256xf32>
    %2 = arith.maximumf %0, %1 : vector<2x256xf32>
    %3 = arith.truncf %2 : vector<2x256xf32> to vector<2x256xbf16>
    %c0_1 = arith.constant 0 : index
    %c0_2 = arith.constant 0 : index
    %4 = vector.load %arg2[%c0_1, %c0_2] : memref<256x16xbf16, #tpu.memory_space<vmem>>, vector<256x16xbf16>
    %cst_3 = arith.constant dense<0.000000e+00> : vector<2x16xf32>
    %5 = tpu.matmul %3, %4, %cst_3 {dimension_numbers = #tpu.dot_dimension_numbers<[1], [0], [0], [1], [0, 0, 1, 1], [], []>} : vector<2x256xbf16>, vector<256x16xbf16>, vector<2x16xf32> -> vector<2x16xf32>
    %c0_4 = arith.constant 0 : index
    %c0_5 = arith.constant 0 : index
    %6 = vector.load %arg3[%c0_4, %c0_5] : memref<1x16xf32, #tpu.memory_space<vmem>>, vector<1x16xf32>
    %7 = vector.broadcast %6 : vector<1x16xf32> to vector<2x16xf32>
    %8 = arith.addf %5, %7 : vector<2x16xf32>
    %c0_6 = arith.constant 0 : index
    %c0_7 = arith.constant 0 : index
    %9 = vector.load %arg4[%c0_6, %c0_7] : memref<2x16xf32, #tpu.memory_space<vmem>>, vector<2x16xf32>
    tpu.vector_store %arg4[%c0_6, %c0_7], %8 {strides = array<i32>} : memref<2x16xf32, #tpu.memory_space<vmem>>, vector<2x16xf32>,
    return
  }
  func.func @transform_0(%arg0: i32) -> (i32, i32) {
    %c0_i32 = arith.constant 0 : i32
    %c0_i32_0 = arith.constant 0 : i32
    return %arg0, %c0_i32 : i32, i32
  }
  func.func @transform_1(%arg0: i32) -> (i32, i32) {
    %c0_i32 = arith.constant 0 : i32
    %c0_i32_0 = arith.constant 0 : i32
    %c0_i32_1 = arith.constant 0 : i32
    return %c0_i32, %c0_i32_0 : i32, i32
  }
  func.func @transform_2(%arg0: i32) -> (i32, i32) {
    %c0_i32 = arith.constant 0 : i32
    %c0_i32_0 = arith.constant 0 : i32
    %c0_i32_1 = arith.constant 0 : i32
    return %c0_i32, %c0_i32_0 : i32, i32
  }
  func.func @transform_3(%arg0: i32) -> (i32, i32) {
    %c0_i32 = arith.constant 0 : i32
    %c0_i32_0 = arith.constant 0 : i32
    return %arg0, %c0_i32 : i32, i32
  }
}

</mosaic_0001>

<bundles_post_ra>
// kernel: _lambda_.32
= control target key start
LH: loop header
LB: loop body
LE: loop exit
PB: predicated region body
PF: predicated region fallthrough
CT: control target
= control target key end

     0   :  { %vm21_vm0 = vcmask 523264   ;;  %s257_s0 = inlined_call_operand.vmem [shape: f32[24,64], index: 0, kind: input, shape index: {}]   ;;  %s258_s2 = inlined_call_operand.vmem [shape: f32[1,128], index: 2, kind: input, shape index: {}]   ;;  %s259_s1 = inlined_call_operand.vmem [shape: bf16[64,128], index: 1, kind: input, shape index: {}]   ;;  %s260_s3 = inlined_call_operand.vmem [shape: f32[24,128], index: 3, kind: output, shape index: {}]  }
   0x1   :  { %v207_v0 = vld [vmem:[%s257_s0 + $0x10] sm:$0xff]  ;;  %v212_v1 = vld [vmem:[%s257_s0] sm:$0xff]  ;;  %v221_v4 = vld [vmem:[%s257_s0 + $0x8] sm:$0xff] }
   0x2   :  { %v20_v2 = vmul.f32 %v207_v0, %v207_v0  ;;  %v18_v3 = vmul.f32 %v212_v1, %v212_v1  ;;  %v19_v7 = vmul.f32 %v221_v4, %v221_v4  ;;  %v166_v9 = vld [vmem:[%s259_s1 + $0x18] sm:$0xff]  ;;  %v165_v10 = vld [vmem:[%s259_s1 + $0x10] sm:$0xff]  ;;  %v164_v11 = vld [vmem:[%s259_s1 + $0x8] sm:$0xff] }
   0x3   :  { %167 = vmatpush.bf16.msra.mxu1 %v166_v9  ;;  %124 = vmatpush.bf16.msra.mxu0 %v166_v9  ;;  %v163_v12 = vld [vmem:[%s259_s1] sm:$0xff] }
   0x4   :  { %v28_v5 = vsel %vm21_vm0, %v20_v2, 0.0  ;;  %v22_v6 = vsel %vm21_vm0, %v18_v3, 0.0  ;;  %v25_v8 = vsel %vm21_vm0, %v19_v7, 0.0  ;;  %v171_v57 = vld [vmem:[%s258_s2] ss:$0 sm:$0xff] }
   0x5   :  { %29 = vadd.xlane.f32.xlu1 %v28_v5  ;;  %23 = vadd.xlane.f32.xlu0 %v22_v6 }
   0x7   :  { %168 = vmatpush.bf16.msra.mxu1 %v165_v10  ;;  %125 = vmatpush.bf16.msra.mxu0 %v165_v10 }
   0xb   :  { %169 = vmatpush.bf16.msra.mxu1 %v164_v11  ;;  %126 = vmatpush.bf16.msra.mxu0 %v164_v11 }
   0xd   :  { %26 = vadd.xlane.f32.xlu0 %v25_v8 }
   0xf   :  { %170 = vmatpush.bf16.msra.mxu1 %v163_v12  ;;  %127 = vmatpush.bf16.msra.mxu0 %v163_v12 }
  0x78   :  { %v30_v13 = vpop.xlane.xlu1 %29  ;;  %v24_v14 = vpop.xlane.xlu0 %23 }
  0x79   :  { %172 = vrsqrt.f32 %v30_v13  ;;  %vm62_vm1 = vcmp.eq.f32.partialorder %v30_v13, inf  ;;  %v65_v32 = vand.u32 2147483648, %v30_v13  ;;  %vm64_vm2 = vcmp.eq.f32.partialorder %v30_v13, 0.0 }
  0x7a   :  { %174 = vrsqrt.f32 %v24_v14  ;;  %vm38_vm3 = vcmp.eq.f32.partialorder %v24_v14, inf  ;;  %v41_v37 = vand.u32 2147483648, %v24_v14  ;;  %vm40_vm4 = vcmp.eq.f32.partialorder %v24_v14, 0.0 }
  0x7f   :  { %v173_v15 = vpop.eup %172 }
  0x80   :  { %v175_v16 = vpop.eup %174  ;;  %v56_v17 = vmul.f32 %v173_v15, %v30_v13  ;;  %v27_v18 = vpop.xlane.xlu0 %26 }
  0x81   :  { %v32_v19 = vmul.f32 %v175_v16, %v24_v14  ;;  %176 = vrsqrt.f32 %v27_v18  ;;  %vm50_vm5 = vcmp.eq.f32.partialorder %v27_v18, inf  ;;  %v53_v45 = vand.u32 2147483648, %v27_v18 }
  0x82   :  { %v57_v20 = vmul.f32 %v173_v15, %v56_v17  ;;  %vm52_vm6 = vcmp.eq.f32.partialorder %v27_v18, 0.0 }
  0x83   :  { %v33_v21 = vmul.f32 %v175_v16, %v32_v19 }
  0x84   :  { %v58_v22 = vmul.f32 0.5, %v57_v20 }
  0x85   :  { %v34_v23 = vmul.f32 0.5, %v33_v21 }
  0x86   :  { %v59_v24 = vsub.f32 1.5, %v58_v22 }
  0x87   :  { %v177_v25 = vpop.eup %176  ;;  %v35_v26 = vsub.f32 1.5, %v34_v23 }
  0x88   :  { %v60_v27 = vmul.f32 %v173_v15, %v59_v24  ;;  %v44_v28 = vmul.f32 %v177_v25, %v27_v18 }
  0x89   :  { %v36_v29 = vmul.f32 %v175_v16, %v35_v26 }
  0x8a   :  { %v61_v30 = vmul.f32 %v60_v27, %v30_v13  ;;  %v45_v31 = vmul.f32 %v177_v25, %v44_v28 }
  0x8b   :  { %v37_v33 = vmul.f32 %v36_v29, %v24_v14 }
  0x8c   :  { %v63_v34 = vsel %vm62_vm1, %v30_v13, %v61_v30  ;;  %v46_v35 = vmul.f32 0.5, %v45_v31 }
  0x8d   :  { %v39_v36 = vsel %vm38_vm3, %v24_v14, %v37_v33  ;;  %v66_v38 = vsel %vm64_vm2, %v65_v32, %v63_v34 }
  0x8e   :  { %v47_v39 = vsub.f32 1.5, %v46_v35  ;;  %v69_v40 = vadd.f32 1e-12, %v66_v38  ;;  %v42_v41 = vsel %vm40_vm4, %v41_v37, %v39_v36 }
  0x8f   :  { %v67_v44 = vadd.f32 1e-12, %v42_v41 }
  0x90   :  { %v48_v42 = vmul.f32 %v177_v25, %v47_v39  ;;  %178 = vrcp.f32 %v69_v40 }
  0x91   :  { %180 = vrcp.f32 %v67_v44 }
  0x92   :  { %v49_v43 = vmul.f32 %v48_v42, %v27_v18 }
  0x94   :  { %v51_v46 = vsel %vm50_vm5, %v27_v18, %v49_v43 }
  0x95   :  { %v54_v47 = vsel %vm52_vm6, %v53_v45, %v51_v46 }
  0x96   :  { %v179_v48 = vpop.eup %178  ;;  %v68_v49 = vadd.f32 1e-12, %v54_v47 }
  0x97   :  { %v75_v50 = vmul.f32 %v179_v48, %v207_v0  ;;  %v181_v52 = vpop.eup %180 }
  0x98   :  { %182 = vrcp.f32 %v68_v49  ;;  %v73_v54 = vmul.f32 %v181_v52, %v212_v1 }
  0x99   :  { %v77_v51 = vpack.c.bf16 %v75_v50, %v75_v50 }
  0x9b   :  { %162 = vmatmul.msk.bf16.vlgmr.msra.gmra.mxu1 %vm21_vm0, %v77_v51 }
  0x9e   :  { %v183_v53 = vpop.eup %182 }
  0x9f   :  { %v74_v55 = vmul.f32 %v183_v53, %v221_v4 }
  0xa1   :  { %v76_v56 = vpack.c.bf16 %v74_v55, %v73_v54 }
  0xa3   :  { %161 = vmatmul.msk.bf16.vlgmr.msra.gmra.mxu0 %vm21_vm0, %v76_v56 }
 0x118   :  { %v134_v58 = vpop.f32.mrf.mxu1 }
 0x119   :  { %v135_v59 = vadd.f32 %v171_v57, %v134_v58 }
 0x11b   :  { %140 = vst [vmem:[%s260_s3 + $0x10] sm:$0xff] %v135_v59 }
 0x120   :  { %v129_v60 = vpop.f32.mrf.mxu0  ;;  %v136_v61 = vpop.f32.mrf.mxu1 }
 0x121   :  { %v130_v62 = vadd.f32 %v171_v57, %v129_v60 }
 0x123   :  { %138 = vst [vmem:[%s260_s3] sm:$0xff] %v130_v62 }
 0x128   :  { %v131_v63 = vpop.f32.mrf.mxu0 }
 0x129   :  { %v132_v0 = vadd.f32 %v171_v57, %v131_v63 }
 0x12b   :  { %139 = vst [vmem:[%s260_s3 + $0x8] sm:$0xff] %v132_v0 }

// kernel: _lambda_.33
= control target key start
LH: loop header
LB: loop body
LE: loop exit
PB: predicated region body
PF: predicated region fallthrough
CT: control target
= control target key end

     0   :  { %vm46_vm0 = vcmask 392192   ;;  %s131_s1 = inlined_call_operand.vmem [shape: bf16[48,128], index: 1, kind: input, shape index: {}]   ;;  %s132_s2 = inlined_call_operand.vmem [shape: f32[1,128], index: 2, kind: input, shape index: {}]   ;;  %s133_s0 = inlined_call_operand.vmem [shape: f32[16,48], index: 0, kind: input, shape index: {}]   ;;  %s134_s3 = inlined_call_operand.vmem [shape: f32[16,128], index: 3, kind: output, shape index: {}]  }
   0x1   :  { %v85_v0 = vld [vmem:[%s131_s1 + $0x10] sm:$0xff]  ;;  %v84_v1 = vld [vmem:[%s131_s1 + $0x8] sm:$0xff]  ;;  %v83_v2 = vld [vmem:[%s131_s1] sm:$0xff] }
   0x2   :  { %55 = vmatpush.bf16.msra.mxu0 %v85_v0  ;;  %v15_v3 = vld [vmem:[%s133_s0] sm:$0xff]  ;;  %v16_v4 = vld [vmem:[%s133_s0 + $0x8] sm:$0xff] }
   0x3   :  { %v17_v5 = vpack.c.bf16 %v16_v4, %v15_v3  ;;  %v86_v6 = vld [vmem:[%s132_s2] ss:$0 sm:$0xff] }
   0x6   :  { %56 = vmatpush.bf16.msra.mxu0 %v84_v1 }
   0xa   :  { %57 = vmatpush.bf16.msra.mxu0 %v83_v2 }
   0xd   :  { %82 = vmatmul.msk.bf16.vlgmr.msra.gmra.mxu0 %vm46_vm0, %v17_v5 }
  0x8a   :  { %v59_v7 = vpop.f32.mrf.mxu0 }
  0x8b   :  { %v60_v8 = vadd.f32 %v86_v6, %v59_v7 }
  0x8d   :  { %64 = vst [vmem:[%s134_s3] sm:$0xff] %v60_v8 }
  0x92   :  { %v61_v9 = vpop.f32.mrf.mxu0 }
  0x93   :  { %v62_v10 = vadd.f32 %v86_v6, %v61_v9 }
  0x95   :  { %65 = vst [vmem:[%s134_s3 + $0x8] sm:$0xff] %v62_v10 }

// kernel: _lambda_.35
= control target key start
LH: loop header
LB: loop body
LE: loop exit
PB: predicated region body
PF: predicated region fallthrough
CT: control target
= control target key end

     0   :  { %9 = vsyncpa [#allocation3], 0  ;;  %s428_s18 = smov [#allocation2]   ;;  %s429_s20 = smov 192   ;;  %s493_s0 = inlined_call_operand.vmem [shape: f32[16,128], index: 0, kind: input, shape index: {}]   ;;  %s494_s1 = inlined_call_operand.hbm [shape: bf16[128,384], index: 1, kind: input, shape index: {}]   ;;  %s495_s2 = inlined_call_operand.vmem [shape: f32[1,384], index: 2, kind: input, shape index: {}]   ;;  %s496_s3 = inlined_call_operand.vmem [shape: f32[16,1], index: 3, kind: input, shape index: {}]   ;;  %s497_s4 = inlined_call_operand.vmem [shape: f32[16,384], index: 4, kind: output, shape index: {}]  }
   0x1   :  { %s16_s17 = sshll.u32 %s494_s1, 4  ;;  %s18_s19 = sshll.u32 %s428_s18, 4  ;;  %s17_s17 = int_to_ptr.hbm [resolvable:$true] %s16_s17  ;;  %s19_s19 = int_to_ptr.vmem [resolvable:$true] %s18_s19 }
   0x2   :  { %s430_s21 = smov 12  }
   0x3   :  { %24 = dma.hbm_to_vmem [thread:$0]  %s17_s17, 3072, %s19_s19, [#allocation3], %s429_s20, %s429_s20, %s430_s21  }
   0x4   :  { %426 = dma.done.wait [#allocation3], 3072  }
   0x5   :  { %427 = vsyncadd [#allocation3], 4294964224  ;;  %v363_v0 = vld [vmem:[#allocation2 + $0xa8] sm:$0xf]  ;;  %v395_v1 = vld [vmem:[#allocation2 + $0xb0] sm:$0xf0] }
   0x6   :  { %v394_v2 = vld [vmem:[#allocation2 + $0xac] sm:$0xf]  ;;  %v364_v3 = vor.u32 %v395_v1, %v363_v0  ;;  %v365_v4 = vld [vmem:[#allocation2 + $0xb4] sm:$0xf0]  ;;  %v371_v5 = vld [vmem:[#allocation2 + $0xb0] sm:$0xf] }
   0x7   :  { %v396_v6 = vld [vmem:[#allocation2 + $0xb8] sm:$0xf0]  ;;  %v368_v7 = vor.u32 %v394_v2, %v365_v4  ;;  %v351_v9 = vld [vmem:[#allocation2 + $0x90] sm:$0xf]  ;;  %v391_v11 = vld [vmem:[#allocation2 + $0x94] sm:$0xf] }
   0x8   :  { %v372_v8 = vor.u32 %v396_v6, %v371_v5  ;;  %v392_v10 = vld [vmem:[#allocation2 + $0x98] sm:$0xf0]  ;;  %206 = vmatpush.bf16.msra.mxu0 %v364_v3  ;;  %v353_v13 = vld [vmem:[#allocation2 + $0x9c] sm:$0xf0]  ;;  %v359_v14 = vld [vmem:[#allocation2 + $0x98] sm:$0xf] }
   0x9   :  { %v352_v12 = vor.u32 %v392_v10, %v351_v9  ;;  %v393_v15 = vld [vmem:[#allocation2 + $0xa0] sm:$0xf0]  ;;  %220 = vmatpush.bf16.msra.mxu1 %v368_v7  ;;  %v356_v16 = vor.u32 %v391_v11, %v353_v13  ;;  %v339_v18 = vld [vmem:[#allocation2 + $0x78] sm:$0xf]  ;;  %v388_v20 = vld [vmem:[#allocation2 + $0x7c] sm:$0xf] }
   0xa   :  { %234 = vmatpush.bf16.msra.mxu2 %v372_v8  ;;  %v360_v17 = vor.u32 %v393_v15, %v359_v14  ;;  %v389_v19 = vld [vmem:[#allocation2 + $0x80] sm:$0xf0]  ;;  %v341_v21 = vld [vmem:[#allocation2 + $0x84] sm:$0xf0]  ;;  %v347_v22 = vld [vmem:[#allocation2 + $0x80] sm:$0xf] }
   0xb   :  { %v390_v23 = vld [vmem:[#allocation2 + $0x88] sm:$0xf0]  ;;  %v340_v24 = vor.u32 %v389_v19, %v339_v18  ;;  %v344_v25 = vor.u32 %v388_v20, %v341_v21  ;;  %v327_v27 = vld [vmem:[#allocation2 + $0x60] sm:$0xf]  ;;  %v385_v29 = vld [vmem:[#allocation2 + $0x64] sm:$0xf] }
   0xc   :  { %207 = vmatpush.bf16.msra.mxu0 %v352_v12  ;;  %v348_v26 = vor.u32 %v390_v23, %v347_v22  ;;  %v386_v28 = vld [vmem:[#allocation2 + $0x68] sm:$0xf0]  ;;  %v329_v30 = vld [vmem:[#allocation2 + $0x6c] sm:$0xf0]  ;;  %v335_v31 = vld [vmem:[#allocation2 + $0x68] sm:$0xf] }
   0xd   :  { %221 = vmatpush.bf16.msra.mxu1 %v356_v16  ;;  %v387_v32 = vld [vmem:[#allocation2 + $0x70] sm:$0xf0]  ;;  %v328_v33 = vor.u32 %v386_v28, %v327_v27  ;;  %v332_v34 = vor.u32 %v385_v29, %v329_v30  ;;  %v315_v36 = vld [vmem:[#allocation2 + $0x48] sm:$0xf]  ;;  %v382_v38 = vld [vmem:[#allocation2 + $0x4c] sm:$0xf] }
   0xe   :  { %235 = vmatpush.bf16.msra.mxu2 %v360_v17  ;;  %v336_v35 = vor.u32 %v387_v32, %v335_v31  ;;  %v383_v37 = vld [vmem:[#allocation2 + $0x50] sm:$0xf0]  ;;  %v317_v39 = vld [vmem:[#allocation2 + $0x54] sm:$0xf0]  ;;  %v323_v40 = vld [vmem:[#allocation2 + $0x50] sm:$0xf] }
   0xf   :  { %v384_v41 = vld [vmem:[#allocation2 + $0x58] sm:$0xf0]  ;;  %v316_v42 = vor.u32 %v383_v37, %v315_v36  ;;  %v303_v43 = vld [vmem:[#allocation2 + $0x30] sm:$0xf]  ;;  %v320_v44 = vor.u32 %v382_v38, %v317_v39  ;;  %v379_v47 = vld [vmem:[#allocation2 + $0x34] sm:$0xf] }
  0x10   :  { %208 = vmatpush.bf16.msra.mxu0 %v340_v24  ;;  %v324_v45 = vor.u32 %v384_v41, %v323_v40  ;;  %v380_v46 = vld [vmem:[#allocation2 + $0x38] sm:$0xf0]  ;;  %v248_v48 = vld [vmem:[%s496_s3] sm:$0xff]  ;;  %v311_v50 = vld [vmem:[#allocation2 + $0x38] sm:$0xf]  ;;  %v431_v52 = vmov 0  }
  0x11   :  { %222 = vmatpush.bf16.msra.mxu1 %v344_v25  ;;  %v305_v49 = vld [vmem:[#allocation2 + $0x3c] sm:$0xf0]  ;;  %v381_v51 = vld [vmem:[#allocation2 + $0x40] sm:$0xf0]  ;;  %401 = vset.pattern.permute.xlu0 %v431_v52  ;;  %v304_v53 = vor.u32 %v380_v46, %v303_v43  ;;  %v291_v56 = vld [vmem:[#allocation2 + $0x18] sm:$0xf] }
  0x12   :  { %236 = vmatpush.bf16.msra.mxu2 %v348_v26  ;;  %252 = vperm.xlu0 %401, %v248_v48   ;;  %v308_v54 = vor.u32 %v379_v47, %v305_v49  ;;  %v312_v55 = vor.u32 %v381_v51, %v311_v50  ;;  %v377_v57 = vld [vmem:[#allocation2 + $0x20] sm:$0xf0]  ;;  %v376_v58 = vld [vmem:[#allocation2 + $0x1c] sm:$0xf]  ;;  %v293_v59 = vld [vmem:[#allocation2 + $0x24] sm:$0xf0] }
  0x13   :  { %v299_v60 = vld [vmem:[#allocation2 + $0x20] sm:$0xf]  ;;  %v378_v61 = vld [vmem:[#allocation2 + $0x28] sm:$0xf0]  ;;  %v292_v62 = vor.u32 %v377_v57, %v291_v56  ;;  %v296_v2 = vor.u32 %v376_v58, %v293_v59  ;;  %v373_v6 = vld [vmem:[#allocation2 + $0x4] sm:$0xf] }
  0x14   :  { %209 = vmatpush.bf16.msra.mxu0 %v328_v33  ;;  %v33_v63 = vld [vmem:[%s493_s0] sm:$0xff]  ;;  %v34_v0 = vld [vmem:[%s493_s0 + $0x8] sm:$0xff]  ;;  %v300_v3 = vor.u32 %v378_v61, %v299_v60  ;;  %v281_v7 = vld [vmem:[#allocation2 + $0xc] sm:$0xf0] }
  0x15   :  { %223 = vmatpush.bf16.msra.mxu1 %v332_v34  ;;  %v249_v1 = vld [vmem:[%s496_s3 + $0x8] sm:$0xff]  ;;  %v279_v4 = vld [vmem:[#allocation2] sm:$0xf]  ;;  %v375_v9 = vld [vmem:[#allocation2 + $0x10] sm:$0xf0]  ;;  %v35_v10 = vmax.f32 %v33_v63, 0.0  ;;  %v284_v13 = vor.u32 %v373_v6, %v281_v7 }
  0x16   :  { %237 = vmatpush.bf16.msra.mxu2 %v336_v35  ;;  %v374_v5 = vld [vmem:[#allocation2 + $0x8] sm:$0xf0]  ;;  %v287_v8 = vld [vmem:[#allocation2 + $0x8] sm:$0xf]  ;;  %v36_v11 = vmax.f32 %v34_v0, 0.0 }
  0x17   :  { %v280_v12 = vor.u32 %v374_v5, %v279_v4  ;;  %v288_v14 = vor.u32 %v375_v9, %v287_v8  ;;  %v70_v16 = vld [vmem:[%s495_s2] sm:$0x7] }
  0x18   :  { %210 = vmatpush.bf16.msra.mxu0 %v316_v42  ;;  %v37_v15 = vpack.c.bf16 %v36_v11, %v35_v10  ;;  %v72_v17 = vperm.slane %v70_v16, 0  ;;  %v73_v18 = vperm.slane %v70_v16, 1  ;;  %v74_v26 = vperm.slane %v70_v16, 2 }
  0x19   :  { %224 = vmatpush.bf16.msra.mxu1 %v320_v44 }
  0x1a   :  { %238 = vmatpush.bf16.msra.mxu2 %v324_v45  ;;  %257 = vperm.xlu0 %401, %v249_v1  }
  0x1c   :  { %211 = vmatpush.bf16.msra.mxu0 %v304_v53 }
  0x1d   :  { %225 = vmatpush.bf16.msra.mxu1 %v308_v54 }
  0x1e   :  { %239 = vmatpush.bf16.msra.mxu2 %v312_v55 }
  0x20   :  { %212 = vmatpush.bf16.msra.mxu0 %v292_v62 }
  0x21   :  { %226 = vmatpush.bf16.msra.mxu1 %v296_v2 }
  0x22   :  { %240 = vmatpush.bf16.msra.mxu2 %v300_v3 }
  0x24   :  { %213 = vmatpush.bf16.msra.mxu0 %v280_v12 }
  0x25   :  { %227 = vmatpush.bf16.msra.mxu1 %v284_v13 }
  0x26   :  { %241 = vmatpush.bf16.msra.mxu2 %v288_v14 }
  0x27   :  { %214 = vmatmul.bf16.vlgmr.msra.gmra.mxu0 %v37_v15 }
  0x28   :  { %228 = vmatmul.bf16.vlgmr.msra.gmra.mxu1 %v37_v15 }
  0x29   :  { %242 = vmatmul.bf16.vlgmr.msra.gmra.mxu2 %v37_v15 }
  0x84   :  { %v253_v19 = vpop.permute.xlu0 %252 }
  0x8c   :  { %v258_v33 = vpop.permute.xlu0 %257 }
  0xa4   :  { %v215_v20 = vpop.f32.mrf.mxu0 }
  0xa5   :  { %v216_v21 = vadd.f32 %v215_v20, %v72_v17  ;;  %v229_v22 = vpop.f32.mrf.mxu1 }
  0xa6   :  { %v230_v23 = vadd.f32 %v229_v22, %v73_v18 }
  0xa7   :  { %v260_v24 = vmul.f32 %v253_v19, %v216_v21 }
  0xa8   :  { %v261_v25 = vmul.f32 %v253_v19, %v230_v23 }
  0xa9   :  { %266 = vst [vmem:[%s497_s4] sm:$0xff] %v260_v24 }
  0xaa   :  { %267 = vst [vmem:[%s497_s4 + $0x8] sm:$0xff] %v261_v25 }
  0xac   :  { %v243_v27 = vpop.f32.mrf.mxu2  ;;  %v217_v29 = vpop.f32.mrf.mxu0 }
  0xad   :  { %v244_v28 = vadd.f32 %v243_v27, %v74_v26  ;;  %v218_v30 = vadd.f32 %v217_v29, %v72_v17  ;;  %v231_v31 = vpop.f32.mrf.mxu1 }
  0xae   :  { %v232_v34 = vadd.f32 %v231_v31, %v73_v18 }
  0xaf   :  { %v262_v32 = vmul.f32 %v253_v19, %v244_v28  ;;  %v263_v35 = vmul.f32 %v258_v33, %v218_v30 }
  0xb0   :  { %v264_v36 = vmul.f32 %v258_v33, %v232_v34 }
  0xb1   :  { %268 = vst [vmem:[%s497_s4 + $0x10] sm:$0xff] %v262_v32 }
  0xb2   :  { %269 = vst [vmem:[%s497_s4 + $0x18] sm:$0xff] %v263_v35 }
  0xb3   :  { %270 = vst [vmem:[%s497_s4 + $0x20] sm:$0xff] %v264_v36 }
  0xb4   :  { %v245_v37 = vpop.f32.mrf.mxu2 }
  0xb5   :  { %v246_v38 = vadd.f32 %v245_v37, %v74_v26 }
  0xb7   :  { %v265_v39 = vmul.f32 %v258_v33, %v246_v38 }
  0xb9   :  { %271 = vst [vmem:[%s497_s4 + $0x28] sm:$0xff] %v265_v39 }
  0xba   :  { %276 = vsyncpa [#allocation3], 1 }

// kernel: _lambda_.34
= control target key start
LH: loop header
LB: loop body
LE: loop exit
PB: predicated region body
PF: predicated region fallthrough
CT: control target
= control target key end

     0   :  { %9 = vsyncpa [#allocation3], 0  ;;  %s464_s18 = smov [#allocation2]   ;;  %s465_s20 = smov 192   ;;  %s544_s0 = inlined_call_operand.vmem [shape: f32[24,128], index: 0, kind: input, shape index: {}]   ;;  %s545_s1 = inlined_call_operand.hbm [shape: bf16[128,384], index: 1, kind: input, shape index: {}]   ;;  %s546_s2 = inlined_call_operand.vmem [shape: f32[1,384], index: 2, kind: input, shape index: {}]   ;;  %s547_s3 = inlined_call_operand.vmem [shape: f32[24,1], index: 3, kind: input, shape index: {}]   ;;  %s548_s4 = inlined_call_operand.vmem [shape: f32[24,384], index: 4, kind: output, shape index: {}]  }
   0x1   :  { %s16_s17 = sshll.u32 %s545_s1, 4  ;;  %s18_s19 = sshll.u32 %s464_s18, 4  ;;  %s17_s17 = int_to_ptr.hbm [resolvable:$true] %s16_s17  ;;  %s19_s19 = int_to_ptr.vmem [resolvable:$true] %s18_s19 }
   0x2   :  { %s466_s21 = smov 12  }
   0x3   :  { %24 = dma.hbm_to_vmem [thread:$0]  %s17_s17, 3072, %s19_s19, [#allocation3], %s465_s20, %s465_s20, %s466_s21  }
   0x4   :  { %462 = dma.done.wait [#allocation3], 3072  }
   0x5   :  { %463 = vsyncadd [#allocation3], 4294964224  ;;  %v421_v0 = vld [vmem:[#allocation2 + $0xac] sm:$0xf]  ;;  %v392_v1 = vld [vmem:[#allocation2 + $0xb4] sm:$0xf0] }
   0x6   :  { %v398_v2 = vld [vmem:[#allocation2 + $0xb0] sm:$0xf]  ;;  %v395_v3 = vor.u32 %v421_v0, %v392_v1  ;;  %v423_v4 = vld [vmem:[#allocation2 + $0xb8] sm:$0xf0]  ;;  %v418_v5 = vld [vmem:[#allocation2 + $0x94] sm:$0xf] }
   0x7   :  { %v380_v6 = vld [vmem:[#allocation2 + $0x9c] sm:$0xf0]  ;;  %v399_v7 = vor.u32 %v423_v4, %v398_v2  ;;  %v386_v8 = vld [vmem:[#allocation2 + $0x98] sm:$0xf]  ;;  %v420_v9 = vld [vmem:[#allocation2 + $0xa0] sm:$0xf0] }
   0x8   :  { %v390_v10 = vld [vmem:[#allocation2 + $0xa8] sm:$0xf]  ;;  %227 = vmatpush.bf16.msra.mxu1 %v395_v3  ;;  %v383_v11 = vor.u32 %v418_v5, %v380_v6  ;;  %v422_v12 = vld [vmem:[#allocation2 + $0xb0] sm:$0xf0]  ;;  %v387_v13 = vor.u32 %v420_v9, %v386_v8  ;;  %v415_v15 = vld [vmem:[#allocation2 + $0x7c] sm:$0xf] }
   0x9   :  { %245 = vmatpush.bf16.msra.mxu2 %v399_v7  ;;  %v391_v14 = vor.u32 %v422_v12, %v390_v10  ;;  %v368_v16 = vld [vmem:[#allocation2 + $0x84] sm:$0xf0]  ;;  %v378_v17 = vld [vmem:[#allocation2 + $0x90] sm:$0xf]  ;;  %v374_v18 = vld [vmem:[#allocation2 + $0x80] sm:$0xf] }
   0xa   :  { %v417_v19 = vld [vmem:[#allocation2 + $0x88] sm:$0xf0]  ;;  %v419_v20 = vld [vmem:[#allocation2 + $0x98] sm:$0xf0]  ;;  %v371_v22 = vor.u32 %v415_v15, %v368_v16  ;;  %v366_v23 = vld [vmem:[#allocation2 + $0x78] sm:$0xf] }
   0xb   :  { %424 = vmatpush.bf16.msra.mxu3 %v391_v14  ;;  %209 = vmatpush.bf16.msra.mxu0 %v391_v14  ;;  %v379_v21 = vor.u32 %v419_v20, %v378_v17  ;;  %v416_v24 = vld [vmem:[#allocation2 + $0x80] sm:$0xf0]  ;;  %v375_v25 = vor.u32 %v417_v19, %v374_v18  ;;  %v356_v27 = vld [vmem:[#allocation2 + $0x6c] sm:$0xf0]  ;;  %v362_v28 = vld [vmem:[#allocation2 + $0x68] sm:$0xf] }
   0xc   :  { %228 = vmatpush.bf16.msra.mxu1 %v383_v11  ;;  %v412_v26 = vld [vmem:[#allocation2 + $0x64] sm:$0xf]  ;;  %v414_v29 = vld [vmem:[#allocation2 + $0x70] sm:$0xf0]  ;;  %v367_v30 = vor.u32 %v416_v24, %v366_v23  ;;  %v354_v32 = vld [vmem:[#allocation2 + $0x60] sm:$0xf] }
   0xd   :  { %246 = vmatpush.bf16.msra.mxu2 %v387_v13  ;;  %v359_v31 = vor.u32 %v412_v26, %v356_v27  ;;  %v413_v33 = vld [vmem:[#allocation2 + $0x68] sm:$0xf0]  ;;  %v363_v34 = vor.u32 %v414_v29, %v362_v28  ;;  %v344_v36 = vld [vmem:[#allocation2 + $0x54] sm:$0xf0]  ;;  %v350_v37 = vld [vmem:[#allocation2 + $0x50] sm:$0xf] }
   0xe   :  { %v409_v35 = vld [vmem:[#allocation2 + $0x4c] sm:$0xf]  ;;  %v411_v38 = vld [vmem:[#allocation2 + $0x58] sm:$0xf0]  ;;  %v355_v39 = vor.u32 %v413_v33, %v354_v32  ;;  %v342_v41 = vld [vmem:[#allocation2 + $0x48] sm:$0xf] }
   0xf   :  { %425 = vmatpush.bf16.msra.mxu3 %v379_v21  ;;  %210 = vmatpush.bf16.msra.mxu0 %v379_v21  ;;  %v347_v40 = vor.u32 %v409_v35, %v344_v36  ;;  %v410_v42 = vld [vmem:[#allocation2 + $0x50] sm:$0xf0]  ;;  %v467_v43 = vmov 0   ;;  %v351_v44 = vor.u32 %v411_v38, %v350_v37  ;;  %v332_v46 = vld [vmem:[#allocation2 + $0x3c] sm:$0xf0]  ;;  %v34_v63 = vld [vmem:[%s544_s0 + $0x8] sm:$0xff] }
  0x10   :  { %229 = vmatpush.bf16.msra.mxu1 %v371_v22  ;;  %436 = vset.pattern.permute.xlu0 %v467_v43  ;;  %v406_v45 = vld [vmem:[#allocation2 + $0x34] sm:$0xf]  ;;  %v338_v47 = vld [vmem:[#allocation2 + $0x38] sm:$0xf]  ;;  %v408_v48 = vld [vmem:[#allocation2 + $0x40] sm:$0xf0]  ;;  %v343_v50 = vor.u32 %v410_v42, %v342_v41 }
  0x11   :  { %247 = vmatpush.bf16.msra.mxu2 %v375_v25  ;;  %437 = vset.pattern.permute.xlu1 %v467_v43  ;;  %v263_v49 = vld [vmem:[%s547_s3] sm:$0xff]  ;;  %v335_v51 = vor.u32 %v406_v45, %v332_v46  ;;  %v330_v52 = vld [vmem:[#allocation2 + $0x30] sm:$0xf]  ;;  %v407_v53 = vld [vmem:[#allocation2 + $0x38] sm:$0xf0]  ;;  %v339_v55 = vor.u32 %v408_v48, %v338_v47  ;;  %v37_v9 = vmax.f32 %v34_v63, 0.0 }
  0x12   :  { %268 = vperm.xlu0 %436, %v263_v49   ;;  %v265_v54 = vld [vmem:[%s547_s3 + $0x10] sm:$0xff]  ;;  %v403_v56 = vld [vmem:[#allocation2 + $0x1c] sm:$0xf]  ;;  %v320_v57 = vld [vmem:[#allocation2 + $0x24] sm:$0xf0]  ;;  %v331_v60 = vor.u32 %v407_v53, %v330_v52 }
  0x13   :  { %426 = vmatpush.bf16.msra.mxu3 %v367_v30  ;;  %211 = vmatpush.bf16.msra.mxu0 %v367_v30  ;;  %v326_v58 = vld [vmem:[#allocation2 + $0x20] sm:$0xf]  ;;  %v405_v59 = vld [vmem:[#allocation2 + $0x28] sm:$0xf0]  ;;  %v323_v62 = vor.u32 %v403_v56, %v320_v57  ;;  %v318_v0 = vld [vmem:[#allocation2 + $0x18] sm:$0xf] }
  0x14   :  { %230 = vmatpush.bf16.msra.mxu1 %v359_v31  ;;  %278 = vperm.xlu1 %437, %v265_v54   ;;  %v33_v61 = vld [vmem:[%s544_s0] sm:$0xff]  ;;  %v327_v2 = vor.u32 %v405_v59, %v326_v58  ;;  %v308_v4 = vld [vmem:[#allocation2 + $0xc] sm:$0xf0]  ;;  %v264_v5 = vld [vmem:[%s547_s3 + $0x8] sm:$0xff] }
  0x15   :  { %248 = vmatpush.bf16.msra.mxu2 %v363_v34  ;;  %v404_v1 = vld [vmem:[#allocation2 + $0x20] sm:$0xf0]  ;;  %v314_v6 = vld [vmem:[#allocation2 + $0x8] sm:$0xf]  ;;  %v402_v7 = vld [vmem:[#allocation2 + $0x10] sm:$0xf0] }
  0x16   :  { %v400_v3 = vld [vmem:[#allocation2 + $0x4] sm:$0xf]  ;;  %v36_v8 = vmax.f32 %v33_v61, 0.0  ;;  %v319_v10 = vor.u32 %v404_v1, %v318_v0  ;;  %v35_v11 = vld [vmem:[%s544_s0 + $0x10] sm:$0xff]  ;;  %v306_v13 = vld [vmem:[#allocation2] sm:$0xf]  ;;  %v315_v15 = vor.u32 %v402_v7, %v314_v6 }
  0x17   :  { %427 = vmatpush.bf16.msra.mxu3 %v355_v39  ;;  %212 = vmatpush.bf16.msra.mxu0 %v355_v39  ;;  %v311_v12 = vor.u32 %v400_v3, %v308_v4  ;;  %v401_v14 = vld [vmem:[#allocation2 + $0x8] sm:$0xf0]  ;;  %v38_v16 = vmax.f32 %v35_v11, 0.0  ;;  %v73_v20 = vld [vmem:[%s546_s2] sm:$0x7] }
  0x18   :  { %231 = vmatpush.bf16.msra.mxu1 %v347_v40  ;;  %v39_v17 = vpack.c.bf16 %v37_v9, %v36_v8  ;;  %v307_v18 = vor.u32 %v401_v14, %v306_v13  ;;  %v76_v21 = vperm.slane %v73_v20, 1  ;;  %v75_v25 = vperm.slane %v73_v20, 0 }
  0x19   :  { %249 = vmatpush.bf16.msra.mxu2 %v351_v44  ;;  %v40_v19 = vpack.c.bf16 %v38_v16, %v38_v16  ;;  %v77_v27 = vperm.slane %v73_v20, 2 }
  0x1a   :  { %273 = vperm.xlu0 %436, %v264_v5  }
  0x1b   :  { %428 = vmatpush.bf16.msra.mxu3 %v343_v50  ;;  %213 = vmatpush.bf16.msra.mxu0 %v343_v50 }
  0x1c   :  { %232 = vmatpush.bf16.msra.mxu1 %v335_v51 }
  0x1d   :  { %250 = vmatpush.bf16.msra.mxu2 %v339_v55 }
  0x1f   :  { %429 = vmatpush.bf16.msra.mxu3 %v331_v60  ;;  %214 = vmatpush.bf16.msra.mxu0 %v331_v60 }
  0x20   :  { %233 = vmatpush.bf16.msra.mxu1 %v323_v62 }
  0x21   :  { %251 = vmatpush.bf16.msra.mxu2 %v327_v2 }
  0x23   :  { %430 = vmatpush.bf16.msra.mxu3 %v319_v10  ;;  %215 = vmatpush.bf16.msra.mxu0 %v319_v10 }
  0x24   :  { %234 = vmatpush.bf16.msra.mxu1 %v311_v12 }
  0x25   :  { %252 = vmatpush.bf16.msra.mxu2 %v315_v15 }
  0x27   :  { %235 = vmatmul.bf16.vlgmr.msra.gmra.mxu1 %v39_v17  ;;  %431 = vmatpush.bf16.msra.mxu3 %v307_v18 }
  0x28   :  { %253 = vmatmul.bf16.vlgmr.msra.gmra.mxu2 %v39_v17  ;;  %216 = vmatpush.bf16.msra.mxu0 %v307_v18 }
  0x2a   :  { %222 = vmatmul.bf16.vlgmr.msra.gmra.mxu3 %v40_v19 }
  0x2b   :  { %217 = vmatmul.bf16.vlgmr.msra.gmra.mxu0 %v39_v17 }
  0x37   :  { %240 = vmatmul.bf16.gmra.mxu1 %v40_v19 }
  0x38   :  { %258 = vmatmul.bf16.gmra.mxu2 %v40_v19 }
  0x84   :  { %v269_v22 = vpop.permute.xlu0 %268 }
  0x86   :  { %v279_v37 = vpop.permute.xlu1 %278 }
  0x8c   :  { %v274_v34 = vpop.permute.xlu0 %273 }
  0xa4   :  { %v236_v23 = vpop.f32.mrf.mxu1 }
  0xa5   :  { %v237_v24 = vadd.f32 %v236_v23, %v76_v21 }
  0xa7   :  { %v282_v26 = vmul.f32 %v269_v22, %v237_v24 }
  0xa8   :  { %v218_v28 = vpop.f32.mrf.mxu0 }
  0xa9   :  { %291 = vst [vmem:[%s548_s4 + $0x8] sm:$0xff] %v282_v26  ;;  %v219_v29 = vadd.f32 %v218_v28, %v75_v25 }
  0xab   :  { %v254_v30 = vpop.f32.mrf.mxu2  ;;  %v281_v31 = vmul.f32 %v269_v22, %v219_v29 }
  0xac   :  { %v255_v32 = vadd.f32 %v254_v30, %v77_v27  ;;  %v238_v33 = vpop.f32.mrf.mxu1 }
  0xad   :  { %v239_v35 = vadd.f32 %v238_v33, %v76_v21  ;;  %290 = vst [vmem:[%s548_s4] sm:$0xff] %v281_v31  ;;  %v223_v36 = vpop.f32.mrf.mxu3 }
  0xae   :  { %v283_v38 = vmul.f32 %v269_v22, %v255_v32  ;;  %v224_v39 = vadd.f32 %v223_v36, %v75_v25 }
  0xaf   :  { %v285_v40 = vmul.f32 %v274_v34, %v239_v35 }
  0xb0   :  { %292 = vst [vmem:[%s548_s4 + $0x10] sm:$0xff] %v283_v38  ;;  %v220_v41 = vpop.f32.mrf.mxu0  ;;  %v287_v42 = vmul.f32 %v279_v37, %v224_v39 }
  0xb1   :  { %294 = vst [vmem:[%s548_s4 + $0x20] sm:$0xff] %v285_v40  ;;  %v221_v43 = vadd.f32 %v220_v41, %v75_v25 }
  0xb2   :  { %296 = vst [vmem:[%s548_s4 + $0x30] sm:$0xff] %v287_v42 }
  0xb3   :  { %v256_v44 = vpop.f32.mrf.mxu2  ;;  %v284_v45 = vmul.f32 %v274_v34, %v221_v43 }
  0xb4   :  { %v257_v46 = vadd.f32 %v256_v44, %v77_v27  ;;  %v241_v47 = vpop.f32.mrf.mxu1 }
  0xb5   :  { %v242_v48 = vadd.f32 %v241_v47, %v76_v21  ;;  %293 = vst [vmem:[%s548_s4 + $0x18] sm:$0xff] %v284_v45  ;;  %v225_v49 = vpop.f32.mrf.mxu3 }
  0xb6   :  { %v286_v50 = vmul.f32 %v274_v34, %v257_v46 }
  0xb7   :  { %v288_v51 = vmul.f32 %v279_v37, %v242_v48 }
  0xb8   :  { %295 = vst [vmem:[%s548_s4 + $0x28] sm:$0xff] %v286_v50 }
  0xb9   :  { %297 = vst [vmem:[%s548_s4 + $0x38] sm:$0xff] %v288_v51 }
  0xbb   :  { %v259_v52 = vpop.f32.mrf.mxu2 }
  0xbc   :  { %v260_v53 = vadd.f32 %v259_v52, %v77_v27  ;;  %v243_v54 = vpop.f32.mrf.mxu1 }
  0xbe   :  { %v289_v55 = vmul.f32 %v279_v37, %v260_v53 }
  0xc0   :  { %298 = vst [vmem:[%s548_s4 + $0x40] sm:$0xff] %v289_v55 }
  0xc3   :  { %v261_v56 = vpop.f32.mrf.mxu2 }
  0xc4   :  { %303 = vsyncpa [#allocation3], 1 }

// kernel: _lambda_.38
= control target key start
LH: loop header
LB: loop body
LE: loop exit
PB: predicated region body
PF: predicated region fallthrough
CT: control target
= control target key end

     0   :  { %s394_s1 = inlined_call_operand.vmem [shape: bf16[256,128], index: 1, kind: input, shape index: {}]   ;;  %s395_s2 = inlined_call_operand.vmem [shape: f32[1,128], index: 2, kind: input, shape index: {}]   ;;  %s396_s0 = inlined_call_operand.vmem [shape: f32[24,256], index: 0, kind: input, shape index: {}]   ;;  %s397_s3 = inlined_call_operand.vmem [shape: f32[24,128], index: 3, kind: output, shape index: {}]  }
   0x1   :  { %v270_v0 = vld [vmem:[%s394_s1 + $0x38] sm:$0xff]  ;;  %v269_v2 = vld [vmem:[%s394_s1 + $0x30] sm:$0xff]  ;;  %v268_v4 = vld [vmem:[%s394_s1 + $0x28] sm:$0xff] }
   0x2   :  { %v278_v1 = vld [vmem:[%s394_s1 + $0x78] sm:$0xff]  ;;  %156 = vmatpush.bf16.msra.mxu0 %v270_v0  ;;  %279 = vmatpush.bf16.msra.mxu2 %v270_v0  ;;  %v277_v3 = vld [vmem:[%s394_s1 + $0x70] sm:$0xff]  ;;  %v276_v5 = vld [vmem:[%s394_s1 + $0x68] sm:$0xff] }
   0x3   :  { %174 = vmatpush.bf16.msra.mxu1 %v278_v1  ;;  %287 = vmatpush.bf16.msra.mxu3 %v278_v1  ;;  %v267_v6 = vld [vmem:[%s394_s1 + $0x20] sm:$0xff]  ;;  %v266_v8 = vld [vmem:[%s394_s1 + $0x18] sm:$0xff]  ;;  %v265_v10 = vld [vmem:[%s394_s1 + $0x10] sm:$0xff] }
   0x4   :  { %v275_v7 = vld [vmem:[%s394_s1 + $0x60] sm:$0xff]  ;;  %v274_v9 = vld [vmem:[%s394_s1 + $0x58] sm:$0xff]  ;;  %v273_v11 = vld [vmem:[%s394_s1 + $0x50] sm:$0xff] }
   0x5   :  { %v264_v12 = vld [vmem:[%s394_s1 + $0x8] sm:$0xff]  ;;  %v263_v14 = vld [vmem:[%s394_s1] sm:$0xff]  ;;  %v16_v17 = vld [vmem:[%s396_s0 + $0x10] sm:$0xff] }
   0x6   :  { %157 = vmatpush.bf16.msra.mxu0 %v269_v2  ;;  %280 = vmatpush.bf16.msra.mxu2 %v269_v2  ;;  %v272_v13 = vld [vmem:[%s394_s1 + $0x48] sm:$0xff]  ;;  %v271_v15 = vld [vmem:[%s394_s1 + $0x40] sm:$0xff]  ;;  %v17_v20 = vld [vmem:[%s396_s0 + $0x18] sm:$0xff] }
   0x7   :  { %175 = vmatpush.bf16.msra.mxu1 %v277_v3  ;;  %288 = vmatpush.bf16.msra.mxu3 %v277_v3  ;;  %v14_v16 = vld [vmem:[%s396_s0] sm:$0xff]  ;;  %v15_v19 = vld [vmem:[%s396_s0 + $0x8] sm:$0xff] }
   0x8   :  { %v18_v18 = vld [vmem:[%s396_s0 + $0x20] sm:$0xff]  ;;  %v19_v21 = vld [vmem:[%s396_s0 + $0x28] sm:$0xff]  ;;  %v20_v22 = vpack.c.bf16 %v16_v17, %v14_v16  ;;  %v21_v24 = vpack.c.bf16 %v17_v20, %v15_v19 }
   0x9   :  { %v22_v23 = vpack.c.bf16 %v18_v18, %v18_v18  ;;  %v23_v25 = vpack.c.bf16 %v19_v21, %v19_v21  ;;  %v295_v26 = vld [vmem:[%s395_s2] ss:$0 sm:$0xff] }
   0xa   :  { %158 = vmatpush.bf16.msra.mxu0 %v268_v4  ;;  %281 = vmatpush.bf16.msra.mxu2 %v268_v4 }
   0xb   :  { %176 = vmatpush.bf16.msra.mxu1 %v276_v5  ;;  %289 = vmatpush.bf16.msra.mxu3 %v276_v5 }
   0xe   :  { %159 = vmatpush.bf16.msra.mxu0 %v267_v6  ;;  %282 = vmatpush.bf16.msra.mxu2 %v267_v6 }
   0xf   :  { %177 = vmatpush.bf16.msra.mxu1 %v275_v7  ;;  %290 = vmatpush.bf16.msra.mxu3 %v275_v7 }
  0x12   :  { %160 = vmatpush.bf16.msra.mxu0 %v266_v8  ;;  %283 = vmatpush.bf16.msra.mxu2 %v266_v8 }
  0x13   :  { %178 = vmatpush.bf16.msra.mxu1 %v274_v9  ;;  %291 = vmatpush.bf16.msra.mxu3 %v274_v9 }
  0x16   :  { %161 = vmatpush.bf16.msra.mxu0 %v265_v10  ;;  %284 = vmatpush.bf16.msra.mxu2 %v265_v10 }
  0x17   :  { %179 = vmatpush.bf16.msra.mxu1 %v273_v11  ;;  %292 = vmatpush.bf16.msra.mxu3 %v273_v11 }
  0x1a   :  { %162 = vmatpush.bf16.msra.mxu0 %v264_v12  ;;  %285 = vmatpush.bf16.msra.mxu2 %v264_v12 }
  0x1b   :  { %180 = vmatpush.bf16.msra.mxu1 %v272_v13  ;;  %293 = vmatpush.bf16.msra.mxu3 %v272_v13 }
  0x1e   :  { %163 = vmatpush.bf16.msra.mxu0 %v263_v14  ;;  %286 = vmatpush.bf16.msra.mxu2 %v263_v14 }
  0x1f   :  { %181 = vmatpush.bf16.msra.mxu1 %v271_v15  ;;  %294 = vmatpush.bf16.msra.mxu3 %v271_v15 }
  0x21   :  { %164 = vmatmul.bf16.vlgmr.msra.gmra.mxu0 %v20_v22  ;;  %169 = vmatmul.bf16.vlgmr.msra.gmra.mxu2 %v22_v23 }
  0x22   :  { %182 = vmatmul.bf16.vlgmr.msra.gmra.mxu1 %v21_v24  ;;  %187 = vmatmul.bf16.vlgmr.msra.gmra.mxu3 %v23_v25 }
  0x9e   :  { %v165_v27 = vpop.f32.mrf.mxu0 }
  0x9f   :  { %v166_v28 = vadd.f32 %v295_v26, %v165_v27  ;;  %v183_v29 = vpop.f32.mrf.mxu1 }
  0xa1   :  { %v184_v30 = vadd.f32 %v183_v29, %v166_v28 }
  0xa3   :  { %192 = vst [vmem:[%s397_s3] sm:$0xff] %v184_v30 }
  0xa4   :  { %v170_v31 = vpop.f32.mrf.mxu2 }
  0xa5   :  { %v171_v32 = vadd.f32 %v295_v26, %v170_v31  ;;  %v188_v33 = vpop.f32.mrf.mxu3 }
  0xa6   :  { %v167_v34 = vpop.f32.mrf.mxu0 }
  0xa7   :  { %v189_v35 = vadd.f32 %v188_v33, %v171_v32  ;;  %v168_v36 = vadd.f32 %v295_v26, %v167_v34  ;;  %v185_v37 = vpop.f32.mrf.mxu1 }
  0xa9   :  { %194 = vst [vmem:[%s397_s3 + $0x10] sm:$0xff] %v189_v35  ;;  %v186_v38 = vadd.f32 %v185_v37, %v168_v36 }
  0xab   :  { %193 = vst [vmem:[%s397_s3 + $0x8] sm:$0xff] %v186_v38 }
  0xac   :  { %v172_v39 = vpop.f32.mrf.mxu2 }
  0xad   :  { %v190_v40 = vpop.f32.mrf.mxu3 }

// kernel: _lambda_.39
= control target key start
LH: loop header
LB: loop body
LE: loop exit
PB: predicated region body
PF: predicated region fallthrough
CT: control target
= control target key end

     0   :  { %8 = vsyncpa [#allocation3], 0  ;;  %s313_s15 = smov [#allocation2]   ;;  %s314_s17 = smov 64   ;;  %s360_s0 = inlined_call_operand.vmem [shape: f32[16,256], index: 0, kind: input, shape index: {}]   ;;  %s361_s1 = inlined_call_operand.hbm [shape: bf16[256,128], index: 1, kind: input, shape index: {}]   ;;  %s362_s2 = inlined_call_operand.vmem [shape: f32[1,128], index: 2, kind: input, shape index: {}]   ;;  %s363_s3 = inlined_call_operand.vmem [shape: f32[16,128], index: 3, kind: output, shape index: {}]  }
   0x1   :  { %s15_s14 = sshll.u32 %s361_s1, 4  ;;  %s17_s16 = sshll.u32 %s313_s15, 4  ;;  %s16_s14 = int_to_ptr.hbm [resolvable:$true] %s15_s14  ;;  %s18_s16 = int_to_ptr.vmem [resolvable:$true] %s17_s16 }
   0x2   :  { %s315_s18 = smov 4  }
   0x3   :  { %23 = dma.hbm_to_vmem [thread:$0]  %s16_s14, 2048, %s18_s16, [#allocation3], %s314_s17, %s314_s17, %s315_s18  }
   0x4   :  { %311 = dma.done.wait [#allocation3], 2048  }
   0x5   :  { %312 = vsyncadd [#allocation3], 4294965248  ;;  %v274_v0 = vld [vmem:[#allocation2 + $0x38] sm:$0xff]  ;;  %v273_v2 = vld [vmem:[#allocation2 + $0x30] sm:$0xff] }
   0x6   :  { %v282_v1 = vld [vmem:[#allocation2 + $0x78] sm:$0xff]  ;;  %168 = vmatpush.bf16.msra.mxu0 %v274_v0  ;;  %v281_v3 = vld [vmem:[#allocation2 + $0x70] sm:$0xff]  ;;  %v272_v4 = vld [vmem:[#allocation2 + $0x28] sm:$0xff] }
   0x7   :  { %182 = vmatpush.bf16.msra.mxu1 %v282_v1  ;;  %v280_v5 = vld [vmem:[#allocation2 + $0x68] sm:$0xff]  ;;  %v271_v6 = vld [vmem:[#allocation2 + $0x20] sm:$0xff]  ;;  %v270_v8 = vld [vmem:[#allocation2 + $0x18] sm:$0xff] }
   0x8   :  { %v279_v7 = vld [vmem:[#allocation2 + $0x60] sm:$0xff]  ;;  %v278_v9 = vld [vmem:[#allocation2 + $0x58] sm:$0xff]  ;;  %v269_v10 = vld [vmem:[#allocation2 + $0x10] sm:$0xff] }
   0x9   :  { %v277_v11 = vld [vmem:[#allocation2 + $0x50] sm:$0xff]  ;;  %v268_v12 = vld [vmem:[#allocation2 + $0x8] sm:$0xff]  ;;  %v267_v14 = vld [vmem:[#allocation2] sm:$0xff] }
   0xa   :  { %169 = vmatpush.bf16.msra.mxu0 %v273_v2  ;;  %v276_v13 = vld [vmem:[#allocation2 + $0x48] sm:$0xff]  ;;  %v275_v15 = vld [vmem:[#allocation2 + $0x40] sm:$0xff]  ;;  %v32_v17 = vld [vmem:[%s360_s0 + $0x10] sm:$0xff] }
   0xb   :  { %183 = vmatpush.bf16.msra.mxu1 %v281_v3  ;;  %v30_v16 = vld [vmem:[%s360_s0] sm:$0xff]  ;;  %v31_v18 = vld [vmem:[%s360_s0 + $0x8] sm:$0xff]  ;;  %v33_v19 = vld [vmem:[%s360_s0 + $0x18] sm:$0xff] }
   0xc   :  { %v34_v20 = vpack.c.bf16 %v32_v17, %v30_v16  ;;  %v35_v21 = vpack.c.bf16 %v33_v19, %v31_v18  ;;  %v286_v22 = vld [vmem:[%s362_s2] ss:$0 sm:$0xff] }
   0xe   :  { %170 = vmatpush.bf16.msra.mxu0 %v272_v4 }
   0xf   :  { %184 = vmatpush.bf16.msra.mxu1 %v280_v5 }
  0x12   :  { %171 = vmatpush.bf16.msra.mxu0 %v271_v6 }
  0x13   :  { %185 = vmatpush.bf16.msra.mxu1 %v279_v7 }
  0x16   :  { %172 = vmatpush.bf16.msra.mxu0 %v270_v8 }
  0x17   :  { %186 = vmatpush.bf16.msra.mxu1 %v278_v9 }
  0x1a   :  { %173 = vmatpush.bf16.msra.mxu0 %v269_v10 }
  0x1b   :  { %187 = vmatpush.bf16.msra.mxu1 %v277_v11 }
  0x1e   :  { %174 = vmatpush.bf16.msra.mxu0 %v268_v12 }
  0x1f   :  { %188 = vmatpush.bf16.msra.mxu1 %v276_v13 }
  0x22   :  { %175 = vmatpush.bf16.msra.mxu0 %v267_v14 }
  0x23   :  { %189 = vmatpush.bf16.msra.mxu1 %v275_v15 }
  0x25   :  { %176 = vmatmul.bf16.vlgmr.msra.gmra.mxu0 %v34_v20 }
  0x26   :  { %190 = vmatmul.bf16.vlgmr.msra.gmra.mxu1 %v35_v21 }
  0xa2   :  { %v177_v23 = vpop.f32.mrf.mxu0 }
  0xa3   :  { %v191_v24 = vpop.f32.mrf.mxu1  ;;  %v178_v25 = vadd.f32 %v286_v22, %v177_v23 }
  0xa5   :  { %v192_v26 = vadd.f32 %v191_v24, %v178_v25 }
  0xa7   :  { %196 = vst [vmem:[%s363_s3] sm:$0xff] %v192_v26 }
  0xaa   :  { %v179_v27 = vpop.f32.mrf.mxu0 }
  0xab   :  { %v180_v28 = vadd.f32 %v286_v22, %v179_v27  ;;  %v193_v29 = vpop.f32.mrf.mxu1 }
  0xad   :  { %v194_v30 = vadd.f32 %v193_v29, %v180_v28 }
  0xaf   :  { %197 = vst [vmem:[%s363_s3 + $0x8] sm:$0xff] %v194_v30 }
  0xb0   :  { %202 = vsyncpa [#allocation3], 1 }

// kernel: _lambda_.36
= control target key start
LH: loop header
LB: loop body
LE: loop exit
PB: predicated region body
PF: predicated region fallthrough
CT: control target
= control target key end

     0   :  { %s1248_s15 = smov 0   ;;  %s1250_s16 = smov 0   ;;  %s1579_s0 = inlined_call_operand.vmem [shape: f32[2,12,384], index: 0, kind: input, shape index: {}]   ;;  %s1580_s1 = inlined_call_operand.vmem [shape: f32[2,8,384], index: 1, kind: input, shape index: {}, may-alias: {1,2}]   ;;  %s1581_s2 = inlined_call_operand.vmem [shape: f32[2,8,384], index: 2, kind: input, shape index: {}, may-alias: {1,2}]   ;;  %s1582_s3 = inlined_call_operand.vmem [shape: f32[2,1,8], index: 3, kind: input, shape index: {}]   ;;  %s1583_s4 = inlined_call_operand.vmem [shape: f32[2,12,128], index: 4, kind: output, shape index: {}]  }
   0x1   :  { %s1252_s17 = smov 0  }
   0x2 LB: > { %s1060_s18 = sadd.s32 4294967295, %s1213_s17   ;;  %s1265_s19 = sadd.s32 1, %s1213_s17   ;;  %s1213_s17 = sphi %s1252_s17, %s1588_s17   ;;  %s1209_s16 = sphi %s1250_s16, %s1587_s16   ;;  %s1205_s15 = sphi %s1248_s15, %s1586_s15  }
   0x3   : > { %s18_s20 = ssub.s32 %s1213_s17, %s1265_s19  ;;  %s21_s21 = sadd.s32 1, %s1209_s16 }
   0x4   : > { %p19_p0 = scmp.eq.s32.totalorder %s18_s20, 0  ;;  %p28_p1 = scmp.ne.s32.totalorder %s1209_s16, %s1205_s15 }
   0x5   : > { %p29_p2 = scmp.eq.s32.totalorder %s1213_s17, 0  ;;  %p1063_p4 = scmp.ge.s32.totalorder %s1213_s17, 2 }
   0x6   : > { %s1274_s22 = scalar_select %p19_p0, %s1209_s16, %s21_s21  }
   0x7   : > { %p30_p3 = por %p29_p2, %p28_p1  ;;  %158 = sbr.rel (%p1063_p4) target bundleno = 19 (0x13), region = 16 }
   0xc   : > { %161 = sbr.rel (!%p30_p3) target bundleno = 19 (0x13), region = 20  ;;  %s163_s23 = sand.u32 (%p30_p3), 1, %s1209_s16  }
   0xd   : > { %s1065_s24 = smul.u32 (%p30_p3), 48, %s1213_s17  ;;  %s1064_s25 = sshll.u32 (%p30_p3), %s163_s23, 4 }
   0xe   : > { %s165_s29 = scalar_lea.vmem (%p30_p3), [#allocation2], %s1064_s25 }
   0xf   : > { %s983_s28 = scalar_lea.vmem (%p30_p3), %s1579_s0, %s1065_s24 }
  0x10   : > { %v1066_v0 = vld [vmem:[%s983_s28 + $0x8] sm:$0xff] (%p30_p3)  ;;  %v1067_v1 = vld [vmem:[%s983_s28 + $0x20] sm:$0xff] (%p30_p3) }
  0x11   : > { %201 = vst [vmem:[%s165_s29] sm:$0xff] %v1066_v0 }
  0x12   : > { %203 = vst [vmem:[%s165_s29 + $0x8] sm:$0xff] %v1067_v1 }
  0x13 PF: > { %p1068_p5 = scmp.ge.s32.totalorder %s1213_s17, 1  ;;  %p231_p6 = scmp.lt.s32.totalorder %s1213_s17, 3 }
  0x15   : > { %p232_p7 = pnand %p1068_p5, %p231_p6 }
  0x16   : > { %p277_p8 = scmp.lt.s32.totalorder (!%p232_p7), %s1060_s18, 1  ;;  %s238_s30 = sand.u32 (!%p232_p7), 1, %s1205_s15  }
  0x17   : > { %235 = sbr.rel (%p232_p7) target bundleno = 1188 (0x4a4), region = 70  ;;  %s1069_s5 = sshll.u32 (!%p232_p7), %s238_s30, 4 }
  0x18   : > { %s240_s7 = scalar_lea.vmem (!%p232_p7), [#allocation2], %s1069_s5  ;;  %s1215_s11 = smov (!%p232_p7), 112  }
  0x19   : > { %s1216_s12 = smov (!%p232_p7), 80   ;;  %s1217_s13 = smov (!%p232_p7), 48  }
  0x1a   : > { %s1218_s14 = smov (!%p232_p7), 32   ;;  %s1220_s21 = smov (!%p232_p7), 96  }
  0x1b   : > { %s1221_s23 = smov (!%p232_p7), 64   ;;  %s1222_s24 = smov (!%p232_p7), 16  }
  0x1c   : > { %s1590_s18 = smov (!%p277_p8, %s1060_s18), 1  ;;  %v297_v2 = vld [vmem:[%s240_s7] sm:$0xff]  ;;  %v298_v3 = vld [vmem:[%s240_s7 + $0x8] sm:$0xf]  ;;  %vm306_vm0 = vcmask 130048   ;;  %v1219_v15 = vmov 0  }
  0x1d   : > { %s1094_s6 = smul.u32 24, %s1590_s18  ;;  %v302_v4 = vmul.f32 0.25, %v297_v2  ;;  %v303_v5 = vmul.f32 0.25, %v298_v3  ;;  %s290_s20 = scalar_lea.vmem %s1582_s3, %s1590_s18  ;;  %vm333_vm3 = vcmask 64512   ;;  %vm337_vm4 = vcmask 60416  }
  0x1e   : > { %v301_v13 = vld [vmem:[%s290_s20] sm:$0x1]  ;;  %vm362_vm5 = vcmask 1043456   ;;  %vm938_vm6 = vcmask 261120   ;;  %vm941_vm7 = vcmask 392192   ;;  %vm944_vm8 = vcmask 523264  }
  0x1f   : > { %s281_s10 = scalar_lea.vmem %s1580_s1, %s1094_s6  ;;  %v1297_v7 = vpack.c.bf16 %v303_v5, %v302_v4  ;;  %vm327_vm1 = vcmp.eq.f32.partialorder %v301_v13, 0.0  ;;  %s1009_s27 = scalar_lea.vmem %s1581_s2, %s1094_s6  ;;  %vm950_vm9 = vcmask 785408   ;;  %vm947_vm10 = vcmask 654336  }
  0x20   : > { %v299_v6 = vld [vmem:[%s281_s10] sm:$0xff]  ;;  %v328_v16 = vsel %vm327_vm1, 1, %v1219_v15  ;;  %v1074_v27 = vld [vmem:[%s1009_s27 + $0x10] sm:$0xff]  ;;  %s1093_s28 = sshll.u32 %s1590_s18, 4  ;;  %vm953_vm11 = vcmask 916480  }
  0x21   : > { %v305_v8 = vpack.c.bf16 %v299_v6, %v299_v6  ;;  %381 = vrot.lane.b32.xlu2 %v1297_v7, %s1215_s11  ;;  %v329_v17 = vperm.slane %v328_v16, 0  ;;  %v1342_v28 = vpack.c.bf16 %v1074_v27, %v1074_v27  ;;  %s295_s5 = scalar_lea.vmem %s1583_s4, %s1093_s28 }
  0x23   : > { %v311_v9 = vsel %vm306_vm0, %v305_v8, 0  ;;  %384 = vrot.lane.b32.xlu1 %v305_v8, %s1215_s11  ;;  %vm1316_vm2 = vcmp.eq.s32.totalorder %v329_v17, 1  ;;  %v364_v29 = vsel %vm362_vm5, %v1342_v28, 0 }
  0x24   : > { %320 = vmatpush.bf16.xpose.msra.mxu0 %v311_v9  ;;  %373 = vmatpush.bf16.msra.mxu1 %v364_v29 }
  0x29   : > { %527 = vrot.lane.b32.xlu2 %v305_v8, %s1216_s12 }
  0x2b   : > { %1075 = vmatmul.msk.bf16.vlgmr.msra.gmra.mxu0 %vm306_vm0, %v1297_v7 }
  0x31   : > { %525 = vrot.lane.b32.xlu2 %v1297_v7, %s1216_s12 }
  0x39   : > { %669 = vrot.lane.b32.xlu2 %v305_v8, %s1217_s13 }
  0x41   : > { %740 = vrot.lane.b32.xlu2 %v305_v8, %s1218_s14 }
  0x7b   : > { %v382_v10 = vpop.permute.xlu2 %381 }
  0x83   : > { %v528_v11 = vpop.permute.xlu2 %527 }
  0x84   : > { %v533_v12 = vsel %vm306_vm0, %v528_v11, 0 }
  0x85   : > { %542 = vmatpush.bf16.xpose.msrb.mxu0 %v533_v12 }
  0x8b   : > { %v526_v14 = vpop.permute.xlu2 %525 }
  0x8c   : > { %1081 = vmatmul.msk.bf16.vlgmr.msrb.gmra.mxu0 %vm306_vm0, %v526_v14 }
  0x93   : > { %v670_v36 = vpop.permute.xlu2 %669 }
  0x94   : > { %v675_v38 = vsel %vm306_vm0, %v670_v36, 0 }
  0x95   : > { %v385_v25 = vpop.permute.xlu1 %384  ;;  %684 = vmatpush.bf16.xpose.msra.mxu0 %v675_v38 }
  0x96   : > { %v390_v26 = vsel %vm306_vm0, %v385_v25, 0 }
  0x97   : > { %399 = vmatpush.bf16.xpose.msra.mxu2 %v390_v26 }
  0x9b   : > { %v741_v62 = vpop.permute.xlu2 %740 }
  0x9e   : > { %1077 = vmatmul.msk.bf16.vlgmr.msra.gmra.mxu2 %vm306_vm0, %v382_v10 }
  0xa8   : > { %v322_v19 = vpop.f32.mrf.mxu0 }
  0xa9   : > { %v331_v20 = vsel %vm1316_vm2, -1e+09, %v322_v19 }
  0xaa   : > { %v334_v21 = vsel %vm333_vm3, %v331_v20, -inf }
  0xab   : > { %335 = vmax.xlane.f32.xlu0 %v334_v21 }
  0xb0   : > { %v324_v22 = vpop.f32.mrf.mxu0 }
  0xb1   : > { %v332_v23 = vsel %vm1316_vm2, -1e+09, %v324_v22 }
  0xb2   : > { %v338_v24 = vsel %vm337_vm4, %v332_v23, -inf }
  0xb3   : > { %339 = vmax.xlane.f32.xlu0 %v338_v24 }
  0xc7   : > { %456 = vrot.lane.b32.xlu0 %v305_v8, %s1220_s21 }
  0xcf   : > { %454 = vrot.lane.b32.xlu0 %v1297_v7, %s1220_s21 }
  0xd7   : > { %598 = vrot.lane.b32.xlu0 %v305_v8, %s1221_s23 }
  0xdf   : > { %667 = vrot.lane.b32.xlu0 %v1297_v7, %s1217_s13 }
  0xe7   : > { %811 = vrot.lane.b32.xlu0 %v305_v8, %s1222_s24 }
  0xef   : > { %809 = vrot.lane.b32.xlu0 %v1297_v7, %s1222_s24 }
 0x109   : > { %v544_v30 = vpop.f32.mrf.mxu0 }
 0x10a   : > { %v1372_v59 = vsel %vm1316_vm2, -1e+09, %v544_v30 }
 0x10b   : > { %v551_v61 = vsel %vm333_vm3, %v1372_v59, -inf }
 0x111   : > { %v546_v34 = vpop.f32.mrf.mxu0 }
 0x112   : > { %v1348_v35 = vsel %vm1316_vm2, -1e+09, %v546_v34 }
 0x113   : > { %v554_v37 = vsel %vm337_vm4, %v1348_v35, -inf }
 0x119   : > { %555 = vmax.xlane.f32.xlu0 %v554_v37 }
 0x11e   : > { %v336_v31 = vpop.xlane.xlu0 %335 }
 0x11f   : > { %v341_v32 = vsub.f32 %v331_v20, %v336_v31 }
 0x121   : > { %v343_v33 = vmul.f32 1.442695, %v341_v32  ;;  %v401_v53 = vpop.f32.mrf.mxu2 }
 0x122   : > { %v1368_v58 = vsel %vm1316_vm2, -1e+09, %v401_v53 }
 0x123   : > { %1127 = vpow2.f32 %v343_v33  ;;  %v408_v60 = vsel %vm333_vm3, %v1368_v58, -inf }
 0x126   : > { %v340_v39 = vpop.xlane.xlu0 %339 }
 0x127   : > { %v342_v40 = vsub.f32 %v332_v23, %v340_v39 }
 0x129   : > { %v1128_v41 = vpop.eup %1127  ;;  %v345_v42 = vmul.f32 1.442695, %v342_v40  ;;  %v403_v55 = vpop.f32.mrf.mxu2 }
 0x12a   : > { %v347_v43 = vsel %vm333_vm3, %v1128_v41, 0.0  ;;  %v407_v56 = vsel %vm1316_vm2, -1e+09, %v403_v55 }
 0x12b   : > { %1129 = vpow2.f32 %v345_v42  ;;  %348 = vadd.xlane.f32.xlu1 %v347_v43  ;;  %v411_v57 = vsel %vm337_vm4, %v407_v56, -inf }
 0x131   : > { %v1130_v44 = vpop.eup %1129 }
 0x132   : > { %v350_v45 = vsel %vm337_vm4, %v1130_v44, 0.0 }
 0x133   : > { %351 = vadd.xlane.f32.xlu2 %v350_v45 }
 0x139   : > { %v457_v46 = vpop.permute.xlu0 %456 }
 0x13a   : > { %v462_v47 = vsel %vm306_vm0, %v457_v46, 0 }
 0x13b   : > { %471 = vmatpush.bf16.xpose.msrb.mxu1 %v462_v47 }
 0x141   : > { %v455_v48 = vpop.permute.xlu0 %454 }
 0x144   : > { %596 = vrot.lane.b32.xlu1 %v1297_v7, %s1221_s23 }
 0x149   : > { %v599_v49 = vpop.permute.xlu0 %598 }
 0x14a   : > { %v604_v6 = vsel %vm306_vm0, %v599_v49, 0 }
 0x14b   : > { %738 = vrot.lane.b32.xlu2 %v1297_v7, %s1218_s14  ;;  %v746_v7 = vsel %vm306_vm0, %v741_v62, 0 }
 0x151   : > { %v668_v50 = vpop.permute.xlu0 %667 }
 0x152   : > { %1085 = vmatmul.msk.bf16.vlgmr.msra.gmra.mxu0 %vm306_vm0, %v668_v50 }
 0x159   : > { %v812_v51 = vpop.permute.xlu0 %811 }
 0x15a   : > { %v817_v52 = vsel %vm306_vm0, %v812_v51, 0 }
 0x15b   : > { %826 = vmatpush.bf16.xpose.msrb.mxu0 %v817_v52 }
 0x161   : > { %v810_v54 = vpop.permute.xlu0 %809 }
 0x162   : > { %1089 = vmatmul.msk.bf16.vlgmr.msrb.gmra.mxu0 %vm306_vm0, %v810_v54 }
 0x16e   : > { %412 = vmax.xlane.f32.xlu1 %v411_v57 }
 0x174   : > { %409 = vmax.xlane.f32.xlu2 %v408_v60 }
 0x176   : > { %552 = vmax.xlane.f32.xlu1 %v551_v61 }
 0x18c   : > { %574 = vrot.lane.b32.xlu2 %v1342_v28, %s1216_s12  ;;  %v556_v12 = vpop.xlane.xlu0 %555 }
 0x18d   : > { %v558_v14 = vsub.f32 %v1348_v35, %v556_v12 }
 0x18f   : > { %432 = vrot.lane.b32.xlu1 %v1342_v28, %s1215_s11  ;;  %v561_v17 = vmul.f32 1.442695, %v558_v14 }
 0x19e   : > { %v349_v63 = vpop.xlane.xlu1 %348 }
 0x19f   : > { %1131 = vrcp.f32 %v349_v63 }
 0x1a5   : > { %v1132_v1 = vpop.eup %1131 }
 0x1a6   : > { %v352_v0 = vpop.xlane.xlu2 %351  ;;  %v355_v3 = vmul.f32 %v1132_v1, %v1128_v41 }
 0x1a7   : > { %1133 = vrcp.f32 %v352_v0 }
 0x1a8   : > { %1135 = vpow2.f32 %v561_v17 }
 0x1ad   : > { %v1134_v2 = vpop.eup %1133 }
 0x1ae   : > { %v356_v4 = vmul.f32 %v1134_v2, %v1130_v44  ;;  %v739_v21 = vpop.permute.xlu2 %738  ;;  %v1401_v26 = vpop.eup %1135 }
 0x1af   : > { %v566_v31 = vsel %vm337_vm4, %v1401_v26, 0.0 }
 0x1b0   : > { %v357_v5 = vpack.c.bf16 %v356_v4, %v355_v3 }
 0x1b2   : > { %1076 = vmatmul.msk.bf16.vlgmr.msra.gmra.mxu1 %vm333_vm3, %v357_v5 }
 0x1b3   : > { %613 = vmatpush.bf16.xpose.msra.mxu1 %v604_v6 }
 0x1b6   : > { %v597_v9 = vpop.permute.xlu1 %596 }
 0x1c2   : > { %1079 = vmatmul.msk.bf16.vlgmr.msrb.gmra.mxu1 %vm306_vm0, %v455_v48 }
 0x1c3   : > { %755 = vmatpush.bf16.xpose.msrb.mxu1 %v746_v7 }
 0x1cf   : > { %v686_v8 = vpop.f32.mrf.mxu0 }
 0x1d0   : > { %v691_v10 = vsel %vm1316_vm2, -1e+09, %v686_v8 }
 0x1d1   : > { %v693_v11 = vsel %vm333_vm3, %v691_v10, -inf }
 0x1d2   : > { %1083 = vmatmul.msk.bf16.vlgmr.msra.gmra.mxu1 %vm306_vm0, %v597_v9  ;;  %694 = vmax.xlane.f32.xlu0 %v693_v11 }
 0x1d7   : > { %v688_v13 = vpop.f32.mrf.mxu0 }
 0x1d8   : > { %v692_v15 = vsel %vm1316_vm2, -1e+09, %v688_v13 }
 0x1d9   : > { %v696_v16 = vsel %vm337_vm4, %v692_v15, -inf }
 0x1da   : > { %697 = vmax.xlane.f32.xlu2 %v696_v16 }
 0x1df   : > { %v828_v19 = vpop.f32.mrf.mxu0 }
 0x1e0   : > { %v1396_v20 = vsel %vm1316_vm2, -1e+09, %v828_v19 }
 0x1e1   : > { %v413_v22 = vpop.xlane.xlu1 %412  ;;  %v835_v23 = vsel %vm333_vm3, %v1396_v20, -inf }
 0x1e2   : > { %v415_v24 = vsub.f32 %v407_v56, %v413_v22  ;;  %1087 = vmatmul.msk.bf16.vlgmr.msrb.gmra.mxu1 %vm306_vm0, %v739_v21  ;;  %836 = vmax.xlane.f32.xlu2 %v835_v23 }
 0x1e4   : > { %v418_v25 = vmul.f32 1.442695, %v415_v24 }
 0x1e6   : > { %503 = vrot.lane.b32.xlu0 %v1342_v28, %s1220_s21  ;;  %1137 = vpow2.f32 %v418_v25 }
 0x1e7   : > { %v830_v27 = vpop.f32.mrf.mxu0  ;;  %v410_v33 = vpop.xlane.xlu2 %409 }
 0x1e8   : > { %v1407_v29 = vsel %vm1316_vm2, -1e+09, %v830_v27  ;;  %v414_v40 = vsub.f32 %v1368_v58, %v410_v33 }
 0x1e9   : > { %v838_v30 = vsel %vm337_vm4, %v1407_v29, -inf  ;;  %v553_v37 = vpop.xlane.xlu1 %552 }
 0x1ea   : > { %839 = vmax.xlane.f32.xlu1 %v838_v30  ;;  %567 = vadd.xlane.f32.xlu2 %v566_v31  ;;  %v557_v38 = vsub.f32 %v1372_v59, %v553_v37  ;;  %v416_v41 = vmul.f32 1.442695, %v414_v40 }
 0x1ec   : > { %v1413_v32 = vpop.eup %1137  ;;  %v559_v39 = vmul.f32 1.442695, %v557_v38 }
 0x1ed   : > { %v423_v34 = vsel %vm337_vm4, %v1413_v32, 0.0 }
 0x1ee   : > { %1139 = vpow2.f32 %v559_v39 }
 0x1ef   : > { %v575_v35 = vpop.permute.xlu2 %574  ;;  %1141 = vpow2.f32 %v416_v41 }
 0x1f0   : > { %v580_v36 = vsel %vm362_vm5, %v575_v35, 0 }
 0x1f1   : > { %589 = vmatpush.bf16.msrb.mxu2 %v580_v36 }
 0x1f2   : > { %424 = vadd.xlane.f32.xlu2 %v423_v34 }
 0x1f4   : > { %v1420_v42 = vpop.eup %1139 }
 0x1f5   : > { %v563_v43 = vsel %vm333_vm3, %v1420_v42, 0.0  ;;  %v1424_v44 = vpop.eup %1141 }
 0x1f6   : > { %v420_v45 = vsel %vm333_vm3, %v1424_v44, 0.0 }
 0x201   : > { %v433_v12 = vpop.permute.xlu1 %432 }
 0x202   : > { %v438_v13 = vsel %vm362_vm5, %v433_v12, 0 }
 0x203   : > { %447 = vmatpush.bf16.msra.mxu3 %v438_v13 }
 0x210   : > { %564 = vadd.xlane.f32.xlu0 %v563_v43 }
 0x218   : > { %421 = vadd.xlane.f32.xlu0 %v420_v45 }
 0x22f   : > { %v1428_v46 = vpop.f32.mrf.mxu1 }
 0x237   : > { %v1430_v47 = vpop.f32.mrf.mxu1 }
 0x23f   : > { %v473_v48 = vpop.f32.mrf.mxu1 }
 0x240   : > { %v1434_v49 = vsel %vm1316_vm2, -1e+09, %v473_v48 }
 0x241   : > { %v480_v50 = vsel %vm333_vm3, %v1434_v49, -inf }
 0x242   : > { %481 = vmax.xlane.f32.xlu0 %v480_v50 }
 0x245   : > { %v695_v51 = vpop.xlane.xlu0 %694 }
 0x246   : > { %v699_v52 = vsub.f32 %v691_v10, %v695_v51 }
 0x247   : > { %v475_v53 = vpop.f32.mrf.mxu1 }
 0x248   : > { %v701_v54 = vmul.f32 1.442695, %v699_v52  ;;  %v479_v61 = vsel %vm1316_vm2, -1e+09, %v475_v53 }
 0x249   : > { %v483_v1 = vsel %vm337_vm4, %v479_v61, -inf }
 0x24a   : > { %1143 = vpow2.f32 %v701_v54 }
 0x24d   : > { %v698_v55 = vpop.xlane.xlu2 %697 }
 0x24e   : > { %v700_v56 = vsub.f32 %v692_v15, %v698_v55 }
 0x24f   : > { %v615_v57 = vpop.f32.mrf.mxu1 }
 0x250   : > { %v1438_v58 = vpop.eup %1143  ;;  %v703_v59 = vmul.f32 1.442695, %v700_v56  ;;  %v1451_v2 = vsel %vm1316_vm2, -1e+09, %v615_v57 }
 0x251   : > { %v705_v60 = vsel %vm333_vm3, %v1438_v58, 0.0  ;;  %v622_v6 = vsel %vm333_vm3, %v1451_v2, -inf }
 0x252   : > { %1145 = vpow2.f32 %v703_v59  ;;  %706 = vadd.xlane.f32.xlu2 %v705_v60 }
 0x255   : > { %v1474_v14 = vpop.xlane.xlu2 %836 }
 0x257   : > { %v617_v62 = vpop.f32.mrf.mxu1 }
 0x258   : > { %v1444_v63 = vpop.eup %1145  ;;  %v1455_v3 = vsel %vm1316_vm2, -1e+09, %v617_v62  ;;  %v504_v15 = vpop.permute.xlu0 %503 }
 0x259   : > { %v708_v0 = vsel %vm337_vm4, %v1444_v63, 0.0  ;;  %v625_v5 = vsel %vm337_vm4, %v1455_v3, -inf  ;;  %v509_v16 = vsel %vm362_vm5, %v504_v15, 0 }
 0x25a   : > { %709 = vadd.xlane.f32.xlu1 %v708_v0  ;;  %484 = vmax.xlane.f32.xlu2 %v483_v1 }
 0x25b   : > { %518 = vmatpush.bf16.msrb.mxu3 %v509_v16 }
 0x25d   : > { %v568_v18 = vpop.xlane.xlu2 %567  ;;  %v840_v40 = vpop.xlane.xlu1 %839 }
 0x25e   : > { %1147 = vrcp.f32 %v568_v18 }
 0x25f   : > { %v757_v4 = vpop.f32.mrf.mxu1 }
 0x260   : > { %v1463_v7 = vsel %vm1316_vm2, -1e+09, %v757_v4 }
 0x261   : > { %v764_v11 = vsel %vm333_vm3, %v1463_v7, -inf }
 0x262   : > { %626 = vmax.xlane.f32.xlu1 %v625_v5  ;;  %623 = vmax.xlane.f32.xlu2 %v622_v6 }
 0x264   : > { %v1148_v21 = vpop.eup %1147 }
 0x265   : > { %v425_v19 = vpop.xlane.xlu2 %424  ;;  %v572_v23 = vmul.f32 %v1148_v21, %v1401_v26 }
 0x267   : > { %v759_v8 = vpop.f32.mrf.mxu1 }
 0x268   : > { %v1467_v9 = vsel %vm1316_vm2, -1e+09, %v759_v8  ;;  %v842_v8 = vsub.f32 %v1407_v29, %v840_v40 }
 0x269   : > { %v767_v10 = vsel %vm337_vm4, %v1467_v9, -inf }
 0x26a   : > { %768 = vmax.xlane.f32.xlu0 %v767_v10  ;;  %765 = vmax.xlane.f32.xlu1 %v764_v11  ;;  %v845_v12 = vmul.f32 1.442695, %v842_v8 }
 0x283   : > { %v565_v17 = vpop.xlane.xlu0 %564 }
 0x284   : > { %1149 = vrcp.f32 %v565_v17 }
 0x285   : > { %1151 = vrcp.f32 %v425_v19 }
 0x28a   : > { %v1150_v22 = vpop.eup %1149 }
 0x28b   : > { %v571_v24 = vmul.f32 %v1150_v22, %v1420_v42  ;;  %v422_v25 = vpop.xlane.xlu0 %421  ;;  %v1152_v30 = vpop.eup %1151 }
 0x28c   : > { %1153 = vrcp.f32 %v422_v25  ;;  %v429_v34 = vmul.f32 %v1152_v30, %v1413_v32 }
 0x28d   : > { %v573_v27 = vpack.c.bf16 %v572_v23, %v571_v24 }
 0x28f   : > { %1082 = vmatmul.msk.bf16.vlgmr.msrb.gmra.mxu2 %vm333_vm3, %v573_v27 }
 0x292   : > { %v1154_v31 = vpop.eup %1153 }
 0x293   : > { %v428_v33 = vmul.f32 %v1154_v31, %v1424_v44 }
 0x295   : > { %v430_v35 = vpack.c.bf16 %v429_v34, %v428_v33 }
 0x297   : > { %1078 = vmatmul.msk.bf16.vlgmr.msra.gmra.mxu3 %vm333_vm3, %v430_v35 }
 0x2b5   : > { %v482_v36 = vpop.xlane.xlu0 %481 }
 0x2b6   : > { %v486_v37 = vsub.f32 %v1434_v49, %v482_v36 }
 0x2b8   : > { %v488_v26 = vmul.f32 1.442695, %v486_v37 }
 0x2ba   : > { %1155 = vpow2.f32 %v488_v26 }
 0x2c0   : > { %v1484_v38 = vpop.eup %1155 }
 0x2c1   : > { %v492_v39 = vsel %vm333_vm3, %v1484_v38, 0.0 }
 0x2c2   : > { %493 = vadd.xlane.f32.xlu0 %v492_v39 }
 0x2c5   : > { %v707_v41 = vpop.xlane.xlu2 %706 }
 0x2c6   : > { %1157 = vrcp.f32 %v707_v41 }
 0x2cc   : > { %v1158_v45 = vpop.eup %1157 }
 0x2cd   : > { %v710_v42 = vpop.xlane.xlu1 %709  ;;  %v485_v43 = vpop.xlane.xlu2 %484  ;;  %v1489_v49 = vmul.f32 %v1158_v45, %v1438_v58 }
 0x2ce   : > { %1159 = vrcp.f32 %v710_v42  ;;  %v487_v32 = vsub.f32 %v479_v61, %v485_v43 }
 0x2d0   : > { %v490_v44 = vmul.f32 1.442695, %v487_v32 }
 0x2d2   : > { %1161 = vpow2.f32 %v490_v44 }
 0x2d4   : > { %v1160_v48 = vpop.eup %1159 }
 0x2d5   : > { %v1492_v50 = vmul.f32 %v1160_v48, %v1444_v63  ;;  %v627_v51 = vpop.xlane.xlu1 %626  ;;  %v624_v52 = vpop.xlane.xlu2 %623 }
 0x2d6   : > { %v629_v53 = vsub.f32 %v1455_v3, %v627_v51  ;;  %v628_v54 = vsub.f32 %v1451_v2, %v624_v52  ;;  %v841_v3 = vsub.f32 %v1396_v20, %v1474_v14 }
 0x2d7   : > { %v715_v55 = vpack.c.bf16 %v1492_v50, %v1489_v49 }
 0x2d8   : > { %v1162_v56 = vpop.eup %1161  ;;  %v632_v57 = vmul.f32 1.442695, %v629_v53  ;;  %v630_v59 = vmul.f32 1.442695, %v628_v54  ;;  %v843_v6 = vmul.f32 1.442695, %v841_v3 }
 0x2d9   : > { %v495_v60 = vsel %vm337_vm4, %v1162_v56, 0.0 }
 0x2da   : > { %1163 = vpow2.f32 %v632_v57  ;;  %496 = vadd.xlane.f32.xlu2 %v495_v60 }
 0x2db   : > { %1165 = vpow2.f32 %v630_v59 }
 0x2dd   : > { %v766_v0 = vpop.xlane.xlu1 %765  ;;  %v769_v4 = vpop.xlane.xlu0 %768 }
 0x2de   : > { %v770_v1 = vsub.f32 %v1463_v7, %v766_v0  ;;  %v771_v5 = vsub.f32 %v1467_v9, %v769_v4 }
 0x2e0   : > { %v1499_v58 = vpop.eup %1163  ;;  %v772_v2 = vmul.f32 1.442695, %v770_v1  ;;  %v774_v10 = vmul.f32 1.442695, %v771_v5 }
 0x2e1   : > { %v1166_v61 = vpop.eup %1165  ;;  %v637_v62 = vsel %vm337_vm4, %v1499_v58, 0.0 }
 0x2e2   : > { %v634_v63 = vsel %vm333_vm3, %v1166_v61, 0.0  ;;  %638 = vadd.xlane.f32.xlu0 %v637_v62  ;;  %1167 = vpow2.f32 %v772_v2 }
 0x2e3   : > { %635 = vadd.xlane.f32.xlu1 %v634_v63  ;;  %1169 = vpow2.f32 %v843_v6 }
 0x2e4   : > { %1171 = vpow2.f32 %v774_v10 }
 0x2e5   : > { %1173 = vpow2.f32 %v845_v12 }
 0x2e8   : > { %v1515_v11 = vpop.eup %1167 }
 0x2e9   : > { %v776_v7 = vsel %vm333_vm3, %v1515_v11, 0.0  ;;  %v1519_v13 = vpop.eup %1169 }
 0x2ea   : > { %v1172_v20 = vpop.eup %1171  ;;  %v847_v9 = vsel %vm333_vm3, %v1519_v13, 0.0 }
 0x2eb   : > { %v1523_v14 = vpop.eup %1173  ;;  %v779_v29 = vsel %vm337_vm4, %v1172_v20, 0.0 }
 0x2ec   : > { %v850_v15 = vsel %vm337_vm4, %v1523_v14, 0.0 }
 0x2f2   : > { %787 = vrot.lane.b32.xlu2 %v1342_v28, %s1218_s14 }
 0x2f6   : > { %716 = vrot.lane.b32.xlu0 %v1342_v28, %s1217_s13 }
 0x2fc   : > { %645 = vrot.lane.b32.xlu1 %v1342_v28, %s1221_s23 }
 0x312   : > { %v591_v17 = vpop.f32.mrf.mxu2 }
 0x31a   : > { %v449_v16 = vpop.f32.mrf.mxu3  ;;  %v593_v23 = vpop.f32.mrf.mxu2 }
 0x31b   : > { %777 = vadd.xlane.f32.xlu2 %v776_v7 }
 0x320   : > { %848 = vadd.xlane.f32.xlu0 %v847_v9 }
 0x322   : > { %v451_v18 = vpop.f32.mrf.mxu3 }
 0x323   : > { %780 = vadd.xlane.f32.xlu2 %v779_v29 }
 0x326   : > { %851 = vadd.xlane.f32.xlu1 %v850_v15 }
 0x334   : > { %884 = vrot.lane.b32.xlu0 %v451_v18, %s1222_s24 }
 0x335   : > { %v494_v19 = vpop.xlane.xlu0 %493 }
 0x336   : > { %1175 = vrcp.f32 %v494_v19 }
 0x33b   : > { %858 = vrot.lane.b32.xlu2 %v1342_v28, %s1222_s24 }
 0x33c   : > { %v1176_v22 = vpop.eup %1175 }
 0x33d   : > { %v500_v25 = vmul.f32 %v1176_v22, %v1484_v38 }
 0x343   : > { %882 = vrot.lane.b32.xlu2 %v449_v16, %s1222_s24 }
 0x34b   : > { %898 = vrot.lane.b32.xlu2 %v591_v17, %s1217_s13 }
 0x34d   : > { %v497_v21 = vpop.xlane.xlu2 %496 }
 0x34e   : > { %1177 = vrcp.f32 %v497_v21 }
 0x353   : > { %900 = vrot.lane.b32.xlu2 %v593_v23, %s1217_s13 }
 0x354   : > { %v1178_v24 = vpop.eup %1177 }
 0x355   : > { %v501_v27 = vmul.f32 %v1178_v24, %v1162_v56  ;;  %v639_v28 = vpop.xlane.xlu0 %638  ;;  %v788_v26 = vpop.permute.xlu2 %787 }
 0x356   : > { %v636_v31 = vpop.xlane.xlu1 %635  ;;  %1179 = vrcp.f32 %v639_v28  ;;  %v793_v41 = vsel %vm362_vm5, %v788_v26, 0 }
 0x357   : > { %v502_v30 = vpack.c.bf16 %v501_v27, %v500_v25  ;;  %1181 = vrcp.f32 %v636_v31 }
 0x359   : > { %1080 = vmatmul.msk.bf16.vlgmr.msrb.gmra.mxu3 %vm333_vm3, %v502_v30 }
 0x35c   : > { %v1180_v34 = vpop.eup %1179 }
 0x35d   : > { %v1182_v36 = vpop.eup %1181  ;;  %v643_v39 = vmul.f32 %v1180_v34, %v1499_v58 }
 0x35e   : > { %v642_v37 = vmul.f32 %v1182_v36, %v1166_v61 }
 0x360   : > { %v644_v42 = vpack.c.bf16 %v643_v39, %v642_v37 }
 0x368   : > { %v717_v33 = vpop.permute.xlu0 %716 }
 0x369   : > { %v722_v35 = vsel %vm362_vm5, %v717_v33, 0 }
 0x36a   : > { %731 = vmatpush.bf16.msra.mxu2 %v722_v35 }
 0x36d   : > { %1086 = vmatmul.msk.bf16.vlgmr.msra.gmra.mxu2 %vm333_vm3, %v715_v55 }
 0x36e   : > { %v646_v38 = vpop.permute.xlu1 %645 }
 0x36f   : > { %v651_v40 = vsel %vm362_vm5, %v646_v38, 0 }
 0x370   : > { %660 = vmatpush.bf16.msra.mxu3 %v651_v40 }
 0x373   : > { %1084 = vmatmul.msk.bf16.vlgmr.msra.gmra.mxu3 %vm333_vm3, %v644_v42 }
 0x374   : > { %802 = vmatpush.bf16.msrb.mxu3 %v793_v41 }
 0x38e   : > { %v778_v43 = vpop.xlane.xlu2 %777 }
 0x38f   : > { %1183 = vrcp.f32 %v778_v43 }
 0x393   : > { %v849_v32 = vpop.xlane.xlu0 %848 }
 0x395   : > { %v1184_v48 = vpop.eup %1183 }
 0x396   : > { %v781_v44 = vpop.xlane.xlu2 %780  ;;  %v784_v51 = vmul.f32 %v1184_v48, %v1515_v11 }
 0x397   : > { %1185 = vrcp.f32 %v781_v44 }
 0x398   : > { %1187 = vrcp.f32 %v849_v32 }
 0x399   : > { %v852_v45 = vpop.xlane.xlu1 %851 }
 0x39a   : > { %1189 = vrcp.f32 %v852_v45 }
 0x39d   : > { %v1186_v49 = vpop.eup %1185 }
 0x39e   : > { %v1188_v50 = vpop.eup %1187  ;;  %v785_v52 = vmul.f32 %v1186_v49, %v1172_v20  ;;  %v859_v53 = vpop.permute.xlu2 %858 }
 0x39f   : > { %v864_v54 = vsel %vm362_vm5, %v859_v53, 0  ;;  %v855_v57 = vmul.f32 %v1188_v50, %v1519_v13 }
 0x3a0   : > { %v1190_v55 = vpop.eup %1189  ;;  %v786_v56 = vpack.c.bf16 %v785_v52, %v784_v51  ;;  %873 = vmatpush.bf16.msrb.mxu2 %v864_v54 }
 0x3a1   : > { %v856_v59 = vmul.f32 %v1190_v55, %v1523_v14 }
 0x3a2   : > { %1088 = vmatmul.msk.bf16.vlgmr.msrb.gmra.mxu3 %vm333_vm3, %v786_v56 }
 0x3a3   : > { %v857_v60 = vpack.c.bf16 %v856_v59, %v855_v57 }
 0x3a5   : > { %1090 = vmatmul.msk.bf16.vlgmr.msrb.gmra.mxu2 %vm333_vm3, %v857_v60 }
 0x3a6   : > { %v883_v6 = vpop.permute.xlu2 %882  ;;  %v885_v11 = vpop.permute.xlu0 %884 }
 0x3a7   : > { %v936_v9 = vsel %vm306_vm0, %v1428_v46, %v883_v6  ;;  %v937_v16 = vsel %vm306_vm0, %v1430_v47, %v885_v11 }
 0x3ae   : > { %v899_v8 = vpop.permute.xlu2 %898 }
 0x3b6   : > { %v901_v10 = vpop.permute.xlu2 %900 }
 0x3dc   : > { %v520_v58 = vpop.f32.mrf.mxu3 }
 0x3dd   : > { %890 = vrot.lane.b32.xlu2 %v520_v58, %s1218_s14 }
 0x3e4   : > { %v522_v61 = vpop.f32.mrf.mxu3 }
 0x3f0   : > { %v733_v62 = vpop.f32.mrf.mxu2 }
 0x3f1   : > { %914 = vrot.lane.b32.xlu1 %v733_v62, %s1216_s12 }
 0x3f6   : > { %v662_v63 = vpop.f32.mrf.mxu3 }
 0x3f8   : > { %v735_v0 = vpop.f32.mrf.mxu2 }
 0x3f9   : > { %892 = vrot.lane.b32.xlu1 %v522_v61, %s1218_s14  ;;  %916 = vrot.lane.b32.xlu0 %v735_v0, %s1216_s12 }
 0x3fe   : > { %v664_v1 = vpop.f32.mrf.mxu3 }
 0x3ff   : > { %908 = vrot.lane.b32.xlu2 %v664_v1, %s1221_s23 }
 0x401   : > { %906 = vrot.lane.b32.xlu0 %v662_v63, %s1221_s23 }
 0x425   : > { %v804_v2 = vpop.f32.mrf.mxu3 }
 0x426   : > { %922 = vrot.lane.b32.xlu2 %v804_v2, %s1220_s21 }
 0x428   : > { %v875_v3 = vpop.f32.mrf.mxu2 }
 0x429   : > { %930 = vrot.lane.b32.xlu0 %v875_v3, %s1215_s11 }
 0x42d   : > { %v806_v4 = vpop.f32.mrf.mxu3 }
 0x42e   : > { %924 = vrot.lane.b32.xlu1 %v806_v4, %s1220_s21 }
 0x430   : > { %v877_v5 = vpop.f32.mrf.mxu2 }
 0x431   : > { %932 = vrot.lane.b32.xlu2 %v877_v5, %s1215_s11 }
 0x437   : > { %v891_v12 = vpop.permute.xlu2 %890 }
 0x438   : > { %v939_v14 = vsel %vm938_vm6, %v936_v9, %v891_v12 }
 0x439   : > { %v942_v18 = vsel %vm941_vm7, %v939_v14, %v899_v8 }
 0x459   : > { %v909_v20 = vpop.permute.xlu2 %908 }
 0x463   : > { %v915_v13 = vpop.permute.xlu1 %914 }
 0x46b   : > { %v917_v7 = vpop.permute.xlu0 %916  ;;  %v893_v15 = vpop.permute.xlu1 %892 }
 0x46c   : > { %v940_v17 = vsel %vm938_vm6, %v937_v16, %v893_v15 }
 0x46d   : > { %v943_v22 = vsel %vm941_vm7, %v940_v17, %v901_v10 }
 0x46e   : > { %v946_v27 = vsel %vm944_vm8, %v943_v22, %v909_v20 }
 0x46f   : > { %v949_v47 = vsel %vm947_vm10, %v946_v27, %v917_v7 }
 0x473   : > { %v907_v29 = vpop.permute.xlu0 %906 }
 0x474   : > { %v945_v19 = vsel %vm944_vm8, %v942_v18, %v907_v29 }
 0x475   : > { %v948_v23 = vsel %vm947_vm10, %v945_v19, %v915_v13 }
 0x480   : > { %v923_v21 = vpop.permute.xlu2 %922 }
 0x481   : > { %v951_v46 = vsel %vm950_vm9, %v948_v23, %v923_v21 }
 0x48b   : > { %v933_v28 = vpop.permute.xlu2 %932 }
 0x49b   : > { %v931_v24 = vpop.permute.xlu0 %930 }
 0x49c   : > { %v954_v25 = vsel %vm953_vm11, %v951_v46, %v931_v24 }
 0x49d   : > { %956 = vst [vmem:[%s295_s5] sm:$0xff] %v954_v25 }
 0x4a0   : > { %v925_v30 = vpop.permute.xlu1 %924 }
 0x4a1   : > { %v952_v31 = vsel %vm950_vm9, %v949_v47, %v925_v30 }
 0x4a2   : > { %v955_v33 = vsel %vm953_vm11, %v952_v31, %v933_v28 }
 0x4a3   : > { %957 = vst [vmem:[%s295_s5 + $0x8] sm:$0xf] %v955_v33 }
 0x4a4 PF: > { %p11_p9 = scmp.ge.s32.totalorder %s1265_s19, 4   ;;  %s1586_s15 = smov %s1209_s16 }
 0x4a5   : > { %s1587_s16 = smov %s1274_s22  ;;  %s1588_s17 = smov %s1265_s19 }
 0x4a6   :  { %13 = sbr.rel (!%p11_p9) target bundleno = 2 (0x2), region = 118 }

// kernel: _lambda_.37
= control target key start
LH: loop header
LB: loop body
LE: loop exit
PB: predicated region body
PF: predicated region fallthrough
CT: control target
= control target key end

     0   :  { %s1109_s15 = smov 0   ;;  %s1111_s16 = smov 0   ;;  %s1321_s0 = inlined_call_operand.vmem [shape: f32[2,8,384], index: 0, kind: input, shape index: {}]   ;;  %s1322_s1 = inlined_call_operand.vmem [shape: f32[2,12,384], index: 1, kind: input, shape index: {}, may-alias: {1,2}]   ;;  %s1323_s2 = inlined_call_operand.vmem [shape: f32[2,12,384], index: 2, kind: input, shape index: {}, may-alias: {1,2}]   ;;  %s1324_s3 = inlined_call_operand.vmem [shape: f32[2,1,12], index: 3, kind: input, shape index: {}]   ;;  %s1325_s4 = inlined_call_operand.vmem [shape: f32[2,8,128], index: 4, kind: output, shape index: {}]  }
   0x1   :  { %s1113_s17 = smov 0  }
   0x2 LB: > { %s953_s18 = sadd.s32 4294967295, %s1074_s17   ;;  %s1126_s19 = sadd.s32 1, %s1074_s17   ;;  %s1074_s17 = sphi %s1113_s17, %s1331_s17   ;;  %s1070_s16 = sphi %s1111_s16, %s1330_s16   ;;  %s1066_s15 = sphi %s1109_s15, %s1329_s15  }
   0x3   : > { %s44_s20 = ssub.s32 %s1074_s17, %s1126_s19  ;;  %s47_s21 = sadd.s32 1, %s1070_s16 }
   0x4   : > { %p45_p0 = scmp.eq.s32.totalorder %s44_s20, 0  ;;  %p54_p1 = scmp.ne.s32.totalorder %s1070_s16, %s1066_s15 }
   0x5   : > { %p55_p2 = scmp.eq.s32.totalorder %s1074_s17, 0  ;;  %p956_p4 = scmp.ge.s32.totalorder %s1074_s17, 2 }
   0x6   : > { %s1135_s22 = scalar_select %p45_p0, %s1070_s16, %s47_s21  }
   0x7   : > { %p1137_p3 = por %p55_p2, %p54_p1  ;;  %158 = sbr.rel (%p956_p4) target bundleno = 26 (0x1a), region = 16 }
   0xc   : > { %170 = sbr.rel (!%p1137_p3) target bundleno = 19 (0x13), region = 24  ;;  %s172_s24 = sand.u32 (%p1137_p3), 1, %s1070_s16  }
   0xd   : > { %s987_s25 = smul.u32 (%p1137_p3), 48, %s1074_s17  ;;  %s957_s26 = sshll.u32 (%p1137_p3), %s172_s24, 4 }
   0xe   : > { %s174_s30 = scalar_lea.vmem (%p1137_p3), [#allocation2], %s957_s26 }
   0xf   : > { %s177_s29 = scalar_lea.vmem (%p1137_p3), %s1322_s1, %s987_s25 }
  0x10   : > { %v208_v0 = vld [vmem:[%s177_s29] sm:$0xff] (%p1137_p3)  ;;  %v210_v1 = vld [vmem:[%s177_s29 + $0x18] sm:$0xff] (%p1137_p3) }
  0x11   : > { %209 = vst [vmem:[%s174_s30] sm:$0xff] %v208_v0 }
  0x12   : > { %211 = vst [vmem:[%s174_s30 + $0x8] sm:$0xff] %v210_v1 }
  0x13 PF: > { %217 = sbr.rel (!%p1137_p3) target bundleno = 26 (0x1a), region = 62  ;;  %s219_s5 = sand.u32 (%p1137_p3), 1, %s1070_s16  }
  0x14   : > { %s960_s6 = smul.u32 (%p1137_p3), 48, %s1074_s17  ;;  %s959_s7 = sshll.u32 (%p1137_p3), %s219_s5, 4 }
  0x15   : > { %s221_s11 = scalar_lea.vmem (%p1137_p3), [#allocation3], %s959_s7 }
  0x16   : > { %s878_s10 = scalar_lea.vmem (%p1137_p3), %s1323_s2, %s960_s6 }
  0x17   : > { %v961_v2 = vld [vmem:[%s878_s10 + $0x10] sm:$0xff] (%p1137_p3)  ;;  %v962_v3 = vld [vmem:[%s878_s10 + $0x28] sm:$0xff] (%p1137_p3) }
  0x18   : > { %257 = vst [vmem:[%s221_s11] sm:$0xff] %v961_v2 }
  0x19   : > { %259 = vst [vmem:[%s221_s11 + $0x8] sm:$0xff] %v962_v3 }
  0x1a PF: > { %p963_p5 = scmp.ge.s32.totalorder %s1074_s17, 1  ;;  %p270_p6 = scmp.lt.s32.totalorder %s1074_s17, 3 }
  0x1c   : > { %p271_p7 = pnand %p963_p5, %p270_p6 }
  0x1d   : > { %s277_s12 = sand.u32 (!%p271_p7), 1, %s1066_s15   ;;  %p321_p8 = scmp.lt.s32.totalorder (!%p271_p7), %s953_s18, 1 }
  0x1e   : > { %274 = sbr.rel (%p271_p7) target bundleno = 1284 (0x504), region = 104  ;;  %s1161_s13 = sshll.u32 (!%p271_p7), %s277_s12, 4 }
  0x1f   : > { %s279_s14 = scalar_lea.vmem (!%p271_p7), [#allocation2], %s1161_s13  ;;  %s1077_s26 = smov (!%p271_p7), 96  }
  0x20   : > { %s1078_s27 = smov (!%p271_p7), 80   ;;  %s1079_s28 = smov (!%p271_p7), 112  }
  0x21   : > { %s1080_s29 = smov (!%p271_p7), 64   ;;  %s1081_s30 = smov (!%p271_p7), 48  }
  0x22   : > { %s1082_s5 = smov (!%p271_p7), 32   ;;  %s1083_s6 = smov (!%p271_p7), 16  }
  0x23   : > { %v336_v4 = vld [vmem:[%s279_s14] sm:$0xff]  ;;  %v337_v5 = vld [vmem:[%s279_s14 + $0x8] sm:$0xf]  ;;  %vm344_vm0 = vcmask 130048   ;;  %s1333_s18 = smov (!%p321_p8, %s953_s18), 1  ;;  %v1076_v12 = vmov 0  }
  0x24   : > { %v343_v6 = vpack.c.bf16 %v337_v5, %v336_v4  ;;  %s966_s20 = smul.u32 24, %s1333_s18  ;;  %s329_s25 = scalar_lea.vmem %s1324_s3, %s1333_s18  ;;  %vm369_vm3 = vcmask 97280   ;;  %vm386_vm4 = vcmask 1045504   ;;  %vm834_vm5 = vcmask 261120  }
  0x25   : > { %v340_v11 = vld [vmem:[%s329_s25] sm:$0x1]  ;;  %s286_s7 = scalar_lea.vmem [#allocation3], %s1161_s13  ;;  %vm836_vm6 = vcmask 392192   ;;  %vm838_vm7 = vcmask 523264   ;;  %s967_s8 = sshll.u32 %s1333_s18, 3 }
  0x26   : > { %v349_v7 = vsel %vm344_vm0, %v343_v6, 0  ;;  %s898_s23 = scalar_lea.vmem %s1321_s0, %s966_s20  ;;  %vm364_vm1 = vcmp.eq.f32.partialorder %v340_v11, 0.0  ;;  %465 = vrot.lane.b32.xlu2 %v343_v6, %s1077_s26  ;;  %v338_v29 = vld [vmem:[%s286_s7] sm:$0xff]  ;;  %v339_v30 = vld [vmem:[%s286_s7 + $0x8] sm:$0xf]  ;;  %vm840_vm8 = vcmask 654336   ;;  %s333_s11 = scalar_lea.vmem %s1325_s4, %s967_s8 }
  0x27   : > { %358 = vmatpush.bf16.xpose.msra.mxu0 %v349_v7  ;;  %v968_v8 = vld [vmem:[%s898_s23 + $0x8] sm:$0xff]  ;;  %v365_v13 = vsel %vm364_vm1, 1, %v1076_v12  ;;  %v1202_v32 = vpack.c.bf16 %v339_v30, %v338_v29  ;;  %vm842_vm9 = vcmask 785408   ;;  %vm844_vm10 = vcmask 916480  }
  0x28   : > { %v341_v9 = vmul.f32 0.25, %v968_v8  ;;  %v366_v14 = vperm.slane %v365_v13, 0 }
  0x29   : > { %v388_v33 = vsel %vm386_vm4, %v1202_v32, 0 }
  0x2a   : > { %v342_v10 = vpack.c.bf16 %v341_v9, %v341_v9  ;;  %vm1178_vm2 = vcmp.eq.s32.totalorder %v366_v14, 1  ;;  %397 = vmatpush.bf16.msra.mxu1 %v388_v33 }
  0x2e   : > { %969 = vmatmul.msk.bf16.vlgmr.msra.gmra.mxu0 %vm344_vm0, %v342_v10  ;;  %522 = vrot.lane.b32.xlu2 %v343_v6, %s1078_s27 }
  0x36   : > { %463 = vrot.lane.b32.xlu2 %v342_v10, %s1077_s26 }
  0x3e   : > { %520 = vrot.lane.b32.xlu2 %v342_v10, %s1078_s27 }
  0x46   : > { %636 = vrot.lane.b32.xlu2 %v343_v6, %s1081_s30 }
  0x4e   : > { %693 = vrot.lane.b32.xlu2 %v343_v6, %s1082_s5 }
  0x56   : > { %748 = vrot.lane.b32.xlu2 %v342_v10, %s1083_s6 }
  0x80   : > { %v466_v25 = vpop.permute.xlu2 %465 }
  0x81   : > { %v471_v41 = vsel %vm344_vm0, %v466_v25, 0 }
  0x82   : > { %480 = vmatpush.bf16.xpose.msrb.mxu1 %v471_v41 }
  0x88   : > { %v523_v26 = vpop.permute.xlu2 %522 }
  0x89   : > { %v528_v28 = vsel %vm344_vm0, %v523_v26, 0 }
  0x8a   : > { %537 = vmatpush.bf16.xpose.msrb.mxu0 %v528_v28 }
  0x90   : > { %v464_v27 = vpop.permute.xlu2 %463 }
  0x98   : > { %v521_v31 = vpop.permute.xlu2 %520 }
  0x99   : > { %975 = vmatmul.msk.bf16.vlgmr.msrb.gmra.mxu0 %vm344_vm0, %v521_v31 }
  0xa0   : > { %v637_v35 = vpop.permute.xlu2 %636 }
  0xa1   : > { %v642_v37 = vsel %vm344_vm0, %v637_v35, 0 }
  0xa2   : > { %651 = vmatpush.bf16.xpose.msra.mxu0 %v642_v37 }
  0xa8   : > { %v694_v47 = vpop.permute.xlu2 %693 }
  0xa9   : > { %v699_v48 = vsel %vm344_vm0, %v694_v47, 0 }
  0xab   : > { %v360_v16 = vpop.f32.mrf.mxu0 }
  0xac   : > { %v368_v17 = vsel %vm1178_vm2, -1e+09, %v360_v16 }
  0xad   : > { %v370_v18 = vsel %vm369_vm3, %v368_v17, -inf }
  0xae   : > { %371 = vmax.xlane.f32.xlu0 %v370_v18 }
  0xb0   : > { %v749_v52 = vpop.permute.xlu2 %748 }
  0xb3   : > { %v362_v19 = vpop.f32.mrf.mxu0 }
  0xc2   : > { %407 = vrot.lane.b32.xlu0 %v343_v6, %s1079_s28 }
  0xca   : > { %579 = vrot.lane.b32.xlu0 %v343_v6, %s1080_s29 }
  0xd2   : > { %634 = vrot.lane.b32.xlu0 %v342_v10, %s1081_s30 }
  0xda   : > { %691 = vrot.lane.b32.xlu0 %v342_v10, %s1082_s5 }
 0x116   : > { %v539_v54 = vpop.f32.mrf.mxu0 }
 0x117   : > { %v543_v55 = vsel %vm1178_vm2, -1e+09, %v539_v54 }
 0x118   : > { %v544_v56 = vsel %vm369_vm3, %v543_v55, -inf }
 0x119   : > { %545 = vmax.xlane.f32.xlu2 %v544_v56 }
 0x11e   : > { %v541_v57 = vpop.f32.mrf.mxu0 }
 0x121   : > { %v372_v20 = vpop.xlane.xlu0 %371 }
 0x122   : > { %v373_v21 = vsub.f32 %v368_v17, %v372_v20 }
 0x124   : > { %v374_v22 = vmul.f32 1.442695, %v373_v21 }
 0x126   : > { %1020 = vpow2.f32 %v374_v22 }
 0x12c   : > { %v1021_v23 = vpop.eup %1020 }
 0x12d   : > { %v376_v24 = vsel %vm369_vm3, %v1021_v23, 0.0 }
 0x12e   : > { %377 = vadd.xlane.f32.xlu1 %v376_v24 }
 0x134   : > { %v408_v34 = vpop.permute.xlu0 %407 }
 0x135   : > { %v413_v36 = vsel %vm344_vm0, %v408_v34, 0 }
 0x136   : > { %422 = vmatpush.bf16.xpose.msra.mxu2 %v413_v36 }
 0x13c   : > { %v580_v38 = vpop.permute.xlu0 %579 }
 0x13d   : > { %v585_v45 = vsel %vm344_vm0, %v580_v38, 0 }
 0x144   : > { %v635_v40 = vpop.permute.xlu0 %634 }
 0x145   : > { %979 = vmatmul.msk.bf16.vlgmr.msra.gmra.mxu0 %vm344_vm0, %v635_v40 }
 0x147   : > { %404 = vrot.lane.b32.xlu1 %v342_v10, %s1079_s28 }
 0x14c   : > { %v692_v53 = vpop.permute.xlu0 %691 }
 0x14f   : > { %577 = vrot.lane.b32.xlu1 %v342_v10, %s1080_s29 }
 0x157   : > { %750 = vrot.lane.b32.xlu1 %v343_v6, %s1083_s6 }
 0x18c   : > { %v546_v22 = vpop.xlane.xlu2 %545 }
 0x18d   : > { %v547_v24 = vsub.f32 %v543_v55, %v546_v22 }
 0x18f   : > { %v548_v26 = vmul.f32 1.442695, %v547_v24 }
 0x1a1   : > { %v378_v39 = vpop.xlane.xlu1 %377 }
 0x1a2   : > { %1022 = vrcp.f32 %v378_v39 }
 0x1a8   : > { %v1023_v42 = vpop.eup %1022 }
 0x1a9   : > { %v380_v43 = vmul.f32 %v1023_v42, %v1021_v23 }
 0x1ab   : > { %v381_v44 = vpack.c.bf16 %v380_v43, %v380_v43 }
 0x1ad   : > { %970 = vmatmul.msk.bf16.vlgmr.msra.gmra.mxu1 %vm369_vm3, %v381_v44 }
 0x1ae   : > { %594 = vmatpush.bf16.xpose.msra.mxu1 %v585_v45 }
 0x1b9   : > { %v405_v46 = vpop.permute.xlu1 %404 }
 0x1ba   : > { %971 = vmatmul.msk.bf16.vlgmr.msra.gmra.mxu2 %vm344_vm0, %v405_v46 }
 0x1bd   : > { %973 = vmatmul.msk.bf16.vlgmr.msrb.gmra.mxu1 %vm344_vm0, %v464_v27 }
 0x1be   : > { %708 = vmatpush.bf16.xpose.msrb.mxu1 %v699_v48 }
 0x1c1   : > { %v578_v49 = vpop.permute.xlu1 %577 }
 0x1c2   : > { %v653_v58 = vpop.f32.mrf.mxu0 }
 0x1c3   : > { %v1225_v59 = vsel %vm1178_vm2, -1e+09, %v653_v58 }
 0x1c4   : > { %v658_v60 = vsel %vm369_vm3, %v1225_v59, -inf }
 0x1c5   : > { %659 = vmax.xlane.f32.xlu0 %v658_v60 }
 0x1c9   : > { %v751_v50 = vpop.permute.xlu1 %750 }
 0x1ca   : > { %v756_v51 = vsel %vm344_vm0, %v751_v50, 0  ;;  %v655_v61 = vpop.f32.mrf.mxu0 }
 0x1cb   : > { %765 = vmatpush.bf16.xpose.msrb.mxu0 %v756_v51 }
 0x1cd   : > { %977 = vmatmul.msk.bf16.vlgmr.msra.gmra.mxu1 %vm344_vm0, %v578_v49 }
 0x1d2   : > { %983 = vmatmul.msk.bf16.vlgmr.msrb.gmra.mxu0 %vm344_vm0, %v749_v52 }
 0x1dd   : > { %981 = vmatmul.msk.bf16.vlgmr.msrb.gmra.mxu1 %vm344_vm0, %v692_v53 }
 0x22a   : > { %v1229_v62 = vpop.f32.mrf.mxu1 }
 0x232   : > { %v401_v63 = vpop.f32.mrf.mxu1 }
 0x238   : > { %v660_v41 = vpop.xlane.xlu0 %659 }
 0x239   : > { %v661_v42 = vsub.f32 %v1225_v59, %v660_v41 }
 0x23a   : > { %v482_v0 = vpop.f32.mrf.mxu1 }
 0x23b   : > { %v486_v27 = vsel %vm1178_vm2, -1e+09, %v482_v0  ;;  %v662_v43 = vmul.f32 1.442695, %v661_v42 }
 0x23c   : > { %v487_v29 = vsel %vm369_vm3, %v486_v27, -inf }
 0x23d   : > { %v424_v1 = vpop.f32.mrf.mxu2 }
 0x23e   : > { %v428_v2 = vsel %vm1178_vm2, -1e+09, %v424_v1 }
 0x23f   : > { %v429_v3 = vsel %vm369_vm3, %v428_v2, -inf }
 0x240   : > { %430 = vmax.xlane.f32.xlu1 %v429_v3 }
 0x242   : > { %v484_v4 = vpop.f32.mrf.mxu1 }
 0x245   : > { %v426_v5 = vpop.f32.mrf.mxu2 }
 0x24a   : > { %v596_v6 = vpop.f32.mrf.mxu1 }
 0x24b   : > { %v600_v11 = vsel %vm1178_vm2, -1e+09, %v596_v6 }
 0x24c   : > { %v601_v12 = vsel %vm369_vm3, %v600_v11, -inf }
 0x24f   : > { %v767_v7 = vpop.f32.mrf.mxu0 }
 0x250   : > { %v771_v8 = vsel %vm1178_vm2, -1e+09, %v767_v7 }
 0x251   : > { %v772_v9 = vsel %vm369_vm3, %v771_v8, -inf }
 0x252   : > { %773 = vmax.xlane.f32.xlu1 %v772_v9  ;;  %v598_v10 = vpop.f32.mrf.mxu1 }
 0x257   : > { %v769_v13 = vpop.f32.mrf.mxu0 }
 0x25a   : > { %602 = vmax.xlane.f32.xlu1 %v601_v12  ;;  %v710_v14 = vpop.f32.mrf.mxu1 }
 0x25b   : > { %v1242_v16 = vsel %vm1178_vm2, -1e+09, %v710_v14 }
 0x25c   : > { %v715_v17 = vsel %vm369_vm3, %v1242_v16, -inf }
 0x25d   : > { %716 = vmax.xlane.f32.xlu2 %v715_v17 }
 0x262   : > { %v712_v18 = vpop.f32.mrf.mxu1 }
 0x273   : > { %499 = vrot.lane.b32.xlu1 %v1202_v32, %s1077_s26 }
 0x275   : > { %442 = vrot.lane.b32.xlu2 %v1202_v32, %s1079_s28 }
 0x27b   : > { %613 = vrot.lane.b32.xlu1 %v1202_v32, %s1080_s29 }
 0x2b3   : > { %v431_v19 = vpop.xlane.xlu1 %430 }
 0x2b4   : > { %v432_v20 = vsub.f32 %v428_v2, %v431_v19 }
 0x2b6   : > { %v433_v21 = vmul.f32 1.442695, %v432_v20 }
 0x2b8   : > { %1024 = vpow2.f32 %v433_v21 }
 0x2b9   : > { %1026 = vpow2.f32 %v548_v26 }
 0x2be   : > { %v1025_v23 = vpop.eup %1024 }
 0x2bf   : > { %v435_v25 = vsel %vm369_vm3, %v1025_v23, 0.0  ;;  %v1027_v30 = vpop.eup %1026 }
 0x2c0   : > { %436 = vadd.xlane.f32.xlu0 %v435_v25  ;;  %v550_v35 = vsel %vm369_vm3, %v1027_v30, 0.0 }
 0x2c5   : > { %v774_v28 = vpop.xlane.xlu1 %773 }
 0x2c6   : > { %v775_v33 = vsub.f32 %v771_v8, %v774_v28 }
 0x2c8   : > { %488 = vmax.xlane.f32.xlu0 %v487_v29  ;;  %v776_v37 = vmul.f32 1.442695, %v775_v33 }
 0x2cd   : > { %v603_v31 = vpop.xlane.xlu1 %602 }
 0x2ce   : > { %v604_v34 = vsub.f32 %v600_v11, %v603_v31 }
 0x2d0   : > { %v605_v36 = vmul.f32 1.442695, %v604_v34  ;;  %551 = vadd.xlane.f32.xlu0 %v550_v35  ;;  %v717_v46 = vpop.xlane.xlu2 %716 }
 0x2d1   : > { %v718_v5 = vsub.f32 %v1242_v16, %v717_v46 }
 0x2d2   : > { %1028 = vpow2.f32 %v605_v36 }
 0x2d3   : > { %1030 = vpow2.f32 %v776_v37  ;;  %v719_v6 = vmul.f32 1.442695, %v718_v5 }
 0x2d4   : > { %1032 = vpow2.f32 %v662_v43 }
 0x2d8   : > { %v1257_v38 = vpop.eup %1028  ;;  %v443_v47 = vpop.permute.xlu2 %442 }
 0x2d9   : > { %v607_v15 = vsel %vm369_vm3, %v1257_v38, 0.0  ;;  %v1261_v39 = vpop.eup %1030  ;;  %v448_v48 = vsel %vm386_vm4, %v443_v47, 0 }
 0x2da   : > { %608 = vadd.xlane.f32.xlu2 %v607_v15  ;;  %v778_v40 = vsel %vm369_vm3, %v1261_v39, 0.0  ;;  %v1270_v44 = vpop.eup %1032  ;;  %457 = vmatpush.bf16.msra.mxu3 %v448_v48 }
 0x2db   : > { %v664_v45 = vsel %vm369_vm3, %v1270_v44, 0.0 }
 0x2e2   : > { %779 = vadd.xlane.f32.xlu2 %v778_v40 }
 0x2e4   : > { %556 = vrot.lane.b32.xlu0 %v1202_v32, %s1078_s27 }
 0x2e5   : > { %v500_v1 = vpop.permute.xlu1 %499 }
 0x2e6   : > { %v505_v2 = vsel %vm386_vm4, %v500_v1, 0 }
 0x2e7   : > { %514 = vmatpush.bf16.msrb.mxu3 %v505_v2 }
 0x2ed   : > { %v614_v3 = vpop.permute.xlu1 %613 }
 0x2ee   : > { %v619_v4 = vsel %vm386_vm4, %v614_v3, 0 }
 0x2fa   : > { %727 = vrot.lane.b32.xlu2 %v1202_v32, %s1082_s5 }
 0x30e   : > { %665 = vadd.xlane.f32.xlu0 %v664_v45 }
 0x322   : > { %784 = vrot.lane.b32.xlu0 %v1202_v32, %s1083_s6 }
 0x333   : > { %v437_v49 = vpop.xlane.xlu0 %436 }
 0x334   : > { %1034 = vrcp.f32 %v437_v49 }
 0x33a   : > { %v1035_v50 = vpop.eup %1034 }
 0x33b   : > { %v489_v51 = vpop.xlane.xlu0 %488  ;;  %v439_v52 = vmul.f32 %v1035_v50, %v1025_v23 }
 0x33c   : > { %v490_v53 = vsub.f32 %v486_v27, %v489_v51 }
 0x33d   : > { %v440_v54 = vpack.c.bf16 %v439_v52, %v439_v52 }
 0x33e   : > { %v491_v55 = vmul.f32 1.442695, %v490_v53 }
 0x33f   : > { %972 = vmatmul.msk.bf16.vlgmr.msra.gmra.mxu3 %vm369_vm3, %v440_v54 }
 0x340   : > { %1036 = vpow2.f32 %v491_v55  ;;  %628 = vmatpush.bf16.msra.mxu3 %v619_v4 }
 0x343   : > { %v552_v58 = vpop.xlane.xlu0 %551 }
 0x344   : > { %1038 = vrcp.f32 %v552_v58 }
 0x345   : > { %1040 = vpow2.f32 %v719_v6 }
 0x346   : > { %v1037_v56 = vpop.eup %1036 }
 0x347   : > { %v493_v57 = vsel %vm369_vm3, %v1037_v56, 0.0 }
 0x348   : > { %494 = vadd.xlane.f32.xlu1 %v493_v57 }
 0x34a   : > { %v1039_v59 = vpop.eup %1038 }
 0x34b   : > { %v554_v60 = vmul.f32 %v1039_v59, %v1027_v30  ;;  %v1041_v7 = vpop.eup %1040 }
 0x34c   : > { %v721_v8 = vsel %vm369_vm3, %v1041_v7, 0.0 }
 0x34d   : > { %v555_v0 = vpack.c.bf16 %v554_v60, %v554_v60  ;;  %v609_v9 = vpop.xlane.xlu2 %608 }
 0x356   : > { %v557_v61 = vpop.permute.xlu0 %556 }
 0x357   : > { %v562_v63 = vsel %vm386_vm4, %v557_v61, 0 }
 0x358   : > { %571 = vmatpush.bf16.msrb.mxu2 %v562_v63 }
 0x35b   : > { %976 = vmatmul.msk.bf16.vlgmr.msrb.gmra.mxu2 %vm369_vm3, %v555_v0 }
 0x361   : > { %670 = vrot.lane.b32.xlu1 %v1202_v32, %s1081_s30  ;;  %v780_v32 = vpop.xlane.xlu2 %779 }
 0x369   : > { %v728_v16 = vpop.permute.xlu2 %727 }
 0x36a   : > { %v733_v18 = vsel %vm386_vm4, %v728_v16, 0 }
 0x381   : > { %v666_v17 = vpop.xlane.xlu0 %665 }
 0x38b   : > { %722 = vadd.xlane.f32.xlu1 %v721_v8 }
 0x394   : > { %v785_v22 = vpop.permute.xlu0 %784 }
 0x395   : > { %v790_v26 = vsel %vm386_vm4, %v785_v22, 0 }
 0x3bb   : > { %v495_v10 = vpop.xlane.xlu1 %494 }
 0x3bc   : > { %1042 = vrcp.f32 %v495_v10 }
 0x3bd   : > { %1044 = vrcp.f32 %v609_v9 }
 0x3be   : > { %1046 = vrcp.f32 %v666_v17 }
 0x3bf   : > { %1048 = vrcp.f32 %v780_v32 }
 0x3c2   : > { %v1043_v11 = vpop.eup %1042  ;;  %v459_v12 = vpop.f32.mrf.mxu3 }
 0x3c3   : > { %v497_v13 = vmul.f32 %v1043_v11, %v1037_v56  ;;  %806 = vrot.lane.b32.xlu1 %v459_v12, %s1083_s6  ;;  %v1045_v20 = vpop.eup %1044 }
 0x3c4   : > { %v1047_v21 = vpop.eup %1046  ;;  %v611_v23 = vmul.f32 %v1045_v20, %v1257_v38 }
 0x3c5   : > { %v498_v14 = vpack.c.bf16 %v497_v13, %v497_v13  ;;  %v668_v24 = vmul.f32 %v1047_v21, %v1270_v44  ;;  %v1049_v31 = vpop.eup %1048 }
 0x3c6   : > { %v612_v28 = vpack.c.bf16 %v611_v23, %v611_v23  ;;  %v782_v33 = vmul.f32 %v1049_v31, %v1261_v39 }
 0x3c7   : > { %974 = vmatmul.msk.bf16.vlgmr.msrb.gmra.mxu3 %vm369_vm3, %v498_v14  ;;  %v669_v29 = vpack.c.bf16 %v668_v24, %v668_v24 }
 0x3c8   : > { %742 = vmatpush.bf16.msrb.mxu3 %v733_v18  ;;  %v783_v34 = vpack.c.bf16 %v782_v33, %v782_v33 }
 0x3ca   : > { %v461_v19 = vpop.f32.mrf.mxu3 }
 0x3d3   : > { %v671_v25 = vpop.permute.xlu1 %670 }
 0x3d4   : > { %v676_v27 = vsel %vm386_vm4, %v671_v25, 0 }
 0x3d5   : > { %685 = vmatpush.bf16.msra.mxu2 %v676_v27 }
 0x3d7   : > { %978 = vmatmul.msk.bf16.vlgmr.msra.gmra.mxu3 %vm369_vm3, %v612_v28 }
 0x3d8   : > { %980 = vmatmul.msk.bf16.vlgmr.msra.gmra.mxu2 %vm369_vm3, %v669_v29 }
 0x3d9   : > { %799 = vmatpush.bf16.msrb.mxu2 %v790_v26 }
 0x3de   : > { %v573_v30 = vpop.f32.mrf.mxu2 }
 0x3df   : > { %814 = vrot.lane.b32.xlu2 %v573_v30, %s1081_s30 }
 0x3e6   : > { %v575_v35 = vpop.f32.mrf.mxu2 }
 0x3e8   : > { %984 = vmatmul.msk.bf16.vlgmr.msrb.gmra.mxu2 %vm369_vm3, %v783_v34 }
 0x3fe   : > { %v723_v36 = vpop.xlane.xlu1 %722 }
 0x3ff   : > { %1050 = vrcp.f32 %v723_v36 }
 0x405   : > { %v1051_v37 = vpop.eup %1050 }
 0x406   : > { %v725_v38 = vmul.f32 %v1051_v37, %v1041_v7 }
 0x408   : > { %v726_v15 = vpack.c.bf16 %v725_v38, %v725_v38 }
 0x40a   : > { %982 = vmatmul.msk.bf16.vlgmr.msrb.gmra.mxu3 %vm369_vm3, %v726_v15 }
 0x435   : > { %v807_v51 = vpop.permute.xlu1 %806 }
 0x436   : > { %v833_v52 = vsel %vm344_vm0, %v1229_v62, %v807_v51 }
 0x439   : > { %v815_v50 = vpop.permute.xlu2 %814 }
 0x44a   : > { %v516_v40 = vpop.f32.mrf.mxu3 }
 0x44b   : > { %810 = vrot.lane.b32.xlu0 %v516_v40, %s1082_s5 }
 0x452   : > { %v518_v41 = vpop.f32.mrf.mxu3 }
 0x45a   : > { %v630_v42 = vpop.f32.mrf.mxu3 }
 0x45b   : > { %818 = vrot.lane.b32.xlu0 %v630_v42, %s1080_s29  ;;  %v687_v43 = vpop.f32.mrf.mxu2 }
 0x45c   : > { %822 = vrot.lane.b32.xlu2 %v687_v43, %s1078_s27 }
 0x462   : > { %v632_v39 = vpop.f32.mrf.mxu3 }
 0x463   : > { %v689_v44 = vpop.f32.mrf.mxu2 }
 0x46b   : > { %v801_v45 = vpop.f32.mrf.mxu2 }
 0x46c   : > { %830 = vrot.lane.b32.xlu2 %v801_v45, %s1079_s28 }
 0x473   : > { %v803_v46 = vpop.f32.mrf.mxu2 }
 0x48d   : > { %v744_v47 = vpop.f32.mrf.mxu3 }
 0x48e   : > { %826 = vrot.lane.b32.xlu0 %v744_v47, %s1077_s26 }
 0x495   : > { %v746_v48 = vpop.f32.mrf.mxu3 }
 0x4b6   : > { %v823_v54 = vpop.permute.xlu2 %822 }
 0x4bd   : > { %v811_v49 = vpop.permute.xlu0 %810 }
 0x4be   : > { %v835_v55 = vsel %vm834_vm5, %v833_v52, %v811_v49 }
 0x4bf   : > { %v837_v56 = vsel %vm836_vm6, %v835_v55, %v815_v50 }
 0x4c6   : > { %v831_v60 = vpop.permute.xlu2 %830 }
 0x4cd   : > { %v819_v53 = vpop.permute.xlu0 %818 }
 0x4ce   : > { %v839_v57 = vsel %vm838_vm7, %v837_v56, %v819_v53 }
 0x4cf   : > { %v841_v59 = vsel %vm840_vm8, %v839_v57, %v823_v54 }
 0x500   : > { %v827_v58 = vpop.permute.xlu0 %826 }
 0x501   : > { %v843_v61 = vsel %vm842_vm9, %v841_v59, %v827_v58 }
 0x502   : > { %v845_v62 = vsel %vm844_vm10, %v843_v61, %v831_v60 }
 0x503   : > { %846 = vst [vmem:[%s333_s11] sm:$0xff] %v845_v62 }
 0x504 PF: > { %p11_p9 = scmp.ge.s32.totalorder %s1126_s19, 4   ;;  %s1329_s15 = smov %s1070_s16 }
 0x505   : > { %s1330_s16 = smov %s1135_s22  ;;  %s1331_s17 = smov %s1126_s19 }
 0x506   :  { %13 = sbr.rel (!%p11_p9) target bundleno = 2 (0x2), region = 161 }

// kernel: _lambda_.41
= control target key start
LH: loop header
LB: loop body
LE: loop exit
PB: predicated region body
PF: predicated region fallthrough
CT: control target
= control target key end

     0   :  { %s197_s1 = inlined_call_operand.vmem [shape: bf16[128,128], index: 1, kind: input, shape index: {}]   ;;  %s198_s2 = inlined_call_operand.vmem [shape: f32[1,128], index: 2, kind: input, shape index: {}]   ;;  %s199_s0 = inlined_call_operand.vmem [shape: f32[2,128], index: 0, kind: input, shape index: {}]   ;;  %s200_s3 = inlined_call_operand.vmem [shape: f32[2,128], index: 3, kind: output, shape index: {}]  }
   0x1   :  { %v142_v0 = vld [vmem:[%s197_s1 + $0x38] sm:$0xff]  ;;  %v141_v1 = vld [vmem:[%s197_s1 + $0x30] sm:$0xff]  ;;  %v140_v2 = vld [vmem:[%s197_s1 + $0x28] sm:$0xff] }
   0x2   :  { %85 = vmatpush.bf16.msra.mxu0 %v142_v0  ;;  %v139_v3 = vld [vmem:[%s197_s1 + $0x20] sm:$0xff]  ;;  %v138_v4 = vld [vmem:[%s197_s1 + $0x18] sm:$0xff]  ;;  %v137_v5 = vld [vmem:[%s197_s1 + $0x10] sm:$0xff] }
   0x3   :  { %v136_v6 = vld [vmem:[%s197_s1 + $0x8] sm:$0xff]  ;;  %v14_v7 = vld [vmem:[%s199_s0] sm:$0x3] }
   0x4   :  { %v15_v8 = vmax.f32 %v14_v7, 0.0  ;;  %v135_v9 = vld [vmem:[%s197_s1] sm:$0xff] }
   0x5   :  { %v143_v11 = vld [vmem:[%s198_s2] ss:$0 sm:$0xff] }
   0x6   :  { %86 = vmatpush.bf16.msra.mxu0 %v141_v1  ;;  %v16_v10 = vpack.c.bf16 %v15_v8, %v15_v8 }
   0xa   :  { %87 = vmatpush.bf16.msra.mxu0 %v140_v2 }
   0xe   :  { %88 = vmatpush.bf16.msra.mxu0 %v139_v3 }
  0x12   :  { %89 = vmatpush.bf16.msra.mxu0 %v138_v4 }
  0x16   :  { %90 = vmatpush.bf16.msra.mxu0 %v137_v5 }
  0x1a   :  { %91 = vmatpush.bf16.msra.mxu0 %v136_v6 }
  0x1e   :  { %92 = vmatpush.bf16.msra.mxu0 %v135_v9 }
  0x21   :  { %93 = vmatmul.bf16.vlgmr.msra.gmra.mxu0 %v16_v10 }
  0x9e   :  { %v94_v12 = vpop.f32.mrf.mxu0 }
  0x9f   :  { %v95_v13 = vadd.f32 %v143_v11, %v94_v12 }
  0xa1   :  { %98 = vst [vmem:[%s200_s3] sm:$0x3] %v95_v13 }
  0xa6   :  { %v96_v14 = vpop.f32.mrf.mxu0 }

// kernel: _lambda_.42
= control target key start
LH: loop header
LB: loop body
LE: loop exit
PB: predicated region body
PF: predicated region fallthrough
CT: control target
= control target key end

     0   :  { %v418_v43 = vmov 0   ;;  %s636_s1 = inlined_call_operand.vmem [shape: bf16[128,384], index: 1, kind: input, shape index: {}]   ;;  %s637_s3 = inlined_call_operand.vmem [shape: f32[24,1], index: 3, kind: input, shape index: {}]   ;;  %s638_s0 = inlined_call_operand.vmem [shape: f32[24,128], index: 0, kind: input, shape index: {}]   ;;  %s639_s2 = inlined_call_operand.vmem [shape: f32[1,384], index: 2, kind: input, shape index: {}]   ;;  %s640_s4 = inlined_call_operand.vmem [shape: f32[24,384], index: 4, kind: output, shape index: {}]  }
   0x1   :  { %v404_v0 = vld [vmem:[%s636_s1 + $0xac] sm:$0xf]  ;;  %v375_v1 = vld [vmem:[%s636_s1 + $0xb4] sm:$0xf0]  ;;  %v381_v2 = vld [vmem:[%s636_s1 + $0xb0] sm:$0xf]  ;;  %416 = vset.pattern.permute.xlu0 %v418_v43  ;;  %417 = vset.pattern.permute.xlu1 %v418_v43 }
   0x2   :  { %v378_v3 = vor.u32 %v404_v0, %v375_v1  ;;  %v406_v4 = vld [vmem:[%s636_s1 + $0xb8] sm:$0xf0]  ;;  %v401_v5 = vld [vmem:[%s636_s1 + $0x94] sm:$0xf]  ;;  %v363_v6 = vld [vmem:[%s636_s1 + $0x9c] sm:$0xf0] }
   0x3   :  { %v382_v7 = vor.u32 %v406_v4, %v381_v2  ;;  %v369_v8 = vld [vmem:[%s636_s1 + $0x98] sm:$0xf]  ;;  %v403_v9 = vld [vmem:[%s636_s1 + $0xa0] sm:$0xf0]  ;;  %v373_v10 = vld [vmem:[%s636_s1 + $0xa8] sm:$0xf]  ;;  %v366_v11 = vor.u32 %v401_v5, %v363_v6 }
   0x4   :  { %211 = vmatpush.bf16.msra.mxu1 %v378_v3  ;;  %v405_v12 = vld [vmem:[%s636_s1 + $0xb0] sm:$0xf0]  ;;  %v370_v13 = vor.u32 %v403_v9, %v369_v8  ;;  %v398_v15 = vld [vmem:[%s636_s1 + $0x7c] sm:$0xf]  ;;  %v351_v16 = vld [vmem:[%s636_s1 + $0x84] sm:$0xf0] }
   0x5   :  { %229 = vmatpush.bf16.msra.mxu2 %v382_v7  ;;  %v374_v14 = vor.u32 %v405_v12, %v373_v10  ;;  %v361_v17 = vld [vmem:[%s636_s1 + $0x90] sm:$0xf]  ;;  %v357_v18 = vld [vmem:[%s636_s1 + $0x80] sm:$0xf]  ;;  %v400_v19 = vld [vmem:[%s636_s1 + $0x88] sm:$0xf0]  ;;  %v354_v22 = vor.u32 %v398_v15, %v351_v16 }
   0x6   :  { %v402_v20 = vld [vmem:[%s636_s1 + $0x98] sm:$0xf0]  ;;  %v349_v23 = vld [vmem:[%s636_s1 + $0x78] sm:$0xf]  ;;  %v399_v24 = vld [vmem:[%s636_s1 + $0x80] sm:$0xf0]  ;;  %v358_v25 = vor.u32 %v400_v19, %v357_v18 }
   0x7   :  { %407 = vmatpush.bf16.msra.mxu3 %v374_v14  ;;  %193 = vmatpush.bf16.msra.mxu0 %v374_v14  ;;  %v362_v21 = vor.u32 %v402_v20, %v361_v17  ;;  %v395_v26 = vld [vmem:[%s636_s1 + $0x64] sm:$0xf]  ;;  %v339_v27 = vld [vmem:[%s636_s1 + $0x6c] sm:$0xf0]  ;;  %v345_v28 = vld [vmem:[%s636_s1 + $0x68] sm:$0xf]  ;;  %v350_v30 = vor.u32 %v399_v24, %v349_v23 }
   0x8   :  { %212 = vmatpush.bf16.msra.mxu1 %v366_v11  ;;  %v397_v29 = vld [vmem:[%s636_s1 + $0x70] sm:$0xf0]  ;;  %v342_v31 = vor.u32 %v395_v26, %v339_v27  ;;  %v337_v32 = vld [vmem:[%s636_s1 + $0x60] sm:$0xf]  ;;  %v396_v33 = vld [vmem:[%s636_s1 + $0x68] sm:$0xf0] }
   0x9   :  { %230 = vmatpush.bf16.msra.mxu2 %v370_v13  ;;  %v346_v34 = vor.u32 %v397_v29, %v345_v28  ;;  %v392_v35 = vld [vmem:[%s636_s1 + $0x4c] sm:$0xf]  ;;  %v327_v36 = vld [vmem:[%s636_s1 + $0x54] sm:$0xf0]  ;;  %v333_v37 = vld [vmem:[%s636_s1 + $0x50] sm:$0xf]  ;;  %v338_v39 = vor.u32 %v396_v33, %v337_v32 }
   0xa   :  { %v394_v38 = vld [vmem:[%s636_s1 + $0x58] sm:$0xf0]  ;;  %v330_v40 = vor.u32 %v392_v35, %v327_v36  ;;  %v325_v41 = vld [vmem:[%s636_s1 + $0x48] sm:$0xf]  ;;  %v393_v42 = vld [vmem:[%s636_s1 + $0x50] sm:$0xf0] }
   0xb   :  { %408 = vmatpush.bf16.msra.mxu3 %v362_v21  ;;  %194 = vmatpush.bf16.msra.mxu0 %v362_v21  ;;  %v334_v44 = vor.u32 %v394_v38, %v333_v37  ;;  %v389_v45 = vld [vmem:[%s636_s1 + $0x34] sm:$0xf]  ;;  %v315_v46 = vld [vmem:[%s636_s1 + $0x3c] sm:$0xf0]  ;;  %v321_v47 = vld [vmem:[%s636_s1 + $0x38] sm:$0xf]  ;;  %v326_v50 = vor.u32 %v393_v42, %v325_v41 }
   0xc   :  { %213 = vmatpush.bf16.msra.mxu1 %v354_v22  ;;  %v391_v48 = vld [vmem:[%s636_s1 + $0x40] sm:$0xf0]  ;;  %v318_v51 = vor.u32 %v389_v45, %v315_v46  ;;  %v313_v52 = vld [vmem:[%s636_s1 + $0x30] sm:$0xf]  ;;  %v390_v53 = vld [vmem:[%s636_s1 + $0x38] sm:$0xf0] }
   0xd   :  { %231 = vmatpush.bf16.msra.mxu2 %v358_v25  ;;  %v247_v49 = vld [vmem:[%s637_s3] sm:$0xff]  ;;  %v249_v54 = vld [vmem:[%s637_s3 + $0x10] sm:$0xff]  ;;  %v322_v55 = vor.u32 %v391_v48, %v321_v47  ;;  %v386_v56 = vld [vmem:[%s636_s1 + $0x1c] sm:$0xf]  ;;  %v314_v60 = vor.u32 %v390_v53, %v313_v52 }
   0xe   :  { %252 = vperm.xlu0 %416, %v247_v49   ;;  %v303_v57 = vld [vmem:[%s636_s1 + $0x24] sm:$0xf0]  ;;  %262 = vperm.xlu1 %417, %v249_v54   ;;  %v309_v58 = vld [vmem:[%s636_s1 + $0x20] sm:$0xf]  ;;  %v388_v59 = vld [vmem:[%s636_s1 + $0x28] sm:$0xf0] }
   0xf   :  { %409 = vmatpush.bf16.msra.mxu3 %v350_v30  ;;  %195 = vmatpush.bf16.msra.mxu0 %v350_v30  ;;  %v17_v61 = vld [vmem:[%s638_s0] sm:$0xff]  ;;  %v306_v62 = vor.u32 %v386_v56, %v303_v57  ;;  %v18_v63 = vld [vmem:[%s638_s0 + $0x8] sm:$0xff]  ;;  %v301_v0 = vld [vmem:[%s636_s1 + $0x18] sm:$0xf]  ;;  %v310_v2 = vor.u32 %v388_v59, %v309_v58 }
  0x10   :  { %214 = vmatpush.bf16.msra.mxu1 %v342_v31  ;;  %v387_v1 = vld [vmem:[%s636_s1 + $0x20] sm:$0xf0]  ;;  %v291_v4 = vld [vmem:[%s636_s1 + $0xc] sm:$0xf0]  ;;  %v248_v5 = vld [vmem:[%s637_s3 + $0x8] sm:$0xff]  ;;  %v20_v8 = vmax.f32 %v17_v61, 0.0 }
  0x11   :  { %232 = vmatpush.bf16.msra.mxu2 %v346_v34  ;;  %v383_v3 = vld [vmem:[%s636_s1 + $0x4] sm:$0xf]  ;;  %v297_v6 = vld [vmem:[%s636_s1 + $0x8] sm:$0xf]  ;;  %v385_v7 = vld [vmem:[%s636_s1 + $0x10] sm:$0xf0]  ;;  %v302_v10 = vor.u32 %v387_v1, %v301_v0 }
  0x12   :  { %v21_v9 = vmax.f32 %v18_v63, 0.0  ;;  %v19_v11 = vld [vmem:[%s638_s0 + $0x10] sm:$0xff]  ;;  %v294_v12 = vor.u32 %v383_v3, %v291_v4  ;;  %v289_v13 = vld [vmem:[%s636_s1] sm:$0xf]  ;;  %v384_v14 = vld [vmem:[%s636_s1 + $0x8] sm:$0xf0]  ;;  %v298_v15 = vor.u32 %v385_v7, %v297_v6 }
  0x13   :  { %410 = vmatpush.bf16.msra.mxu3 %v338_v39  ;;  %196 = vmatpush.bf16.msra.mxu0 %v338_v39  ;;  %v22_v16 = vmax.f32 %v19_v11, 0.0  ;;  %v290_v18 = vor.u32 %v384_v14, %v289_v13  ;;  %v57_v20 = vld [vmem:[%s639_s2] sm:$0x7] }
  0x14   :  { %215 = vmatpush.bf16.msra.mxu1 %v330_v40  ;;  %v23_v17 = vpack.c.bf16 %v21_v9, %v20_v8  ;;  %v60_v21 = vperm.slane %v57_v20, 1  ;;  %v59_v25 = vperm.slane %v57_v20, 0  ;;  %v61_v27 = vperm.slane %v57_v20, 2 }
  0x15   :  { %233 = vmatpush.bf16.msra.mxu2 %v334_v44  ;;  %v24_v19 = vpack.c.bf16 %v22_v16, %v22_v16 }
  0x16   :  { %257 = vperm.xlu0 %416, %v248_v5  }
  0x17   :  { %411 = vmatpush.bf16.msra.mxu3 %v326_v50  ;;  %197 = vmatpush.bf16.msra.mxu0 %v326_v50 }
  0x18   :  { %216 = vmatpush.bf16.msra.mxu1 %v318_v51 }
  0x19   :  { %234 = vmatpush.bf16.msra.mxu2 %v322_v55 }
  0x1b   :  { %412 = vmatpush.bf16.msra.mxu3 %v314_v60  ;;  %198 = vmatpush.bf16.msra.mxu0 %v314_v60 }
  0x1c   :  { %217 = vmatpush.bf16.msra.mxu1 %v306_v62 }
  0x1d   :  { %235 = vmatpush.bf16.msra.mxu2 %v310_v2 }
  0x1f   :  { %413 = vmatpush.bf16.msra.mxu3 %v302_v10  ;;  %199 = vmatpush.bf16.msra.mxu0 %v302_v10 }
  0x20   :  { %218 = vmatpush.bf16.msra.mxu1 %v294_v12 }
  0x21   :  { %236 = vmatpush.bf16.msra.mxu2 %v298_v15 }
  0x23   :  { %219 = vmatmul.bf16.vlgmr.msra.gmra.mxu1 %v23_v17  ;;  %414 = vmatpush.bf16.msra.mxu3 %v290_v18 }
  0x24   :  { %237 = vmatmul.bf16.vlgmr.msra.gmra.mxu2 %v23_v17  ;;  %200 = vmatpush.bf16.msra.mxu0 %v290_v18 }
  0x26   :  { %206 = vmatmul.bf16.vlgmr.msra.gmra.mxu3 %v24_v19 }
  0x27   :  { %201 = vmatmul.bf16.vlgmr.msra.gmra.mxu0 %v23_v17 }
  0x33   :  { %224 = vmatmul.bf16.gmra.mxu1 %v24_v19 }
  0x34   :  { %242 = vmatmul.bf16.gmra.mxu2 %v24_v19 }
  0x80   :  { %v253_v22 = vpop.permute.xlu0 %252  ;;  %v263_v37 = vpop.permute.xlu1 %262 }
  0x88   :  { %v258_v34 = vpop.permute.xlu0 %257 }
  0xa0   :  { %v220_v23 = vpop.f32.mrf.mxu1 }
  0xa1   :  { %v221_v24 = vadd.f32 %v220_v23, %v60_v21 }
  0xa3   :  { %v266_v26 = vmul.f32 %v253_v22, %v221_v24 }
  0xa4   :  { %v202_v28 = vpop.f32.mrf.mxu0 }
  0xa5   :  { %275 = vst [vmem:[%s640_s4 + $0x8] sm:$0xff] %v266_v26  ;;  %v203_v29 = vadd.f32 %v202_v28, %v59_v25 }
  0xa7   :  { %v238_v30 = vpop.f32.mrf.mxu2  ;;  %v265_v31 = vmul.f32 %v253_v22, %v203_v29 }
  0xa8   :  { %v239_v32 = vadd.f32 %v238_v30, %v61_v27  ;;  %v222_v33 = vpop.f32.mrf.mxu1 }
  0xa9   :  { %v223_v35 = vadd.f32 %v222_v33, %v60_v21  ;;  %274 = vst [vmem:[%s640_s4] sm:$0xff] %v265_v31  ;;  %v207_v36 = vpop.f32.mrf.mxu3 }
  0xaa   :  { %v267_v38 = vmul.f32 %v253_v22, %v239_v32  ;;  %v208_v39 = vadd.f32 %v207_v36, %v59_v25 }
  0xab   :  { %v269_v40 = vmul.f32 %v258_v34, %v223_v35 }
  0xac   :  { %276 = vst [vmem:[%s640_s4 + $0x10] sm:$0xff] %v267_v38  ;;  %v204_v41 = vpop.f32.mrf.mxu0  ;;  %v271_v42 = vmul.f32 %v263_v37, %v208_v39 }
  0xad   :  { %278 = vst [vmem:[%s640_s4 + $0x20] sm:$0xff] %v269_v40  ;;  %v205_v43 = vadd.f32 %v204_v41, %v59_v25 }
  0xae   :  { %280 = vst [vmem:[%s640_s4 + $0x30] sm:$0xff] %v271_v42 }
  0xaf   :  { %v240_v44 = vpop.f32.mrf.mxu2  ;;  %v268_v45 = vmul.f32 %v258_v34, %v205_v43 }
  0xb0   :  { %v241_v46 = vadd.f32 %v240_v44, %v61_v27  ;;  %v225_v47 = vpop.f32.mrf.mxu1 }
  0xb1   :  { %v226_v48 = vadd.f32 %v225_v47, %v60_v21  ;;  %277 = vst [vmem:[%s640_s4 + $0x18] sm:$0xff] %v268_v45  ;;  %v209_v49 = vpop.f32.mrf.mxu3 }
  0xb2   :  { %v270_v50 = vmul.f32 %v258_v34, %v241_v46 }
  0xb3   :  { %v272_v51 = vmul.f32 %v263_v37, %v226_v48 }
  0xb4   :  { %279 = vst [vmem:[%s640_s4 + $0x28] sm:$0xff] %v270_v50 }
  0xb5   :  { %281 = vst [vmem:[%s640_s4 + $0x38] sm:$0xff] %v272_v51 }
  0xb7   :  { %v243_v52 = vpop.f32.mrf.mxu2 }
  0xb8   :  { %v244_v53 = vadd.f32 %v243_v52, %v61_v27  ;;  %v227_v54 = vpop.f32.mrf.mxu1 }
  0xba   :  { %v273_v55 = vmul.f32 %v263_v37, %v244_v53 }
  0xbc   :  { %282 = vst [vmem:[%s640_s4 + $0x40] sm:$0xff] %v273_v55 }
  0xbf   :  { %v245_v56 = vpop.f32.mrf.mxu2 }

// kernel: _lambda_.46
= control target key start
LH: loop header
LB: loop body
LE: loop exit
PB: predicated region body
PF: predicated region fallthrough
CT: control target
= control target key end

     0   :  { %8 = vsyncpa [#allocation3], 0  ;;  %s207_s15 = smov [#allocation2]   ;;  %s208_s17 = smov 64   ;;  %s254_s0 = inlined_call_operand.vmem [shape: f32[24,128], index: 0, kind: input, shape index: {}]   ;;  %s255_s1 = inlined_call_operand.hbm [shape: bf16[128,128], index: 1, kind: input, shape index: {}]   ;;  %s256_s2 = inlined_call_operand.vmem [shape: f32[1,128], index: 2, kind: input, shape index: {}]   ;;  %s257_s3 = inlined_call_operand.vmem [shape: f32[24,128], index: 3, kind: output, shape index: {}]  }
   0x1   :  { %s15_s14 = sshll.u32 %s255_s1, 4  ;;  %s17_s16 = sshll.u32 %s207_s15, 4  ;;  %s16_s14 = int_to_ptr.hbm [resolvable:$true] %s15_s14  ;;  %s18_s16 = int_to_ptr.vmem [resolvable:$true] %s17_s16 }
   0x2   :  { %s209_s18 = smov 4  }
   0x3   :  { %23 = dma.hbm_to_vmem [thread:$0]  %s16_s14, 1024, %s18_s16, [#allocation3], %s208_s17, %s208_s17, %s209_s18  }
   0x4   :  { %205 = dma.done.wait [#allocation3], 1024  }
   0x5   :  { %206 = vsyncadd [#allocation3], 4294966272  ;;  %v168_v0 = vld [vmem:[#allocation2 + $0x38] sm:$0xff]  ;;  %v167_v1 = vld [vmem:[#allocation2 + $0x30] sm:$0xff] }
   0x6   :  { %103 = vmatpush.bf16.msra.mxu0 %v168_v0  ;;  %169 = vmatpush.bf16.msra.mxu1 %v168_v0  ;;  %v166_v2 = vld [vmem:[#allocation2 + $0x28] sm:$0xff]  ;;  %v165_v3 = vld [vmem:[#allocation2 + $0x20] sm:$0xff]  ;;  %v164_v4 = vld [vmem:[#allocation2 + $0x18] sm:$0xff] }
   0x7   :  { %v163_v5 = vld [vmem:[#allocation2 + $0x10] sm:$0xff]  ;;  %v162_v6 = vld [vmem:[#allocation2 + $0x8] sm:$0xff]  ;;  %v161_v7 = vld [vmem:[#allocation2] sm:$0xff] }
   0x8   :  { %v30_v8 = vld [vmem:[%s254_s0] sm:$0xff]  ;;  %v31_v9 = vld [vmem:[%s254_s0 + $0x8] sm:$0xff]  ;;  %v32_v10 = vld [vmem:[%s254_s0 + $0x10] sm:$0xff] }
   0x9   :  { %v33_v11 = vpack.c.bf16 %v31_v9, %v30_v8  ;;  %v34_v12 = vpack.c.bf16 %v32_v10, %v32_v10  ;;  %v180_v13 = vld [vmem:[%s256_s2] ss:$0 sm:$0xff] }
   0xa   :  { %104 = vmatpush.bf16.msra.mxu0 %v167_v1  ;;  %170 = vmatpush.bf16.msra.mxu1 %v167_v1 }
   0xe   :  { %105 = vmatpush.bf16.msra.mxu0 %v166_v2  ;;  %171 = vmatpush.bf16.msra.mxu1 %v166_v2 }
  0x12   :  { %106 = vmatpush.bf16.msra.mxu0 %v165_v3  ;;  %172 = vmatpush.bf16.msra.mxu1 %v165_v3 }
  0x16   :  { %107 = vmatpush.bf16.msra.mxu0 %v164_v4  ;;  %173 = vmatpush.bf16.msra.mxu1 %v164_v4 }
  0x1a   :  { %108 = vmatpush.bf16.msra.mxu0 %v163_v5  ;;  %174 = vmatpush.bf16.msra.mxu1 %v163_v5 }
  0x1e   :  { %109 = vmatpush.bf16.msra.mxu0 %v162_v6  ;;  %175 = vmatpush.bf16.msra.mxu1 %v162_v6 }
  0x22   :  { %110 = vmatpush.bf16.msra.mxu0 %v161_v7  ;;  %176 = vmatpush.bf16.msra.mxu1 %v161_v7 }
  0x25   :  { %111 = vmatmul.bf16.vlgmr.msra.gmra.mxu0 %v33_v11  ;;  %116 = vmatmul.bf16.vlgmr.msra.gmra.mxu1 %v34_v12 }
  0xa2   :  { %v112_v14 = vpop.f32.mrf.mxu0  ;;  %v117_v15 = vpop.f32.mrf.mxu1 }
  0xa3   :  { %v113_v16 = vadd.f32 %v180_v13, %v112_v14  ;;  %v118_v17 = vadd.f32 %v180_v13, %v117_v15 }
  0xa5   :  { %121 = vst [vmem:[%s257_s3] sm:$0xff] %v113_v16 }
  0xa6   :  { %123 = vst [vmem:[%s257_s3 + $0x10] sm:$0xff] %v118_v17 }
  0xaa   :  { %v114_v18 = vpop.f32.mrf.mxu0  ;;  %v119_v19 = vpop.f32.mrf.mxu1 }
  0xab   :  { %v115_v20 = vadd.f32 %v180_v13, %v114_v18 }
  0xad   :  { %122 = vst [vmem:[%s257_s3 + $0x8] sm:$0xff] %v115_v20 }
  0xae   :  { %128 = vsyncpa [#allocation3], 1 }

// kernel: _lambda_.40
= control target key start
LH: loop header
LB: loop body
LE: loop exit
PB: predicated region body
PF: predicated region fallthrough
CT: control target
= control target key end

     0   :  { %8 = vsyncpa [#allocation3], 0  ;;  %s190_s15 = smov [#allocation2]   ;;  %s191_s17 = smov 64   ;;  %s225_s0 = inlined_call_operand.vmem [shape: f32[2,128], index: 0, kind: input, shape index: {}]   ;;  %s226_s1 = inlined_call_operand.hbm [shape: bf16[128,128], index: 1, kind: input, shape index: {}]   ;;  %s227_s2 = inlined_call_operand.vmem [shape: f32[1,128], index: 2, kind: input, shape index: {}]   ;;  %s228_s3 = inlined_call_operand.vmem [shape: f32[2,128], index: 3, kind: output, shape index: {}]  }
   0x1   :  { %s15_s14 = sshll.u32 %s226_s1, 4  ;;  %s17_s16 = sshll.u32 %s190_s15, 4  ;;  %s16_s14 = int_to_ptr.hbm [resolvable:$true] %s15_s14  ;;  %s18_s16 = int_to_ptr.vmem [resolvable:$true] %s17_s16 }
   0x2   :  { %s192_s18 = smov 4  }
   0x3   :  { %23 = dma.hbm_to_vmem [thread:$0]  %s16_s14, 1024, %s18_s16, [#allocation3], %s191_s17, %s191_s17, %s192_s18  }
   0x4   :  { %188 = dma.done.wait [#allocation3], 1024  }
   0x5   :  { %189 = vsyncadd [#allocation3], 4294966272  ;;  %v159_v0 = vld [vmem:[#allocation2 + $0x38] sm:$0xff]  ;;  %v158_v1 = vld [vmem:[#allocation2 + $0x30] sm:$0xff] }
   0x6   :  { %101 = vmatpush.bf16.msra.mxu0 %v159_v0  ;;  %v157_v2 = vld [vmem:[#allocation2 + $0x28] sm:$0xff]  ;;  %v156_v3 = vld [vmem:[#allocation2 + $0x20] sm:$0xff]  ;;  %v155_v4 = vld [vmem:[#allocation2 + $0x18] sm:$0xff] }
   0x7   :  { %v154_v5 = vld [vmem:[#allocation2 + $0x10] sm:$0xff]  ;;  %v153_v6 = vld [vmem:[#allocation2 + $0x8] sm:$0xff]  ;;  %v30_v7 = vld [vmem:[%s225_s0] sm:$0x3] }
   0x8   :  { %v31_v8 = vmax.f32 %v30_v7, 0.0  ;;  %v152_v9 = vld [vmem:[#allocation2] sm:$0xff] }
   0x9   :  { %v163_v11 = vld [vmem:[%s227_s2] ss:$0 sm:$0xff] }
   0xa   :  { %102 = vmatpush.bf16.msra.mxu0 %v158_v1  ;;  %v32_v10 = vpack.c.bf16 %v31_v8, %v31_v8 }
   0xe   :  { %103 = vmatpush.bf16.msra.mxu0 %v157_v2 }
  0x12   :  { %104 = vmatpush.bf16.msra.mxu0 %v156_v3 }
  0x16   :  { %105 = vmatpush.bf16.msra.mxu0 %v155_v4 }
  0x1a   :  { %106 = vmatpush.bf16.msra.mxu0 %v154_v5 }
  0x1e   :  { %107 = vmatpush.bf16.msra.mxu0 %v153_v6 }
  0x22   :  { %108 = vmatpush.bf16.msra.mxu0 %v152_v9 }
  0x25   :  { %109 = vmatmul.bf16.vlgmr.msra.gmra.mxu0 %v32_v10 }
  0xa2   :  { %v110_v12 = vpop.f32.mrf.mxu0 }
  0xa3   :  { %v111_v13 = vadd.f32 %v163_v11, %v110_v12 }
  0xa5   :  { %114 = vst [vmem:[%s228_s3] sm:$0x3] %v111_v13 }
  0xaa   :  { %v112_v14 = vpop.f32.mrf.mxu0 }
  0xab   :  { %119 = vsyncpa [#allocation3], 1 }

// kernel: _lambda_.44
= control target key start
LH: loop header
LB: loop body
LE: loop exit
PB: predicated region body
PF: predicated region fallthrough
CT: control target
= control target key end

     0   :  { %s1405_s18 = smov 0   ;;  %s1407_s19 = smov 0   ;;  %s1754_s0 = inlined_call_operand.vmem [shape: f32[2,12,384], index: 0, kind: input, shape index: {}, may-alias: {0,1,2}]   ;;  %s1755_s1 = inlined_call_operand.vmem [shape: f32[2,12,384], index: 1, kind: input, shape index: {}, may-alias: {0,1,2}]   ;;  %s1756_s2 = inlined_call_operand.vmem [shape: f32[2,12,384], index: 2, kind: input, shape index: {}, may-alias: {0,1,2}]   ;;  %s1757_s3 = inlined_call_operand.vmem [shape: f32[2,1,12], index: 3, kind: input, shape index: {}]   ;;  %s1758_s4 = inlined_call_operand.vmem [shape: f32[2,1,128], index: 4, kind: input, shape index: {}]   ;;  %s1759_s5 = inlined_call_operand.vmem [shape: f32[2,12,128], index: 5, kind: output, shape index: {}]  }
   0x1   :  { %s1409_s20 = smov 0  }
   0x2 LB: > { %s1206_s21 = sadd.s32 4294967295, %s1365_s20   ;;  %s1422_s22 = sadd.s32 1, %s1365_s20   ;;  %s1365_s20 = sphi %s1409_s20, %s1765_s20   ;;  %s1361_s19 = sphi %s1407_s19, %s1764_s19   ;;  %s1357_s18 = sphi %s1405_s18, %s1763_s18  }
   0x3   : > { %s19_s23 = ssub.s32 %s1365_s20, %s1422_s22  ;;  %s22_s24 = sadd.s32 1, %s1361_s19 }
   0x4   : > { %p20_p0 = scmp.eq.s32.totalorder %s19_s23, 0  ;;  %p29_p1 = scmp.ne.s32.totalorder %s1361_s19, %s1357_s18 }
   0x5   : > { %p30_p2 = scmp.eq.s32.totalorder %s1365_s20, 0  ;;  %p1209_p4 = scmp.ge.s32.totalorder %s1365_s20, 2 }
   0x6   : > { %s1431_s25 = scalar_select %p20_p0, %s1361_s19, %s22_s24  }
   0x7   : > { %p1433_p3 = por %p30_p2, %p29_p1  ;;  %185 = sbr.rel (%p1209_p4) target bundleno = 33 (0x21), region = 16 }
   0xc   : > { %188 = sbr.rel (!%p1433_p3) target bundleno = 19 (0x13), region = 20  ;;  %s190_s27 = sand.u32 (%p1433_p3), 1, %s1361_s19  }
   0xd   : > { %s1211_s28 = smul.u32 (%p1433_p3), 48, %s1365_s20  ;;  %s1210_s29 = sshll.u32 (%p1433_p3), %s190_s27, 4 }
   0xe   : > { %s192_s8 = scalar_lea.vmem (%p1433_p3), [#allocation2], %s1210_s29 }
   0xf   : > { %s1112_s7 = scalar_lea.vmem (%p1433_p3), %s1754_s0, %s1211_s28 }
  0x10   : > { %v1212_v0 = vld [vmem:[%s1112_s7 + $0x8] sm:$0xff] (%p1433_p3)  ;;  %v1213_v1 = vld [vmem:[%s1112_s7 + $0x20] sm:$0xff] (%p1433_p3) }
  0x11   : > { %228 = vst [vmem:[%s192_s8] sm:$0xff] %v1212_v0 }
  0x12   : > { %230 = vst [vmem:[%s192_s8 + $0x8] sm:$0xff] %v1213_v1 }
  0x13 PF: > { %236 = sbr.rel (!%p1433_p3) target bundleno = 26 (0x1a), region = 58  ;;  %s238_s9 = sand.u32 (%p1433_p3), 1, %s1361_s19  }
  0x14   : > { %s1245_s10 = smul.u32 (%p1433_p3), 48, %s1365_s20  ;;  %s1214_s11 = sshll.u32 (%p1433_p3), %s238_s9, 4 }
  0x15   : > { %s240_s15 = scalar_lea.vmem (%p1433_p3), [#allocation3], %s1214_s11 }
  0x16   : > { %s243_s14 = scalar_lea.vmem (%p1433_p3), %s1755_s1, %s1245_s10 }
  0x17   : > { %v274_v2 = vld [vmem:[%s243_s14] sm:$0xff] (%p1433_p3)  ;;  %v276_v3 = vld [vmem:[%s243_s14 + $0x18] sm:$0xff] (%p1433_p3) }
  0x18   : > { %275 = vst [vmem:[%s240_s15] sm:$0xff] %v274_v2 }
  0x19   : > { %277 = vst [vmem:[%s240_s15 + $0x8] sm:$0xff] %v276_v3 }
  0x1a PF: > { %283 = sbr.rel (!%p1433_p3) target bundleno = 33 (0x21), region = 96  ;;  %s285_s16 = sand.u32 (%p1433_p3), 1, %s1361_s19  }
  0x1b   : > { %s1217_s17 = smul.u32 (%p1433_p3), 48, %s1365_s20  ;;  %s1216_s23 = sshll.u32 (%p1433_p3), %s285_s16, 4 }
  0x1c   : > { %s287_s29 = scalar_lea.vmem (%p1433_p3), [#allocation4], %s1216_s23 }
  0x1d   : > { %s1122_s28 = scalar_lea.vmem (%p1433_p3), %s1756_s2, %s1217_s17 }
  0x1e   : > { %v1218_v4 = vld [vmem:[%s1122_s28 + $0x10] sm:$0xff] (%p1433_p3)  ;;  %v1219_v5 = vld [vmem:[%s1122_s28 + $0x28] sm:$0xff] (%p1433_p3) }
  0x1f   : > { %323 = vst [vmem:[%s287_s29] sm:$0xff] %v1218_v4 }
  0x20   : > { %325 = vst [vmem:[%s287_s29 + $0x8] sm:$0xff] %v1219_v5 }
  0x21 PF: > { %p1220_p5 = scmp.ge.s32.totalorder %s1365_s20, 1  ;;  %p342_p6 = scmp.lt.s32.totalorder %s1365_s20, 3 }
  0x23   : > { %p343_p7 = pnand %p1220_p5, %p342_p6 }
  0x24   : > { %s349_s26 = sand.u32 (!%p343_p7), 1, %s1357_s18   ;;  %p404_p8 = scmp.lt.s32.totalorder (!%p343_p7), %s1206_s21, 1 }
  0x25   : > { %346 = sbr.rel (%p343_p7) target bundleno = 1202 (0x4b2), region = 142  ;;  %s1464_s30 = sshll.u32 (!%p343_p7), %s349_s26, 4 }
  0x26   : > { %s358_s9 = scalar_lea.vmem (!%p343_p7), [#allocation3], %s1464_s30  ;;  %s351_s10 = scalar_lea.vmem (!%p343_p7), [#allocation2], %s1464_s30 }
  0x27   : > { %s1367_s18 = smov (!%p343_p7), 112   ;;  %s1368_s20 = smov (!%p343_p7), 80  }
  0x28   : > { %s1369_s11 = smov (!%p343_p7), 48   ;;  %s1370_s12 = smov (!%p343_p7), 32  }
  0x29   : > { %s1372_s16 = smov (!%p343_p7), 96   ;;  %s1373_s17 = smov (!%p343_p7), 64  }
  0x2a   : > { %s1767_s21 = smov (!%p404_p8, %s1206_s21), 1  ;;  %v418_v6 = vld [vmem:[%s358_s9] sm:$0xff]  ;;  %v419_v7 = vld [vmem:[%s358_s9 + $0x8] sm:$0xf]  ;;  %vm435_vm0 = vcmask 130048   ;;  %v1371_v25 = vmov 0  }
  0x2b   : > { %s409_s8 = scalar_lea.vmem %s1758_s4, %s1767_s21  ;;  %v416_v8 = vld [vmem:[%s351_s10] sm:$0xff]  ;;  %v417_v10 = vld [vmem:[%s351_s10 + $0x8] sm:$0xf]  ;;  %s406_s15 = scalar_lea.vmem %s1757_s3, %s1767_s21  ;;  %vm462_vm3 = vcmask 97280   ;;  %vm466_vm4 = vcmask 93184   ;;  %vm491_vm5 = vcmask 1045504  }
  0x2c   : > { %v1278_v9 = vld [vmem:[%s409_s8] ss:$0 sm:$0xff]  ;;  %s1374_s23 = smov 16   ;;  %s365_s24 = scalar_lea.vmem [#allocation4], %s1464_s30  ;;  %vm1067_vm6 = vcmask 261120   ;;  %vm1070_vm7 = vcmask 392192  }
  0x2d   : > { %v429_v11 = vmul.f32 %v1278_v9, %v418_v6  ;;  %v430_v12 = vmul.f32 %v1278_v9, %v419_v7  ;;  %v427_v13 = vmul.f32 %v1278_v9, %v416_v8  ;;  %v428_v14 = vmul.f32 %v1278_v9, %v417_v10  ;;  %v422_v23 = vld [vmem:[%s406_s15] sm:$0x1]  ;;  %v421_v38 = vld [vmem:[%s365_s24 + $0x8] sm:$0xf]  ;;  %s1244_s27 = sshll.u32 %s1767_s21, 4 }
  0x2e   : > { %vm456_vm1 = vcmp.eq.f32.partialorder %v422_v23, 0.0  ;;  %v420_v37 = vld [vmem:[%s365_s24] sm:$0xff]  ;;  %vm1073_vm8 = vcmask 523264   ;;  %vm1079_vm9 = vcmask 785408   ;;  %vm1076_vm10 = vcmask 654336   ;;  %s414_s26 = scalar_lea.vmem %s1759_s5, %s1244_s27 }
  0x2f   : > { %v434_v15 = vpack.c.bf16 %v430_v12, %v429_v11  ;;  %v431_v16 = vmul.f32 0.25, %v427_v13  ;;  %v432_v17 = vmul.f32 0.25, %v428_v14  ;;  %v457_v26 = vsel %vm456_vm1, 1, %v1371_v25 }
  0x30   : > { %v458_v27 = vperm.slane %v457_v26, 0  ;;  %v1517_v39 = vpack.c.bf16 %v421_v38, %v420_v37  ;;  %vm1082_vm11 = vcmask 916480  }
  0x31   : > { %v440_v18 = vsel %vm435_vm0, %v434_v15, 0  ;;  %513 = vrot.lane.b32.xlu1 %v434_v15, %s1367_s18  ;;  %v1478_v19 = vpack.c.bf16 %v432_v17, %v431_v16 }
  0x32   : > { %449 = vmatpush.bf16.xpose.msra.mxu0 %v440_v18  ;;  %vm1495_vm2 = vcmp.eq.s32.totalorder %v458_v27, 1  ;;  %v493_v40 = vsel %vm491_vm5, %v1517_v39, 0 }
  0x33   : > { %510 = vrot.lane.b32.xlu2 %v1478_v19, %s1367_s18  ;;  %502 = vmatpush.bf16.msra.mxu1 %v493_v40 }
  0x39   : > { %1226 = vmatmul.msk.bf16.vlgmr.msra.gmra.mxu0 %vm435_vm0, %v1478_v19 }
  0x3b   : > { %656 = vrot.lane.b32.xlu2 %v434_v15, %s1368_s20 }
  0x43   : > { %654 = vrot.lane.b32.xlu2 %v1478_v19, %s1368_s20 }
  0x4b   : > { %798 = vrot.lane.b32.xlu2 %v434_v15, %s1369_s11 }
  0x53   : > { %869 = vrot.lane.b32.xlu2 %v434_v15, %s1370_s12 }
  0x8d   : > { %v511_v20 = vpop.permute.xlu2 %510 }
  0x95   : > { %v657_v21 = vpop.permute.xlu2 %656 }
  0x96   : > { %v662_v22 = vsel %vm435_vm0, %v657_v21, 0 }
  0x97   : > { %671 = vmatpush.bf16.xpose.msrb.mxu0 %v662_v22 }
  0x9d   : > { %v655_v24 = vpop.permute.xlu2 %654 }
  0x9e   : > { %1232 = vmatmul.msk.bf16.vlgmr.msrb.gmra.mxu0 %vm435_vm0, %v655_v24 }
  0xa3   : > { %v514_v35 = vpop.permute.xlu1 %513 }
  0xa4   : > { %v519_v36 = vsel %vm435_vm0, %v514_v35, 0 }
  0xa5   : > { %528 = vmatpush.bf16.xpose.msra.mxu2 %v519_v36  ;;  %v799_v47 = vpop.permute.xlu2 %798 }
  0xa6   : > { %v804_v49 = vsel %vm435_vm0, %v799_v47, 0 }
  0xa7   : > { %813 = vmatpush.bf16.xpose.msra.mxu0 %v804_v49 }
  0xac   : > { %1228 = vmatmul.msk.bf16.vlgmr.msra.gmra.mxu2 %vm435_vm0, %v511_v20 }
  0xad   : > { %v870_v9 = vpop.permute.xlu2 %869 }
  0xae   : > { %v875_v18 = vsel %vm435_vm0, %v870_v9, 0 }
  0xb6   : > { %v451_v29 = vpop.f32.mrf.mxu0 }
  0xb7   : > { %v460_v30 = vsel %vm1495_vm2, -1e+09, %v451_v29 }
  0xb8   : > { %v463_v31 = vsel %vm462_vm3, %v460_v30, -inf }
  0xb9   : > { %464 = vmax.xlane.f32.xlu0 %v463_v31 }
  0xbe   : > { %v453_v32 = vpop.f32.mrf.mxu0 }
  0xbf   : > { %v461_v33 = vsel %vm1495_vm2, -1e+09, %v453_v32 }
  0xc0   : > { %v467_v34 = vsel %vm466_vm4, %v461_v33, -inf }
  0xc1   : > { %468 = vmax.xlane.f32.xlu0 %v467_v34 }
  0xd5   : > { %585 = vrot.lane.b32.xlu0 %v434_v15, %s1372_s16 }
  0xdd   : > { %583 = vrot.lane.b32.xlu0 %v1478_v19, %s1372_s16 }
  0xe5   : > { %727 = vrot.lane.b32.xlu0 %v434_v15, %s1373_s17 }
  0xed   : > { %796 = vrot.lane.b32.xlu0 %v1478_v19, %s1369_s11 }
  0xf5   : > { %940 = vrot.lane.b32.xlu0 %v434_v15, %s1374_s23 }
  0xfd   : > { %938 = vrot.lane.b32.xlu0 %v1478_v19, %s1374_s23 }
 0x11b   : > { %v673_v41 = vpop.f32.mrf.mxu0 }
 0x11c   : > { %v1547_v6 = vsel %vm1495_vm2, -1e+09, %v673_v41 }
 0x11d   : > { %v680_v8 = vsel %vm462_vm3, %v1547_v6, -inf }
 0x123   : > { %v675_v45 = vpop.f32.mrf.mxu0 }
 0x124   : > { %v1523_v46 = vsel %vm1495_vm2, -1e+09, %v675_v45 }
 0x125   : > { %v683_v48 = vsel %vm466_vm4, %v1523_v46, -inf }
 0x127   : > { %684 = vmax.xlane.f32.xlu0 %v683_v48 }
 0x12c   : > { %v465_v42 = vpop.xlane.xlu0 %464 }
 0x12d   : > { %v470_v43 = vsub.f32 %v460_v30, %v465_v42 }
 0x12f   : > { %v472_v44 = vmul.f32 1.442695, %v470_v43  ;;  %v530_v0 = vpop.f32.mrf.mxu2 }
 0x130   : > { %v1543_v5 = vsel %vm1495_vm2, -1e+09, %v530_v0 }
 0x131   : > { %1279 = vpow2.f32 %v472_v44  ;;  %v537_v7 = vsel %vm462_vm3, %v1543_v5, -inf }
 0x134   : > { %v469_v50 = vpop.xlane.xlu0 %468 }
 0x135   : > { %v471_v51 = vsub.f32 %v461_v33, %v469_v50 }
 0x137   : > { %v1280_v52 = vpop.eup %1279  ;;  %v474_v53 = vmul.f32 1.442695, %v471_v51  ;;  %v532_v2 = vpop.f32.mrf.mxu2 }
 0x138   : > { %v476_v54 = vsel %vm462_vm3, %v1280_v52, 0.0  ;;  %v536_v3 = vsel %vm1495_vm2, -1e+09, %v532_v2 }
 0x139   : > { %1281 = vpow2.f32 %v474_v53  ;;  %477 = vadd.xlane.f32.xlu1 %v476_v54  ;;  %v540_v4 = vsel %vm466_vm4, %v536_v3, -inf }
 0x13f   : > { %v1282_v55 = vpop.eup %1281 }
 0x140   : > { %v479_v56 = vsel %vm466_vm4, %v1282_v55, 0.0 }
 0x141   : > { %480 = vadd.xlane.f32.xlu2 %v479_v56 }
 0x147   : > { %v586_v57 = vpop.permute.xlu0 %585 }
 0x148   : > { %v591_v58 = vsel %vm435_vm0, %v586_v57, 0 }
 0x149   : > { %600 = vmatpush.bf16.xpose.msrb.mxu1 %v591_v58 }
 0x14f   : > { %v584_v59 = vpop.permute.xlu0 %583 }
 0x152   : > { %725 = vrot.lane.b32.xlu1 %v1478_v19, %s1373_s17 }
 0x157   : > { %v728_v60 = vpop.permute.xlu0 %727 }
 0x158   : > { %v733_v17 = vsel %vm435_vm0, %v728_v60, 0 }
 0x159   : > { %867 = vrot.lane.b32.xlu2 %v1478_v19, %s1370_s12 }
 0x15f   : > { %v797_v61 = vpop.permute.xlu0 %796 }
 0x160   : > { %1236 = vmatmul.msk.bf16.vlgmr.msra.gmra.mxu0 %vm435_vm0, %v797_v61 }
 0x167   : > { %v941_v62 = vpop.permute.xlu0 %940 }
 0x168   : > { %v946_v63 = vsel %vm435_vm0, %v941_v62, 0 }
 0x169   : > { %955 = vmatpush.bf16.xpose.msrb.mxu0 %v946_v63 }
 0x16f   : > { %v939_v1 = vpop.permute.xlu0 %938 }
 0x170   : > { %1240 = vmatmul.msk.bf16.vlgmr.msrb.gmra.mxu0 %vm435_vm0, %v939_v1 }
 0x17c   : > { %541 = vmax.xlane.f32.xlu1 %v540_v4 }
 0x182   : > { %538 = vmax.xlane.f32.xlu2 %v537_v7 }
 0x184   : > { %681 = vmax.xlane.f32.xlu1 %v680_v8 }
 0x19a   : > { %703 = vrot.lane.b32.xlu2 %v1517_v39, %s1368_s20  ;;  %v685_v23 = vpop.xlane.xlu0 %684 }
 0x19b   : > { %v687_v25 = vsub.f32 %v1523_v46, %v685_v23 }
 0x19d   : > { %561 = vrot.lane.b32.xlu1 %v1517_v39, %s1367_s18  ;;  %v690_v29 = vmul.f32 1.442695, %v687_v25 }
 0x1ac   : > { %v478_v10 = vpop.xlane.xlu1 %477 }
 0x1ad   : > { %1283 = vrcp.f32 %v478_v10 }
 0x1b3   : > { %v1284_v12 = vpop.eup %1283 }
 0x1b4   : > { %v481_v11 = vpop.xlane.xlu2 %480  ;;  %v484_v14 = vmul.f32 %v1284_v12, %v1280_v52 }
 0x1b5   : > { %1285 = vrcp.f32 %v481_v11 }
 0x1b6   : > { %1287 = vpow2.f32 %v690_v29 }
 0x1bb   : > { %v1286_v13 = vpop.eup %1285 }
 0x1bc   : > { %v485_v15 = vmul.f32 %v1286_v13, %v1282_v55  ;;  %v868_v32 = vpop.permute.xlu2 %867  ;;  %v1576_v37 = vpop.eup %1287 }
 0x1bd   : > { %v695_v42 = vsel %vm466_vm4, %v1576_v37, 0.0 }
 0x1be   : > { %v486_v16 = vpack.c.bf16 %v485_v15, %v484_v14 }
 0x1c0   : > { %1227 = vmatmul.msk.bf16.vlgmr.msra.gmra.mxu1 %vm462_vm3, %v486_v16 }
 0x1c1   : > { %742 = vmatpush.bf16.xpose.msra.mxu1 %v733_v17 }
 0x1c4   : > { %v726_v20 = vpop.permute.xlu1 %725 }
 0x1d0   : > { %1230 = vmatmul.msk.bf16.vlgmr.msrb.gmra.mxu1 %vm435_vm0, %v584_v59 }
 0x1d1   : > { %884 = vmatpush.bf16.xpose.msrb.mxu1 %v875_v18 }
 0x1dd   : > { %v815_v19 = vpop.f32.mrf.mxu0 }
 0x1de   : > { %v820_v21 = vsel %vm1495_vm2, -1e+09, %v815_v19 }
 0x1df   : > { %v822_v22 = vsel %vm462_vm3, %v820_v21, -inf }
 0x1e0   : > { %1234 = vmatmul.msk.bf16.vlgmr.msra.gmra.mxu1 %vm435_vm0, %v726_v20  ;;  %823 = vmax.xlane.f32.xlu0 %v822_v22 }
 0x1e5   : > { %v817_v24 = vpop.f32.mrf.mxu0 }
 0x1e6   : > { %v821_v26 = vsel %vm1495_vm2, -1e+09, %v817_v24 }
 0x1e7   : > { %v825_v27 = vsel %vm466_vm4, %v821_v26, -inf }
 0x1e8   : > { %826 = vmax.xlane.f32.xlu2 %v825_v27 }
 0x1ed   : > { %v957_v30 = vpop.f32.mrf.mxu0 }
 0x1ee   : > { %v1571_v31 = vsel %vm1495_vm2, -1e+09, %v957_v30 }
 0x1ef   : > { %v542_v33 = vpop.xlane.xlu1 %541  ;;  %v964_v34 = vsel %vm462_vm3, %v1571_v31, -inf }
 0x1f0   : > { %v544_v35 = vsub.f32 %v536_v3, %v542_v33  ;;  %1238 = vmatmul.msk.bf16.vlgmr.msrb.gmra.mxu1 %vm435_vm0, %v868_v32  ;;  %965 = vmax.xlane.f32.xlu2 %v964_v34 }
 0x1f2   : > { %v547_v36 = vmul.f32 1.442695, %v544_v35 }
 0x1f4   : > { %632 = vrot.lane.b32.xlu0 %v1517_v39, %s1372_s16  ;;  %1289 = vpow2.f32 %v547_v36 }
 0x1f5   : > { %v959_v38 = vpop.f32.mrf.mxu0  ;;  %v539_v44 = vpop.xlane.xlu2 %538 }
 0x1f6   : > { %v1582_v40 = vsel %vm1495_vm2, -1e+09, %v959_v38  ;;  %v543_v51 = vsub.f32 %v1543_v5, %v539_v44 }
 0x1f7   : > { %v967_v41 = vsel %vm466_vm4, %v1582_v40, -inf  ;;  %v682_v48 = vpop.xlane.xlu1 %681 }
 0x1f8   : > { %968 = vmax.xlane.f32.xlu1 %v967_v41  ;;  %696 = vadd.xlane.f32.xlu2 %v695_v42  ;;  %v686_v49 = vsub.f32 %v1547_v6, %v682_v48  ;;  %v545_v52 = vmul.f32 1.442695, %v543_v51 }
 0x1fa   : > { %v1588_v43 = vpop.eup %1289  ;;  %v688_v50 = vmul.f32 1.442695, %v686_v49 }
 0x1fb   : > { %v552_v45 = vsel %vm466_vm4, %v1588_v43, 0.0 }
 0x1fc   : > { %1291 = vpow2.f32 %v688_v50 }
 0x1fd   : > { %v704_v46 = vpop.permute.xlu2 %703  ;;  %1293 = vpow2.f32 %v545_v52 }
 0x1fe   : > { %v709_v47 = vsel %vm491_vm5, %v704_v46, 0 }
 0x1ff   : > { %718 = vmatpush.bf16.msrb.mxu2 %v709_v47 }
 0x200   : > { %553 = vadd.xlane.f32.xlu2 %v552_v45 }
 0x202   : > { %v1595_v53 = vpop.eup %1291 }
 0x203   : > { %v692_v54 = vsel %vm462_vm3, %v1595_v53, 0.0  ;;  %v1599_v55 = vpop.eup %1293 }
 0x204   : > { %v549_v56 = vsel %vm462_vm3, %v1599_v55, 0.0 }
 0x20f   : > { %v562_v23 = vpop.permute.xlu1 %561 }
 0x210   : > { %v567_v24 = vsel %vm491_vm5, %v562_v23, 0 }
 0x211   : > { %576 = vmatpush.bf16.msra.mxu3 %v567_v24 }
 0x21e   : > { %693 = vadd.xlane.f32.xlu0 %v692_v54 }
 0x226   : > { %550 = vadd.xlane.f32.xlu0 %v549_v56 }
 0x23d   : > { %v1603_v57 = vpop.f32.mrf.mxu1 }
 0x245   : > { %v1605_v58 = vpop.f32.mrf.mxu1 }
 0x24d   : > { %v602_v59 = vpop.f32.mrf.mxu1 }
 0x24e   : > { %v1609_v60 = vsel %vm1495_vm2, -1e+09, %v602_v59 }
 0x24f   : > { %v609_v61 = vsel %vm462_vm3, %v1609_v60, -inf }
 0x250   : > { %610 = vmax.xlane.f32.xlu0 %v609_v61 }
 0x253   : > { %v824_v62 = vpop.xlane.xlu0 %823 }
 0x254   : > { %v828_v63 = vsub.f32 %v820_v21, %v824_v62 }
 0x255   : > { %v604_v0 = vpop.f32.mrf.mxu1 }
 0x256   : > { %v830_v1 = vmul.f32 1.442695, %v828_v63  ;;  %v608_v8 = vsel %vm1495_vm2, -1e+09, %v604_v0 }
 0x257   : > { %v612_v12 = vsel %vm466_vm4, %v608_v8, -inf }
 0x258   : > { %1295 = vpow2.f32 %v830_v1 }
 0x25b   : > { %v827_v2 = vpop.xlane.xlu2 %826 }
 0x25c   : > { %v829_v3 = vsub.f32 %v821_v26, %v827_v2 }
 0x25d   : > { %v744_v4 = vpop.f32.mrf.mxu1 }
 0x25e   : > { %v1613_v5 = vpop.eup %1295  ;;  %v832_v6 = vmul.f32 1.442695, %v829_v3  ;;  %v1626_v13 = vsel %vm1495_vm2, -1e+09, %v744_v4 }
 0x25f   : > { %v834_v7 = vsel %vm462_vm3, %v1613_v5, 0.0  ;;  %v751_v17 = vsel %vm462_vm3, %v1626_v13, -inf }
 0x260   : > { %1297 = vpow2.f32 %v832_v6  ;;  %835 = vadd.xlane.f32.xlu2 %v834_v7 }
 0x263   : > { %v1649_v25 = vpop.xlane.xlu2 %965 }
 0x265   : > { %v746_v9 = vpop.f32.mrf.mxu1 }
 0x266   : > { %v1619_v10 = vpop.eup %1297  ;;  %v1630_v14 = vsel %vm1495_vm2, -1e+09, %v746_v9  ;;  %v633_v26 = vpop.permute.xlu0 %632 }
 0x267   : > { %v837_v11 = vsel %vm466_vm4, %v1619_v10, 0.0  ;;  %v754_v16 = vsel %vm466_vm4, %v1630_v14, -inf  ;;  %v638_v27 = vsel %vm491_vm5, %v633_v26, 0 }
 0x268   : > { %838 = vadd.xlane.f32.xlu1 %v837_v11  ;;  %613 = vmax.xlane.f32.xlu2 %v612_v12 }
 0x269   : > { %647 = vmatpush.bf16.msrb.mxu3 %v638_v27 }
 0x26b   : > { %v697_v28 = vpop.xlane.xlu2 %696  ;;  %v969_v51 = vpop.xlane.xlu1 %968 }
 0x26c   : > { %1299 = vrcp.f32 %v697_v28 }
 0x26d   : > { %v886_v15 = vpop.f32.mrf.mxu1 }
 0x26e   : > { %v1638_v18 = vsel %vm1495_vm2, -1e+09, %v886_v15 }
 0x26f   : > { %v893_v22 = vsel %vm462_vm3, %v1638_v18, -inf }
 0x270   : > { %755 = vmax.xlane.f32.xlu1 %v754_v16  ;;  %752 = vmax.xlane.f32.xlu2 %v751_v17 }
 0x272   : > { %v1300_v32 = vpop.eup %1299 }
 0x273   : > { %v554_v30 = vpop.xlane.xlu2 %553  ;;  %v701_v34 = vmul.f32 %v1300_v32, %v1576_v37 }
 0x275   : > { %v888_v19 = vpop.f32.mrf.mxu1 }
 0x276   : > { %v1642_v20 = vsel %vm1495_vm2, -1e+09, %v888_v19  ;;  %v971_v19 = vsub.f32 %v1582_v40, %v969_v51 }
 0x277   : > { %v896_v21 = vsel %vm466_vm4, %v1642_v20, -inf }
 0x278   : > { %897 = vmax.xlane.f32.xlu0 %v896_v21  ;;  %894 = vmax.xlane.f32.xlu1 %v893_v22  ;;  %v974_v23 = vmul.f32 1.442695, %v971_v19 }
 0x291   : > { %v694_v29 = vpop.xlane.xlu0 %693 }
 0x292   : > { %1301 = vrcp.f32 %v694_v29 }
 0x293   : > { %1303 = vrcp.f32 %v554_v30 }
 0x298   : > { %v1302_v33 = vpop.eup %1301 }
 0x299   : > { %v700_v35 = vmul.f32 %v1302_v33, %v1595_v53  ;;  %v551_v36 = vpop.xlane.xlu0 %550  ;;  %v1304_v41 = vpop.eup %1303 }
 0x29a   : > { %1305 = vrcp.f32 %v551_v36  ;;  %v558_v45 = vmul.f32 %v1304_v41, %v1588_v43 }
 0x29b   : > { %v702_v38 = vpack.c.bf16 %v701_v34, %v700_v35 }
 0x29d   : > { %1233 = vmatmul.msk.bf16.vlgmr.msrb.gmra.mxu2 %vm462_vm3, %v702_v38 }
 0x2a0   : > { %v1306_v42 = vpop.eup %1305 }
 0x2a1   : > { %v557_v44 = vmul.f32 %v1306_v42, %v1599_v55 }
 0x2a3   : > { %v559_v46 = vpack.c.bf16 %v558_v45, %v557_v44 }
 0x2a5   : > { %1229 = vmatmul.msk.bf16.vlgmr.msra.gmra.mxu3 %vm462_vm3, %v559_v46 }
 0x2c3   : > { %v611_v47 = vpop.xlane.xlu0 %610 }
 0x2c4   : > { %v615_v48 = vsub.f32 %v1609_v60, %v611_v47 }
 0x2c6   : > { %v617_v37 = vmul.f32 1.442695, %v615_v48 }
 0x2c8   : > { %1307 = vpow2.f32 %v617_v37 }
 0x2ce   : > { %v1659_v49 = vpop.eup %1307 }
 0x2cf   : > { %v621_v50 = vsel %vm462_vm3, %v1659_v49, 0.0 }
 0x2d0   : > { %622 = vadd.xlane.f32.xlu0 %v621_v50 }
 0x2d3   : > { %v836_v52 = vpop.xlane.xlu2 %835 }
 0x2d4   : > { %1309 = vrcp.f32 %v836_v52 }
 0x2da   : > { %v1310_v56 = vpop.eup %1309 }
 0x2db   : > { %v839_v53 = vpop.xlane.xlu1 %838  ;;  %v614_v54 = vpop.xlane.xlu2 %613  ;;  %v1664_v60 = vmul.f32 %v1310_v56, %v1613_v5 }
 0x2dc   : > { %1311 = vrcp.f32 %v839_v53  ;;  %v616_v43 = vsub.f32 %v608_v8, %v614_v54 }
 0x2de   : > { %v619_v55 = vmul.f32 1.442695, %v616_v43 }
 0x2e0   : > { %1313 = vpow2.f32 %v619_v55 }
 0x2e2   : > { %v1312_v59 = vpop.eup %1311 }
 0x2e3   : > { %v1667_v61 = vmul.f32 %v1312_v59, %v1619_v10  ;;  %v756_v62 = vpop.xlane.xlu1 %755  ;;  %v753_v63 = vpop.xlane.xlu2 %752 }
 0x2e4   : > { %v758_v0 = vsub.f32 %v1630_v14, %v756_v62  ;;  %v757_v1 = vsub.f32 %v1626_v13, %v753_v63  ;;  %v970_v14 = vsub.f32 %v1571_v31, %v1649_v25 }
 0x2e5   : > { %v844_v2 = vpack.c.bf16 %v1667_v61, %v1664_v60 }
 0x2e6   : > { %v1314_v3 = vpop.eup %1313  ;;  %v761_v4 = vmul.f32 1.442695, %v758_v0  ;;  %v759_v6 = vmul.f32 1.442695, %v757_v1  ;;  %v972_v17 = vmul.f32 1.442695, %v970_v14 }
 0x2e7   : > { %v624_v7 = vsel %vm466_vm4, %v1314_v3, 0.0 }
 0x2e8   : > { %1315 = vpow2.f32 %v761_v4  ;;  %625 = vadd.xlane.f32.xlu2 %v624_v7 }
 0x2e9   : > { %1317 = vpow2.f32 %v759_v6 }
 0x2eb   : > { %v895_v11 = vpop.xlane.xlu1 %894  ;;  %v898_v15 = vpop.xlane.xlu0 %897 }
 0x2ec   : > { %v899_v12 = vsub.f32 %v1638_v18, %v895_v11  ;;  %v900_v16 = vsub.f32 %v1642_v20, %v898_v15 }
 0x2ee   : > { %v1674_v5 = vpop.eup %1315  ;;  %v901_v13 = vmul.f32 1.442695, %v899_v12  ;;  %v903_v21 = vmul.f32 1.442695, %v900_v16 }
 0x2ef   : > { %v1318_v8 = vpop.eup %1317  ;;  %v766_v9 = vsel %vm466_vm4, %v1674_v5, 0.0 }
 0x2f0   : > { %v763_v10 = vsel %vm462_vm3, %v1318_v8, 0.0  ;;  %767 = vadd.xlane.f32.xlu0 %v766_v9  ;;  %1319 = vpow2.f32 %v901_v13 }
 0x2f1   : > { %764 = vadd.xlane.f32.xlu1 %v763_v10  ;;  %1321 = vpow2.f32 %v972_v17 }
 0x2f2   : > { %1323 = vpow2.f32 %v903_v21 }
 0x2f3   : > { %1325 = vpow2.f32 %v974_v23 }
 0x2f6   : > { %v1690_v22 = vpop.eup %1319 }
 0x2f7   : > { %v905_v18 = vsel %vm462_vm3, %v1690_v22, 0.0  ;;  %v1694_v24 = vpop.eup %1321 }
 0x2f8   : > { %v1324_v31 = vpop.eup %1323  ;;  %v976_v20 = vsel %vm462_vm3, %v1694_v24, 0.0 }
 0x2f9   : > { %v1698_v25 = vpop.eup %1325  ;;  %v908_v40 = vsel %vm466_vm4, %v1324_v31, 0.0 }
 0x2fa   : > { %v979_v26 = vsel %vm466_vm4, %v1698_v25, 0.0 }
 0x300   : > { %916 = vrot.lane.b32.xlu2 %v1517_v39, %s1370_s12 }
 0x304   : > { %845 = vrot.lane.b32.xlu0 %v1517_v39, %s1369_s11 }
 0x30a   : > { %774 = vrot.lane.b32.xlu1 %v1517_v39, %s1373_s17 }
 0x320   : > { %v720_v29 = vpop.f32.mrf.mxu2 }
 0x328   : > { %v578_v27 = vpop.f32.mrf.mxu3  ;;  %v722_v34 = vpop.f32.mrf.mxu2 }
 0x329   : > { %906 = vadd.xlane.f32.xlu2 %v905_v18 }
 0x32e   : > { %977 = vadd.xlane.f32.xlu0 %v976_v20 }
 0x330   : > { %v580_v28 = vpop.f32.mrf.mxu3 }
 0x331   : > { %909 = vadd.xlane.f32.xlu2 %v908_v40 }
 0x334   : > { %980 = vadd.xlane.f32.xlu1 %v979_v26 }
 0x342   : > { %1013 = vrot.lane.b32.xlu0 %v580_v28, %s1374_s23 }
 0x343   : > { %v623_v30 = vpop.xlane.xlu0 %622 }
 0x344   : > { %1327 = vrcp.f32 %v623_v30 }
 0x349   : > { %987 = vrot.lane.b32.xlu2 %v1517_v39, %s1374_s23 }
 0x34a   : > { %v1328_v33 = vpop.eup %1327 }
 0x34b   : > { %v629_v36 = vmul.f32 %v1328_v33, %v1659_v49 }
 0x351   : > { %1011 = vrot.lane.b32.xlu2 %v578_v27, %s1374_s23 }
 0x359   : > { %1027 = vrot.lane.b32.xlu2 %v720_v29, %s1369_s11 }
 0x35b   : > { %v626_v32 = vpop.xlane.xlu2 %625 }
 0x35c   : > { %1329 = vrcp.f32 %v626_v32 }
 0x361   : > { %1029 = vrot.lane.b32.xlu2 %v722_v34, %s1369_s11 }
 0x362   : > { %v1330_v35 = vpop.eup %1329 }
 0x363   : > { %v630_v38 = vmul.f32 %v1330_v35, %v1314_v3  ;;  %v768_v39 = vpop.xlane.xlu0 %767  ;;  %v917_v37 = vpop.permute.xlu2 %916 }
 0x364   : > { %v765_v42 = vpop.xlane.xlu1 %764  ;;  %1331 = vrcp.f32 %v768_v39  ;;  %v922_v52 = vsel %vm491_vm5, %v917_v37, 0 }
 0x365   : > { %v631_v41 = vpack.c.bf16 %v630_v38, %v629_v36  ;;  %1333 = vrcp.f32 %v765_v42 }
 0x367   : > { %1231 = vmatmul.msk.bf16.vlgmr.msrb.gmra.mxu3 %vm462_vm3, %v631_v41 }
 0x36a   : > { %v1332_v45 = vpop.eup %1331 }
 0x36b   : > { %v1334_v47 = vpop.eup %1333  ;;  %v772_v50 = vmul.f32 %v1332_v45, %v1674_v5 }
 0x36c   : > { %v771_v48 = vmul.f32 %v1334_v47, %v1318_v8 }
 0x36e   : > { %v773_v53 = vpack.c.bf16 %v772_v50, %v771_v48 }
 0x376   : > { %v846_v44 = vpop.permute.xlu0 %845 }
 0x377   : > { %v851_v46 = vsel %vm491_vm5, %v846_v44, 0 }
 0x378   : > { %860 = vmatpush.bf16.msra.mxu2 %v851_v46 }
 0x37b   : > { %1237 = vmatmul.msk.bf16.vlgmr.msra.gmra.mxu2 %vm462_vm3, %v844_v2 }
 0x37c   : > { %v775_v49 = vpop.permute.xlu1 %774 }
 0x37d   : > { %v780_v51 = vsel %vm491_vm5, %v775_v49, 0 }
 0x37e   : > { %789 = vmatpush.bf16.msra.mxu3 %v780_v51 }
 0x381   : > { %1235 = vmatmul.msk.bf16.vlgmr.msra.gmra.mxu3 %vm462_vm3, %v773_v53 }
 0x382   : > { %931 = vmatpush.bf16.msrb.mxu3 %v922_v52 }
 0x39c   : > { %v907_v54 = vpop.xlane.xlu2 %906 }
 0x39d   : > { %1335 = vrcp.f32 %v907_v54 }
 0x3a1   : > { %v978_v43 = vpop.xlane.xlu0 %977 }
 0x3a3   : > { %v1336_v59 = vpop.eup %1335 }
 0x3a4   : > { %v910_v55 = vpop.xlane.xlu2 %909  ;;  %v913_v62 = vmul.f32 %v1336_v59, %v1690_v22 }
 0x3a5   : > { %1337 = vrcp.f32 %v910_v55 }
 0x3a6   : > { %1339 = vrcp.f32 %v978_v43 }
 0x3a7   : > { %v981_v56 = vpop.xlane.xlu1 %980 }
 0x3a8   : > { %1341 = vrcp.f32 %v981_v56 }
 0x3ab   : > { %v1338_v60 = vpop.eup %1337 }
 0x3ac   : > { %v1340_v61 = vpop.eup %1339  ;;  %v914_v63 = vmul.f32 %v1338_v60, %v1324_v31  ;;  %v988_v0 = vpop.permute.xlu2 %987 }
 0x3ad   : > { %v993_v1 = vsel %vm491_vm5, %v988_v0, 0  ;;  %v984_v4 = vmul.f32 %v1340_v61, %v1694_v24 }
 0x3ae   : > { %v1342_v2 = vpop.eup %1341  ;;  %v915_v3 = vpack.c.bf16 %v914_v63, %v913_v62  ;;  %1002 = vmatpush.bf16.msrb.mxu2 %v993_v1 }
 0x3af   : > { %v985_v6 = vmul.f32 %v1342_v2, %v1698_v25 }
 0x3b0   : > { %1239 = vmatmul.msk.bf16.vlgmr.msrb.gmra.mxu3 %vm462_vm3, %v915_v3 }
 0x3b1   : > { %v986_v7 = vpack.c.bf16 %v985_v6, %v984_v4 }
 0x3b3   : > { %1241 = vmatmul.msk.bf16.vlgmr.msrb.gmra.mxu2 %vm462_vm3, %v986_v7 }
 0x3b4   : > { %v1012_v17 = vpop.permute.xlu2 %1011  ;;  %v1014_v22 = vpop.permute.xlu0 %1013 }
 0x3b5   : > { %v1065_v20 = vsel %vm435_vm0, %v1603_v57, %v1012_v17  ;;  %v1066_v27 = vsel %vm435_vm0, %v1605_v58, %v1014_v22 }
 0x3bc   : > { %v1028_v19 = vpop.permute.xlu2 %1027 }
 0x3c4   : > { %v1030_v21 = vpop.permute.xlu2 %1029 }
 0x3ea   : > { %v649_v5 = vpop.f32.mrf.mxu3 }
 0x3eb   : > { %1019 = vrot.lane.b32.xlu2 %v649_v5, %s1370_s12 }
 0x3f2   : > { %v651_v8 = vpop.f32.mrf.mxu3 }
 0x3fe   : > { %v862_v9 = vpop.f32.mrf.mxu2 }
 0x3ff   : > { %1043 = vrot.lane.b32.xlu1 %v862_v9, %s1368_s20 }
 0x404   : > { %v791_v10 = vpop.f32.mrf.mxu3 }
 0x406   : > { %v864_v11 = vpop.f32.mrf.mxu2 }
 0x407   : > { %1021 = vrot.lane.b32.xlu1 %v651_v8, %s1370_s12  ;;  %1045 = vrot.lane.b32.xlu0 %v864_v11, %s1368_s20 }
 0x40c   : > { %v793_v12 = vpop.f32.mrf.mxu3 }
 0x40d   : > { %1037 = vrot.lane.b32.xlu2 %v793_v12, %s1373_s17 }
 0x40f   : > { %1035 = vrot.lane.b32.xlu0 %v791_v10, %s1373_s17 }
 0x433   : > { %v933_v13 = vpop.f32.mrf.mxu3 }
 0x434   : > { %1051 = vrot.lane.b32.xlu2 %v933_v13, %s1372_s16 }
 0x436   : > { %v1004_v14 = vpop.f32.mrf.mxu2 }
 0x437   : > { %1059 = vrot.lane.b32.xlu0 %v1004_v14, %s1367_s18 }
 0x43b   : > { %v935_v15 = vpop.f32.mrf.mxu3 }
 0x43c   : > { %1053 = vrot.lane.b32.xlu1 %v935_v15, %s1372_s16 }
 0x43e   : > { %v1006_v16 = vpop.f32.mrf.mxu2 }
 0x43f   : > { %1061 = vrot.lane.b32.xlu2 %v1006_v16, %s1367_s18 }
 0x445   : > { %v1020_v23 = vpop.permute.xlu2 %1019 }
 0x446   : > { %v1068_v25 = vsel %vm1067_vm6, %v1065_v20, %v1020_v23 }
 0x447   : > { %v1071_v28 = vsel %vm1070_vm7, %v1068_v25, %v1028_v19 }
 0x467   : > { %v1038_v31 = vpop.permute.xlu2 %1037 }
 0x471   : > { %v1044_v24 = vpop.permute.xlu1 %1043 }
 0x479   : > { %v1046_v18 = vpop.permute.xlu0 %1045  ;;  %v1022_v26 = vpop.permute.xlu1 %1021 }
 0x47a   : > { %v1069_v29 = vsel %vm1067_vm6, %v1066_v27, %v1022_v26 }
 0x47b   : > { %v1072_v33 = vsel %vm1070_vm7, %v1069_v29, %v1030_v21 }
 0x47c   : > { %v1075_v38 = vsel %vm1073_vm8, %v1072_v33, %v1038_v31 }
 0x47d   : > { %v1078_v58 = vsel %vm1076_vm10, %v1075_v38, %v1046_v18 }
 0x481   : > { %v1036_v40 = vpop.permute.xlu0 %1035 }
 0x482   : > { %v1074_v30 = vsel %vm1073_vm8, %v1071_v28, %v1036_v40 }
 0x483   : > { %v1077_v34 = vsel %vm1076_vm10, %v1074_v30, %v1044_v24 }
 0x48e   : > { %v1052_v32 = vpop.permute.xlu2 %1051 }
 0x48f   : > { %v1080_v57 = vsel %vm1079_vm9, %v1077_v34, %v1052_v32 }
 0x499   : > { %v1062_v39 = vpop.permute.xlu2 %1061 }
 0x4a9   : > { %v1060_v35 = vpop.permute.xlu0 %1059 }
 0x4aa   : > { %v1083_v36 = vsel %vm1082_vm11, %v1080_v57, %v1060_v35 }
 0x4ab   : > { %1085 = vst [vmem:[%s414_s26] sm:$0xff] %v1083_v36 }
 0x4ae   : > { %v1054_v41 = vpop.permute.xlu1 %1053 }
 0x4af   : > { %v1081_v42 = vsel %vm1079_vm9, %v1078_v58, %v1054_v41 }
 0x4b0   : > { %v1084_v44 = vsel %vm1082_vm11, %v1081_v42, %v1062_v39 }
 0x4b1   : > { %1086 = vst [vmem:[%s414_s26 + $0x8] sm:$0xf] %v1084_v44 }
 0x4b2 PF: > { %p12_p9 = scmp.ge.s32.totalorder %s1422_s22, 4   ;;  %s1763_s18 = smov %s1361_s19 }
 0x4b3   : > { %s1764_s19 = smov %s1431_s25  ;;  %s1765_s20 = smov %s1422_s22 }
 0x4b4   :  { %14 = sbr.rel (!%p12_p9) target bundleno = 2 (0x2), region = 211 }

// kernel: _lambda_.43
= control target key start
LH: loop header
LB: loop body
LE: loop exit
PB: predicated region body
PF: predicated region fallthrough
CT: control target
= control target key end

     0   :  { %v382_v52 = vmov 0   ;;  %s585_s1 = inlined_call_operand.vmem [shape: bf16[128,384], index: 1, kind: input, shape index: {}]   ;;  %s586_s3 = inlined_call_operand.vmem [shape: f32[16,1], index: 3, kind: input, shape index: {}]   ;;  %s587_s0 = inlined_call_operand.vmem [shape: f32[16,128], index: 0, kind: input, shape index: {}]   ;;  %s588_s2 = inlined_call_operand.vmem [shape: f32[1,384], index: 2, kind: input, shape index: {}]   ;;  %s589_s4 = inlined_call_operand.vmem [shape: f32[16,384], index: 4, kind: output, shape index: {}]  }
   0x1   :  { %v346_v0 = vld [vmem:[%s585_s1 + $0xa8] sm:$0xf]  ;;  %v378_v1 = vld [vmem:[%s585_s1 + $0xb0] sm:$0xf0]  ;;  %v377_v2 = vld [vmem:[%s585_s1 + $0xac] sm:$0xf]  ;;  %381 = vset.pattern.permute.xlu0 %v382_v52 }
   0x2   :  { %v347_v3 = vor.u32 %v378_v1, %v346_v0  ;;  %v348_v4 = vld [vmem:[%s585_s1 + $0xb4] sm:$0xf0]  ;;  %v354_v5 = vld [vmem:[%s585_s1 + $0xb0] sm:$0xf]  ;;  %v379_v6 = vld [vmem:[%s585_s1 + $0xb8] sm:$0xf0] }
   0x3   :  { %v351_v7 = vor.u32 %v377_v2, %v348_v4  ;;  %v355_v8 = vor.u32 %v379_v6, %v354_v5  ;;  %v334_v9 = vld [vmem:[%s585_s1 + $0x90] sm:$0xf]  ;;  %v375_v10 = vld [vmem:[%s585_s1 + $0x98] sm:$0xf0]  ;;  %v374_v11 = vld [vmem:[%s585_s1 + $0x94] sm:$0xf] }
   0x4   :  { %190 = vmatpush.bf16.msra.mxu0 %v347_v3  ;;  %v335_v12 = vor.u32 %v375_v10, %v334_v9  ;;  %v336_v13 = vld [vmem:[%s585_s1 + $0x9c] sm:$0xf0]  ;;  %v342_v14 = vld [vmem:[%s585_s1 + $0x98] sm:$0xf]  ;;  %v376_v15 = vld [vmem:[%s585_s1 + $0xa0] sm:$0xf0] }
   0x5   :  { %204 = vmatpush.bf16.msra.mxu1 %v351_v7  ;;  %218 = vmatpush.bf16.msra.mxu2 %v355_v8  ;;  %v339_v16 = vor.u32 %v374_v11, %v336_v13  ;;  %v343_v17 = vor.u32 %v376_v15, %v342_v14  ;;  %v322_v18 = vld [vmem:[%s585_s1 + $0x78] sm:$0xf]  ;;  %v372_v19 = vld [vmem:[%s585_s1 + $0x80] sm:$0xf0]  ;;  %v371_v20 = vld [vmem:[%s585_s1 + $0x7c] sm:$0xf] }
   0x6   :  { %v324_v21 = vld [vmem:[%s585_s1 + $0x84] sm:$0xf0]  ;;  %v330_v22 = vld [vmem:[%s585_s1 + $0x80] sm:$0xf]  ;;  %v373_v23 = vld [vmem:[%s585_s1 + $0x88] sm:$0xf0]  ;;  %v323_v24 = vor.u32 %v372_v19, %v322_v18 }
   0x7   :  { %v327_v25 = vor.u32 %v371_v20, %v324_v21  ;;  %v331_v26 = vor.u32 %v373_v23, %v330_v22  ;;  %v310_v27 = vld [vmem:[%s585_s1 + $0x60] sm:$0xf]  ;;  %v369_v28 = vld [vmem:[%s585_s1 + $0x68] sm:$0xf0]  ;;  %v368_v29 = vld [vmem:[%s585_s1 + $0x64] sm:$0xf] }
   0x8   :  { %191 = vmatpush.bf16.msra.mxu0 %v335_v12  ;;  %v312_v30 = vld [vmem:[%s585_s1 + $0x6c] sm:$0xf0]  ;;  %v318_v31 = vld [vmem:[%s585_s1 + $0x68] sm:$0xf]  ;;  %v370_v32 = vld [vmem:[%s585_s1 + $0x70] sm:$0xf0]  ;;  %v311_v33 = vor.u32 %v369_v28, %v310_v27 }
   0x9   :  { %205 = vmatpush.bf16.msra.mxu1 %v339_v16  ;;  %219 = vmatpush.bf16.msra.mxu2 %v343_v17  ;;  %v315_v34 = vor.u32 %v368_v29, %v312_v30  ;;  %v319_v35 = vor.u32 %v370_v32, %v318_v31  ;;  %v298_v36 = vld [vmem:[%s585_s1 + $0x48] sm:$0xf]  ;;  %v366_v37 = vld [vmem:[%s585_s1 + $0x50] sm:$0xf0]  ;;  %v365_v38 = vld [vmem:[%s585_s1 + $0x4c] sm:$0xf] }
   0xa   :  { %v300_v39 = vld [vmem:[%s585_s1 + $0x54] sm:$0xf0]  ;;  %v306_v40 = vld [vmem:[%s585_s1 + $0x50] sm:$0xf]  ;;  %v367_v41 = vld [vmem:[%s585_s1 + $0x58] sm:$0xf0]  ;;  %v299_v42 = vor.u32 %v366_v37, %v298_v36 }
   0xb   :  { %v286_v43 = vld [vmem:[%s585_s1 + $0x30] sm:$0xf]  ;;  %v303_v44 = vor.u32 %v365_v38, %v300_v39  ;;  %v307_v45 = vor.u32 %v367_v41, %v306_v40  ;;  %v363_v46 = vld [vmem:[%s585_s1 + $0x38] sm:$0xf0]  ;;  %v362_v47 = vld [vmem:[%s585_s1 + $0x34] sm:$0xf] }
   0xc   :  { %192 = vmatpush.bf16.msra.mxu0 %v323_v24  ;;  %v232_v48 = vld [vmem:[%s586_s3] sm:$0xff]  ;;  %v294_v50 = vld [vmem:[%s585_s1 + $0x38] sm:$0xf]  ;;  %v287_v53 = vor.u32 %v363_v46, %v286_v43  ;;  %v359_v58 = vld [vmem:[%s585_s1 + $0x1c] sm:$0xf] }
   0xd   :  { %206 = vmatpush.bf16.msra.mxu1 %v327_v25  ;;  %220 = vmatpush.bf16.msra.mxu2 %v331_v26  ;;  %v288_v49 = vld [vmem:[%s585_s1 + $0x3c] sm:$0xf0]  ;;  %v364_v51 = vld [vmem:[%s585_s1 + $0x40] sm:$0xf0]  ;;  %v274_v56 = vld [vmem:[%s585_s1 + $0x18] sm:$0xf] }
   0xe   :  { %236 = vperm.xlu0 %381, %v232_v48   ;;  %v291_v54 = vor.u32 %v362_v47, %v288_v49  ;;  %v295_v55 = vor.u32 %v364_v51, %v294_v50  ;;  %v360_v57 = vld [vmem:[%s585_s1 + $0x20] sm:$0xf0]  ;;  %v276_v59 = vld [vmem:[%s585_s1 + $0x24] sm:$0xf0]  ;;  %v282_v60 = vld [vmem:[%s585_s1 + $0x20] sm:$0xf] }
   0xf   :  { %v361_v61 = vld [vmem:[%s585_s1 + $0x28] sm:$0xf0]  ;;  %v275_v62 = vor.u32 %v360_v57, %v274_v56  ;;  %v17_v63 = vld [vmem:[%s587_s0] sm:$0xff]  ;;  %v279_v2 = vor.u32 %v359_v58, %v276_v59  ;;  %v264_v7 = vld [vmem:[%s585_s1 + $0xc] sm:$0xf0] }
  0x10   :  { %193 = vmatpush.bf16.msra.mxu0 %v311_v33  ;;  %v18_v0 = vld [vmem:[%s587_s0 + $0x8] sm:$0xff]  ;;  %v283_v3 = vor.u32 %v361_v61, %v282_v60  ;;  %v262_v4 = vld [vmem:[%s585_s1] sm:$0xf]  ;;  %v356_v6 = vld [vmem:[%s585_s1 + $0x4] sm:$0xf]  ;;  %v19_v10 = vmax.f32 %v17_v63, 0.0 }
  0x11   :  { %207 = vmatpush.bf16.msra.mxu1 %v315_v34  ;;  %221 = vmatpush.bf16.msra.mxu2 %v319_v35  ;;  %v233_v1 = vld [vmem:[%s586_s3 + $0x8] sm:$0xff]  ;;  %v358_v9 = vld [vmem:[%s585_s1 + $0x10] sm:$0xf0]  ;;  %v20_v11 = vmax.f32 %v18_v0, 0.0  ;;  %v267_v13 = vor.u32 %v356_v6, %v264_v7  ;;  %v54_v16 = vld [vmem:[%s588_s2] sm:$0x7] }
  0x12   :  { %v357_v5 = vld [vmem:[%s585_s1 + $0x8] sm:$0xf0]  ;;  %v270_v8 = vld [vmem:[%s585_s1 + $0x8] sm:$0xf]  ;;  %v56_v17 = vperm.slane %v54_v16, 0  ;;  %v57_v18 = vperm.slane %v54_v16, 1 }
  0x13   :  { %v263_v12 = vor.u32 %v357_v5, %v262_v4  ;;  %v271_v14 = vor.u32 %v358_v9, %v270_v8  ;;  %v21_v15 = vpack.c.bf16 %v20_v11, %v19_v10  ;;  %v58_v26 = vperm.slane %v54_v16, 2 }
  0x14   :  { %194 = vmatpush.bf16.msra.mxu0 %v299_v42 }
  0x15   :  { %208 = vmatpush.bf16.msra.mxu1 %v303_v44  ;;  %222 = vmatpush.bf16.msra.mxu2 %v307_v45 }
  0x16   :  { %241 = vperm.xlu0 %381, %v233_v1  }
  0x18   :  { %195 = vmatpush.bf16.msra.mxu0 %v287_v53 }
  0x19   :  { %209 = vmatpush.bf16.msra.mxu1 %v291_v54  ;;  %223 = vmatpush.bf16.msra.mxu2 %v295_v55 }
  0x1c   :  { %196 = vmatpush.bf16.msra.mxu0 %v275_v62 }
  0x1d   :  { %210 = vmatpush.bf16.msra.mxu1 %v279_v2  ;;  %224 = vmatpush.bf16.msra.mxu2 %v283_v3 }
  0x20   :  { %197 = vmatpush.bf16.msra.mxu0 %v263_v12 }
  0x21   :  { %211 = vmatpush.bf16.msra.mxu1 %v267_v13  ;;  %225 = vmatpush.bf16.msra.mxu2 %v271_v14 }
  0x23   :  { %198 = vmatmul.bf16.vlgmr.msra.gmra.mxu0 %v21_v15 }
  0x24   :  { %212 = vmatmul.bf16.vlgmr.msra.gmra.mxu1 %v21_v15  ;;  %226 = vmatmul.bf16.vlgmr.msra.gmra.mxu2 %v21_v15 }
  0x80   :  { %v237_v19 = vpop.permute.xlu0 %236 }
  0x88   :  { %v242_v33 = vpop.permute.xlu0 %241 }
  0xa0   :  { %v199_v20 = vpop.f32.mrf.mxu0 }
  0xa1   :  { %v200_v21 = vadd.f32 %v199_v20, %v56_v17  ;;  %v213_v22 = vpop.f32.mrf.mxu1 }
  0xa2   :  { %v214_v23 = vadd.f32 %v213_v22, %v57_v18 }
  0xa3   :  { %v244_v24 = vmul.f32 %v237_v19, %v200_v21 }
  0xa4   :  { %v245_v25 = vmul.f32 %v237_v19, %v214_v23 }
  0xa5   :  { %250 = vst [vmem:[%s589_s4] sm:$0xff] %v244_v24 }
  0xa6   :  { %251 = vst [vmem:[%s589_s4 + $0x8] sm:$0xff] %v245_v25 }
  0xa7   :  { %v227_v27 = vpop.f32.mrf.mxu2 }
  0xa8   :  { %v228_v28 = vadd.f32 %v227_v27, %v58_v26  ;;  %v201_v29 = vpop.f32.mrf.mxu0 }
  0xa9   :  { %v202_v30 = vadd.f32 %v201_v29, %v56_v17  ;;  %v215_v31 = vpop.f32.mrf.mxu1 }
  0xaa   :  { %v246_v32 = vmul.f32 %v237_v19, %v228_v28  ;;  %v216_v34 = vadd.f32 %v215_v31, %v57_v18 }
  0xab   :  { %v247_v35 = vmul.f32 %v242_v33, %v202_v30 }
  0xac   :  { %252 = vst [vmem:[%s589_s4 + $0x10] sm:$0xff] %v246_v32  ;;  %v248_v36 = vmul.f32 %v242_v33, %v216_v34 }
  0xad   :  { %253 = vst [vmem:[%s589_s4 + $0x18] sm:$0xff] %v247_v35 }
  0xae   :  { %254 = vst [vmem:[%s589_s4 + $0x20] sm:$0xff] %v248_v36 }
  0xaf   :  { %v229_v37 = vpop.f32.mrf.mxu2 }
  0xb0   :  { %v230_v38 = vadd.f32 %v229_v37, %v58_v26 }
  0xb2   :  { %v249_v39 = vmul.f32 %v242_v33, %v230_v38 }
  0xb4   :  { %255 = vst [vmem:[%s589_s4 + $0x28] sm:$0xff] %v249_v39 }

// kernel: _lambda_.47
= control target key start
LH: loop header
LB: loop body
LE: loop exit
PB: predicated region body
PF: predicated region fallthrough
CT: control target
= control target key end

     0   :  { %8 = vsyncpa [#allocation3], 0  ;;  %s192_s15 = smov [#allocation2]   ;;  %s193_s17 = smov 64   ;;  %s233_s0 = inlined_call_operand.vmem [shape: f32[16,128], index: 0, kind: input, shape index: {}]   ;;  %s234_s1 = inlined_call_operand.hbm [shape: bf16[128,128], index: 1, kind: input, shape index: {}]   ;;  %s235_s2 = inlined_call_operand.vmem [shape: f32[1,128], index: 2, kind: input, shape index: {}]   ;;  %s236_s3 = inlined_call_operand.vmem [shape: f32[16,128], index: 3, kind: output, shape index: {}]  }
   0x1   :  { %s15_s14 = sshll.u32 %s234_s1, 4  ;;  %s17_s16 = sshll.u32 %s192_s15, 4  ;;  %s16_s14 = int_to_ptr.hbm [resolvable:$true] %s15_s14  ;;  %s18_s16 = int_to_ptr.vmem [resolvable:$true] %s17_s16 }
   0x2   :  { %s194_s18 = smov 4  }
   0x3   :  { %23 = dma.hbm_to_vmem [thread:$0]  %s16_s14, 1024, %s18_s16, [#allocation3], %s193_s17, %s193_s17, %s194_s18  }
   0x4   :  { %190 = dma.done.wait [#allocation3], 1024  }
   0x5   :  { %191 = vsyncadd [#allocation3], 4294966272  ;;  %v161_v0 = vld [vmem:[#allocation2 + $0x38] sm:$0xff]  ;;  %v160_v1 = vld [vmem:[#allocation2 + $0x30] sm:$0xff] }
   0x6   :  { %101 = vmatpush.bf16.msra.mxu0 %v161_v0  ;;  %v159_v2 = vld [vmem:[#allocation2 + $0x28] sm:$0xff]  ;;  %v158_v3 = vld [vmem:[#allocation2 + $0x20] sm:$0xff]  ;;  %v157_v4 = vld [vmem:[#allocation2 + $0x18] sm:$0xff] }
   0x7   :  { %v156_v5 = vld [vmem:[#allocation2 + $0x10] sm:$0xff]  ;;  %v155_v6 = vld [vmem:[#allocation2 + $0x8] sm:$0xff]  ;;  %v154_v7 = vld [vmem:[#allocation2] sm:$0xff] }
   0x8   :  { %v30_v8 = vld [vmem:[%s233_s0] sm:$0xff]  ;;  %v31_v9 = vld [vmem:[%s233_s0 + $0x8] sm:$0xff] }
   0x9   :  { %v32_v10 = vpack.c.bf16 %v31_v9, %v30_v8  ;;  %v165_v11 = vld [vmem:[%s235_s2] ss:$0 sm:$0xff] }
   0xa   :  { %102 = vmatpush.bf16.msra.mxu0 %v160_v1 }
   0xe   :  { %103 = vmatpush.bf16.msra.mxu0 %v159_v2 }
  0x12   :  { %104 = vmatpush.bf16.msra.mxu0 %v158_v3 }
  0x16   :  { %105 = vmatpush.bf16.msra.mxu0 %v157_v4 }
  0x1a   :  { %106 = vmatpush.bf16.msra.mxu0 %v156_v5 }
  0x1e   :  { %107 = vmatpush.bf16.msra.mxu0 %v155_v6 }
  0x22   :  { %108 = vmatpush.bf16.msra.mxu0 %v154_v7 }
  0x25   :  { %109 = vmatmul.bf16.vlgmr.msra.gmra.mxu0 %v32_v10 }
  0xa2   :  { %v110_v12 = vpop.f32.mrf.mxu0 }
  0xa3   :  { %v111_v13 = vadd.f32 %v165_v11, %v110_v12 }
  0xa5   :  { %115 = vst [vmem:[%s236_s3] sm:$0xff] %v111_v13 }
  0xaa   :  { %v112_v14 = vpop.f32.mrf.mxu0 }
  0xab   :  { %v113_v15 = vadd.f32 %v165_v11, %v112_v14 }
  0xad   :  { %116 = vst [vmem:[%s236_s3 + $0x8] sm:$0xff] %v113_v15 }
  0xae   :  { %121 = vsyncpa [#allocation3], 1 }

// kernel: _lambda_.45
= control target key start
LH: loop header
LB: loop body
LE: loop exit
PB: predicated region body
PF: predicated region fallthrough
CT: control target
= control target key end

     0   :  { %s1046_s18 = smov 0   ;;  %s1216_s0 = inlined_call_operand.vmem [shape: f32[2,8,384], index: 0, kind: input, shape index: {}, may-alias: {0,1,2}]   ;;  %s1217_s1 = inlined_call_operand.vmem [shape: f32[2,8,384], index: 1, kind: input, shape index: {}, may-alias: {0,1,2}]   ;;  %s1218_s2 = inlined_call_operand.vmem [shape: f32[2,8,384], index: 2, kind: input, shape index: {}, may-alias: {0,1,2}]   ;;  %s1219_s3 = inlined_call_operand.vmem [shape: f32[2,1,8], index: 3, kind: input, shape index: {}]   ;;  %s1220_s4 = inlined_call_operand.vmem [shape: f32[2,1,128], index: 4, kind: input, shape index: {}]   ;;  %s1221_s5 = inlined_call_operand.vmem [shape: f32[2,8,128], index: 5, kind: output, shape index: {}]  }
   0x1 LB: > { %s921_s19 = sadd.s32 4294967295, %s1006_s18   ;;  %p925_p0 = scmp.ge.s32.totalorder %s1006_s18, 1  ;;  %s1006_s18 = sphi %s1046_s18, %s15_s18  }
   0x2   : > { %p225_p1 = scmp.lt.s32.totalorder %s1006_s18, 3 }
   0x4   : > { %p226_p2 = pnand %p925_p0, %p225_p1 }
   0x5   : > { %p270_p3 = scmp.lt.s32.totalorder (!%p226_p2), %s921_s19, 1  ;;  %s1009_s8 = smov (!%p226_p2), 96  }
   0x6   : > { %229 = sbr.rel (%p226_p2) target bundleno = 1266 (0x4f2), region = 40  ;;  %s1010_s9 = smov (!%p226_p2), 80  }
   0x7   : > { %s1011_s10 = smov (!%p226_p2), 112   ;;  %s1012_s11 = smov (!%p226_p2), 64  }
   0x8   : > { %s1013_s12 = smov (!%p226_p2), 48   ;;  %s1014_s13 = smov (!%p226_p2), 32  }
   0x9   : > { %s1015_s14 = smov (!%p226_p2), 16  }
   0xb   : > { %s1225_s19 = smov (!%p270_p3, %s921_s19), 1  ;;  %vm311_vm0 = vcmask 130048   ;;  %v1008_v10 = vmov 0   ;;  %vm336_vm3 = vcmask 64512   ;;  %vm353_vm4 = vcmask 1043456  }
   0xc   : > { %s1057_s20 = smul.u32 24, %s1225_s19  ;;  %s292_s23 = scalar_lea.vmem %s1220_s4, %s1225_s19  ;;  %vm801_vm5 = vcmask 261120   ;;  %vm803_vm6 = vcmask 392192   ;;  %vm805_vm7 = vcmask 523264   ;;  %vm807_vm8 = vcmask 654336  }
   0xd   : > { %v967_v0 = vld [vmem:[%s292_s23] ss:$0 sm:$0xff]  ;;  %s289_s7 = scalar_lea.vmem %s1219_s3, %s1225_s19  ;;  %vm809_vm9 = vcmask 785408   ;;  %vm811_vm10 = vcmask 916480  }
   0xe   : > { %s280_s26 = scalar_lea.vmem %s1217_s1, %s1057_s20  ;;  %s861_s29 = scalar_lea.vmem %s1216_s0, %s1057_s20  ;;  %v301_v9 = vld [vmem:[%s289_s7] sm:$0x1] }
   0xf   : > { %v299_v1 = vld [vmem:[%s280_s26] sm:$0xff]  ;;  %v930_v2 = vld [vmem:[%s861_s29 + $0x8] sm:$0xff]  ;;  %vm331_vm1 = vcmp.eq.f32.partialorder %v301_v9, 0.0  ;;  %s867_s17 = scalar_lea.vmem %s1218_s2, %s1057_s20  ;;  %s929_s20 = sshll.u32 %s1225_s19, 3 }
  0x10   : > { %v307_v3 = vmul.f32 %v967_v0, %v299_v1  ;;  %v306_v4 = vmul.f32 %v967_v0, %v930_v2  ;;  %v332_v11 = vsel %vm331_vm1, 1, %v1008_v10  ;;  %v931_v27 = vld [vmem:[%s867_s17 + $0x10] sm:$0xff]  ;;  %s296_s23 = scalar_lea.vmem %s1221_s5, %s929_s20 }
  0x11   : > { %v333_v12 = vperm.slane %v332_v11, 0  ;;  %v1104_v29 = vpack.c.bf16 %v931_v27, %v931_v27 }
  0x12   : > { %v310_v5 = vpack.c.bf16 %v307_v3, %v307_v3  ;;  %v308_v7 = vmul.f32 0.25, %v306_v4 }
  0x13   : > { %vm1077_vm2 = vcmp.eq.s32.totalorder %v333_v12, 1  ;;  %v355_v30 = vsel %vm353_vm4, %v1104_v29, 0 }
  0x14   : > { %v316_v6 = vsel %vm311_vm0, %v310_v5, 0  ;;  %v309_v8 = vpack.c.bf16 %v308_v7, %v308_v7  ;;  %432 = vrot.lane.b32.xlu2 %v310_v5, %s1009_s8  ;;  %364 = vmatpush.bf16.msra.mxu1 %v355_v30 }
  0x15   : > { %325 = vmatpush.bf16.xpose.msra.mxu0 %v316_v6 }
  0x1c   : > { %932 = vmatmul.msk.bf16.vlgmr.msra.gmra.mxu0 %vm311_vm0, %v309_v8  ;;  %489 = vrot.lane.b32.xlu2 %v310_v5, %s1010_s9 }
  0x24   : > { %430 = vrot.lane.b32.xlu2 %v309_v8, %s1009_s8 }
  0x2c   : > { %487 = vrot.lane.b32.xlu2 %v309_v8, %s1010_s9 }
  0x34   : > { %603 = vrot.lane.b32.xlu2 %v310_v5, %s1013_s12 }
  0x3c   : > { %660 = vrot.lane.b32.xlu2 %v310_v5, %s1014_s13 }
  0x44   : > { %715 = vrot.lane.b32.xlu2 %v309_v8, %s1015_s14 }
  0x6e   : > { %v433_v23 = vpop.permute.xlu2 %432 }
  0x6f   : > { %v438_v38 = vsel %vm311_vm0, %v433_v23, 0 }
  0x70   : > { %447 = vmatpush.bf16.xpose.msrb.mxu1 %v438_v38 }
  0x76   : > { %v490_v24 = vpop.permute.xlu2 %489 }
  0x77   : > { %v495_v26 = vsel %vm311_vm0, %v490_v24, 0 }
  0x78   : > { %504 = vmatpush.bf16.xpose.msrb.mxu0 %v495_v26 }
  0x7e   : > { %v431_v25 = vpop.permute.xlu2 %430 }
  0x86   : > { %v488_v28 = vpop.permute.xlu2 %487 }
  0x87   : > { %938 = vmatmul.msk.bf16.vlgmr.msrb.gmra.mxu0 %vm311_vm0, %v488_v28 }
  0x8e   : > { %v604_v32 = vpop.permute.xlu2 %603 }
  0x8f   : > { %v609_v34 = vsel %vm311_vm0, %v604_v32, 0 }
  0x90   : > { %618 = vmatpush.bf16.xpose.msra.mxu0 %v609_v34 }
  0x96   : > { %v661_v44 = vpop.permute.xlu2 %660 }
  0x97   : > { %v666_v45 = vsel %vm311_vm0, %v661_v44, 0 }
  0x99   : > { %v327_v14 = vpop.f32.mrf.mxu0 }
  0x9a   : > { %v335_v15 = vsel %vm1077_vm2, -1e+09, %v327_v14 }
  0x9b   : > { %v337_v16 = vsel %vm336_vm3, %v335_v15, -inf }
  0x9c   : > { %338 = vmax.xlane.f32.xlu0 %v337_v16 }
  0x9e   : > { %v716_v49 = vpop.permute.xlu2 %715 }
  0xa1   : > { %v329_v17 = vpop.f32.mrf.mxu0 }
  0xb0   : > { %374 = vrot.lane.b32.xlu0 %v310_v5, %s1011_s10 }
  0xb8   : > { %546 = vrot.lane.b32.xlu0 %v310_v5, %s1012_s11 }
  0xc0   : > { %601 = vrot.lane.b32.xlu0 %v309_v8, %s1013_s12 }
  0xc8   : > { %658 = vrot.lane.b32.xlu0 %v309_v8, %s1014_s13 }
 0x104   : > { %v506_v51 = vpop.f32.mrf.mxu0 }
 0x105   : > { %v510_v52 = vsel %vm1077_vm2, -1e+09, %v506_v51 }
 0x106   : > { %v511_v53 = vsel %vm336_vm3, %v510_v52, -inf }
 0x107   : > { %512 = vmax.xlane.f32.xlu2 %v511_v53 }
 0x10c   : > { %v508_v54 = vpop.f32.mrf.mxu0 }
 0x10f   : > { %v339_v18 = vpop.xlane.xlu0 %338 }
 0x110   : > { %v340_v19 = vsub.f32 %v335_v15, %v339_v18 }
 0x112   : > { %v341_v20 = vmul.f32 1.442695, %v340_v19 }
 0x114   : > { %968 = vpow2.f32 %v341_v20 }
 0x11a   : > { %v969_v21 = vpop.eup %968 }
 0x11b   : > { %v343_v22 = vsel %vm336_vm3, %v969_v21, 0.0 }
 0x11c   : > { %344 = vadd.xlane.f32.xlu1 %v343_v22 }
 0x122   : > { %v375_v31 = vpop.permute.xlu0 %374 }
 0x123   : > { %v380_v33 = vsel %vm311_vm0, %v375_v31, 0 }
 0x124   : > { %389 = vmatpush.bf16.xpose.msra.mxu2 %v380_v33 }
 0x12a   : > { %v547_v35 = vpop.permute.xlu0 %546 }
 0x12b   : > { %v552_v42 = vsel %vm311_vm0, %v547_v35, 0 }
 0x132   : > { %v602_v37 = vpop.permute.xlu0 %601 }
 0x133   : > { %942 = vmatmul.msk.bf16.vlgmr.msra.gmra.mxu0 %vm311_vm0, %v602_v37 }
 0x135   : > { %371 = vrot.lane.b32.xlu1 %v309_v8, %s1011_s10 }
 0x13a   : > { %v659_v50 = vpop.permute.xlu0 %658 }
 0x13d   : > { %544 = vrot.lane.b32.xlu1 %v309_v8, %s1012_s11 }
 0x145   : > { %717 = vrot.lane.b32.xlu1 %v310_v5, %s1015_s14 }
 0x17a   : > { %v513_v19 = vpop.xlane.xlu2 %512 }
 0x18f   : > { %v345_v36 = vpop.xlane.xlu1 %344 }
 0x190   : > { %970 = vrcp.f32 %v345_v36 }
 0x196   : > { %v971_v39 = vpop.eup %970 }
 0x197   : > { %v347_v40 = vmul.f32 %v971_v39, %v969_v21  ;;  %v514_v21 = vsub.f32 %v510_v52, %v513_v19 }
 0x199   : > { %v348_v41 = vpack.c.bf16 %v347_v40, %v347_v40  ;;  %v515_v23 = vmul.f32 1.442695, %v514_v21 }
 0x19b   : > { %933 = vmatmul.msk.bf16.vlgmr.msra.gmra.mxu1 %vm336_vm3, %v348_v41 }
 0x19c   : > { %561 = vmatpush.bf16.xpose.msra.mxu1 %v552_v42 }
 0x1a7   : > { %v372_v43 = vpop.permute.xlu1 %371 }
 0x1a8   : > { %934 = vmatmul.msk.bf16.vlgmr.msra.gmra.mxu2 %vm311_vm0, %v372_v43 }
 0x1ab   : > { %936 = vmatmul.msk.bf16.vlgmr.msrb.gmra.mxu1 %vm311_vm0, %v431_v25 }
 0x1ac   : > { %675 = vmatpush.bf16.xpose.msrb.mxu1 %v666_v45 }
 0x1af   : > { %v545_v46 = vpop.permute.xlu1 %544 }
 0x1b0   : > { %v620_v55 = vpop.f32.mrf.mxu0 }
 0x1b1   : > { %v1127_v56 = vsel %vm1077_vm2, -1e+09, %v620_v55 }
 0x1b2   : > { %v625_v57 = vsel %vm336_vm3, %v1127_v56, -inf }
 0x1b3   : > { %626 = vmax.xlane.f32.xlu0 %v625_v57 }
 0x1b7   : > { %v718_v47 = vpop.permute.xlu1 %717 }
 0x1b8   : > { %v723_v48 = vsel %vm311_vm0, %v718_v47, 0  ;;  %v622_v58 = vpop.f32.mrf.mxu0 }
 0x1b9   : > { %732 = vmatpush.bf16.xpose.msrb.mxu0 %v723_v48 }
 0x1bb   : > { %940 = vmatmul.msk.bf16.vlgmr.msra.gmra.mxu1 %vm311_vm0, %v545_v46 }
 0x1c0   : > { %946 = vmatmul.msk.bf16.vlgmr.msrb.gmra.mxu0 %vm311_vm0, %v716_v49 }
 0x1cb   : > { %944 = vmatmul.msk.bf16.vlgmr.msrb.gmra.mxu1 %vm311_vm0, %v659_v50 }
 0x218   : > { %v1131_v59 = vpop.f32.mrf.mxu1 }
 0x220   : > { %v368_v60 = vpop.f32.mrf.mxu1 }
 0x226   : > { %v627_v38 = vpop.xlane.xlu0 %626 }
 0x227   : > { %v628_v39 = vsub.f32 %v1127_v56, %v627_v38 }
 0x228   : > { %v449_v61 = vpop.f32.mrf.mxu1 }
 0x229   : > { %v453_v24 = vsel %vm1077_vm2, -1e+09, %v449_v61  ;;  %v629_v40 = vmul.f32 1.442695, %v628_v39 }
 0x22a   : > { %v454_v26 = vsel %vm336_vm3, %v453_v24, -inf }
 0x22b   : > { %v391_v62 = vpop.f32.mrf.mxu2 }
 0x22c   : > { %v395_v63 = vsel %vm1077_vm2, -1e+09, %v391_v62 }
 0x22d   : > { %v396_v0 = vsel %vm336_vm3, %v395_v63, -inf }
 0x22e   : > { %397 = vmax.xlane.f32.xlu1 %v396_v0 }
 0x230   : > { %v451_v1 = vpop.f32.mrf.mxu1 }
 0x233   : > { %v393_v2 = vpop.f32.mrf.mxu2 }
 0x238   : > { %v563_v3 = vpop.f32.mrf.mxu1 }
 0x239   : > { %v567_v8 = vsel %vm1077_vm2, -1e+09, %v563_v3 }
 0x23a   : > { %v568_v9 = vsel %vm336_vm3, %v567_v8, -inf }
 0x23d   : > { %v734_v4 = vpop.f32.mrf.mxu0 }
 0x23e   : > { %v738_v5 = vsel %vm1077_vm2, -1e+09, %v734_v4 }
 0x23f   : > { %v739_v6 = vsel %vm336_vm3, %v738_v5, -inf }
 0x240   : > { %740 = vmax.xlane.f32.xlu1 %v739_v6  ;;  %v565_v7 = vpop.f32.mrf.mxu1 }
 0x245   : > { %v736_v10 = vpop.f32.mrf.mxu0 }
 0x248   : > { %569 = vmax.xlane.f32.xlu1 %v568_v9  ;;  %v677_v11 = vpop.f32.mrf.mxu1 }
 0x249   : > { %v1144_v12 = vsel %vm1077_vm2, -1e+09, %v677_v11 }
 0x24a   : > { %v682_v14 = vsel %vm336_vm3, %v1144_v12, -inf }
 0x24b   : > { %683 = vmax.xlane.f32.xlu2 %v682_v14 }
 0x250   : > { %v679_v15 = vpop.f32.mrf.mxu1 }
 0x261   : > { %466 = vrot.lane.b32.xlu1 %v1104_v29, %s1009_s8 }
 0x263   : > { %409 = vrot.lane.b32.xlu2 %v1104_v29, %s1011_s10 }
 0x269   : > { %580 = vrot.lane.b32.xlu1 %v1104_v29, %s1012_s11 }
 0x2a1   : > { %v398_v16 = vpop.xlane.xlu1 %397 }
 0x2a2   : > { %v399_v17 = vsub.f32 %v395_v63, %v398_v16 }
 0x2a4   : > { %v400_v18 = vmul.f32 1.442695, %v399_v17 }
 0x2a6   : > { %972 = vpow2.f32 %v400_v18 }
 0x2a7   : > { %974 = vpow2.f32 %v515_v23 }
 0x2ac   : > { %v973_v20 = vpop.eup %972 }
 0x2ad   : > { %v402_v22 = vsel %vm336_vm3, %v973_v20, 0.0  ;;  %v975_v27 = vpop.eup %974 }
 0x2ae   : > { %403 = vadd.xlane.f32.xlu0 %v402_v22  ;;  %v517_v32 = vsel %vm336_vm3, %v975_v27, 0.0 }
 0x2b3   : > { %v741_v25 = vpop.xlane.xlu1 %740 }
 0x2b4   : > { %v742_v30 = vsub.f32 %v738_v5, %v741_v25 }
 0x2b6   : > { %455 = vmax.xlane.f32.xlu0 %v454_v26  ;;  %v743_v34 = vmul.f32 1.442695, %v742_v30 }
 0x2bb   : > { %v570_v28 = vpop.xlane.xlu1 %569 }
 0x2bc   : > { %v571_v31 = vsub.f32 %v567_v8, %v570_v28 }
 0x2be   : > { %v572_v33 = vmul.f32 1.442695, %v571_v31  ;;  %518 = vadd.xlane.f32.xlu0 %v517_v32  ;;  %v684_v43 = vpop.xlane.xlu2 %683 }
 0x2bf   : > { %v685_v2 = vsub.f32 %v1144_v12, %v684_v43 }
 0x2c0   : > { %976 = vpow2.f32 %v572_v33 }
 0x2c1   : > { %978 = vpow2.f32 %v743_v34  ;;  %v686_v3 = vmul.f32 1.442695, %v685_v2 }
 0x2c2   : > { %980 = vpow2.f32 %v629_v40 }
 0x2c6   : > { %v1159_v35 = vpop.eup %976  ;;  %v410_v44 = vpop.permute.xlu2 %409 }
 0x2c7   : > { %v574_v13 = vsel %vm336_vm3, %v1159_v35, 0.0  ;;  %v1163_v36 = vpop.eup %978  ;;  %v415_v45 = vsel %vm353_vm4, %v410_v44, 0 }
 0x2c8   : > { %575 = vadd.xlane.f32.xlu2 %v574_v13  ;;  %v745_v37 = vsel %vm336_vm3, %v1163_v36, 0.0  ;;  %v1172_v41 = vpop.eup %980  ;;  %424 = vmatpush.bf16.msra.mxu3 %v415_v45 }
 0x2c9   : > { %v631_v42 = vsel %vm336_vm3, %v1172_v41, 0.0 }
 0x2d0   : > { %746 = vadd.xlane.f32.xlu2 %v745_v37 }
 0x2d2   : > { %523 = vrot.lane.b32.xlu0 %v1104_v29, %s1010_s9 }
 0x2d3   : > { %v467_v62 = vpop.permute.xlu1 %466 }
 0x2d4   : > { %v472_v63 = vsel %vm353_vm4, %v467_v62, 0 }
 0x2d5   : > { %481 = vmatpush.bf16.msrb.mxu3 %v472_v63 }
 0x2db   : > { %v581_v0 = vpop.permute.xlu1 %580 }
 0x2dc   : > { %v586_v1 = vsel %vm353_vm4, %v581_v0, 0 }
 0x2e8   : > { %694 = vrot.lane.b32.xlu2 %v1104_v29, %s1014_s13 }
 0x2fc   : > { %632 = vadd.xlane.f32.xlu0 %v631_v42 }
 0x310   : > { %751 = vrot.lane.b32.xlu0 %v1104_v29, %s1015_s14 }
 0x321   : > { %v404_v46 = vpop.xlane.xlu0 %403 }
 0x322   : > { %982 = vrcp.f32 %v404_v46 }
 0x328   : > { %v983_v47 = vpop.eup %982 }
 0x329   : > { %v456_v48 = vpop.xlane.xlu0 %455  ;;  %v406_v49 = vmul.f32 %v983_v47, %v973_v20 }
 0x32a   : > { %v457_v50 = vsub.f32 %v453_v24, %v456_v48 }
 0x32b   : > { %v407_v51 = vpack.c.bf16 %v406_v49, %v406_v49 }
 0x32c   : > { %v458_v52 = vmul.f32 1.442695, %v457_v50 }
 0x32d   : > { %935 = vmatmul.msk.bf16.vlgmr.msra.gmra.mxu3 %vm336_vm3, %v407_v51 }
 0x32e   : > { %984 = vpow2.f32 %v458_v52  ;;  %595 = vmatpush.bf16.msra.mxu3 %v586_v1 }
 0x331   : > { %v519_v55 = vpop.xlane.xlu0 %518 }
 0x332   : > { %986 = vrcp.f32 %v519_v55 }
 0x333   : > { %988 = vpow2.f32 %v686_v3 }
 0x334   : > { %v985_v53 = vpop.eup %984 }
 0x335   : > { %v460_v54 = vsel %vm336_vm3, %v985_v53, 0.0 }
 0x336   : > { %461 = vadd.xlane.f32.xlu1 %v460_v54 }
 0x338   : > { %v987_v56 = vpop.eup %986 }
 0x339   : > { %v521_v57 = vmul.f32 %v987_v56, %v975_v27  ;;  %v989_v4 = vpop.eup %988 }
 0x33a   : > { %v688_v5 = vsel %vm336_vm3, %v989_v4, 0.0 }
 0x33b   : > { %v522_v61 = vpack.c.bf16 %v521_v57, %v521_v57  ;;  %v576_v6 = vpop.xlane.xlu2 %575 }
 0x344   : > { %v524_v58 = vpop.permute.xlu0 %523 }
 0x345   : > { %v529_v60 = vsel %vm353_vm4, %v524_v58, 0 }
 0x346   : > { %538 = vmatpush.bf16.msrb.mxu2 %v529_v60 }
 0x349   : > { %939 = vmatmul.msk.bf16.vlgmr.msrb.gmra.mxu2 %vm336_vm3, %v522_v61 }
 0x34f   : > { %637 = vrot.lane.b32.xlu1 %v1104_v29, %s1013_s12  ;;  %v747_v29 = vpop.xlane.xlu2 %746 }
 0x357   : > { %v695_v12 = vpop.permute.xlu2 %694 }
 0x358   : > { %v700_v15 = vsel %vm353_vm4, %v695_v12, 0 }
 0x36f   : > { %v633_v14 = vpop.xlane.xlu0 %632 }
 0x379   : > { %689 = vadd.xlane.f32.xlu1 %v688_v5 }
 0x382   : > { %v752_v19 = vpop.permute.xlu0 %751 }
 0x383   : > { %v757_v23 = vsel %vm353_vm4, %v752_v19, 0 }
 0x3a9   : > { %v462_v7 = vpop.xlane.xlu1 %461 }
 0x3aa   : > { %990 = vrcp.f32 %v462_v7 }
 0x3ab   : > { %992 = vrcp.f32 %v576_v6 }
 0x3ac   : > { %994 = vrcp.f32 %v633_v14 }
 0x3ad   : > { %996 = vrcp.f32 %v747_v29 }
 0x3b0   : > { %v991_v8 = vpop.eup %990  ;;  %v426_v9 = vpop.f32.mrf.mxu3 }
 0x3b1   : > { %v464_v10 = vmul.f32 %v991_v8, %v985_v53  ;;  %773 = vrot.lane.b32.xlu1 %v426_v9, %s1015_s14  ;;  %v993_v17 = vpop.eup %992 }
 0x3b2   : > { %v995_v18 = vpop.eup %994  ;;  %v578_v20 = vmul.f32 %v993_v17, %v1159_v35 }
 0x3b3   : > { %v465_v11 = vpack.c.bf16 %v464_v10, %v464_v10  ;;  %v635_v21 = vmul.f32 %v995_v18, %v1172_v41  ;;  %v997_v28 = vpop.eup %996 }
 0x3b4   : > { %v579_v25 = vpack.c.bf16 %v578_v20, %v578_v20  ;;  %v749_v30 = vmul.f32 %v997_v28, %v1163_v36 }
 0x3b5   : > { %937 = vmatmul.msk.bf16.vlgmr.msrb.gmra.mxu3 %vm336_vm3, %v465_v11  ;;  %v636_v26 = vpack.c.bf16 %v635_v21, %v635_v21 }
 0x3b6   : > { %709 = vmatpush.bf16.msrb.mxu3 %v700_v15  ;;  %v750_v31 = vpack.c.bf16 %v749_v30, %v749_v30 }
 0x3b8   : > { %v428_v16 = vpop.f32.mrf.mxu3 }
 0x3c1   : > { %v638_v22 = vpop.permute.xlu1 %637 }
 0x3c2   : > { %v643_v24 = vsel %vm353_vm4, %v638_v22, 0 }
 0x3c3   : > { %652 = vmatpush.bf16.msra.mxu2 %v643_v24 }
 0x3c5   : > { %941 = vmatmul.msk.bf16.vlgmr.msra.gmra.mxu3 %vm336_vm3, %v579_v25 }
 0x3c6   : > { %943 = vmatmul.msk.bf16.vlgmr.msra.gmra.mxu2 %vm336_vm3, %v636_v26 }
 0x3c7   : > { %766 = vmatpush.bf16.msrb.mxu2 %v757_v23 }
 0x3cc   : > { %v540_v27 = vpop.f32.mrf.mxu2 }
 0x3cd   : > { %781 = vrot.lane.b32.xlu2 %v540_v27, %s1013_s12 }
 0x3d4   : > { %v542_v32 = vpop.f32.mrf.mxu2 }
 0x3d6   : > { %947 = vmatmul.msk.bf16.vlgmr.msrb.gmra.mxu2 %vm336_vm3, %v750_v31 }
 0x3ec   : > { %v690_v33 = vpop.xlane.xlu1 %689 }
 0x3ed   : > { %998 = vrcp.f32 %v690_v33 }
 0x3f3   : > { %v999_v34 = vpop.eup %998 }
 0x3f4   : > { %v692_v35 = vmul.f32 %v999_v34, %v989_v4 }
 0x3f6   : > { %v693_v13 = vpack.c.bf16 %v692_v35, %v692_v35 }
 0x3f8   : > { %945 = vmatmul.msk.bf16.vlgmr.msrb.gmra.mxu3 %vm336_vm3, %v693_v13 }
 0x423   : > { %v774_v48 = vpop.permute.xlu1 %773 }
 0x424   : > { %v800_v49 = vsel %vm311_vm0, %v1131_v59, %v774_v48 }
 0x427   : > { %v782_v47 = vpop.permute.xlu2 %781 }
 0x438   : > { %v483_v37 = vpop.f32.mrf.mxu3 }
 0x439   : > { %777 = vrot.lane.b32.xlu0 %v483_v37, %s1014_s13 }
 0x440   : > { %v485_v38 = vpop.f32.mrf.mxu3 }
 0x448   : > { %v597_v39 = vpop.f32.mrf.mxu3 }
 0x449   : > { %785 = vrot.lane.b32.xlu0 %v597_v39, %s1012_s11  ;;  %v654_v40 = vpop.f32.mrf.mxu2 }
 0x44a   : > { %789 = vrot.lane.b32.xlu2 %v654_v40, %s1010_s9 }
 0x450   : > { %v599_v36 = vpop.f32.mrf.mxu3 }
 0x451   : > { %v656_v41 = vpop.f32.mrf.mxu2 }
 0x459   : > { %v768_v42 = vpop.f32.mrf.mxu2 }
 0x45a   : > { %797 = vrot.lane.b32.xlu2 %v768_v42, %s1011_s10 }
 0x461   : > { %v770_v43 = vpop.f32.mrf.mxu2 }
 0x47b   : > { %v711_v44 = vpop.f32.mrf.mxu3 }
 0x47c   : > { %793 = vrot.lane.b32.xlu0 %v711_v44, %s1009_s8 }
 0x483   : > { %v713_v45 = vpop.f32.mrf.mxu3 }
 0x4a4   : > { %v790_v51 = vpop.permute.xlu2 %789 }
 0x4ab   : > { %v778_v46 = vpop.permute.xlu0 %777 }
 0x4ac   : > { %v802_v52 = vsel %vm801_vm5, %v800_v49, %v778_v46 }
 0x4ad   : > { %v804_v53 = vsel %vm803_vm6, %v802_v52, %v782_v47 }
 0x4b4   : > { %v798_v57 = vpop.permute.xlu2 %797 }
 0x4bb   : > { %v786_v50 = vpop.permute.xlu0 %785 }
 0x4bc   : > { %v806_v54 = vsel %vm805_vm7, %v804_v53, %v786_v50 }
 0x4bd   : > { %v808_v56 = vsel %vm807_vm8, %v806_v54, %v790_v51 }
 0x4ee   : > { %v794_v55 = vpop.permute.xlu0 %793 }
 0x4ef   : > { %v810_v58 = vsel %vm809_vm9, %v808_v56, %v794_v55 }
 0x4f0   : > { %v812_v59 = vsel %vm811_vm10, %v810_v58, %v798_v57 }
 0x4f1   : > { %813 = vst [vmem:[%s296_s23] sm:$0xff] %v812_v59 }
 0x4f2 PF: > { %s15_s18 = sadd.s32 1, %s1006_s18  }
 0x4f3   : > { %p12_p4 = scmp.ge.s32.totalorder %s15_s18, 4  }
 0x4f5   :  { %14 = sbr.rel (!%p12_p4) target bundleno = 1 (0x1), region = 82 }

// kernel: _lambda_.53
= control target key start
LH: loop header
LB: loop body
LE: loop exit
PB: predicated region body
PF: predicated region fallthrough
CT: control target
= control target key end

     0   :  { %s356_s1 = inlined_call_operand.vmem [shape: bf16[256,128], index: 1, kind: input, shape index: {}]   ;;  %s357_s2 = inlined_call_operand.vmem [shape: f32[1,128], index: 2, kind: input, shape index: {}]   ;;  %s358_s0 = inlined_call_operand.vmem [shape: f32[16,256], index: 0, kind: input, shape index: {}]   ;;  %s359_s3 = inlined_call_operand.vmem [shape: f32[16,128], index: 3, kind: output, shape index: {}]  }
   0x1   :  { %v257_v0 = vld [vmem:[%s356_s1 + $0x38] sm:$0xff]  ;;  %v256_v2 = vld [vmem:[%s356_s1 + $0x30] sm:$0xff]  ;;  %v255_v4 = vld [vmem:[%s356_s1 + $0x28] sm:$0xff] }
   0x2   :  { %v265_v1 = vld [vmem:[%s356_s1 + $0x78] sm:$0xff]  ;;  %152 = vmatpush.bf16.msra.mxu0 %v257_v0  ;;  %v264_v3 = vld [vmem:[%s356_s1 + $0x70] sm:$0xff]  ;;  %v263_v5 = vld [vmem:[%s356_s1 + $0x68] sm:$0xff] }
   0x3   :  { %166 = vmatpush.bf16.msra.mxu1 %v265_v1  ;;  %v254_v6 = vld [vmem:[%s356_s1 + $0x20] sm:$0xff]  ;;  %v253_v8 = vld [vmem:[%s356_s1 + $0x18] sm:$0xff]  ;;  %v252_v10 = vld [vmem:[%s356_s1 + $0x10] sm:$0xff] }
   0x4   :  { %v262_v7 = vld [vmem:[%s356_s1 + $0x60] sm:$0xff]  ;;  %v261_v9 = vld [vmem:[%s356_s1 + $0x58] sm:$0xff]  ;;  %v260_v11 = vld [vmem:[%s356_s1 + $0x50] sm:$0xff] }
   0x5   :  { %v251_v12 = vld [vmem:[%s356_s1 + $0x8] sm:$0xff]  ;;  %v250_v14 = vld [vmem:[%s356_s1] sm:$0xff]  ;;  %v16_v17 = vld [vmem:[%s358_s0 + $0x10] sm:$0xff] }
   0x6   :  { %153 = vmatpush.bf16.msra.mxu0 %v256_v2  ;;  %v259_v13 = vld [vmem:[%s356_s1 + $0x48] sm:$0xff]  ;;  %v258_v15 = vld [vmem:[%s356_s1 + $0x40] sm:$0xff]  ;;  %v17_v19 = vld [vmem:[%s358_s0 + $0x18] sm:$0xff] }
   0x7   :  { %167 = vmatpush.bf16.msra.mxu1 %v264_v3  ;;  %v14_v16 = vld [vmem:[%s358_s0] sm:$0xff]  ;;  %v15_v18 = vld [vmem:[%s358_s0 + $0x8] sm:$0xff] }
   0x8   :  { %v18_v20 = vpack.c.bf16 %v16_v17, %v14_v16  ;;  %v19_v21 = vpack.c.bf16 %v17_v19, %v15_v18  ;;  %v266_v22 = vld [vmem:[%s357_s2] ss:$0 sm:$0xff] }
   0xa   :  { %154 = vmatpush.bf16.msra.mxu0 %v255_v4 }
   0xb   :  { %168 = vmatpush.bf16.msra.mxu1 %v263_v5 }
   0xe   :  { %155 = vmatpush.bf16.msra.mxu0 %v254_v6 }
   0xf   :  { %169 = vmatpush.bf16.msra.mxu1 %v262_v7 }
  0x12   :  { %156 = vmatpush.bf16.msra.mxu0 %v253_v8 }
  0x13   :  { %170 = vmatpush.bf16.msra.mxu1 %v261_v9 }
  0x16   :  { %157 = vmatpush.bf16.msra.mxu0 %v252_v10 }
  0x17   :  { %171 = vmatpush.bf16.msra.mxu1 %v260_v11 }
  0x1a   :  { %158 = vmatpush.bf16.msra.mxu0 %v251_v12 }
  0x1b   :  { %172 = vmatpush.bf16.msra.mxu1 %v259_v13 }
  0x1e   :  { %159 = vmatpush.bf16.msra.mxu0 %v250_v14 }
  0x1f   :  { %173 = vmatpush.bf16.msra.mxu1 %v258_v15 }
  0x21   :  { %160 = vmatmul.bf16.vlgmr.msra.gmra.mxu0 %v18_v20 }
  0x22   :  { %174 = vmatmul.bf16.vlgmr.msra.gmra.mxu1 %v19_v21 }
  0x9e   :  { %v161_v23 = vpop.f32.mrf.mxu0 }
  0x9f   :  { %v175_v24 = vpop.f32.mrf.mxu1  ;;  %v162_v25 = vadd.f32 %v266_v22, %v161_v23 }
  0xa1   :  { %v176_v26 = vadd.f32 %v175_v24, %v162_v25 }
  0xa3   :  { %180 = vst [vmem:[%s359_s3] sm:$0xff] %v176_v26 }
  0xa6   :  { %v163_v27 = vpop.f32.mrf.mxu0 }
  0xa7   :  { %v164_v28 = vadd.f32 %v266_v22, %v163_v27  ;;  %v177_v29 = vpop.f32.mrf.mxu1 }
  0xa9   :  { %v178_v30 = vadd.f32 %v177_v29, %v164_v28 }
  0xab   :  { %181 = vst [vmem:[%s359_s3 + $0x8] sm:$0xff] %v178_v30 }

// kernel: _lambda_.60
= control target key start
LH: loop header
LB: loop body
LE: loop exit
PB: predicated region body
PF: predicated region fallthrough
CT: control target
= control target key end

     0   :  { %s226_s1 = inlined_call_operand.vmem [shape: bf16[128,128], index: 1, kind: input, shape index: {}]   ;;  %s227_s2 = inlined_call_operand.vmem [shape: f32[1,128], index: 2, kind: input, shape index: {}]   ;;  %s228_s0 = inlined_call_operand.vmem [shape: f32[24,128], index: 0, kind: input, shape index: {}]   ;;  %s229_s3 = inlined_call_operand.vmem [shape: f32[24,128], index: 3, kind: output, shape index: {}]  }
   0x1   :  { %v151_v0 = vld [vmem:[%s226_s1 + $0x38] sm:$0xff]  ;;  %v150_v1 = vld [vmem:[%s226_s1 + $0x30] sm:$0xff]  ;;  %v149_v2 = vld [vmem:[%s226_s1 + $0x28] sm:$0xff] }
   0x2   :  { %87 = vmatpush.bf16.msra.mxu0 %v151_v0  ;;  %152 = vmatpush.bf16.msra.mxu1 %v151_v0  ;;  %v148_v3 = vld [vmem:[%s226_s1 + $0x20] sm:$0xff]  ;;  %v147_v4 = vld [vmem:[%s226_s1 + $0x18] sm:$0xff]  ;;  %v146_v5 = vld [vmem:[%s226_s1 + $0x10] sm:$0xff] }
   0x3   :  { %v145_v6 = vld [vmem:[%s226_s1 + $0x8] sm:$0xff]  ;;  %v144_v7 = vld [vmem:[%s226_s1] sm:$0xff]  ;;  %v16_v10 = vld [vmem:[%s228_s0 + $0x10] sm:$0xff] }
   0x4   :  { %v14_v8 = vld [vmem:[%s228_s0] sm:$0xff]  ;;  %v15_v9 = vld [vmem:[%s228_s0 + $0x8] sm:$0xff]  ;;  %v18_v12 = vpack.c.bf16 %v16_v10, %v16_v10 }
   0x5   :  { %v17_v11 = vpack.c.bf16 %v15_v9, %v14_v8  ;;  %v160_v13 = vld [vmem:[%s227_s2] ss:$0 sm:$0xff] }
   0x6   :  { %88 = vmatpush.bf16.msra.mxu0 %v150_v1  ;;  %153 = vmatpush.bf16.msra.mxu1 %v150_v1 }
   0xa   :  { %89 = vmatpush.bf16.msra.mxu0 %v149_v2  ;;  %154 = vmatpush.bf16.msra.mxu1 %v149_v2 }
   0xe   :  { %90 = vmatpush.bf16.msra.mxu0 %v148_v3  ;;  %155 = vmatpush.bf16.msra.mxu1 %v148_v3 }
  0x12   :  { %91 = vmatpush.bf16.msra.mxu0 %v147_v4  ;;  %156 = vmatpush.bf16.msra.mxu1 %v147_v4 }
  0x16   :  { %92 = vmatpush.bf16.msra.mxu0 %v146_v5  ;;  %157 = vmatpush.bf16.msra.mxu1 %v146_v5 }
  0x1a   :  { %93 = vmatpush.bf16.msra.mxu0 %v145_v6  ;;  %158 = vmatpush.bf16.msra.mxu1 %v145_v6 }
  0x1e   :  { %94 = vmatpush.bf16.msra.mxu0 %v144_v7  ;;  %159 = vmatpush.bf16.msra.mxu1 %v144_v7 }
  0x21   :  { %95 = vmatmul.bf16.vlgmr.msra.gmra.mxu0 %v17_v11  ;;  %100 = vmatmul.bf16.vlgmr.msra.gmra.mxu1 %v18_v12 }
  0x9e   :  { %v96_v14 = vpop.f32.mrf.mxu0  ;;  %v101_v15 = vpop.f32.mrf.mxu1 }
  0x9f   :  { %v97_v16 = vadd.f32 %v160_v13, %v96_v14  ;;  %v102_v17 = vadd.f32 %v160_v13, %v101_v15 }
  0xa1   :  { %105 = vst [vmem:[%s229_s3] sm:$0xff] %v97_v16 }
  0xa2   :  { %107 = vst [vmem:[%s229_s3 + $0x10] sm:$0xff] %v102_v17 }
  0xa6   :  { %v98_v18 = vpop.f32.mrf.mxu0  ;;  %v103_v19 = vpop.f32.mrf.mxu1 }
  0xa7   :  { %v99_v20 = vadd.f32 %v160_v13, %v98_v18 }
  0xa9   :  { %106 = vst [vmem:[%s229_s3 + $0x8] sm:$0xff] %v99_v20 }

// kernel: _lambda_.61
= control target key start
LH: loop header
LB: loop body
LE: loop exit
PB: predicated region body
PF: predicated region fallthrough
CT: control target
= control target key end

     0   :  { %s205_s1 = inlined_call_operand.vmem [shape: bf16[128,128], index: 1, kind: input, shape index: {}]   ;;  %s206_s2 = inlined_call_operand.vmem [shape: f32[1,128], index: 2, kind: input, shape index: {}]   ;;  %s207_s0 = inlined_call_operand.vmem [shape: f32[16,128], index: 0, kind: input, shape index: {}]   ;;  %s208_s3 = inlined_call_operand.vmem [shape: f32[16,128], index: 3, kind: output, shape index: {}]  }
   0x1   :  { %v144_v0 = vld [vmem:[%s205_s1 + $0x38] sm:$0xff]  ;;  %v143_v1 = vld [vmem:[%s205_s1 + $0x30] sm:$0xff]  ;;  %v142_v2 = vld [vmem:[%s205_s1 + $0x28] sm:$0xff] }
   0x2   :  { %85 = vmatpush.bf16.msra.mxu0 %v144_v0  ;;  %v141_v3 = vld [vmem:[%s205_s1 + $0x20] sm:$0xff]  ;;  %v140_v4 = vld [vmem:[%s205_s1 + $0x18] sm:$0xff]  ;;  %v139_v5 = vld [vmem:[%s205_s1 + $0x10] sm:$0xff] }
   0x3   :  { %v138_v6 = vld [vmem:[%s205_s1 + $0x8] sm:$0xff]  ;;  %v137_v7 = vld [vmem:[%s205_s1] sm:$0xff] }
   0x4   :  { %v14_v8 = vld [vmem:[%s207_s0] sm:$0xff]  ;;  %v15_v9 = vld [vmem:[%s207_s0 + $0x8] sm:$0xff] }
   0x5   :  { %v16_v10 = vpack.c.bf16 %v15_v9, %v14_v8  ;;  %v145_v11 = vld [vmem:[%s206_s2] ss:$0 sm:$0xff] }
   0x6   :  { %86 = vmatpush.bf16.msra.mxu0 %v143_v1 }
   0xa   :  { %87 = vmatpush.bf16.msra.mxu0 %v142_v2 }
   0xe   :  { %88 = vmatpush.bf16.msra.mxu0 %v141_v3 }
  0x12   :  { %89 = vmatpush.bf16.msra.mxu0 %v140_v4 }
  0x16   :  { %90 = vmatpush.bf16.msra.mxu0 %v139_v5 }
  0x1a   :  { %91 = vmatpush.bf16.msra.mxu0 %v138_v6 }
  0x1e   :  { %92 = vmatpush.bf16.msra.mxu0 %v137_v7 }
  0x21   :  { %93 = vmatmul.bf16.vlgmr.msra.gmra.mxu0 %v16_v10 }
  0x9e   :  { %v94_v12 = vpop.f32.mrf.mxu0 }
  0x9f   :  { %v95_v13 = vadd.f32 %v145_v11, %v94_v12 }
  0xa1   :  { %99 = vst [vmem:[%s208_s3] sm:$0xff] %v95_v13 }
  0xa6   :  { %v96_v14 = vpop.f32.mrf.mxu0 }
  0xa7   :  { %v97_v15 = vadd.f32 %v145_v11, %v96_v14 }
  0xa9   :  { %100 = vst [vmem:[%s208_s3 + $0x8] sm:$0xff] %v97_v15 }

// kernel: _lambda_.62
= control target key start
LH: loop header
LB: loop body
LE: loop exit
PB: predicated region body
PF: predicated region fallthrough
CT: control target
= control target key end

     0   :  { %vm147_vm0 = vcmask 1041408   ;;  %s360_s1 = inlined_call_operand.vmem [shape: bf16[128,256], index: 1, kind: input, shape index: {}]   ;;  %s361_s0 = inlined_call_operand.vmem [shape: f32[2,128], index: 0, kind: input, shape index: {}]   ;;  %s362_s2 = inlined_call_operand.vmem [shape: f32[1,256], index: 2, kind: input, shape index: {}]   ;;  %s363_s3 = inlined_call_operand.vmem [shape: f32[2,256], index: 3, kind: output, shape index: {}]  }
   0x1   :  { %v213_v0 = vld [vmem:[%s360_s1 + $0x70] sm:$0xf]  ;;  %v234_v1 = vld [vmem:[%s360_s1 + $0x74] sm:$0xf0]  ;;  %v233_v2 = vld [vmem:[%s360_s1 + $0x74] sm:$0xf] }
   0x2   :  { %v214_v3 = vor.u32 %v234_v1, %v213_v0  ;;  %v215_v4 = vld [vmem:[%s360_s1 + $0x78] sm:$0xf0]  ;;  %v205_v5 = vld [vmem:[%s360_s1 + $0x60] sm:$0xf]  ;;  %v232_v6 = vld [vmem:[%s360_s1 + $0x64] sm:$0xf0] }
   0x3   :  { %v218_v7 = vor.u32 %v233_v2, %v215_v4  ;;  %v231_v8 = vld [vmem:[%s360_s1 + $0x64] sm:$0xf]  ;;  %v207_v9 = vld [vmem:[%s360_s1 + $0x68] sm:$0xf0]  ;;  %v206_v10 = vor.u32 %v232_v6, %v205_v5  ;;  %v197_v12 = vld [vmem:[%s360_s1 + $0x50] sm:$0xf] }
   0x4   :  { %118 = vmatpush.bf16.msra.mxu0 %v214_v3  ;;  %v210_v11 = vor.u32 %v231_v8, %v207_v9  ;;  %v230_v13 = vld [vmem:[%s360_s1 + $0x54] sm:$0xf0]  ;;  %v229_v14 = vld [vmem:[%s360_s1 + $0x54] sm:$0xf]  ;;  %v199_v15 = vld [vmem:[%s360_s1 + $0x58] sm:$0xf0] }
   0x5   :  { %131 = vmatpush.bf16.msra.mxu1 %v218_v7  ;;  %v198_v16 = vor.u32 %v230_v13, %v197_v12  ;;  %v202_v17 = vor.u32 %v229_v14, %v199_v15  ;;  %v189_v18 = vld [vmem:[%s360_s1 + $0x40] sm:$0xf]  ;;  %v228_v19 = vld [vmem:[%s360_s1 + $0x44] sm:$0xf0]  ;;  %v227_v20 = vld [vmem:[%s360_s1 + $0x44] sm:$0xf] }
   0x6   :  { %v191_v21 = vld [vmem:[%s360_s1 + $0x48] sm:$0xf0]  ;;  %v190_v22 = vor.u32 %v228_v19, %v189_v18  ;;  %v181_v24 = vld [vmem:[%s360_s1 + $0x30] sm:$0xf]  ;;  %v226_v25 = vld [vmem:[%s360_s1 + $0x34] sm:$0xf0] }
   0x7   :  { %v194_v23 = vor.u32 %v227_v20, %v191_v21  ;;  %v225_v26 = vld [vmem:[%s360_s1 + $0x34] sm:$0xf]  ;;  %v183_v27 = vld [vmem:[%s360_s1 + $0x38] sm:$0xf0]  ;;  %v182_v28 = vor.u32 %v226_v25, %v181_v24  ;;  %v173_v30 = vld [vmem:[%s360_s1 + $0x20] sm:$0xf] }
   0x8   :  { %119 = vmatpush.bf16.msra.mxu0 %v206_v10  ;;  %v186_v29 = vor.u32 %v225_v26, %v183_v27  ;;  %v224_v31 = vld [vmem:[%s360_s1 + $0x24] sm:$0xf0]  ;;  %v223_v32 = vld [vmem:[%s360_s1 + $0x24] sm:$0xf]  ;;  %v175_v33 = vld [vmem:[%s360_s1 + $0x28] sm:$0xf0] }
   0x9   :  { %132 = vmatpush.bf16.msra.mxu1 %v210_v11  ;;  %v174_v34 = vor.u32 %v224_v31, %v173_v30  ;;  %v178_v35 = vor.u32 %v223_v32, %v175_v33  ;;  %v165_v36 = vld [vmem:[%s360_s1 + $0x10] sm:$0xf]  ;;  %v222_v37 = vld [vmem:[%s360_s1 + $0x14] sm:$0xf0]  ;;  %v221_v38 = vld [vmem:[%s360_s1 + $0x14] sm:$0xf] }
   0xa   :  { %v167_v39 = vld [vmem:[%s360_s1 + $0x18] sm:$0xf0]  ;;  %v166_v40 = vor.u32 %v222_v37, %v165_v36  ;;  %v157_v42 = vld [vmem:[%s360_s1] sm:$0xf]  ;;  %v220_v43 = vld [vmem:[%s360_s1 + $0x4] sm:$0xf0] }
   0xb   :  { %v170_v41 = vor.u32 %v221_v38, %v167_v39  ;;  %v219_v44 = vld [vmem:[%s360_s1 + $0x4] sm:$0xf]  ;;  %v159_v45 = vld [vmem:[%s360_s1 + $0x8] sm:$0xf0]  ;;  %v158_v46 = vor.u32 %v220_v43, %v157_v42  ;;  %v14_v47 = vld [vmem:[%s361_s0] sm:$0x3] }
   0xc   :  { %120 = vmatpush.bf16.msra.mxu0 %v198_v16  ;;  %v162_v48 = vor.u32 %v219_v44, %v159_v45  ;;  %v15_v49 = vpack.c.bf16 %v14_v47, %v14_v47  ;;  %v32_v50 = vld [vmem:[%s362_s2] sm:$0x3] }
   0xd   :  { %133 = vmatpush.bf16.msra.mxu1 %v202_v17  ;;  %v35_v51 = vperm.slane %v32_v50, 1  ;;  %v34_v52 = vperm.slane %v32_v50, 0 }
  0x10   :  { %121 = vmatpush.bf16.msra.mxu0 %v190_v22 }
  0x11   :  { %134 = vmatpush.bf16.msra.mxu1 %v194_v23 }
  0x14   :  { %122 = vmatpush.bf16.msra.mxu0 %v182_v28 }
  0x15   :  { %135 = vmatpush.bf16.msra.mxu1 %v186_v29 }
  0x18   :  { %123 = vmatpush.bf16.msra.mxu0 %v174_v34 }
  0x19   :  { %136 = vmatpush.bf16.msra.mxu1 %v178_v35 }
  0x1c   :  { %124 = vmatpush.bf16.msra.mxu0 %v166_v40 }
  0x1d   :  { %137 = vmatpush.bf16.msra.mxu1 %v170_v41 }
  0x20   :  { %125 = vmatpush.bf16.msra.mxu0 %v158_v46 }
  0x21   :  { %138 = vmatpush.bf16.msra.mxu1 %v162_v48 }
  0x23   :  { %126 = vmatmul.bf16.vlgmr.msra.gmra.mxu0 %v15_v49 }
  0x24   :  { %139 = vmatmul.bf16.vlgmr.msra.gmra.mxu1 %v15_v49 }
  0xa0   :  { %v127_v53 = vpop.f32.mrf.mxu0 }
  0xa1   :  { %v140_v54 = vpop.f32.mrf.mxu1  ;;  %v128_v56 = vadd.f32 %v127_v53, %v34_v52 }
  0xa2   :  { %v141_v55 = vadd.f32 %v140_v54, %v35_v51 }
  0xa4   :  { %v146_v57 = vrot.slane %v141_v55, 6 }
  0xa6   :  { %v148_v58 = vsel %vm147_vm0, %v128_v56, %v146_v57 }
  0xa7   :  { %150 = vst [vmem:[%s363_s3] sm:$0xf] %v148_v58 }
  0xa8   :  { %v129_v59 = vpop.f32.mrf.mxu0 }
  0xa9   :  { %v142_v60 = vpop.f32.mrf.mxu1 }

// kernel: _lambda_.63
= control target key start
LH: loop header
LB: loop body
LE: loop exit
PB: predicated region body
PF: predicated region fallthrough
CT: control target
= control target key end

     0   :  { %s387_s0 = inlined_call_operand.vmem [shape: f32[2,256], index: 0, kind: input, shape index: {}]   ;;  %s388_s1 = inlined_call_operand.vmem [shape: bf16[256,16], index: 1, kind: input, shape index: {}]   ;;  %s389_s2 = inlined_call_operand.vmem [shape: f32[1,16], index: 2, kind: input, shape index: {}]   ;;  %s390_s3 = inlined_call_operand.hbm [shape: f32[2,16], index: 3, kind: output, shape index: {}]  }
   0x1   :  { %v272_v0 = vld [vmem:[%s388_s1 + $0x38] sm:$0xff]  ;;  %v271_v2 = vld [vmem:[%s388_s1 + $0x30] sm:$0xff]  ;;  %v15_v4 = vld [vmem:[%s387_s0] sm:$0xf] }
   0x2   :  { %v280_v1 = vld [vmem:[%s388_s1 + $0x78] sm:$0xff]  ;;  %157 = vmatpush.bf16.msra.mxu0 %v272_v0  ;;  %v279_v3 = vld [vmem:[%s388_s1 + $0x70] sm:$0xff]  ;;  %v270_v5 = vld [vmem:[%s388_s1 + $0x28] sm:$0xff]  ;;  %v16_v7 = vmax.f32 %v15_v4, 0.0 }
   0x3   :  { %170 = vmatpush.bf16.msra.mxu1 %v280_v1  ;;  %v278_v6 = vld [vmem:[%s388_s1 + $0x68] sm:$0xff] }
   0x6   :  { %158 = vmatpush.bf16.msra.mxu0 %v271_v2 }
   0x7   :  { %171 = vmatpush.bf16.msra.mxu1 %v279_v3 }
   0x8   :  { %8 = vsyncpa [#allocation3], 0  ;;  %18 = vst [vmem:[#allocation1] ss:$4 sm:$0xff] %v16_v7  ;;  %v269_v8 = vld [vmem:[%s388_s1 + $0x20] sm:$0xff]  ;;  %v268_v10 = vld [vmem:[%s388_s1 + $0x18] sm:$0xff] }
   0x9   :  { %v277_v9 = vld [vmem:[%s388_s1 + $0x60] sm:$0xff]  ;;  %v276_v11 = vld [vmem:[%s388_s1 + $0x58] sm:$0xff]  ;;  %v267_v12 = vld [vmem:[%s388_s1 + $0x10] sm:$0xff]  ;;  %s309_s20 = smov [#allocation2]   ;;  %s192_s23 = sshll.u32 %s390_s3, 4  ;;  %vm183_vm0 = vcmask 123904   ;;  %s193_s23 = int_to_ptr.hbm [resolvable:$true] %s192_s23 }
   0xa   :  { %159 = vmatpush.bf16.msra.mxu0 %v270_v5  ;;  %v275_v13 = vld [vmem:[%s388_s1 + $0x50] sm:$0xff]  ;;  %v266_v14 = vld [vmem:[%s388_s1 + $0x8] sm:$0xff]  ;;  %v265_v16 = vld [vmem:[%s388_s1] sm:$0xff]  ;;  %s190_s21 = sshll.u32 %s309_s20, 4  ;;  %s191_s21 = int_to_ptr.vmem [resolvable:$true] %s190_s21 }
   0xb   :  { %172 = vmatpush.bf16.msra.mxu1 %v278_v6  ;;  %v274_v15 = vld [vmem:[%s388_s1 + $0x48] sm:$0xff]  ;;  %v273_v17 = vld [vmem:[%s388_s1 + $0x40] sm:$0xff] }
   0xc   :  { %v282_v22 = vld [vmem:[%s389_s2] ss:$0 sm:$0xff] }
   0xe   :  { %160 = vmatpush.bf16.msra.mxu0 %v269_v8 }
   0xf   :  { %173 = vmatpush.bf16.msra.mxu1 %v277_v9  ;;  %v19_v18 = vld.sshfl [vmem:[#allocation1] sm:$0xff pattern:$0x73625140]  ;;  %v20_v19 = vld.sshfl [vmem:[#allocation1 + $0x8] sm:$0xff pattern:$0x73625140] }
  0x10   :  { %v23_v20 = vpack.c.bf16 %v19_v18, %v19_v18  ;;  %v24_v21 = vpack.c.bf16 %v20_v19, %v20_v19 }
  0x12   :  { %161 = vmatpush.bf16.msra.mxu0 %v268_v10 }
  0x13   :  { %174 = vmatpush.bf16.msra.mxu1 %v276_v11 }
  0x16   :  { %162 = vmatpush.bf16.msra.mxu0 %v267_v12 }
  0x17   :  { %175 = vmatpush.bf16.msra.mxu1 %v275_v13 }
  0x1a   :  { %163 = vmatpush.bf16.msra.mxu0 %v266_v14 }
  0x1b   :  { %176 = vmatpush.bf16.msra.mxu1 %v274_v15 }
  0x1e   :  { %164 = vmatpush.bf16.msra.mxu0 %v265_v16 }
  0x1f   :  { %177 = vmatpush.bf16.msra.mxu1 %v273_v17 }
  0x21   :  { %165 = vmatmul.bf16.vlgmr.msra.gmra.mxu0 %v23_v20 }
  0x22   :  { %178 = vmatmul.bf16.vlgmr.msra.gmra.mxu1 %v24_v21 }
  0x9e   :  { %v166_v23 = vpop.f32.mrf.mxu0 }
  0x9f   :  { %v179_v24 = vpop.f32.mrf.mxu1  ;;  %v167_v25 = vadd.f32 %v282_v22, %v166_v23 }
  0xa1   :  { %v180_v26 = vadd.f32 %v179_v24, %v167_v25 }
  0xa3   :  { %184 = vst.msk [vmem:[#allocation2] sm:$0x3] %vm183_vm0, %v180_v26 }
  0xa4   :  { %195 = dma.vmem_to_hbm [thread:$0]  %s191_s21, 32, %s193_s23, [#allocation3]  }
  0xa6   :  { %v168_v27 = vpop.f32.mrf.mxu0 }
  0xa7   :  { %v181_v28 = vpop.f32.mrf.mxu1 }
  0xa8   :  { %307 = dma.done.wait [#allocation3], 32  }
  0xa9   :  { %308 = vsyncadd [#allocation3], 4294967264 }
  0xaa   :  { %200 = vsyncpa [#allocation3], 1 }

</bundles_post_ra>
